<compile_context>
chip_gen: v6e
topology: v6e:2x2x1
jax: 0.10.0
libtpu: 0.0.40
codegen_flags: <defaults>
</compile_context>

<pallas_src>
from functools import partial

import jax
import jax.numpy as jnp
import numpy as np
from jax.experimental import pallas as pl
from jax.experimental.pallas import tpu as pltpu


GATE_PAD = 128                 # per-gate lane width after padding (one lane span)
GATE_PERM = (0, 1, 3, 2)       # padded block b holds PyTorch gate GATE_PERM[b]
                               # -> padded order is [i, f, o, g]


# ----------------------------- Pallas kernel --------------------------------
def _lstm_mh_kernel(x_ref, wih0_ref, whh0_ref, b0_ref,
                    wih1_ref, whh1_ref, b1_ref, wv_ref, bv_ref,
                    out_ref, state_ref):
    GP = GATE_PAD
    steps = x_ref.shape[0]

    # Hoisted, non-recurrent layer-0 input projection for ALL steps at once:
    # one (steps, K) @ (K, 4*GP) matmul, kept in vregs (4 vregs at steps=8).
    ix0 = (jnp.dot(x_ref[...], wih0_ref[...], preferred_element_type=jnp.float32)
           + b0_ref[...])
    b1 = b1_ref[...]

    def act(g):
        # Gate blocks reordered wrapper-side to [i, f, o, g]: one contiguous
        # sigmoid over the first three 128-lane blocks, one tanh over the last.
        s = jax.nn.sigmoid(g[:, :3 * GP])
        return (s[:, 0:GP], s[:, GP:2 * GP], s[:, 2 * GP:3 * GP],
                jnp.tanh(g[:, 3 * GP:4 * GP]))

    z = jnp.zeros((1, GP), jnp.float32)
    h0, c0, h1, c1 = z, z, z, z          # zero initial state (hidden=None)
    h1_steps = []

    # Fully unrolled time loop; h/c are loop-carried SSA values (vregs).
    # TODO(synk): for long sequences switch to lax.fori_loop(..., unroll=4)
    # and/or a time-tiled grid axis (state in VMEM scratch, axis "arbitrary").
    for t in range(steps):
        # Both recurrent dots depend only on t-1 state -> independent, so the
        # scheduler overlaps them; r1 is off the post-gates critical path.
        r0 = jnp.dot(h0, whh0_ref[...], preferred_element_type=jnp.float32)
        r1 = jnp.dot(h1, whh1_ref[...], preferred_element_type=jnp.float32)

        # ----- layer 0 -----
        g0 = r0 + ix0[t:t + 1, :]
        i0, f0, o0, gg0 = act(g0)
        c0 = f0 * c0 + i0 * gg0
        h0 = o0 * jnp.tanh(c0)

        # ----- layer 1: only the K=GP dot with h0(t) sits on the serial chain
        g1 = (jnp.dot(h0, wih1_ref[...], preferred_element_type=jnp.float32)
              + r1 + b1)
        i1, f1, o1, gg1 = act(g1)
        c1 = f1 * c1 + i1 * gg1
        h1 = o1 * jnp.tanh(c1)

        h1_steps.append(h1)

    # V head over all steps in one matmul; output kept lane-dense (128 cols,
    # only column 0 is real) and sliced wrapper-side.
    h1_all = jnp.concatenate(h1_steps, axis=0)              # (steps, GP) vregs
    out_ref[...] = (jnp.dot(h1_all, wv_ref[...],
                            preferred_element_type=jnp.float32) + bv_ref[...])

    # Single merged state output: rows = [h0, h1, c0, c1] (gate-padded lanes).
    state_ref[...] = jnp.concatenate([h0, h1, c0, c1], axis=0)


# ---------------------- One-time parameter layout prep ----------------------
def prepare_padded_params(params):
    """Host-side, ONE-TIME layout prep (cache the result per parameter set).

    Pads each gate into its own 128-lane block (order [i, f, o, g]), combines
    bih+bhh, transposes weights to (K, N) MXU layout and zero-pads K to the
    carried-state lane width.  The exact-zero padding is a correctness
    invariant: padded h/c lanes stay exactly 0 across all time steps.
    """
    GP = GATE_PAD
    p = {k: np.asarray(v, np.float32) for k, v in params.items()}
    H = p["whh0"].shape[1]               # whh0: (4H, H)
    n_in = p["wih0"].shape[1]
    k_in = max(8, -(-n_in // 8) * 8)     # layer-0 K rows: multiple of 8 only

    def pad_gates(w_t):                  # (K, 4H) -> (K, 4*GP), gate-reordered
        out = np.zeros((w_t.shape[0], 4 * GP), np.float32)
        for blk, g in enumerate(GATE_PERM):
            out[:, blk * GP:blk * GP + H] = w_t[:, g * H:(g + 1) * H]
        return out

    def pad_rows(w, kp):                 # (K, N) -> (kp, N), zero rows appended
        out = np.zeros((kp, w.shape[1]), np.float32)
        out[:w.shape[0]] = w
        return out

    wih0 = pad_rows(pad_gates(p["wih0"].T), k_in)
    whh0 = pad_rows(pad_gates(p["whh0"].T), GP)
    b0 = pad_gates((p["bih0"] + p["bhh0"]).reshape(1, 4 * H))
    wih1 = pad_rows(pad_gates(p["wih1"].T), GP)
    whh1 = pad_rows(pad_gates(p["whh1"].T), GP)
    b1 = pad_gates((p["bih1"] + p["bhh1"]).reshape(1, 4 * H))
    wv = np.zeros((GP, 128), np.float32)
    wv[:H, 0] = p["wv"][0]
    bv = np.zeros((1, 128), np.float32)
    bv[0, 0] = p["bv"][0]

    names = ("wih0", "whh0", "b0", "wih1", "whh1", "b1", "wv", "bv")
    arrs = (wih0, whh0, b0, wih1, whh1, b1, wv, bv)
    return {n: jnp.asarray(a) for n, a in zip(names, arrs)}


# ------------------------------- Forward -------------------------------------
@partial(jax.jit, static_argnames=("hidden_size",))
def lstm_multi_head_forward(inputs, padded, *, hidden_size):
    """inputs: (steps, N_inputs) f32; padded: output of prepare_padded_params.

    Returns (outputs (steps, 1, 1), (h_n (2, 1, H), c_n (2, 1, H))), matching
    the PyTorch module's forward() with force=True and hidden=None.
    """
    steps, n_in = inputs.shape
    GP = GATE_PAD
    k_in = padded["wih0"].shape[0]
    x_p = jnp.pad(inputs.astype(jnp.float32), ((0, 0), (0, k_in - n_in)))

    args = (x_p, padded["wih0"], padded["whh0"], padded["b0"],
            padded["wih1"], padded["whh1"], padded["b1"],
            padded["wv"], padded["bv"])
    vmem = pl.BlockSpec(memory_space=pltpu.MemorySpace.VMEM)

    out_v, state = pl.pallas_call(
        _lstm_mh_kernel,
        out_shape=(
            jax.ShapeDtypeStruct((steps, 128), jnp.float32),  # V head (col 0 real)
            jax.ShapeDtypeStruct((4, GP), jnp.float32),       # [h0, h1, c0, c1]
        ),
        in_specs=[vmem] * len(args),
        out_specs=(vmem, vmem),
    )(*args)

    H = hidden_size
    outputs = out_v[:, :1].reshape(steps, 1, 1)
    hidden = (state[0:2, :H].reshape(2, 1, H),
              state[2:4, :H].reshape(2, 1, H))
    return outputs, hidden


# --------------------------- Pure numpy reference ----------------------------
def lstm_multi_head_ref(inputs, params):
    x = np.asarray(inputs, np.float32)
    steps = x.shape[0]
    H = np.asarray(params["whh0"]).shape[1]
    p = {k: np.asarray(v, np.float32) for k, v in params.items()}
    h = np.zeros((2, H), np.float32)
    c = np.zeros((2, H), np.float32)

    def sig(v):
        return 1.0 / (1.0 + np.exp(-v))

    def cell(xv, hv, cv, wih, whh, bih, bhh):
        g = xv @ wih.T + hv @ whh.T + bih + bhh
        i, f, gg, o = g[:H], g[H:2 * H], g[2 * H:3 * H], g[3 * H:]
        cn = sig(f) * cv + sig(i) * np.tanh(gg)
        hn = sig(o) * np.tanh(cn)
        return hn, cn

    outs = np.zeros((steps, 1, 1), np.float32)
    for t in range(steps):
        h[0], c[0] = cell(x[t], h[0], c[0], p["wih0"], p["whh0"], p["bih0"], p["bhh0"])
        h[1], c[1] = cell(h[0], h[1], c[1], p["wih1"], p["whh1"], p["bih1"], p["bhh1"])
        outs[t, 0, 0] = h[1] @ p["wv"][0] + p["bv"][0]
    return outs, (h.reshape(2, 1, H), c.reshape(2, 1, H))


# ------------------------------- Init / main ---------------------------------
def init_params(key, n_inputs, hidden, n_max_atoms, n_choices):
    k = 1.0 / np.sqrt(hidden)

    def u(key, shape, scale):
        return jax.random.uniform(key, shape, jnp.float32, -scale, scale)

    keys = jax.random.split(key, 16)
    params = {
        "wih0": u(keys[0], (4 * hidden, n_inputs), k),
        "whh0": u(keys[1], (4 * hidden, hidden), k),
        "bih0": u(keys[2], (4 * hidden,), k),
        "bhh0": u(keys[3], (4 * hidden,), k),
        "wih1": u(keys[4], (4 * hidden, hidden), k),
        "whh1": u(keys[5], (4 * hidden, hidden), k),
        "bih1": u(keys[6], (4 * hidden,), k),
        "bhh1": u(keys[7], (4 * hidden,), k),
        # out_V head (the only head forward() actually uses)
        "wv": u(keys[8], (1, hidden), k),
        "bv": u(keys[9], (1,), k),
        # pi heads exist in the module but are unused by forward(); kept for parity
        "w_pi_parent": u(keys[10], (n_max_atoms, hidden), k),
        "b_pi_parent": u(keys[11], (n_max_atoms,), k),
        "w_pi_child": u(keys[12], (n_max_atoms, hidden), k),
        "b_pi_child": u(keys[13], (n_max_atoms,), k),
        "w_pi_choice": u(keys[14], (n_choices, hidden), k),
        "b_pi_choice": u(keys[15], (n_choices,), k),
    }
    return params


if __name__ == "__main__":
    N_inputs, hidden_size = 16, 32
    N_max_atoms, N_choices = 10, 6
    steps = 8

    key = jax.random.PRNGKey(0)
    pkey, xkey = jax.random.split(key)
    params = init_params(pkey, N_inputs, hidden_size, N_max_atoms, N_choices)
    inputs = jax.random.normal(xkey, (steps, N_inputs), jnp.float32)

    # One-time layout prep (cache & reuse across calls; NOT in the jitted path).
    padded = prepare_padded_params(params)

    outputs, (h_n, c_n) = lstm_multi_head_forward(inputs, padded,
                                                  hidden_size=hidden_size)
    jax.block_until_ready((outputs, h_n, c_n))

    # Sanity check vs a pure numpy reference.
    ref_out, (ref_h, ref_c) = lstm_multi_head_ref(np.asarray(inputs), params)
    assert outputs.shape == (steps, 1, 1)
    assert h_n.shape == (2, 1, hidden_size) and c_n.shape == (2, 1, hidden_size)
    np.testing.assert_allclose(np.asarray(outputs), ref_out, atol=2e-3, rtol=2e-3)
    np.testing.assert_allclose(np.asarray(h_n), ref_h, atol=2e-3, rtol=2e-3)
    np.testing.assert_allclose(np.asarray(c_n), ref_c, atol=2e-3, rtol=2e-3)

    print("KERNEL_OK")
</pallas_src>

<mosaic_0001>
module attributes {stable_mosaic.version = 11 : i64} {
  func.func @_lstm_mh_kernel(%arg0: memref<8x16xf32, #tpu.memory_space<vmem>>, %arg1: memref<16x512xf32, #tpu.memory_space<vmem>>, %arg2: memref<128x512xf32, #tpu.memory_space<vmem>>, %arg3: memref<1x512xf32, #tpu.memory_space<vmem>>, %arg4: memref<128x512xf32, #tpu.memory_space<vmem>>, %arg5: memref<128x512xf32, #tpu.memory_space<vmem>>, %arg6: memref<1x512xf32, #tpu.memory_space<vmem>>, %arg7: memref<128x128xf32, #tpu.memory_space<vmem>>, %arg8: memref<1x128xf32, #tpu.memory_space<vmem>>, %arg9: memref<8x128xf32, #tpu.memory_space<vmem>>, %arg10: memref<4x128xf32, #tpu.memory_space<vmem>>) attributes {dimension_semantics = [], scalar_prefetch = 0 : i64, scratch_operands = 0 : i64, tpu.core_type = #tpu.core_type<tc>} {
    %c0 = arith.constant 0 : index
    %c0_0 = arith.constant 0 : index
    %0 = vector.load %arg0[%c0, %c0_0] : memref<8x16xf32, #tpu.memory_space<vmem>>, vector<8x16xf32>
    %c0_1 = arith.constant 0 : index
    %c0_2 = arith.constant 0 : index
    %1 = vector.load %arg1[%c0_1, %c0_2] : memref<16x512xf32, #tpu.memory_space<vmem>>, vector<16x512xf32>
    %cst = arith.constant dense<0.000000e+00> : vector<8x512xf32>
    %2 = tpu.matmul %0, %1, %cst {dimension_numbers = #tpu.dot_dimension_numbers<[1], [0], [0], [1], [0, 0, 1, 1], [], []>} : vector<8x16xf32>, vector<16x512xf32>, vector<8x512xf32> -> vector<8x512xf32>
    %c0_3 = arith.constant 0 : index
    %c0_4 = arith.constant 0 : index
    %3 = vector.load %arg3[%c0_3, %c0_4] : memref<1x512xf32, #tpu.memory_space<vmem>>, vector<1x512xf32>
    %4 = vector.broadcast %3 : vector<1x512xf32> to vector<8x512xf32>
    %5 = arith.addf %2, %4 : vector<8x512xf32>
    %c0_5 = arith.constant 0 : index
    %c0_6 = arith.constant 0 : index
    %6 = vector.load %arg6[%c0_5, %c0_6] : memref<1x512xf32, #tpu.memory_space<vmem>>, vector<1x512xf32>
    %cst_7 = arith.constant 0.000000e+00 : f32
    %7 = vector.broadcast %cst_7 : f32 to vector<1x128xf32>
    %c0_8 = arith.constant 0 : index
    %c0_9 = arith.constant 0 : index
    %8 = vector.load %arg2[%c0_8, %c0_9] : memref<128x512xf32, #tpu.memory_space<vmem>>, vector<128x512xf32>
    %cst_10 = arith.constant dense<0.000000e+00> : vector<1x512xf32>
    %9 = tpu.matmul %7, %8, %cst_10 {dimension_numbers = #tpu.dot_dimension_numbers<[1], [0], [0], [1], [0, 0, 1, 1], [], []>} : vector<1x128xf32>, vector<128x512xf32>, vector<1x512xf32> -> vector<1x512xf32>
    %c0_11 = arith.constant 0 : index
    %c0_12 = arith.constant 0 : index
    %10 = vector.load %arg5[%c0_11, %c0_12] : memref<128x512xf32, #tpu.memory_space<vmem>>, vector<128x512xf32>
    %cst_13 = arith.constant dense<0.000000e+00> : vector<1x512xf32>
    %11 = tpu.matmul %7, %10, %cst_13 {dimension_numbers = #tpu.dot_dimension_numbers<[1], [0], [0], [1], [0, 0, 1, 1], [], []>} : vector<1x128xf32>, vector<128x512xf32>, vector<1x512xf32> -> vector<1x512xf32>
    %12 = vector.extract_strided_slice %5 {offsets = [0, 0], sizes = [1, 512], strides = [1, 1]} : vector<8x512xf32> to vector<1x512xf32>
    %13 = arith.addf %9, %12 : vector<1x512xf32>
    %14 = vector.extract_strided_slice %13 {offsets = [0, 0], sizes = [1, 384], strides = [1, 1]} : vector<1x512xf32> to vector<1x384xf32>
    %15 = arith.negf %14 : vector<1x384xf32>
    %16 = math.exp %15 : vector<1x384xf32>
    %cst_14 = arith.constant 1.000000e+00 : f32
    %17 = vector.broadcast %cst_14 : f32 to vector<1x384xf32>
    %18 = arith.addf %17, %16 : vector<1x384xf32>
    %19 = arith.divf %17, %18 : vector<1x384xf32>
    %20 = vector.extract_strided_slice %19 {offsets = [0, 0], sizes = [1, 128], strides = [1, 1]} : vector<1x384xf32> to vector<1x128xf32>
    %21 = vector.extract_strided_slice %19 {offsets = [0, 128], sizes = [1, 128], strides = [1, 1]} : vector<1x384xf32> to vector<1x128xf32>
    %22 = vector.extract_strided_slice %19 {offsets = [0, 256], sizes = [1, 128], strides = [1, 1]} : vector<1x384xf32> to vector<1x128xf32>
    %23 = vector.extract_strided_slice %13 {offsets = [0, 384], sizes = [1, 128], strides = [1, 1]} : vector<1x512xf32> to vector<1x128xf32>
    %24 = math.tanh %23 : vector<1x128xf32>
    %25 = arith.mulf %21, %7 : vector<1x128xf32>
    %26 = arith.mulf %20, %24 : vector<1x128xf32>
    %27 = arith.addf %25, %26 : vector<1x128xf32>
    %28 = math.tanh %27 : vector<1x128xf32>
    %29 = arith.mulf %22, %28 : vector<1x128xf32>
    %c0_15 = arith.constant 0 : index
    %c0_16 = arith.constant 0 : index
    %30 = vector.load %arg4[%c0_15, %c0_16] : memref<128x512xf32, #tpu.memory_space<vmem>>, vector<128x512xf32>
    %cst_17 = arith.constant dense<0.000000e+00> : vector<1x512xf32>
    %31 = tpu.matmul %29, %30, %cst_17 {dimension_numbers = #tpu.dot_dimension_numbers<[1], [0], [0], [1], [0, 0, 1, 1], [], []>} : vector<1x128xf32>, vector<128x512xf32>, vector<1x512xf32> -> vector<1x512xf32>
    %32 = arith.addf %31, %11 : vector<1x512xf32>
    %33 = arith.addf %32, %6 : vector<1x512xf32>
    %34 = vector.extract_strided_slice %33 {offsets = [0, 0], sizes = [1, 384], strides = [1, 1]} : vector<1x512xf32> to vector<1x384xf32>
    %35 = arith.negf %34 : vector<1x384xf32>
    %36 = math.exp %35 : vector<1x384xf32>
    %cst_18 = arith.constant 1.000000e+00 : f32
    %37 = vector.broadcast %cst_18 : f32 to vector<1x384xf32>
    %38 = arith.addf %37, %36 : vector<1x384xf32>
    %39 = arith.divf %37, %38 : vector<1x384xf32>
    %40 = vector.extract_strided_slice %39 {offsets = [0, 0], sizes = [1, 128], strides = [1, 1]} : vector<1x384xf32> to vector<1x128xf32>
    %41 = vector.extract_strided_slice %39 {offsets = [0, 128], sizes = [1, 128], strides = [1, 1]} : vector<1x384xf32> to vector<1x128xf32>
    %42 = vector.extract_strided_slice %39 {offsets = [0, 256], sizes = [1, 128], strides = [1, 1]} : vector<1x384xf32> to vector<1x128xf32>
    %43 = vector.extract_strided_slice %33 {offsets = [0, 384], sizes = [1, 128], strides = [1, 1]} : vector<1x512xf32> to vector<1x128xf32>
    %44 = math.tanh %43 : vector<1x128xf32>
    %45 = arith.mulf %41, %7 : vector<1x128xf32>
    %46 = arith.mulf %40, %44 : vector<1x128xf32>
    %47 = arith.addf %45, %46 : vector<1x128xf32>
    %48 = math.tanh %47 : vector<1x128xf32>
    %49 = arith.mulf %42, %48 : vector<1x128xf32>
    %c0_19 = arith.constant 0 : index
    %c0_20 = arith.constant 0 : index
    %50 = vector.load %arg2[%c0_19, %c0_20] : memref<128x512xf32, #tpu.memory_space<vmem>>, vector<128x512xf32>
    %cst_21 = arith.constant dense<0.000000e+00> : vector<1x512xf32>
    %51 = tpu.matmul %29, %50, %cst_21 {dimension_numbers = #tpu.dot_dimension_numbers<[1], [0], [0], [1], [0, 0, 1, 1], [], []>} : vector<1x128xf32>, vector<128x512xf32>, vector<1x512xf32> -> vector<1x512xf32>
    %c0_22 = arith.constant 0 : index
    %c0_23 = arith.constant 0 : index
    %52 = vector.load %arg5[%c0_22, %c0_23] : memref<128x512xf32, #tpu.memory_space<vmem>>, vector<128x512xf32>
    %cst_24 = arith.constant dense<0.000000e+00> : vector<1x512xf32>
    %53 = tpu.matmul %49, %52, %cst_24 {dimension_numbers = #tpu.dot_dimension_numbers<[1], [0], [0], [1], [0, 0, 1, 1], [], []>} : vector<1x128xf32>, vector<128x512xf32>, vector<1x512xf32> -> vector<1x512xf32>
    %54 = vector.extract_strided_slice %5 {offsets = [1, 0], sizes = [1, 512], strides = [1, 1]} : vector<8x512xf32> to vector<1x512xf32>
    %55 = arith.addf %51, %54 : vector<1x512xf32>
    %56 = vector.extract_strided_slice %55 {offsets = [0, 0], sizes = [1, 384], strides = [1, 1]} : vector<1x512xf32> to vector<1x384xf32>
    %57 = arith.negf %56 : vector<1x384xf32>
    %58 = math.exp %57 : vector<1x384xf32>
    %cst_25 = arith.constant 1.000000e+00 : f32
    %59 = vector.broadcast %cst_25 : f32 to vector<1x384xf32>
    %60 = arith.addf %59, %58 : vector<1x384xf32>
    %61 = arith.divf %59, %60 : vector<1x384xf32>
    %62 = vector.extract_strided_slice %61 {offsets = [0, 0], sizes = [1, 128], strides = [1, 1]} : vector<1x384xf32> to vector<1x128xf32>
    %63 = vector.extract_strided_slice %61 {offsets = [0, 128], sizes = [1, 128], strides = [1, 1]} : vector<1x384xf32> to vector<1x128xf32>
    %64 = vector.extract_strided_slice %61 {offsets = [0, 256], sizes = [1, 128], strides = [1, 1]} : vector<1x384xf32> to vector<1x128xf32>
    %65 = vector.extract_strided_slice %55 {offsets = [0, 384], sizes = [1, 128], strides = [1, 1]} : vector<1x512xf32> to vector<1x128xf32>
    %66 = math.tanh %65 : vector<1x128xf32>
    %67 = arith.mulf %63, %27 : vector<1x128xf32>
    %68 = arith.mulf %62, %66 : vector<1x128xf32>
    %69 = arith.addf %67, %68 : vector<1x128xf32>
    %70 = math.tanh %69 : vector<1x128xf32>
    %71 = arith.mulf %64, %70 : vector<1x128xf32>
    %c0_26 = arith.constant 0 : index
    %c0_27 = arith.constant 0 : index
    %72 = vector.load %arg4[%c0_26, %c0_27] : memref<128x512xf32, #tpu.memory_space<vmem>>, vector<128x512xf32>
    %cst_28 = arith.constant dense<0.000000e+00> : vector<1x512xf32>
    %73 = tpu.matmul %71, %72, %cst_28 {dimension_numbers = #tpu.dot_dimension_numbers<[1], [0], [0], [1], [0, 0, 1, 1], [], []>} : vector<1x128xf32>, vector<128x512xf32>, vector<1x512xf32> -> vector<1x512xf32>
    %74 = arith.addf %73, %53 : vector<1x512xf32>
    %75 = arith.addf %74, %6 : vector<1x512xf32>
    %76 = vector.extract_strided_slice %75 {offsets = [0, 0], sizes = [1, 384], strides = [1, 1]} : vector<1x512xf32> to vector<1x384xf32>
    %77 = arith.negf %76 : vector<1x384xf32>
    %78 = math.exp %77 : vector<1x384xf32>
    %cst_29 = arith.constant 1.000000e+00 : f32
    %79 = vector.broadcast %cst_29 : f32 to vector<1x384xf32>
    %80 = arith.addf %79, %78 : vector<1x384xf32>
    %81 = arith.divf %79, %80 : vector<1x384xf32>
    %82 = vector.extract_strided_slice %81 {offsets = [0, 0], sizes = [1, 128], strides = [1, 1]} : vector<1x384xf32> to vector<1x128xf32>
    %83 = vector.extract_strided_slice %81 {offsets = [0, 128], sizes = [1, 128], strides = [1, 1]} : vector<1x384xf32> to vector<1x128xf32>
    %84 = vector.extract_strided_slice %81 {offsets = [0, 256], sizes = [1, 128], strides = [1, 1]} : vector<1x384xf32> to vector<1x128xf32>
    %85 = vector.extract_strided_slice %75 {offsets = [0, 384], sizes = [1, 128], strides = [1, 1]} : vector<1x512xf32> to vector<1x128xf32>
    %86 = math.tanh %85 : vector<1x128xf32>
    %87 = arith.mulf %83, %47 : vector<1x128xf32>
    %88 = arith.mulf %82, %86 : vector<1x128xf32>
    %89 = arith.addf %87, %88 : vector<1x128xf32>
    %90 = math.tanh %89 : vector<1x128xf32>
    %91 = arith.mulf %84, %90 : vector<1x128xf32>
    %c0_30 = arith.constant 0 : index
    %c0_31 = arith.constant 0 : index
    %92 = vector.load %arg2[%c0_30, %c0_31] : memref<128x512xf32, #tpu.memory_space<vmem>>, vector<128x512xf32>
    %cst_32 = arith.constant dense<0.000000e+00> : vector<1x512xf32>
    %93 = tpu.matmul %71, %92, %cst_32 {dimension_numbers = #tpu.dot_dimension_numbers<[1], [0], [0], [1], [0, 0, 1, 1], [], []>} : vector<1x128xf32>, vector<128x512xf32>, vector<1x512xf32> -> vector<1x512xf32>
    %c0_33 = arith.constant 0 : index
    %c0_34 = arith.constant 0 : index
    %94 = vector.load %arg5[%c0_33, %c0_34] : memref<128x512xf32, #tpu.memory_space<vmem>>, vector<128x512xf32>
    %cst_35 = arith.constant dense<0.000000e+00> : vector<1x512xf32>
    %95 = tpu.matmul %91, %94, %cst_35 {dimension_numbers = #tpu.dot_dimension_numbers<[1], [0], [0], [1], [0, 0, 1, 1], [], []>} : vector<1x128xf32>, vector<128x512xf32>, vector<1x512xf32> -> vector<1x512xf32>
    %96 = vector.extract_strided_slice %5 {offsets = [2, 0], sizes = [1, 512], strides = [1, 1]} : vector<8x512xf32> to vector<1x512xf32>
    %97 = arith.addf %93, %96 : vector<1x512xf32>
    %98 = vector.extract_strided_slice %97 {offsets = [0, 0], sizes = [1, 384], strides = [1, 1]} : vector<1x512xf32> to vector<1x384xf32>
    %99 = arith.negf %98 : vector<1x384xf32>
    %100 = math.exp %99 : vector<1x384xf32>
    %cst_36 = arith.constant 1.000000e+00 : f32
    %101 = vector.broadcast %cst_36 : f32 to vector<1x384xf32>
    %102 = arith.addf %101, %100 : vector<1x384xf32>
    %103 = arith.divf %101, %102 : vector<1x384xf32>
    %104 = vector.extract_strided_slice %103 {offsets = [0, 0], sizes = [1, 128], strides = [1, 1]} : vector<1x384xf32> to vector<1x128xf32>
    %105 = vector.extract_strided_slice %103 {offsets = [0, 128], sizes = [1, 128], strides = [1, 1]} : vector<1x384xf32> to vector<1x128xf32>
    %106 = vector.extract_strided_slice %103 {offsets = [0, 256], sizes = [1, 128], strides = [1, 1]} : vector<1x384xf32> to vector<1x128xf32>
    %107 = vector.extract_strided_slice %97 {offsets = [0, 384], sizes = [1, 128], strides = [1, 1]} : vector<1x512xf32> to vector<1x128xf32>
    %108 = math.tanh %107 : vector<1x128xf32>
    %109 = arith.mulf %105, %69 : vector<1x128xf32>
    %110 = arith.mulf %104, %108 : vector<1x128xf32>
    %111 = arith.addf %109, %110 : vector<1x128xf32>
    %112 = math.tanh %111 : vector<1x128xf32>
    %113 = arith.mulf %106, %112 : vector<1x128xf32>
    %c0_37 = arith.constant 0 : index
    %c0_38 = arith.constant 0 : index
    %114 = vector.load %arg4[%c0_37, %c0_38] : memref<128x512xf32, #tpu.memory_space<vmem>>, vector<128x512xf32>
    %cst_39 = arith.constant dense<0.000000e+00> : vector<1x512xf32>
    %115 = tpu.matmul %113, %114, %cst_39 {dimension_numbers = #tpu.dot_dimension_numbers<[1], [0], [0], [1], [0, 0, 1, 1], [], []>} : vector<1x128xf32>, vector<128x512xf32>, vector<1x512xf32> -> vector<1x512xf32>
    %116 = arith.addf %115, %95 : vector<1x512xf32>
    %117 = arith.addf %116, %6 : vector<1x512xf32>
    %118 = vector.extract_strided_slice %117 {offsets = [0, 0], sizes = [1, 384], strides = [1, 1]} : vector<1x512xf32> to vector<1x384xf32>
    %119 = arith.negf %118 : vector<1x384xf32>
    %120 = math.exp %119 : vector<1x384xf32>
    %cst_40 = arith.constant 1.000000e+00 : f32
    %121 = vector.broadcast %cst_40 : f32 to vector<1x384xf32>
    %122 = arith.addf %121, %120 : vector<1x384xf32>
    %123 = arith.divf %121, %122 : vector<1x384xf32>
    %124 = vector.extract_strided_slice %123 {offsets = [0, 0], sizes = [1, 128], strides = [1, 1]} : vector<1x384xf32> to vector<1x128xf32>
    %125 = vector.extract_strided_slice %123 {offsets = [0, 128], sizes = [1, 128], strides = [1, 1]} : vector<1x384xf32> to vector<1x128xf32>
    %126 = vector.extract_strided_slice %123 {offsets = [0, 256], sizes = [1, 128], strides = [1, 1]} : vector<1x384xf32> to vector<1x128xf32>
    %127 = vector.extract_strided_slice %117 {offsets = [0, 384], sizes = [1, 128], strides = [1, 1]} : vector<1x512xf32> to vector<1x128xf32>
    %128 = math.tanh %127 : vector<1x128xf32>
    %129 = arith.mulf %125, %89 : vector<1x128xf32>
    %130 = arith.mulf %124, %128 : vector<1x128xf32>
    %131 = arith.addf %129, %130 : vector<1x128xf32>
    %132 = math.tanh %131 : vector<1x128xf32>
    %133 = arith.mulf %126, %132 : vector<1x128xf32>
    %c0_41 = arith.constant 0 : index
    %c0_42 = arith.constant 0 : index
    %134 = vector.load %arg2[%c0_41, %c0_42] : memref<128x512xf32, #tpu.memory_space<vmem>>, vector<128x512xf32>
    %cst_43 = arith.constant dense<0.000000e+00> : vector<1x512xf32>
    %135 = tpu.matmul %113, %134, %cst_43 {dimension_numbers = #tpu.dot_dimension_numbers<[1], [0], [0], [1], [0, 0, 1, 1], [], []>} : vector<1x128xf32>, vector<128x512xf32>, vector<1x512xf32> -> vector<1x512xf32>
    %c0_44 = arith.constant 0 : index
    %c0_45 = arith.constant 0 : index
    %136 = vector.load %arg5[%c0_44, %c0_45] : memref<128x512xf32, #tpu.memory_space<vmem>>, vector<128x512xf32>
    %cst_46 = arith.constant dense<0.000000e+00> : vector<1x512xf32>
    %137 = tpu.matmul %133, %136, %cst_46 {dimension_numbers = #tpu.dot_dimension_numbers<[1], [0], [0], [1], [0, 0, 1, 1], [], []>} : vector<1x128xf32>, vector<128x512xf32>, vector<1x512xf32> -> vector<1x512xf32>
    %138 = vector.extract_strided_slice %5 {offsets = [3, 0], sizes = [1, 512], strides = [1, 1]} : vector<8x512xf32> to vector<1x512xf32>
    %139 = arith.addf %135, %138 : vector<1x512xf32>
    %140 = vector.extract_strided_slice %139 {offsets = [0, 0], sizes = [1, 384], strides = [1, 1]} : vector<1x512xf32> to vector<1x384xf32>
    %141 = arith.negf %140 : vector<1x384xf32>
    %142 = math.exp %141 : vector<1x384xf32>
    %cst_47 = arith.constant 1.000000e+00 : f32
    %143 = vector.broadcast %cst_47 : f32 to vector<1x384xf32>
    %144 = arith.addf %143, %142 : vector<1x384xf32>
    %145 = arith.divf %143, %144 : vector<1x384xf32>
    %146 = vector.extract_strided_slice %145 {offsets = [0, 0], sizes = [1, 128], strides = [1, 1]} : vector<1x384xf32> to vector<1x128xf32>
    %147 = vector.extract_strided_slice %145 {offsets = [0, 128], sizes = [1, 128], strides = [1, 1]} : vector<1x384xf32> to vector<1x128xf32>
    %148 = vector.extract_strided_slice %145 {offsets = [0, 256], sizes = [1, 128], strides = [1, 1]} : vector<1x384xf32> to vector<1x128xf32>
    %149 = vector.extract_strided_slice %139 {offsets = [0, 384], sizes = [1, 128], strides = [1, 1]} : vector<1x512xf32> to vector<1x128xf32>
    %150 = math.tanh %149 : vector<1x128xf32>
    %151 = arith.mulf %147, %111 : vector<1x128xf32>
    %152 = arith.mulf %146, %150 : vector<1x128xf32>
    %153 = arith.addf %151, %152 : vector<1x128xf32>
    %154 = math.tanh %153 : vector<1x128xf32>
    %155 = arith.mulf %148, %154 : vector<1x128xf32>
    %c0_48 = arith.constant 0 : index
    %c0_49 = arith.constant 0 : index
    %156 = vector.load %arg4[%c0_48, %c0_49] : memref<128x512xf32, #tpu.memory_space<vmem>>, vector<128x512xf32>
    %cst_50 = arith.constant dense<0.000000e+00> : vector<1x512xf32>
    %157 = tpu.matmul %155, %156, %cst_50 {dimension_numbers = #tpu.dot_dimension_numbers<[1], [0], [0], [1], [0, 0, 1, 1], [], []>} : vector<1x128xf32>, vector<128x512xf32>, vector<1x512xf32> -> vector<1x512xf32>
    %158 = arith.addf %157, %137 : vector<1x512xf32>
    %159 = arith.addf %158, %6 : vector<1x512xf32>
    %160 = vector.extract_strided_slice %159 {offsets = [0, 0], sizes = [1, 384], strides = [1, 1]} : vector<1x512xf32> to vector<1x384xf32>
    %161 = arith.negf %160 : vector<1x384xf32>
    %162 = math.exp %161 : vector<1x384xf32>
    %cst_51 = arith.constant 1.000000e+00 : f32
    %163 = vector.broadcast %cst_51 : f32 to vector<1x384xf32>
    %164 = arith.addf %163, %162 : vector<1x384xf32>
    %165 = arith.divf %163, %164 : vector<1x384xf32>
    %166 = vector.extract_strided_slice %165 {offsets = [0, 0], sizes = [1, 128], strides = [1, 1]} : vector<1x384xf32> to vector<1x128xf32>
    %167 = vector.extract_strided_slice %165 {offsets = [0, 128], sizes = [1, 128], strides = [1, 1]} : vector<1x384xf32> to vector<1x128xf32>
    %168 = vector.extract_strided_slice %165 {offsets = [0, 256], sizes = [1, 128], strides = [1, 1]} : vector<1x384xf32> to vector<1x128xf32>
    %169 = vector.extract_strided_slice %159 {offsets = [0, 384], sizes = [1, 128], strides = [1, 1]} : vector<1x512xf32> to vector<1x128xf32>
    %170 = math.tanh %169 : vector<1x128xf32>
    %171 = arith.mulf %167, %131 : vector<1x128xf32>
    %172 = arith.mulf %166, %170 : vector<1x128xf32>
    %173 = arith.addf %171, %172 : vector<1x128xf32>
    %174 = math.tanh %173 : vector<1x128xf32>
    %175 = arith.mulf %168, %174 : vector<1x128xf32>
    %c0_52 = arith.constant 0 : index
    %c0_53 = arith.constant 0 : index
    %176 = vector.load %arg2[%c0_52, %c0_53] : memref<128x512xf32, #tpu.memory_space<vmem>>, vector<128x512xf32>
    %cst_54 = arith.constant dense<0.000000e+00> : vector<1x512xf32>
    %177 = tpu.matmul %155, %176, %cst_54 {dimension_numbers = #tpu.dot_dimension_numbers<[1], [0], [0], [1], [0, 0, 1, 1], [], []>} : vector<1x128xf32>, vector<128x512xf32>, vector<1x512xf32> -> vector<1x512xf32>
    %c0_55 = arith.constant 0 : index
    %c0_56 = arith.constant 0 : index
    %178 = vector.load %arg5[%c0_55, %c0_56] : memref<128x512xf32, #tpu.memory_space<vmem>>, vector<128x512xf32>
    %cst_57 = arith.constant dense<0.000000e+00> : vector<1x512xf32>
    %179 = tpu.matmul %175, %178, %cst_57 {dimension_numbers = #tpu.dot_dimension_numbers<[1], [0], [0], [1], [0, 0, 1, 1], [], []>} : vector<1x128xf32>, vector<128x512xf32>, vector<1x512xf32> -> vector<1x512xf32>
    %180 = vector.extract_strided_slice %5 {offsets = [4, 0], sizes = [1, 512], strides = [1, 1]} : vector<8x512xf32> to vector<1x512xf32>
    %181 = arith.addf %177, %180 : vector<1x512xf32>
    %182 = vector.extract_strided_slice %181 {offsets = [0, 0], sizes = [1, 384], strides = [1, 1]} : vector<1x512xf32> to vector<1x384xf32>
    %183 = arith.negf %182 : vector<1x384xf32>
    %184 = math.exp %183 : vector<1x384xf32>
    %cst_58 = arith.constant 1.000000e+00 : f32
    %185 = vector.broadcast %cst_58 : f32 to vector<1x384xf32>
    %186 = arith.addf %185, %184 : vector<1x384xf32>
    %187 = arith.divf %185, %186 : vector<1x384xf32>
    %188 = vector.extract_strided_slice %187 {offsets = [0, 0], sizes = [1, 128], strides = [1, 1]} : vector<1x384xf32> to vector<1x128xf32>
    %189 = vector.extract_strided_slice %187 {offsets = [0, 128], sizes = [1, 128], strides = [1, 1]} : vector<1x384xf32> to vector<1x128xf32>
    %190 = vector.extract_strided_slice %187 {offsets = [0, 256], sizes = [1, 128], strides = [1, 1]} : vector<1x384xf32> to vector<1x128xf32>
    %191 = vector.extract_strided_slice %181 {offsets = [0, 384], sizes = [1, 128], strides = [1, 1]} : vector<1x512xf32> to vector<1x128xf32>
    %192 = math.tanh %191 : vector<1x128xf32>
    %193 = arith.mulf %189, %153 : vector<1x128xf32>
    %194 = arith.mulf %188, %192 : vector<1x128xf32>
    %195 = arith.addf %193, %194 : vector<1x128xf32>
    %196 = math.tanh %195 : vector<1x128xf32>
    %197 = arith.mulf %190, %196 : vector<1x128xf32>
    %c0_59 = arith.constant 0 : index
    %c0_60 = arith.constant 0 : index
    %198 = vector.load %arg4[%c0_59, %c0_60] : memref<128x512xf32, #tpu.memory_space<vmem>>, vector<128x512xf32>
    %cst_61 = arith.constant dense<0.000000e+00> : vector<1x512xf32>
    %199 = tpu.matmul %197, %198, %cst_61 {dimension_numbers = #tpu.dot_dimension_numbers<[1], [0], [0], [1], [0, 0, 1, 1], [], []>} : vector<1x128xf32>, vector<128x512xf32>, vector<1x512xf32> -> vector<1x512xf32>
    %200 = arith.addf %199, %179 : vector<1x512xf32>
    %201 = arith.addf %200, %6 : vector<1x512xf32>
    %202 = vector.extract_strided_slice %201 {offsets = [0, 0], sizes = [1, 384], strides = [1, 1]} : vector<1x512xf32> to vector<1x384xf32>
    %203 = arith.negf %202 : vector<1x384xf32>
    %204 = math.exp %203 : vector<1x384xf32>
    %cst_62 = arith.constant 1.000000e+00 : f32
    %205 = vector.broadcast %cst_62 : f32 to vector<1x384xf32>
    %206 = arith.addf %205, %204 : vector<1x384xf32>
    %207 = arith.divf %205, %206 : vector<1x384xf32>
    %208 = vector.extract_strided_slice %207 {offsets = [0, 0], sizes = [1, 128], strides = [1, 1]} : vector<1x384xf32> to vector<1x128xf32>
    %209 = vector.extract_strided_slice %207 {offsets = [0, 128], sizes = [1, 128], strides = [1, 1]} : vector<1x384xf32> to vector<1x128xf32>
    %210 = vector.extract_strided_slice %207 {offsets = [0, 256], sizes = [1, 128], strides = [1, 1]} : vector<1x384xf32> to vector<1x128xf32>
    %211 = vector.extract_strided_slice %201 {offsets = [0, 384], sizes = [1, 128], strides = [1, 1]} : vector<1x512xf32> to vector<1x128xf32>
    %212 = math.tanh %211 : vector<1x128xf32>
    %213 = arith.mulf %209, %173 : vector<1x128xf32>
    %214 = arith.mulf %208, %212 : vector<1x128xf32>
    %215 = arith.addf %213, %214 : vector<1x128xf32>
    %216 = math.tanh %215 : vector<1x128xf32>
    %217 = arith.mulf %210, %216 : vector<1x128xf32>
    %c0_63 = arith.constant 0 : index
    %c0_64 = arith.constant 0 : index
    %218 = vector.load %arg2[%c0_63, %c0_64] : memref<128x512xf32, #tpu.memory_space<vmem>>, vector<128x512xf32>
    %cst_65 = arith.constant dense<0.000000e+00> : vector<1x512xf32>
    %219 = tpu.matmul %197, %218, %cst_65 {dimension_numbers = #tpu.dot_dimension_numbers<[1], [0], [0], [1], [0, 0, 1, 1], [], []>} : vector<1x128xf32>, vector<128x512xf32>, vector<1x512xf32> -> vector<1x512xf32>
    %c0_66 = arith.constant 0 : index
    %c0_67 = arith.constant 0 : index
    %220 = vector.load %arg5[%c0_66, %c0_67] : memref<128x512xf32, #tpu.memory_space<vmem>>, vector<128x512xf32>
    %cst_68 = arith.constant dense<0.000000e+00> : vector<1x512xf32>
    %221 = tpu.matmul %217, %220, %cst_68 {dimension_numbers = #tpu.dot_dimension_numbers<[1], [0], [0], [1], [0, 0, 1, 1], [], []>} : vector<1x128xf32>, vector<128x512xf32>, vector<1x512xf32> -> vector<1x512xf32>
    %222 = vector.extract_strided_slice %5 {offsets = [5, 0], sizes = [1, 512], strides = [1, 1]} : vector<8x512xf32> to vector<1x512xf32>
    %223 = arith.addf %219, %222 : vector<1x512xf32>
    %224 = vector.extract_strided_slice %223 {offsets = [0, 0], sizes = [1, 384], strides = [1, 1]} : vector<1x512xf32> to vector<1x384xf32>
    %225 = arith.negf %224 : vector<1x384xf32>
    %226 = math.exp %225 : vector<1x384xf32>
    %cst_69 = arith.constant 1.000000e+00 : f32
    %227 = vector.broadcast %cst_69 : f32 to vector<1x384xf32>
    %228 = arith.addf %227, %226 : vector<1x384xf32>
    %229 = arith.divf %227, %228 : vector<1x384xf32>
    %230 = vector.extract_strided_slice %229 {offsets = [0, 0], sizes = [1, 128], strides = [1, 1]} : vector<1x384xf32> to vector<1x128xf32>
    %231 = vector.extract_strided_slice %229 {offsets = [0, 128], sizes = [1, 128], strides = [1, 1]} : vector<1x384xf32> to vector<1x128xf32>
    %232 = vector.extract_strided_slice %229 {offsets = [0, 256], sizes = [1, 128], strides = [1, 1]} : vector<1x384xf32> to vector<1x128xf32>
    %233 = vector.extract_strided_slice %223 {offsets = [0, 384], sizes = [1, 128], strides = [1, 1]} : vector<1x512xf32> to vector<1x128xf32>
    %234 = math.tanh %233 : vector<1x128xf32>
    %235 = arith.mulf %231, %195 : vector<1x128xf32>
    %236 = arith.mulf %230, %234 : vector<1x128xf32>
    %237 = arith.addf %235, %236 : vector<1x128xf32>
    %238 = math.tanh %237 : vector<1x128xf32>
    %239 = arith.mulf %232, %238 : vector<1x128xf32>
    %c0_70 = arith.constant 0 : index
    %c0_71 = arith.constant 0 : index
    %240 = vector.load %arg4[%c0_70, %c0_71] : memref<128x512xf32, #tpu.memory_space<vmem>>, vector<128x512xf32>
    %cst_72 = arith.constant dense<0.000000e+00> : vector<1x512xf32>
    %241 = tpu.matmul %239, %240, %cst_72 {dimension_numbers = #tpu.dot_dimension_numbers<[1], [0], [0], [1], [0, 0, 1, 1], [], []>} : vector<1x128xf32>, vector<128x512xf32>, vector<1x512xf32> -> vector<1x512xf32>
    %242 = arith.addf %241, %221 : vector<1x512xf32>
    %243 = arith.addf %242, %6 : vector<1x512xf32>
    %244 = vector.extract_strided_slice %243 {offsets = [0, 0], sizes = [1, 384], strides = [1, 1]} : vector<1x512xf32> to vector<1x384xf32>
    %245 = arith.negf %244 : vector<1x384xf32>
    %246 = math.exp %245 : vector<1x384xf32>
    %cst_73 = arith.constant 1.000000e+00 : f32
    %247 = vector.broadcast %cst_73 : f32 to vector<1x384xf32>
    %248 = arith.addf %247, %246 : vector<1x384xf32>
    %249 = arith.divf %247, %248 : vector<1x384xf32>
    %250 = vector.extract_strided_slice %249 {offsets = [0, 0], sizes = [1, 128], strides = [1, 1]} : vector<1x384xf32> to vector<1x128xf32>
    %251 = vector.extract_strided_slice %249 {offsets = [0, 128], sizes = [1, 128], strides = [1, 1]} : vector<1x384xf32> to vector<1x128xf32>
    %252 = vector.extract_strided_slice %249 {offsets = [0, 256], sizes = [1, 128], strides = [1, 1]} : vector<1x384xf32> to vector<1x128xf32>
    %253 = vector.extract_strided_slice %243 {offsets = [0, 384], sizes = [1, 128], strides = [1, 1]} : vector<1x512xf32> to vector<1x128xf32>
    %254 = math.tanh %253 : vector<1x128xf32>
    %255 = arith.mulf %251, %215 : vector<1x128xf32>
    %256 = arith.mulf %250, %254 : vector<1x128xf32>
    %257 = arith.addf %255, %256 : vector<1x128xf32>
    %258 = math.tanh %257 : vector<1x128xf32>
    %259 = arith.mulf %252, %258 : vector<1x128xf32>
    %c0_74 = arith.constant 0 : index
    %c0_75 = arith.constant 0 : index
    %260 = vector.load %arg2[%c0_74, %c0_75] : memref<128x512xf32, #tpu.memory_space<vmem>>, vector<128x512xf32>
    %cst_76 = arith.constant dense<0.000000e+00> : vector<1x512xf32>
    %261 = tpu.matmul %239, %260, %cst_76 {dimension_numbers = #tpu.dot_dimension_numbers<[1], [0], [0], [1], [0, 0, 1, 1], [], []>} : vector<1x128xf32>, vector<128x512xf32>, vector<1x512xf32> -> vector<1x512xf32>
    %c0_77 = arith.constant 0 : index
    %c0_78 = arith.constant 0 : index
    %262 = vector.load %arg5[%c0_77, %c0_78] : memref<128x512xf32, #tpu.memory_space<vmem>>, vector<128x512xf32>
    %cst_79 = arith.constant dense<0.000000e+00> : vector<1x512xf32>
    %263 = tpu.matmul %259, %262, %cst_79 {dimension_numbers = #tpu.dot_dimension_numbers<[1], [0], [0], [1], [0, 0, 1, 1], [], []>} : vector<1x128xf32>, vector<128x512xf32>, vector<1x512xf32> -> vector<1x512xf32>
    %264 = vector.extract_strided_slice %5 {offsets = [6, 0], sizes = [1, 512], strides = [1, 1]} : vector<8x512xf32> to vector<1x512xf32>
    %265 = arith.addf %261, %264 : vector<1x512xf32>
    %266 = vector.extract_strided_slice %265 {offsets = [0, 0], sizes = [1, 384], strides = [1, 1]} : vector<1x512xf32> to vector<1x384xf32>
    %267 = arith.negf %266 : vector<1x384xf32>
    %268 = math.exp %267 : vector<1x384xf32>
    %cst_80 = arith.constant 1.000000e+00 : f32
    %269 = vector.broadcast %cst_80 : f32 to vector<1x384xf32>
    %270 = arith.addf %269, %268 : vector<1x384xf32>
    %271 = arith.divf %269, %270 : vector<1x384xf32>
    %272 = vector.extract_strided_slice %271 {offsets = [0, 0], sizes = [1, 128], strides = [1, 1]} : vector<1x384xf32> to vector<1x128xf32>
    %273 = vector.extract_strided_slice %271 {offsets = [0, 128], sizes = [1, 128], strides = [1, 1]} : vector<1x384xf32> to vector<1x128xf32>
    %274 = vector.extract_strided_slice %271 {offsets = [0, 256], sizes = [1, 128], strides = [1, 1]} : vector<1x384xf32> to vector<1x128xf32>
    %275 = vector.extract_strided_slice %265 {offsets = [0, 384], sizes = [1, 128], strides = [1, 1]} : vector<1x512xf32> to vector<1x128xf32>
    %276 = math.tanh %275 : vector<1x128xf32>
    %277 = arith.mulf %273, %237 : vector<1x128xf32>
    %278 = arith.mulf %272, %276 : vector<1x128xf32>
    %279 = arith.addf %277, %278 : vector<1x128xf32>
    %280 = math.tanh %279 : vector<1x128xf32>
    %281 = arith.mulf %274, %280 : vector<1x128xf32>
    %c0_81 = arith.constant 0 : index
    %c0_82 = arith.constant 0 : index
    %282 = vector.load %arg4[%c0_81, %c0_82] : memref<128x512xf32, #tpu.memory_space<vmem>>, vector<128x512xf32>
    %cst_83 = arith.constant dense<0.000000e+00> : vector<1x512xf32>
    %283 = tpu.matmul %281, %282, %cst_83 {dimension_numbers = #tpu.dot_dimension_numbers<[1], [0], [0], [1], [0, 0, 1, 1], [], []>} : vector<1x128xf32>, vector<128x512xf32>, vector<1x512xf32> -> vector<1x512xf32>
    %284 = arith.addf %283, %263 : vector<1x512xf32>
    %285 = arith.addf %284, %6 : vector<1x512xf32>
    %286 = vector.extract_strided_slice %285 {offsets = [0, 0], sizes = [1, 384], strides = [1, 1]} : vector<1x512xf32> to vector<1x384xf32>
    %287 = arith.negf %286 : vector<1x384xf32>
    %288 = math.exp %287 : vector<1x384xf32>
    %cst_84 = arith.constant 1.000000e+00 : f32
    %289 = vector.broadcast %cst_84 : f32 to vector<1x384xf32>
    %290 = arith.addf %289, %288 : vector<1x384xf32>
    %291 = arith.divf %289, %290 : vector<1x384xf32>
    %292 = vector.extract_strided_slice %291 {offsets = [0, 0], sizes = [1, 128], strides = [1, 1]} : vector<1x384xf32> to vector<1x128xf32>
    %293 = vector.extract_strided_slice %291 {offsets = [0, 128], sizes = [1, 128], strides = [1, 1]} : vector<1x384xf32> to vector<1x128xf32>
    %294 = vector.extract_strided_slice %291 {offsets = [0, 256], sizes = [1, 128], strides = [1, 1]} : vector<1x384xf32> to vector<1x128xf32>
    %295 = vector.extract_strided_slice %285 {offsets = [0, 384], sizes = [1, 128], strides = [1, 1]} : vector<1x512xf32> to vector<1x128xf32>
    %296 = math.tanh %295 : vector<1x128xf32>
    %297 = arith.mulf %293, %257 : vector<1x128xf32>
    %298 = arith.mulf %292, %296 : vector<1x128xf32>
    %299 = arith.addf %297, %298 : vector<1x128xf32>
    %300 = math.tanh %299 : vector<1x128xf32>
    %301 = arith.mulf %294, %300 : vector<1x128xf32>
    %c0_85 = arith.constant 0 : index
    %c0_86 = arith.constant 0 : index
    %302 = vector.load %arg2[%c0_85, %c0_86] : memref<128x512xf32, #tpu.memory_space<vmem>>, vector<128x512xf32>
    %cst_87 = arith.constant dense<0.000000e+00> : vector<1x512xf32>
    %303 = tpu.matmul %281, %302, %cst_87 {dimension_numbers = #tpu.dot_dimension_numbers<[1], [0], [0], [1], [0, 0, 1, 1], [], []>} : vector<1x128xf32>, vector<128x512xf32>, vector<1x512xf32> -> vector<1x512xf32>
    %c0_88 = arith.constant 0 : index
    %c0_89 = arith.constant 0 : index
    %304 = vector.load %arg5[%c0_88, %c0_89] : memref<128x512xf32, #tpu.memory_space<vmem>>, vector<128x512xf32>
    %cst_90 = arith.constant dense<0.000000e+00> : vector<1x512xf32>
    %305 = tpu.matmul %301, %304, %cst_90 {dimension_numbers = #tpu.dot_dimension_numbers<[1], [0], [0], [1], [0, 0, 1, 1], [], []>} : vector<1x128xf32>, vector<128x512xf32>, vector<1x512xf32> -> vector<1x512xf32>
    %306 = vector.extract_strided_slice %5 {offsets = [7, 0], sizes = [1, 512], strides = [1, 1]} : vector<8x512xf32> to vector<1x512xf32>
    %307 = arith.addf %303, %306 : vector<1x512xf32>
    %308 = vector.extract_strided_slice %307 {offsets = [0, 0], sizes = [1, 384], strides = [1, 1]} : vector<1x512xf32> to vector<1x384xf32>
    %309 = arith.negf %308 : vector<1x384xf32>
    %310 = math.exp %309 : vector<1x384xf32>
    %cst_91 = arith.constant 1.000000e+00 : f32
    %311 = vector.broadcast %cst_91 : f32 to vector<1x384xf32>
    %312 = arith.addf %311, %310 : vector<1x384xf32>
    %313 = arith.divf %311, %312 : vector<1x384xf32>
    %314 = vector.extract_strided_slice %313 {offsets = [0, 0], sizes = [1, 128], strides = [1, 1]} : vector<1x384xf32> to vector<1x128xf32>
    %315 = vector.extract_strided_slice %313 {offsets = [0, 128], sizes = [1, 128], strides = [1, 1]} : vector<1x384xf32> to vector<1x128xf32>
    %316 = vector.extract_strided_slice %313 {offsets = [0, 256], sizes = [1, 128], strides = [1, 1]} : vector<1x384xf32> to vector<1x128xf32>
    %317 = vector.extract_strided_slice %307 {offsets = [0, 384], sizes = [1, 128], strides = [1, 1]} : vector<1x512xf32> to vector<1x128xf32>
    %318 = math.tanh %317 : vector<1x128xf32>
    %319 = arith.mulf %315, %279 : vector<1x128xf32>
    %320 = arith.mulf %314, %318 : vector<1x128xf32>
    %321 = arith.addf %319, %320 : vector<1x128xf32>
    %322 = math.tanh %321 : vector<1x128xf32>
    %323 = arith.mulf %316, %322 : vector<1x128xf32>
    %c0_92 = arith.constant 0 : index
    %c0_93 = arith.constant 0 : index
    %324 = vector.load %arg4[%c0_92, %c0_93] : memref<128x512xf32, #tpu.memory_space<vmem>>, vector<128x512xf32>
    %cst_94 = arith.constant dense<0.000000e+00> : vector<1x512xf32>
    %325 = tpu.matmul %323, %324, %cst_94 {dimension_numbers = #tpu.dot_dimension_numbers<[1], [0], [0], [1], [0, 0, 1, 1], [], []>} : vector<1x128xf32>, vector<128x512xf32>, vector<1x512xf32> -> vector<1x512xf32>
    %326 = arith.addf %325, %305 : vector<1x512xf32>
    %327 = arith.addf %326, %6 : vector<1x512xf32>
    %328 = vector.extract_strided_slice %327 {offsets = [0, 0], sizes = [1, 384], strides = [1, 1]} : vector<1x512xf32> to vector<1x384xf32>
    %329 = arith.negf %328 : vector<1x384xf32>
    %330 = math.exp %329 : vector<1x384xf32>
    %cst_95 = arith.constant 1.000000e+00 : f32
    %331 = vector.broadcast %cst_95 : f32 to vector<1x384xf32>
    %332 = arith.addf %331, %330 : vector<1x384xf32>
    %333 = arith.divf %331, %332 : vector<1x384xf32>
    %334 = vector.extract_strided_slice %333 {offsets = [0, 0], sizes = [1, 128], strides = [1, 1]} : vector<1x384xf32> to vector<1x128xf32>
    %335 = vector.extract_strided_slice %333 {offsets = [0, 128], sizes = [1, 128], strides = [1, 1]} : vector<1x384xf32> to vector<1x128xf32>
    %336 = vector.extract_strided_slice %333 {offsets = [0, 256], sizes = [1, 128], strides = [1, 1]} : vector<1x384xf32> to vector<1x128xf32>
    %337 = vector.extract_strided_slice %327 {offsets = [0, 384], sizes = [1, 128], strides = [1, 1]} : vector<1x512xf32> to vector<1x128xf32>
    %338 = math.tanh %337 : vector<1x128xf32>
    %339 = arith.mulf %335, %299 : vector<1x128xf32>
    %340 = arith.mulf %334, %338 : vector<1x128xf32>
    %341 = arith.addf %339, %340 : vector<1x128xf32>
    %342 = math.tanh %341 : vector<1x128xf32>
    %343 = arith.mulf %336, %342 : vector<1x128xf32>
    %344 = tpu.concatenate %49, %91, %133, %175, %217, %259, %301, %343 in 0 : vector<1x128xf32>, vector<1x128xf32>, vector<1x128xf32>, vector<1x128xf32>, vector<1x128xf32>, vector<1x128xf32>, vector<1x128xf32>, vector<1x128xf32> -> vector<8x128xf32>
    %c0_96 = arith.constant 0 : index
    %c0_97 = arith.constant 0 : index
    %345 = vector.load %arg7[%c0_96, %c0_97] : memref<128x128xf32, #tpu.memory_space<vmem>>, vector<128x128xf32>
    %cst_98 = arith.constant dense<0.000000e+00> : vector<8x128xf32>
    %346 = tpu.matmul %344, %345, %cst_98 {dimension_numbers = #tpu.dot_dimension_numbers<[1], [0], [0], [1], [0, 0, 1, 1], [], []>} : vector<8x128xf32>, vector<128x128xf32>, vector<8x128xf32> -> vector<8x128xf32>
    %c0_99 = arith.constant 0 : index
    %c0_100 = arith.constant 0 : index
    %347 = vector.load %arg8[%c0_99, %c0_100] : memref<1x128xf32, #tpu.memory_space<vmem>>, vector<1x128xf32>
    %348 = vector.broadcast %347 : vector<1x128xf32> to vector<8x128xf32>
    %349 = arith.addf %346, %348 : vector<8x128xf32>
    %c0_101 = arith.constant 0 : index
    %c0_102 = arith.constant 0 : index
    %350 = vector.load %arg9[%c0_101, %c0_102] : memref<8x128xf32, #tpu.memory_space<vmem>>, vector<8x128xf32>
    tpu.vector_store %arg9[%c0_101, %c0_102], %349 {strides = array<i32>} : memref<8x128xf32, #tpu.memory_space<vmem>>, vector<8x128xf32>,
    %351 = tpu.concatenate %323, %343, %321, %341 in 0 : vector<1x128xf32>, vector<1x128xf32>, vector<1x128xf32>, vector<1x128xf32> -> vector<4x128xf32>
    %c0_103 = arith.constant 0 : index
    %c0_104 = arith.constant 0 : index
    %352 = vector.load %arg10[%c0_103, %c0_104] : memref<4x128xf32, #tpu.memory_space<vmem>>, vector<4x128xf32>
    tpu.vector_store %arg10[%c0_103, %c0_104], %351 {strides = array<i32>} : memref<4x128xf32, #tpu.memory_space<vmem>>, vector<4x128xf32>,
    return
  }
}

</mosaic_0001>

<bundles_post_ra>
// kernel: lstm_multi_head_forward.1
= control target key start
LH: loop header
LB: loop body
LE: loop exit
PB: predicated region body
PF: predicated region fallthrough
CT: control target
= control target key end

     0   :  { %16 = vsyncpa [#allocation3], 0  ;;  %s9280_s0 = inlined_call_operand.hbm [shape: f32[8,16], index: 0, kind: input, shape index: {}]   ;;  %s9281_s1 = inlined_call_operand.hbm [shape: f32[16,512], index: 1, kind: input, shape index: {}]   ;;  %s9282_s2 = inlined_call_operand.hbm [shape: f32[128,512], index: 2, kind: input, shape index: {}]   ;;  %s9283_s3 = inlined_call_operand.hbm [shape: f32[1,512], index: 3, kind: input, shape index: {}]   ;;  %s9284_s4 = inlined_call_operand.hbm [shape: f32[128,512], index: 4, kind: input, shape index: {}]   ;;  %s9285_s5 = inlined_call_operand.hbm [shape: f32[128,512], index: 5, kind: input, shape index: {}]   ;;  %s9286_s6 = inlined_call_operand.hbm [shape: f32[1,512], index: 6, kind: input, shape index: {}]   ;;  %s9287_s7 = inlined_call_operand.hbm [shape: f32[128,128], index: 7, kind: input, shape index: {}]   ;;  %s9288_s8 = inlined_call_operand.vmem [shape: f32[1,128], index: 8, kind: input, shape index: {}]   ;;  %s9289_s9 = inlined_call_operand.vmem [shape: f32[8,128], index: 9, kind: output, shape index: {0}]   ;;  %s9290_s10 = inlined_call_operand.vmem [shape: f32[4,128], index: 10, kind: output, shape index: {1}]  }
   0x1   :  { %17 = vsyncpa [#allocation5], 0 }
   0x2   :  { %18 = vsyncpa [#allocation8], 0 }
   0x3   :  { %19 = vsyncpa [#allocation11], 0 }
   0x4   :  { %20 = vsyncpa [#allocation14], 0  ;;  %s5685_s13 = smov [#allocation4]  }
   0x5   :  { %s36_s14 = sshll.u32 %s5685_s13, 4  ;;  %s37_s14 = int_to_ptr.vmem [resolvable:$true] %s36_s14 }
   0x6   :  { %s5523_s15 = scalar_lea.vmem %s37_s14, 1024  ;;  %p5528_p1 = scmp.lt.s32.totalorder %s37_s14, %s37_s14 }
   0x7   :  { %p5524_p0 = scmp.ne.s32.totalorder %s37_s14, %s5523_s15  ;;  %p5529_p2 = scmp.lt.s32.totalorder %s5523_s15, %s5523_s15 }
   0x9   :  { %p5530_p3 = por %p5529_p2, %p5528_p1 }
   0xb   :  { %p5531_p4 = pnand %p5530_p3, %p5524_p0 }
   0xd   :  { %5534 = shalt.err (!%p5531_p4)
}
   0xe   :  { %s5686_s16 = smov 512   ;;  %s5687_s17 = smov 32  }
   0xf   :  { %42 = dma.hbm_to_vmem [thread:$0]  %s9281_s1, 1024, %s37_s14, [#allocation5], %s5686_s16, %s5686_s16, %s5687_s17  }
  0x10   :  { %s5688_s20 = smov [#allocation7]   ;;  %s5689_s22 = smov [#allocation10]  }
  0x11   :  { %s61_s21 = sshll.u32 %s5688_s20, 4  ;;  %s82_s23 = sshll.u32 %s5689_s22, 4  ;;  %s62_s21 = int_to_ptr.vmem [resolvable:$true] %s61_s21  ;;  %s83_s23 = int_to_ptr.vmem [resolvable:$true] %s82_s23 }
  0x12   :  { %s5543_s24 = scalar_lea.vmem %s62_s21, 64  ;;  %p5548_p6 = scmp.lt.s32.totalorder %s62_s21, %s62_s21 }
  0x13   :  { %p5544_p5 = scmp.ne.s32.totalorder %s62_s21, %s5543_s24  ;;  %p5549_p7 = scmp.lt.s32.totalorder %s5543_s24, %s5543_s24 }
  0x15   :  { %p5550_p8 = por %p5549_p7, %p5548_p6 }
  0x17   :  { %p5551_p9 = pnand %p5550_p8, %p5544_p5 }
  0x19   :  { %5554 = shalt.err (!%p5551_p9)
}
  0x1a   :  { %64 = dma.hbm_to_vmem [thread:$0]  %s9283_s3, 64, %s62_s21, [#allocation8]  }
  0x1b   :  { %s5563_s27 = scalar_lea.vmem %s83_s23, 8192  ;;  %p5568_p11 = scmp.lt.s32.totalorder %s83_s23, %s83_s23 }
  0x1c   :  { %p5564_p10 = scmp.ne.s32.totalorder %s83_s23, %s5563_s27  ;;  %p5569_p12 = scmp.lt.s32.totalorder %s5563_s27, %s5563_s27 }
  0x1e   :  { %p5570_p13 = por %p5569_p12, %p5568_p11 }
  0x20   :  { %p5571_p0 = pnand %p5570_p13, %p5564_p10 }
  0x22   :  { %5574 = shalt.err (!%p5571_p0)
}
  0x23   :  { %88 = dma.hbm_to_vmem [thread:$0]  %s9285_s5, 8192, %s83_s23, [#allocation11], %s5686_s16, %s5686_s16, %s5687_s17  }
  0x24   :  { %s5690_s29 = smov [#allocation2]   ;;  %s5691_s11 = smov [#allocation6]  }
  0x25   :  { %s27_s30 = sshll.u32 %s5690_s29, 4  ;;  %s48_s3 = sshll.u32 %s5691_s11, 4  ;;  %s28_s30 = int_to_ptr.vmem [resolvable:$true] %s27_s30  ;;  %s49_s3 = int_to_ptr.vmem [resolvable:$true] %s48_s3 }
  0x26   :  { %s5583_s12 = scalar_lea.vmem %s28_s30, 128  ;;  %p5588_p2 = scmp.lt.s32.totalorder %s28_s30, %s28_s30 }
  0x27   :  { %p5584_p1 = scmp.ne.s32.totalorder %s28_s30, %s5583_s12  ;;  %p5589_p3 = scmp.lt.s32.totalorder %s5583_s12, %s5583_s12 }
  0x29   :  { %p5590_p4 = por %p5589_p3, %p5588_p2 }
  0x2b   :  { %p5591_p5 = pnand %p5590_p4, %p5584_p1 }
  0x2d   :  { %5594 = shalt.err (!%p5591_p5)
}
  0x2e   :  { %30 = dma.hbm_to_vmem [thread:$0]  %s9280_s0, 128, %s28_s30, [#allocation3]  }
  0x2f   :  { %s5603_s15 = scalar_lea.vmem %s49_s3, 8192  ;;  %p5608_p7 = scmp.lt.s32.totalorder %s49_s3, %s49_s3 }
  0x30   :  { %p5604_p6 = scmp.ne.s32.totalorder %s49_s3, %s5603_s15  ;;  %p5609_p8 = scmp.lt.s32.totalorder %s5603_s15, %s5603_s15 }
  0x32   :  { %p5610_p9 = por %p5609_p8, %p5608_p7 }
  0x34   :  { %p5611_p10 = pnand %p5610_p9, %p5604_p6 }
  0x36   :  { %5614 = shalt.err (!%p5611_p10)
}
  0x37   :  { %54 = dma.hbm_to_vmem [thread:$0]  %s9282_s2, 8192, %s49_s3, [#allocation5], %s5686_s16, %s5686_s16, %s5687_s17  }
  0x38   :  { %s5692_s19 = smov [#allocation9]   ;;  %s5693_s21 = smov [#allocation12]  }
  0x39   :  { %s70_s20 = sshll.u32 %s5692_s19, 4  ;;  %s95_s0 = sshll.u32 %s5693_s21, 4  ;;  %s71_s20 = int_to_ptr.vmem [resolvable:$true] %s70_s20  ;;  %s96_s0 = int_to_ptr.vmem [resolvable:$true] %s95_s0 }
  0x3a   :  { %s5623_s22 = scalar_lea.vmem %s71_s20, 8192  ;;  %p5628_p12 = scmp.lt.s32.totalorder %s71_s20, %s71_s20 }
  0x3b   :  { %p5624_p11 = scmp.ne.s32.totalorder %s71_s20, %s5623_s22  ;;  %p5629_p13 = scmp.lt.s32.totalorder %s5623_s22, %s5623_s22 }
  0x3d   :  { %p5630_p0 = por %p5629_p13, %p5628_p12 }
  0x3f   :  { %p5631_p1 = pnand %p5630_p0, %p5624_p11 }
  0x41   :  { %5634 = shalt.err (!%p5631_p1)
}
  0x42   :  { %76 = dma.hbm_to_vmem [thread:$0]  %s9284_s4, 8192, %s71_s20, [#allocation8], %s5686_s16, %s5686_s16, %s5687_s17  }
  0x43   :  { %s5643_s2 = scalar_lea.vmem %s96_s0, 64  ;;  %p5648_p3 = scmp.lt.s32.totalorder %s96_s0, %s96_s0 }
  0x44   :  { %p5644_p2 = scmp.ne.s32.totalorder %s96_s0, %s5643_s2  ;;  %p5649_p4 = scmp.lt.s32.totalorder %s5643_s2, %s5643_s2 }
  0x46   :  { %p5650_p5 = por %p5649_p4, %p5648_p3 }
  0x48   :  { %p5651_p6 = pnand %p5650_p5, %p5644_p2 }
  0x4a   :  { %5654 = shalt.err (!%p5651_p6)
}
  0x4b   :  { %98 = dma.hbm_to_vmem [thread:$0]  %s9286_s6, 64, %s96_s0, [#allocation11]  }
  0x4c   :  { %s5694_s27 = smov [#allocation13]  }
  0x4d   :  { %s104_s1 = sshll.u32 %s5694_s27, 4  ;;  %s105_s1 = int_to_ptr.vmem [resolvable:$true] %s104_s1 }
  0x4e   :  { %s5663_s28 = scalar_lea.vmem %s105_s1, 2048  ;;  %p5668_p8 = scmp.lt.s32.totalorder %s105_s1, %s105_s1 }
  0x4f   :  { %p5664_p7 = scmp.ne.s32.totalorder %s105_s1, %s5663_s28  ;;  %p5669_p9 = scmp.lt.s32.totalorder %s5663_s28, %s5663_s28 }
  0x51   :  { %p5670_p10 = por %p5669_p9, %p5668_p8 }
  0x53   :  { %p5671_p11 = pnand %p5670_p10, %p5664_p7 }
  0x55   :  { %5674 = shalt.err (!%p5671_p11)
}
  0x56   :  { %s5695_s4 = smov 128   ;;  %s5696_s16 = smov 8  }
  0x57   :  { %110 = dma.hbm_to_vmem [thread:$0]  %s9287_s7, 2048, %s105_s1, [#allocation14], %s5695_s4, %s5695_s4, %s5696_s16  }
  0x58   :  { %5675 = dma.done.wait [#allocation3], 128  }
  0x59   :  { %5676 = vsyncadd [#allocation3], 4294967168 }
  0x5a   :  { %5677 = dma.done.wait [#allocation5], 9216  }
  0x5b   :  { %5678 = vsyncadd [#allocation5], 4294958080 }
  0x5c   :  { %5679 = dma.done.wait [#allocation8], 8256  }
  0x5d   :  { %5680 = vsyncadd [#allocation8], 4294959040 }
  0x5e   :  { %5681 = dma.done.wait [#allocation11], 8256  }
  0x5f   :  { %5682 = vsyncadd [#allocation11], 4294959040 }
  0x60   :  { %5683 = dma.done.wait [#allocation14], 2048  }
  0x61   :  { %5684 = vsyncadd [#allocation14], 4294965248  ;;  %v9294_v0 = vmov 0.0   ;;  %v143_v1 = vld [vmem:[#allocation4 + $0x28] sm:$0xff]  ;;  %v142_v3 = vld [vmem:[#allocation4 + $0x20] sm:$0xff]  ;;  %vm168_vm0 = vcmask 130048  }
  0x62   :  { %236 = vmatprep.mubr.f32.mxu1 %v9294_v0  ;;  %507 = vmatprep.mubr.f32.mxu0 %v9294_v0  ;;  %v5792_v2 = vld [vmem:[#allocation10 + $0x1e8] sm:$0xff]  ;;  %v5795_v4 = vld [vmem:[#allocation10 + $0x1e0] sm:$0xff]  ;;  %v145_v9 = vld [vmem:[#allocation4 + $0x38] sm:$0xff]  ;;  %vm4433_vm1 = vcmask 1040384   ;;  %vm4435_vm2 = vcmask 1041408   ;;  %vm4437_vm3 = vcmask 1042432  }
  0x63   :  { %200 = vmatprep.subr.mxu1 %v143_v1  ;;  %443 = vmatprep.subr.mxu0 %v5792_v2  ;;  %v139_v5 = vld [vmem:[#allocation4 + $0x8] sm:$0xff]  ;;  %v138_v7 = vld [vmem:[#allocation4] sm:$0xff]  ;;  %v137_v11 = vld [vmem:[#allocation2] sm:$0xff]  ;;  %vm4439_vm4 = vcmask 1043456   ;;  %vm4441_vm5 = vcmask 1044480   ;;  %vm4443_vm6 = vcmask 1045504  }
  0x64   :  { %v5797_v6 = vld [vmem:[#allocation10 + $0x1c8] sm:$0xff]  ;;  %201 = vmatpush1.msra.mxu1 %v142_v3  ;;  %444 = vmatpush1.msra.mxu0 %v5795_v4  ;;  %v5800_v8 = vld [vmem:[#allocation10 + $0x1c0] sm:$0xff]  ;;  %v141_v15 = vld [vmem:[#allocation4 + $0x18] sm:$0xff]  ;;  %vm5698_vm7 = vmmov 0   ;;  %vm4445_vm8 = vcmask 1046528  }
  0x65   :  { %202 = vmatprep.subr.mxu1 %v139_v5  ;;  %445 = vmatprep.subr.mxu0 %v5797_v6  ;;  %v5803_v10 = vld [vmem:[#allocation10 + $0x1a8] sm:$0xff]  ;;  %v5806_v13 = vld [vmem:[#allocation10 + $0x1a0] sm:$0xff]  ;;  %v5818_v19 = vld [vmem:[#allocation10 + $0x1f8] sm:$0xff] }
  0x66   :  { %203 = vmatpush1.msra.mxu1 %v138_v7  ;;  %446 = vmatpush1.msra.mxu0 %v5800_v8  ;;  %v144_v12 = vld [vmem:[#allocation4 + $0x30] sm:$0xff]  ;;  %v5811_v16 = vld [vmem:[#allocation10 + $0x180] sm:$0xff]  ;;  %v5830_v23 = vld [vmem:[#allocation10 + $0x1d8] sm:$0xff] }
  0x67   :  { %v5808_v14 = vld [vmem:[#allocation10 + $0x188] sm:$0xff]  ;;  %271 = vmatprep.subr.mxu1 %v145_v9  ;;  %447 = vmatprep.subr.mxu0 %v5803_v10  ;;  %v5821_v20 = vld [vmem:[#allocation10 + $0x160] sm:$0xff]  ;;  %v5824_v21 = vld [vmem:[#allocation10 + $0x1f0] sm:$0xff] }
  0x68   :  { %4566 = vmatmul.mubr.msk.f32.vlgmr.msra.gmra.mxu1 %vm168_vm0, %v137_v11  ;;  %448 = vmatpush1.msra.mxu0 %v5806_v13  ;;  %v140_v17 = vld [vmem:[#allocation4 + $0x10] sm:$0xff]  ;;  %v5832_v24 = vld [vmem:[#allocation10 + $0x140] sm:$0xff]  ;;  %v5842_v27 = vld [vmem:[#allocation10 + $0x1b8] sm:$0xff] }
  0x69   :  { %272 = vmatpush1.msra.mxu1 %v144_v12  ;;  %449 = vmatprep.subr.mxu0 %v5808_v14  ;;  %v5816_v18 = vld [vmem:[#allocation10 + $0x168] sm:$0xff]  ;;  %v5836_v25 = vld [vmem:[#allocation10 + $0x1d0] sm:$0xff]  ;;  %v5844_v28 = vld [vmem:[#allocation10 + $0x120] sm:$0xff] }
  0x6a   :  { %273 = vmatprep.subr.mxu1 %v141_v15  ;;  %450 = vmatpush1.msra.mxu0 %v5811_v16  ;;  %v5826_v22 = vld [vmem:[#allocation10 + $0x148] sm:$0xff]  ;;  %v5848_v29 = vld [vmem:[#allocation10 + $0x1b0] sm:$0xff]  ;;  %v5854_v31 = vld [vmem:[#allocation10 + $0x198] sm:$0xff] }
  0x6b   :  { %274 = vmatpush1.msra.mxu1 %v140_v17  ;;  %307 = vmatprep.mubr.f32.mxu1 %v9294_v0  ;;  %v5838_v26 = vld [vmem:[#allocation10 + $0x128] sm:$0xff]  ;;  %v5856_v32 = vld [vmem:[#allocation10 + $0x100] sm:$0xff]  ;;  %v5860_v33 = vld [vmem:[#allocation10 + $0x190] sm:$0xff] }
  0x6c   :  { %451 = vmatprep.subr.mxu0 %v5816_v18  ;;  %514 = vmatprep.subr.mxu1 %v5818_v19  ;;  %v5850_v30 = vld [vmem:[#allocation10 + $0x108] sm:$0xff]  ;;  %v5866_v35 = vld [vmem:[#allocation10 + $0x178] sm:$0xff]  ;;  %v5868_v36 = vld [vmem:[#allocation10 + $0xe0] sm:$0xff] }
  0x6d   :  { %4567 = vmatmul.mubr.msk.f32.vlgmr.msra.gmra.mxu1 %vm168_vm0, %v137_v11  ;;  %452 = vmatpush1.msra.mxu0 %v5821_v20  ;;  %v5862_v34 = vld [vmem:[#allocation10 + $0xe8] sm:$0xff]  ;;  %v5872_v37 = vld [vmem:[#allocation10 + $0x170] sm:$0xff]  ;;  %v5878_v39 = vld [vmem:[#allocation10 + $0x158] sm:$0xff] }
  0x6e   :  { %515 = vmatpush1.msra.mxu1 %v5824_v21  ;;  %453 = vmatprep.subr.mxu0 %v5826_v22  ;;  %v5874_v38 = vld [vmem:[#allocation10 + $0xc8] sm:$0xff]  ;;  %v5880_v40 = vld [vmem:[#allocation10 + $0xc0] sm:$0xff]  ;;  %v5884_v41 = vld [vmem:[#allocation10 + $0x150] sm:$0xff] }
  0x6f   :  { %516 = vmatprep.subr.mxu1 %v5830_v23  ;;  %454 = vmatpush1.msra.mxu0 %v5832_v24  ;;  %v5886_v42 = vld [vmem:[#allocation10 + $0xa8] sm:$0xff]  ;;  %v5890_v43 = vld [vmem:[#allocation10 + $0x138] sm:$0xff]  ;;  %v5892_v44 = vld [vmem:[#allocation10 + $0xa0] sm:$0xff] }
  0x70   :  { %517 = vmatpush1.msra.mxu1 %v5836_v25  ;;  %455 = vmatprep.subr.mxu0 %v5838_v26  ;;  %v5896_v45 = vld [vmem:[#allocation10 + $0x130] sm:$0xff]  ;;  %v5898_v46 = vld [vmem:[#allocation10 + $0x88] sm:$0xff]  ;;  %v5902_v47 = vld [vmem:[#allocation10 + $0x118] sm:$0xff] }
  0x71   :  { %518 = vmatprep.subr.mxu1 %v5842_v27  ;;  %456 = vmatpush1.msra.mxu0 %v5844_v28  ;;  %v5904_v48 = vld [vmem:[#allocation10 + $0x80] sm:$0xff]  ;;  %v5908_v49 = vld [vmem:[#allocation10 + $0x110] sm:$0xff]  ;;  %v5910_v50 = vld [vmem:[#allocation10 + $0x68] sm:$0xff] }
  0x72   :  { %519 = vmatpush1.msra.mxu1 %v5848_v29  ;;  %457 = vmatprep.subr.mxu0 %v5850_v30  ;;  %9926 = vst [vmem:[#allocation20_spill] sm:$0xff] %v5910_v50  ;;  %v5914_v51 = vld [vmem:[#allocation10 + $0xf8] sm:$0xff]  ;;  %v5916_v52 = vld [vmem:[#allocation10 + $0x60] sm:$0xff]  ;;  %v5920_v53 = vld [vmem:[#allocation10 + $0xf0] sm:$0xff] }
  0x73   :  { %520 = vmatprep.subr.mxu1 %v5854_v31  ;;  %458 = vmatpush1.msra.mxu0 %v5856_v32  ;;  %9927 = vst [vmem:[#allocation21_spill] sm:$0xff] %v5916_v52  ;;  %v5922_v54 = vld [vmem:[#allocation10 + $0x48] sm:$0xff]  ;;  %v5926_v55 = vld [vmem:[#allocation10 + $0xd8] sm:$0xff]  ;;  %v5928_v56 = vld [vmem:[#allocation10 + $0x40] sm:$0xff] }
  0x74   :  { %521 = vmatpush1.msra.mxu1 %v5860_v33  ;;  %459 = vmatprep.subr.mxu0 %v5862_v34  ;;  %9928 = vst [vmem:[#allocation22_spill] sm:$0xff] %v5922_v54  ;;  %9929 = vst [vmem:[#allocation23_spill] sm:$0xff] %v5928_v56  ;;  %v5932_v57 = vld [vmem:[#allocation10 + $0xd0] sm:$0xff]  ;;  %v5934_v58 = vld [vmem:[#allocation10 + $0x28] sm:$0xff] }
  0x75   :  { %522 = vmatprep.subr.mxu1 %v5866_v35  ;;  %460 = vmatpush1.msra.mxu0 %v5868_v36  ;;  %9930 = vst [vmem:[#allocation24_spill] sm:$0xff] %v5934_v58  ;;  %v5938_v59 = vld [vmem:[#allocation10 + $0xb8] sm:$0xff]  ;;  %v5940_v60 = vld [vmem:[#allocation10 + $0x20] sm:$0xff]  ;;  %v5944_v61 = vld [vmem:[#allocation10 + $0xb0] sm:$0xff] }
  0x76   :  { %523 = vmatpush1.msra.mxu1 %v5872_v37  ;;  %461 = vmatprep.subr.mxu0 %v5874_v38  ;;  %9931 = vst [vmem:[#allocation25_spill] sm:$0xff] %v5940_v60  ;;  %v5946_v62 = vld [vmem:[#allocation10 + $0x8] sm:$0xff]  ;;  %v5950_v63 = vld [vmem:[#allocation10 + $0x98] sm:$0xff]  ;;  %v5952_v1 = vld [vmem:[#allocation10] sm:$0xff] }
  0x77   :  { %524 = vmatprep.subr.mxu1 %v5878_v39  ;;  %462 = vmatpush1.msra.mxu0 %v5880_v40  ;;  %9932 = vst [vmem:[#allocation26_spill] sm:$0xff] %v5946_v62  ;;  %9933 = vst [vmem:[#allocation27_spill] sm:$0xff] %v5952_v1  ;;  %v5956_v3 = vld [vmem:[#allocation10 + $0x90] sm:$0xff]  ;;  %v5960_v5 = vld [vmem:[#allocation10 + $0x78] sm:$0xff] }
  0x78   :  { %525 = vmatpush1.msra.mxu1 %v5884_v41  ;;  %463 = vmatprep.subr.mxu0 %v5886_v42  ;;  %9934 = vst [vmem:[#allocation28_spill] sm:$0xff] %v5956_v3  ;;  %9935 = vst [vmem:[#allocation29_spill] sm:$0xff] %v5960_v5  ;;  %v5962_v7 = vld [vmem:[#allocation6 + $0x1e8] sm:$0xff]  ;;  %v5966_v9 = vld [vmem:[#allocation10 + $0x70] sm:$0xff] }
  0x79   :  { %526 = vmatprep.subr.mxu1 %v5890_v43  ;;  %464 = vmatpush1.msra.mxu0 %v5892_v44  ;;  %9936 = vst [vmem:[#allocation30_spill] sm:$0xff] %v5962_v7  ;;  %9937 = vst [vmem:[#allocation31_spill] sm:$0xff] %v5966_v9  ;;  %v5968_v11 = vld [vmem:[#allocation6 + $0x1e0] sm:$0xff]  ;;  %v5974_v15 = vld [vmem:[#allocation6 + $0x1c8] sm:$0xff] }
  0x7a   :  { %527 = vmatpush1.msra.mxu1 %v5896_v45  ;;  %465 = vmatprep.subr.mxu0 %v5898_v46  ;;  %9938 = vst [vmem:[#allocation32_spill] sm:$0xff] %v5968_v11  ;;  %v5972_v12 = vld [vmem:[#allocation10 + $0x58] sm:$0xff]  ;;  %9940 = vst [vmem:[#allocation34_spill] sm:$0xff] %v5974_v15  ;;  %v5978_v17 = vld [vmem:[#allocation10 + $0x50] sm:$0xff] }
  0x7b   :  { %528 = vmatprep.subr.mxu1 %v5902_v47  ;;  %466 = vmatpush1.msra.mxu0 %v5904_v48  ;;  %9939 = vst [vmem:[#allocation33_spill] sm:$0xff] %v5972_v12  ;;  %9941 = vst [vmem:[#allocation35_spill] sm:$0xff] %v5978_v17 }
  0x7c   :  { %529 = vmatpush1.msra.mxu1 %v5908_v49  ;;  %467 = vmatprep.subr.mxu0 %v5910_v50 }
  0x7d   :  { %530 = vmatprep.subr.mxu1 %v5914_v51  ;;  %468 = vmatpush1.msra.mxu0 %v5916_v52 }
  0x7e   :  { %531 = vmatpush1.msra.mxu1 %v5920_v53  ;;  %469 = vmatprep.subr.mxu0 %v5922_v54  ;;  %v6046_v54 = vld [vmem:[#allocation6 + $0x108] sm:$0xff] }
  0x7f   :  { %532 = vmatprep.subr.mxu1 %v5926_v55  ;;  %470 = vmatpush1.msra.mxu0 %v5928_v56  ;;  %v5998_v56 = vld [vmem:[#allocation6 + $0x188] sm:$0xff]  ;;  %9964 = vst [vmem:[#allocation57_spill] sm:$0xff] %v6046_v54 }
  0x80   :  { %533 = vmatpush1.msra.mxu1 %v5932_v57  ;;  %471 = vmatprep.subr.mxu0 %v5934_v58  ;;  %v5992_v58 = vld [vmem:[#allocation6 + $0x1a0] sm:$0xff]  ;;  %9948 = vst [vmem:[#allocation42_spill] sm:$0xff] %v5998_v56 }
  0x81   :  { %534 = vmatprep.subr.mxu1 %v5938_v59  ;;  %472 = vmatpush1.msra.mxu0 %v5940_v60  ;;  %v5986_v60 = vld [vmem:[#allocation6 + $0x1a8] sm:$0xff]  ;;  %9946 = vst [vmem:[#allocation40_spill] sm:$0xff] %v5992_v58 }
  0x82   :  { %535 = vmatpush1.msra.mxu1 %v5944_v61  ;;  %473 = vmatprep.subr.mxu0 %v5946_v62  ;;  %v5980_v62 = vld [vmem:[#allocation6 + $0x1c0] sm:$0xff]  ;;  %9944 = vst [vmem:[#allocation38_spill] sm:$0xff] %v5986_v60 }
  0x83   :  { %536 = vmatprep.subr.mxu1 %v5950_v63  ;;  %474 = vmatpush1.msra.mxu0 %v5952_v1  ;;  %9942 = vst [vmem:[#allocation36_spill] sm:$0xff] %v5980_v62  ;;  %v5984_v1 = vld [vmem:[#allocation10 + $0x38] sm:$0xff] }
  0x84   :  { %537 = vmatpush1.msra.mxu1 %v5956_v3  ;;  %508 = vmatmul.mubr.f32.vlgmr.msra.gmra.mxu0 %v9294_v0  ;;  %9943 = vst [vmem:[#allocation37_spill] sm:$0xff] %v5984_v1  ;;  %v5990_v0 = vld [vmem:[#allocation10 + $0x30] sm:$0xff] }
  0x85   :  { %538 = vmatprep.subr.mxu1 %v5960_v5  ;;  %585 = vmatprep.subr.mxu0 %v5962_v7  ;;  %9945 = vst [vmem:[#allocation39_spill] sm:$0xff] %v5990_v0  ;;  %v5996_v7 = vld [vmem:[#allocation10 + $0x18] sm:$0xff] }
  0x86   :  { %539 = vmatpush1.msra.mxu1 %v5966_v9  ;;  %586 = vmatpush1.msra.mxu0 %v5968_v11  ;;  %9947 = vst [vmem:[#allocation41_spill] sm:$0xff] %v5996_v7  ;;  %v6002_v11 = vld [vmem:[#allocation10 + $0x10] sm:$0xff] }
  0x87   :  { %540 = vmatprep.subr.mxu1 %v5972_v12  ;;  %587 = vmatprep.subr.mxu0 %v5974_v15  ;;  %9949 = vst [vmem:[#allocation43_spill] sm:$0xff] %v6002_v11  ;;  %v6004_v12 = vld [vmem:[#allocation6 + $0x180] sm:$0xff]  ;;  %v6008_v15 = vld [vmem:[#allocation6 + $0x168] sm:$0xff] }
  0x88   :  { %541 = vmatpush1.msra.mxu1 %v5978_v17  ;;  %588 = vmatpush1.msra.mxu0 %v5980_v62  ;;  %9950 = vst [vmem:[#allocation44_spill] sm:$0xff] %v6004_v12  ;;  %9951 = vst [vmem:[#allocation45_spill] sm:$0xff] %v6008_v15  ;;  %v6012_v62 = vld [vmem:[#allocation6 + $0x1f8] sm:$0xff]  ;;  %v9955_v17 = vmov 0.0  }
  0x89   :  { %542 = vmatprep.subr.mxu1 %v5984_v1  ;;  %589 = vmatprep.subr.mxu0 %v5986_v60  ;;  %9952 = vst [vmem:[#allocation46_spill] sm:$0xff] %v6012_v62  ;;  %v6016_v60 = vld [vmem:[#allocation6 + $0x160] sm:$0xff]  ;;  %v6018_v1 = vld [vmem:[#allocation6 + $0x1f0] sm:$0xff] }
  0x8a   :  { %543 = vmatpush1.msra.mxu1 %v5990_v0  ;;  %590 = vmatpush1.msra.mxu0 %v5992_v58  ;;  %9953 = vst [vmem:[#allocation47_spill] sm:$0xff] %v6016_v60  ;;  %9954 = vst [vmem:[#allocation48_spill] sm:$0xff] %v6018_v1  ;;  %v6022_v58 = vld [vmem:[#allocation6 + $0x148] sm:$0xff]  ;;  %v6024_v0 = vld [vmem:[#allocation6 + $0x1d8] sm:$0xff] }
  0x8b   :  { %544 = vmatprep.subr.mxu1 %v5996_v7  ;;  %591 = vmatprep.subr.mxu0 %v5998_v56  ;;  %9956 = vst [vmem:[#allocation49_spill] sm:$0xff] %v6022_v58  ;;  %9957 = vst [vmem:[#allocation50_spill] sm:$0xff] %v6024_v0  ;;  %v6028_v56 = vld [vmem:[#allocation6 + $0x140] sm:$0xff]  ;;  %v6036_v7 = vld [vmem:[#allocation6 + $0x1b8] sm:$0xff] }
  0x8c   :  { %545 = vmatpush1.msra.mxu1 %v6002_v11  ;;  %592 = vmatpush1.msra.mxu0 %v6004_v12  ;;  %9958 = vst [vmem:[#allocation51_spill] sm:$0xff] %v6028_v56  ;;  %v6030_v11 = vld [vmem:[#allocation6 + $0x1d0] sm:$0xff]  ;;  %v6034_v12 = vld [vmem:[#allocation6 + $0x128] sm:$0xff]  ;;  %9961 = vst [vmem:[#allocation54_spill] sm:$0xff] %v6036_v7 }
  0x8d   :  { %578 = vmatprep.mubr.f32.mxu1 %v9955_v17  ;;  %593 = vmatprep.subr.mxu0 %v6008_v15  ;;  %9959 = vst [vmem:[#allocation52_spill] sm:$0xff] %v6030_v11  ;;  %9960 = vst [vmem:[#allocation53_spill] sm:$0xff] %v6034_v12  ;;  %v6040_v15 = vld [vmem:[#allocation6 + $0x120] sm:$0xff] }
  0x8e   :  { %656 = vmatprep.subr.mxu1 %v6012_v62  ;;  %579 = vmatmul.mubr.f32.vlgmr.msra.gmra.mxu1 %v9955_v17  ;;  %9962 = vst [vmem:[#allocation55_spill] sm:$0xff] %v6040_v15  ;;  %v6042_v62 = vld [vmem:[#allocation6 + $0x1b0] sm:$0xff] }
  0x8f   :  { %594 = vmatpush1.msra.mxu0 %v6016_v60  ;;  %657 = vmatpush1.msra.mxu1 %v6018_v1  ;;  %9963 = vst [vmem:[#allocation56_spill] sm:$0xff] %v6042_v62  ;;  %v6048_v60 = vld [vmem:[#allocation6 + $0x198] sm:$0xff]  ;;  %v6052_v1 = vld [vmem:[#allocation6 + $0x100] sm:$0xff] }
  0x90   :  { %595 = vmatprep.subr.mxu0 %v6022_v58  ;;  %658 = vmatprep.subr.mxu1 %v6024_v0  ;;  %9965 = vst [vmem:[#allocation58_spill] sm:$0xff] %v6048_v60  ;;  %9966 = vst [vmem:[#allocation59_spill] sm:$0xff] %v6052_v1  ;;  %v6054_v58 = vld [vmem:[#allocation6 + $0x190] sm:$0xff]  ;;  %v6058_v0 = vld [vmem:[#allocation6 + $0xe8] sm:$0xff] }
  0x91   :  { %596 = vmatpush1.msra.mxu0 %v6028_v56  ;;  %659 = vmatpush1.msra.mxu1 %v6030_v11  ;;  %9967 = vst [vmem:[#allocation60_spill] sm:$0xff] %v6054_v58  ;;  %9968 = vst [vmem:[#allocation61_spill] sm:$0xff] %v6058_v0  ;;  %v6060_v56 = vld [vmem:[#allocation6 + $0x178] sm:$0xff]  ;;  %v6064_v11 = vld [vmem:[#allocation6 + $0xe0] sm:$0xff] }
  0x92   :  { %597 = vmatprep.subr.mxu0 %v6034_v12  ;;  %660 = vmatprep.subr.mxu1 %v6036_v7  ;;  %9969 = vst [vmem:[#allocation62_spill] sm:$0xff] %v6060_v56  ;;  %9970 = vst [vmem:[#allocation63_spill] sm:$0xff] %v6064_v11  ;;  %v6066_v12 = vld [vmem:[#allocation6 + $0x170] sm:$0xff]  ;;  %v6070_v7 = vld [vmem:[#allocation6 + $0xc8] sm:$0xff] }
  0x93   :  { %598 = vmatpush1.msra.mxu0 %v6040_v15  ;;  %661 = vmatpush1.msra.mxu1 %v6042_v62  ;;  %9971 = vst [vmem:[#allocation64_spill] sm:$0xff] %v6066_v12  ;;  %9972 = vst [vmem:[#allocation65_spill] sm:$0xff] %v6070_v7  ;;  %v6072_v15 = vld [vmem:[#allocation6 + $0x158] sm:$0xff]  ;;  %v6076_v62 = vld [vmem:[#allocation6 + $0xc0] sm:$0xff] }
  0x94   :  { %599 = vmatprep.subr.mxu0 %v6046_v54  ;;  %662 = vmatprep.subr.mxu1 %v6048_v60  ;;  %9973 = vst [vmem:[#allocation66_spill] sm:$0xff] %v6072_v15  ;;  %9974 = vst [vmem:[#allocation67_spill] sm:$0xff] %v6076_v62  ;;  %v6078_v54 = vld [vmem:[#allocation6 + $0x150] sm:$0xff]  ;;  %v6082_v60 = vld [vmem:[#allocation6 + $0xa8] sm:$0xff] }
  0x95   :  { %600 = vmatpush1.msra.mxu0 %v6052_v1  ;;  %663 = vmatpush1.msra.mxu1 %v6054_v58  ;;  %9975 = vst [vmem:[#allocation68_spill] sm:$0xff] %v6078_v54  ;;  %9976 = vst [vmem:[#allocation69_spill] sm:$0xff] %v6082_v60  ;;  %v6084_v1 = vld [vmem:[#allocation6 + $0x138] sm:$0xff]  ;;  %v6088_v58 = vld [vmem:[#allocation6 + $0xa0] sm:$0xff] }
  0x96   :  { %601 = vmatprep.subr.mxu0 %v6058_v0  ;;  %664 = vmatprep.subr.mxu1 %v6060_v56  ;;  %9977 = vst [vmem:[#allocation70_spill] sm:$0xff] %v6084_v1  ;;  %9978 = vst [vmem:[#allocation71_spill] sm:$0xff] %v6088_v58  ;;  %v6090_v0 = vld [vmem:[#allocation6 + $0x130] sm:$0xff]  ;;  %v6094_v56 = vld [vmem:[#allocation6 + $0x88] sm:$0xff] }
  0x97   :  { %602 = vmatpush1.msra.mxu0 %v6064_v11  ;;  %665 = vmatpush1.msra.mxu1 %v6066_v12  ;;  %9979 = vst [vmem:[#allocation72_spill] sm:$0xff] %v6090_v0  ;;  %9980 = vst [vmem:[#allocation73_spill] sm:$0xff] %v6094_v56  ;;  %v6096_v11 = vld [vmem:[#allocation6 + $0x118] sm:$0xff]  ;;  %v6100_v12 = vld [vmem:[#allocation6 + $0x80] sm:$0xff] }
  0x98   :  { %603 = vmatprep.subr.mxu0 %v6070_v7  ;;  %666 = vmatprep.subr.mxu1 %v6072_v15  ;;  %9981 = vst [vmem:[#allocation74_spill] sm:$0xff] %v6096_v11  ;;  %9982 = vst [vmem:[#allocation75_spill] sm:$0xff] %v6100_v12  ;;  %v6102_v7 = vld [vmem:[#allocation6 + $0x110] sm:$0xff]  ;;  %v6106_v15 = vld [vmem:[#allocation6 + $0x68] sm:$0xff] }
  0x99   :  { %604 = vmatpush1.msra.mxu0 %v6076_v62  ;;  %667 = vmatpush1.msra.mxu1 %v6078_v54  ;;  %9983 = vst [vmem:[#allocation76_spill] sm:$0xff] %v6102_v7  ;;  %9984 = vst [vmem:[#allocation77_spill] sm:$0xff] %v6106_v15  ;;  %v6108_v62 = vld [vmem:[#allocation6 + $0xf8] sm:$0xff]  ;;  %v6112_v54 = vld [vmem:[#allocation6 + $0x60] sm:$0xff] }
  0x9a   :  { %605 = vmatprep.subr.mxu0 %v6082_v60  ;;  %668 = vmatprep.subr.mxu1 %v6084_v1  ;;  %9985 = vst [vmem:[#allocation78_spill] sm:$0xff] %v6108_v62  ;;  %9986 = vst [vmem:[#allocation79_spill] sm:$0xff] %v6112_v54  ;;  %v6114_v60 = vld [vmem:[#allocation6 + $0xf0] sm:$0xff]  ;;  %v6118_v1 = vld [vmem:[#allocation6 + $0x48] sm:$0xff] }
  0x9b   :  { %606 = vmatpush1.msra.mxu0 %v6088_v58  ;;  %669 = vmatpush1.msra.mxu1 %v6090_v0  ;;  %9987 = vst [vmem:[#allocation80_spill] sm:$0xff] %v6114_v60  ;;  %9988 = vst [vmem:[#allocation81_spill] sm:$0xff] %v6118_v1  ;;  %v6120_v58 = vld [vmem:[#allocation6 + $0xd8] sm:$0xff]  ;;  %v6124_v0 = vld [vmem:[#allocation6 + $0x40] sm:$0xff] }
  0x9c   :  { %607 = vmatprep.subr.mxu0 %v6094_v56  ;;  %670 = vmatprep.subr.mxu1 %v6096_v11  ;;  %9989 = vst [vmem:[#allocation82_spill] sm:$0xff] %v6120_v58  ;;  %9990 = vst [vmem:[#allocation83_spill] sm:$0xff] %v6124_v0  ;;  %v6126_v56 = vld [vmem:[#allocation6 + $0xd0] sm:$0xff]  ;;  %v6130_v11 = vld [vmem:[#allocation6 + $0x28] sm:$0xff] }
  0x9d   :  { %608 = vmatpush1.msra.mxu0 %v6100_v12  ;;  %671 = vmatpush1.msra.mxu1 %v6102_v7  ;;  %9991 = vst [vmem:[#allocation84_spill] sm:$0xff] %v6126_v56  ;;  %9992 = vst [vmem:[#allocation85_spill] sm:$0xff] %v6130_v11  ;;  %v6132_v12 = vld [vmem:[#allocation6 + $0xb8] sm:$0xff]  ;;  %v6136_v7 = vld [vmem:[#allocation6 + $0x20] sm:$0xff] }
  0x9e   :  { %609 = vmatprep.subr.mxu0 %v6106_v15  ;;  %672 = vmatprep.subr.mxu1 %v6108_v62  ;;  %9993 = vst [vmem:[#allocation86_spill] sm:$0xff] %v6132_v12  ;;  %9994 = vst [vmem:[#allocation87_spill] sm:$0xff] %v6136_v7  ;;  %v6138_v15 = vld [vmem:[#allocation6 + $0xb0] sm:$0xff]  ;;  %v6142_v62 = vld [vmem:[#allocation6 + $0x8] sm:$0xff] }
  0x9f   :  { %610 = vmatpush1.msra.mxu0 %v6112_v54  ;;  %673 = vmatpush1.msra.mxu1 %v6114_v60  ;;  %9995 = vst [vmem:[#allocation88_spill] sm:$0xff] %v6138_v15  ;;  %9996 = vst [vmem:[#allocation89_spill] sm:$0xff] %v6142_v62  ;;  %v6144_v54 = vld [vmem:[#allocation6 + $0x98] sm:$0xff]  ;;  %v6148_v60 = vld [vmem:[#allocation6] sm:$0xff] }
  0xa0   :  { %611 = vmatprep.subr.mxu0 %v6118_v1  ;;  %674 = vmatprep.subr.mxu1 %v6120_v58  ;;  %9997 = vst [vmem:[#allocation90_spill] sm:$0xff] %v6144_v54  ;;  %9998 = vst [vmem:[#allocation91_spill] sm:$0xff] %v6148_v60  ;;  %v6152_v1 = vld [vmem:[#allocation6 + $0x90] sm:$0xff]  ;;  %v6322_v58 = vld [vmem:[#allocation9 + $0x80] sm:$0xff] }
  0xa1   :  { %612 = vmatpush1.msra.mxu0 %v6124_v0  ;;  %675 = vmatpush1.msra.mxu1 %v6126_v56  ;;  %9999 = vst [vmem:[#allocation92_spill] sm:$0xff] %v6152_v1  ;;  %v6156_v0 = vld [vmem:[#allocation6 + $0x78] sm:$0xff]  ;;  %10054 = vst [vmem:[#allocation147_spill] sm:$0xff] %v6322_v58 }
  0xa2   :  { %613 = vmatprep.subr.mxu0 %v6130_v11  ;;  %676 = vmatprep.subr.mxu1 %v6132_v12  ;;  %10000 = vst [vmem:[#allocation93_spill] sm:$0xff] %v6156_v0  ;;  %v6160_v11 = vld [vmem:[#allocation6 + $0x70] sm:$0xff]  ;;  %v6298_v12 = vld [vmem:[#allocation9 + $0xc0] sm:$0xff]  ;;  %v6306_v56 = vld [vmem:[#allocation9 + $0xb8] sm:$0xff] }
  0xa3   :  { %614 = vmatpush1.msra.mxu0 %v6136_v7  ;;  %677 = vmatpush1.msra.mxu1 %v6138_v15  ;;  %10001 = vst [vmem:[#allocation94_spill] sm:$0xff] %v6160_v11  ;;  %v6164_v7 = vld [vmem:[#allocation6 + $0x58] sm:$0xff]  ;;  %v6167_v15 = vld [vmem:[#allocation6 + $0x50] sm:$0xff]  ;;  %10046 = vst [vmem:[#allocation139_spill] sm:$0xff] %v6298_v12 }
  0xa4   :  { %615 = vmatprep.subr.mxu0 %v6142_v62  ;;  %678 = vmatprep.subr.mxu1 %v6144_v54  ;;  %10002 = vst [vmem:[#allocation95_spill] sm:$0xff] %v6164_v7  ;;  %10003 = vst [vmem:[#allocation96_spill] sm:$0xff] %v6167_v15  ;;  %v6171_v62 = vld [vmem:[#allocation6 + $0x38] sm:$0xff] }
  0xa5   :  { %616 = vmatpush1.msra.mxu0 %v6148_v60  ;;  %649 = vmatprep.mubr.f32.mxu0 %v9955_v17  ;;  %10004 = vst [vmem:[#allocation97_spill] sm:$0xff] %v6171_v62  ;;  %v6175_v60 = vld [vmem:[#allocation6 + $0x30] sm:$0xff]  ;;  %10049 = vst [vmem:[#allocation142_spill] sm:$0xff] %v6306_v56 }
  0xa6   :  { %679 = vmatpush1.msra.mxu1 %v6152_v1  ;;  %650 = vmatmul.mubr.f32.vlgmr.msra.gmra.mxu0 %v9955_v17  ;;  %10005 = vst [vmem:[#allocation98_spill] sm:$0xff] %v6175_v60  ;;  %v6178_v1 = vld [vmem:[#allocation6 + $0x18] sm:$0xff] }
  0xa7   :  { %680 = vmatprep.subr.mxu1 %v6156_v0  ;;  %720 = vmatprep.mubr.f32.mxu1 %v9955_v17  ;;  %10006 = vst [vmem:[#allocation99_spill] sm:$0xff] %v6178_v1  ;;  %v6181_v0 = vld [vmem:[#allocation6 + $0x10] sm:$0xff] }
  0xa8   :  { %681 = vmatpush1.msra.mxu1 %v6160_v11  ;;  %879 = vmatprep.mubr.f32.mxu0 %v9955_v17  ;;  %10007 = vst [vmem:[#allocation100_spill] sm:$0xff] %v6181_v0  ;;  %v6190_v11 = vld [vmem:[#allocation9 + $0x1f8] sm:$0xff]  ;;  %v6290_v54 = vld [vmem:[#allocation9 + $0xf0] sm:$0xff] }
  0xa9   :  { %682 = vmatprep.subr.mxu1 %v6164_v7  ;;  %v6188_v7 = vld [vmem:[#allocation9 + $0x1e8] sm:$0xff]  ;;  %10009 = vst [vmem:[#allocation102_spill] sm:$0xff] %v6190_v11  ;;  %10043 = vst [vmem:[#allocation136_spill] sm:$0xff] %v6290_v54 }
  0xaa   :  { %683 = vmatpush1.msra.mxu1 %v6167_v15  ;;  %10008 = vst [vmem:[#allocation101_spill] sm:$0xff] %v6188_v7  ;;  %815 = vmatprep.subr.mxu0 %v6188_v7  ;;  %v6196_v15 = vld [vmem:[#allocation9 + $0x1f0] sm:$0xff] }
  0xab   :  { %684 = vmatprep.subr.mxu1 %v6171_v62  ;;  %v6194_v62 = vld [vmem:[#allocation9 + $0x1e0] sm:$0xff]  ;;  %10011 = vst [vmem:[#allocation104_spill] sm:$0xff] %v6196_v15  ;;  %v6208_v7 = vld [vmem:[#allocation9 + $0x1d0] sm:$0xff] }
  0xac   :  { %685 = vmatpush1.msra.mxu1 %v6175_v60  ;;  %10010 = vst [vmem:[#allocation103_spill] sm:$0xff] %v6194_v62  ;;  %816 = vmatpush1.msra.mxu0 %v6194_v62  ;;  %v6206_v60 = vld [vmem:[#allocation9 + $0x1c0] sm:$0xff]  ;;  %10015 = vst [vmem:[#allocation108_spill] sm:$0xff] %v6208_v7  ;;  %v6214_v62 = vld [vmem:[#allocation9 + $0x1b8] sm:$0xff] }
  0xad   :  { %686 = vmatprep.subr.mxu1 %v6178_v1  ;;  %v6202_v1 = vld [vmem:[#allocation9 + $0x1d8] sm:$0xff]  ;;  %10014 = vst [vmem:[#allocation107_spill] sm:$0xff] %v6206_v60  ;;  %10017 = vst [vmem:[#allocation110_spill] sm:$0xff] %v6214_v62 }
  0xae   :  { %687 = vmatpush1.msra.mxu1 %v6181_v0  ;;  %v6200_v0 = vld [vmem:[#allocation9 + $0x1c8] sm:$0xff]  ;;  %10013 = vst [vmem:[#allocation106_spill] sm:$0xff] %v6202_v1 }
  0xaf   :  { %721 = vmatmul.mubr.f32.vlgmr.msra.gmra.mxu1 %v9955_v17  ;;  %886 = vmatprep.subr.mxu1 %v6190_v11  ;;  %10012 = vst [vmem:[#allocation105_spill] sm:$0xff] %v6200_v0  ;;  %v6212_v11 = vld [vmem:[#allocation9 + $0x1a8] sm:$0xff] }
  0xb0   :  { %950 = vmatprep.mubr.f32.mxu1 %v9955_v17  ;;  %887 = vmatpush1.msra.mxu1 %v6196_v15  ;;  %10016 = vst [vmem:[#allocation109_spill] sm:$0xff] %v6212_v11  ;;  %v6218_v15 = vld [vmem:[#allocation9 + $0x1a0] sm:$0xff] }
  0xb1   :  { %817 = vmatprep.subr.mxu0 %v6200_v0  ;;  %888 = vmatprep.subr.mxu1 %v6202_v1  ;;  %10018 = vst [vmem:[#allocation111_spill] sm:$0xff] %v6218_v15  ;;  %v6220_v0 = vld [vmem:[#allocation9 + $0x1b0] sm:$0xff]  ;;  %v6224_v1 = vld [vmem:[#allocation9 + $0x188] sm:$0xff] }
  0xb2   :  { %818 = vmatpush1.msra.mxu0 %v6206_v60  ;;  %889 = vmatpush1.msra.mxu1 %v6208_v7  ;;  %10019 = vst [vmem:[#allocation112_spill] sm:$0xff] %v6220_v0  ;;  %10020 = vst [vmem:[#allocation113_spill] sm:$0xff] %v6224_v1  ;;  %v6226_v60 = vld [vmem:[#allocation9 + $0x198] sm:$0xff]  ;;  %v6230_v7 = vld [vmem:[#allocation9 + $0x180] sm:$0xff] }
  0xb3   :  { %819 = vmatprep.subr.mxu0 %v6212_v11  ;;  %890 = vmatprep.subr.mxu1 %v6214_v62  ;;  %10021 = vst [vmem:[#allocation114_spill] sm:$0xff] %v6226_v60  ;;  %10022 = vst [vmem:[#allocation115_spill] sm:$0xff] %v6230_v7  ;;  %v6232_v11 = vld [vmem:[#allocation9 + $0x190] sm:$0xff]  ;;  %v6236_v62 = vld [vmem:[#allocation9 + $0x168] sm:$0xff] }
  0xb4   :  { %820 = vmatpush1.msra.mxu0 %v6218_v15  ;;  %891 = vmatpush1.msra.mxu1 %v6220_v0  ;;  %10023 = vst [vmem:[#allocation116_spill] sm:$0xff] %v6232_v11  ;;  %10024 = vst [vmem:[#allocation117_spill] sm:$0xff] %v6236_v62  ;;  %v6238_v15 = vld [vmem:[#allocation9 + $0x178] sm:$0xff]  ;;  %v6242_v0 = vld [vmem:[#allocation9 + $0x160] sm:$0xff] }
  0xb5   :  { %821 = vmatprep.subr.mxu0 %v6224_v1  ;;  %892 = vmatprep.subr.mxu1 %v6226_v60  ;;  %10025 = vst [vmem:[#allocation118_spill] sm:$0xff] %v6238_v15  ;;  %10026 = vst [vmem:[#allocation119_spill] sm:$0xff] %v6242_v0  ;;  %v6244_v1 = vld [vmem:[#allocation9 + $0x170] sm:$0xff]  ;;  %v6248_v60 = vld [vmem:[#allocation9 + $0x148] sm:$0xff] }
  0xb6   :  { %822 = vmatpush1.msra.mxu0 %v6230_v7  ;;  %893 = vmatpush1.msra.mxu1 %v6232_v11  ;;  %10027 = vst [vmem:[#allocation120_spill] sm:$0xff] %v6244_v1  ;;  %10028 = vst [vmem:[#allocation121_spill] sm:$0xff] %v6248_v60  ;;  %v6250_v7 = vld [vmem:[#allocation9 + $0x158] sm:$0xff]  ;;  %v6254_v11 = vld [vmem:[#allocation9 + $0x140] sm:$0xff] }
  0xb7   :  { %823 = vmatprep.subr.mxu0 %v6236_v62  ;;  %894 = vmatprep.subr.mxu1 %v6238_v15  ;;  %10029 = vst [vmem:[#allocation122_spill] sm:$0xff] %v6250_v7  ;;  %10030 = vst [vmem:[#allocation123_spill] sm:$0xff] %v6254_v11  ;;  %v6256_v62 = vld [vmem:[#allocation9 + $0x150] sm:$0xff]  ;;  %v6260_v15 = vld [vmem:[#allocation9 + $0x128] sm:$0xff] }
  0xb8   :  { %824 = vmatpush1.msra.mxu0 %v6242_v0  ;;  %895 = vmatpush1.msra.mxu1 %v6244_v1  ;;  %10031 = vst [vmem:[#allocation124_spill] sm:$0xff] %v6256_v62  ;;  %10032 = vst [vmem:[#allocation125_spill] sm:$0xff] %v6260_v15  ;;  %v6262_v0 = vld [vmem:[#allocation9 + $0x138] sm:$0xff]  ;;  %v6266_v1 = vld [vmem:[#allocation9 + $0x120] sm:$0xff] }
  0xb9   :  { %825 = vmatprep.subr.mxu0 %v6248_v60  ;;  %896 = vmatprep.subr.mxu1 %v6250_v7  ;;  %10033 = vst [vmem:[#allocation126_spill] sm:$0xff] %v6262_v0  ;;  %10034 = vst [vmem:[#allocation127_spill] sm:$0xff] %v6266_v1  ;;  %v6268_v60 = vld [vmem:[#allocation9 + $0x130] sm:$0xff]  ;;  %v6272_v7 = vld [vmem:[#allocation9 + $0x108] sm:$0xff] }
  0xba   :  { %826 = vmatpush1.msra.mxu0 %v6254_v11  ;;  %897 = vmatpush1.msra.mxu1 %v6256_v62  ;;  %10035 = vst [vmem:[#allocation128_spill] sm:$0xff] %v6268_v60  ;;  %10036 = vst [vmem:[#allocation129_spill] sm:$0xff] %v6272_v7  ;;  %v6274_v11 = vld [vmem:[#allocation9 + $0x118] sm:$0xff]  ;;  %v6278_v62 = vld [vmem:[#allocation9 + $0x100] sm:$0xff] }
  0xbb   :  { %827 = vmatprep.subr.mxu0 %v6260_v15  ;;  %898 = vmatprep.subr.mxu1 %v6262_v0  ;;  %10037 = vst [vmem:[#allocation130_spill] sm:$0xff] %v6274_v11  ;;  %10038 = vst [vmem:[#allocation131_spill] sm:$0xff] %v6278_v62  ;;  %v6280_v15 = vld [vmem:[#allocation9 + $0x110] sm:$0xff]  ;;  %v6282_v0 = vld [vmem:[#allocation9 + $0xe8] sm:$0xff] }
  0xbc   :  { %828 = vmatpush1.msra.mxu0 %v6266_v1  ;;  %899 = vmatpush1.msra.mxu1 %v6268_v60  ;;  %10039 = vst [vmem:[#allocation132_spill] sm:$0xff] %v6280_v15  ;;  %10040 = vst [vmem:[#allocation133_spill] sm:$0xff] %v6282_v0  ;;  %v6286_v1 = vld [vmem:[#allocation9 + $0xf8] sm:$0xff]  ;;  %v6288_v60 = vld [vmem:[#allocation9 + $0xe0] sm:$0xff] }
  0xbd   :  { %829 = vmatprep.subr.mxu0 %v6272_v7  ;;  %900 = vmatprep.subr.mxu1 %v6274_v11  ;;  %10041 = vst [vmem:[#allocation134_spill] sm:$0xff] %v6286_v1  ;;  %10042 = vst [vmem:[#allocation135_spill] sm:$0xff] %v6288_v60  ;;  %v6294_v11 = vld [vmem:[#allocation9 + $0xc8] sm:$0xff]  ;;  %v6296_v7 = vld [vmem:[#allocation9 + $0xd8] sm:$0xff] }
  0xbe   :  { %830 = vmatpush1.msra.mxu0 %v6278_v62  ;;  %901 = vmatpush1.msra.mxu1 %v6280_v15  ;;  %10044 = vst [vmem:[#allocation137_spill] sm:$0xff] %v6294_v11  ;;  %10045 = vst [vmem:[#allocation138_spill] sm:$0xff] %v6296_v7  ;;  %v6302_v15 = vld [vmem:[#allocation9 + $0xd0] sm:$0xff]  ;;  %v6304_v62 = vld [vmem:[#allocation9 + $0xa8] sm:$0xff] }
  0xbf   :  { %831 = vmatprep.subr.mxu0 %v6282_v0  ;;  %902 = vmatprep.subr.mxu1 %v6286_v1  ;;  %10047 = vst [vmem:[#allocation140_spill] sm:$0xff] %v6302_v15  ;;  %10048 = vst [vmem:[#allocation141_spill] sm:$0xff] %v6304_v62  ;;  %v6310_v1 = vld [vmem:[#allocation9 + $0xa0] sm:$0xff]  ;;  %v6312_v0 = vld [vmem:[#allocation9 + $0xb0] sm:$0xff] }
  0xc0   :  { %832 = vmatpush1.msra.mxu0 %v6288_v60  ;;  %903 = vmatpush1.msra.mxu1 %v6290_v54  ;;  %10050 = vst [vmem:[#allocation143_spill] sm:$0xff] %v6310_v1  ;;  %10051 = vst [vmem:[#allocation144_spill] sm:$0xff] %v6312_v0  ;;  %v6316_v60 = vld [vmem:[#allocation9 + $0x88] sm:$0xff]  ;;  %v6318_v54 = vld [vmem:[#allocation9 + $0x98] sm:$0xff] }
  0xc1   :  { %833 = vmatprep.subr.mxu0 %v6294_v11  ;;  %904 = vmatprep.subr.mxu1 %v6296_v7  ;;  %10052 = vst [vmem:[#allocation145_spill] sm:$0xff] %v6316_v60  ;;  %10053 = vst [vmem:[#allocation146_spill] sm:$0xff] %v6318_v54  ;;  %v6324_v11 = vld [vmem:[#allocation9 + $0x90] sm:$0xff]  ;;  %v6328_v7 = vld [vmem:[#allocation9 + $0x68] sm:$0xff] }
  0xc2   :  { %834 = vmatpush1.msra.mxu0 %v6298_v12  ;;  %905 = vmatpush1.msra.mxu1 %v6302_v15  ;;  %10055 = vst [vmem:[#allocation148_spill] sm:$0xff] %v6324_v11  ;;  %10056 = vst [vmem:[#allocation149_spill] sm:$0xff] %v6328_v7  ;;  %v6330_v12 = vld [vmem:[#allocation9 + $0x78] sm:$0xff]  ;;  %v6334_v15 = vld [vmem:[#allocation9 + $0x60] sm:$0xff] }
  0xc3   :  { %835 = vmatprep.subr.mxu0 %v6304_v62  ;;  %906 = vmatprep.subr.mxu1 %v6306_v56  ;;  %10057 = vst [vmem:[#allocation150_spill] sm:$0xff] %v6330_v12  ;;  %10058 = vst [vmem:[#allocation151_spill] sm:$0xff] %v6334_v15  ;;  %v6336_v62 = vld [vmem:[#allocation9 + $0x70] sm:$0xff]  ;;  %v6340_v56 = vld [vmem:[#allocation9 + $0x48] sm:$0xff] }
  0xc4   :  { %836 = vmatpush1.msra.mxu0 %v6310_v1  ;;  %907 = vmatpush1.msra.mxu1 %v6312_v0  ;;  %10059 = vst [vmem:[#allocation152_spill] sm:$0xff] %v6336_v62  ;;  %10060 = vst [vmem:[#allocation153_spill] sm:$0xff] %v6340_v56  ;;  %v6342_v1 = vld [vmem:[#allocation9 + $0x58] sm:$0xff]  ;;  %v6346_v0 = vld [vmem:[#allocation9 + $0x40] sm:$0xff] }
  0xc5   :  { %837 = vmatprep.subr.mxu0 %v6316_v60  ;;  %908 = vmatprep.subr.mxu1 %v6318_v54  ;;  %10061 = vst [vmem:[#allocation154_spill] sm:$0xff] %v6342_v1  ;;  %10062 = vst [vmem:[#allocation155_spill] sm:$0xff] %v6346_v0  ;;  %v6348_v60 = vld [vmem:[#allocation9 + $0x50] sm:$0xff]  ;;  %v6352_v54 = vld [vmem:[#allocation9 + $0x28] sm:$0xff] }
  0xc6   :  { %838 = vmatpush1.msra.mxu0 %v6322_v58  ;;  %909 = vmatpush1.msra.mxu1 %v6324_v11  ;;  %10063 = vst [vmem:[#allocation156_spill] sm:$0xff] %v6348_v60  ;;  %10064 = vst [vmem:[#allocation157_spill] sm:$0xff] %v6352_v54  ;;  %v6354_v58 = vld [vmem:[#allocation9 + $0x38] sm:$0xff]  ;;  %v6358_v11 = vld [vmem:[#allocation9 + $0x20] sm:$0xff] }
  0xc7   :  { %839 = vmatprep.subr.mxu0 %v6328_v7  ;;  %910 = vmatprep.subr.mxu1 %v6330_v12  ;;  %10065 = vst [vmem:[#allocation158_spill] sm:$0xff] %v6354_v58  ;;  %10066 = vst [vmem:[#allocation159_spill] sm:$0xff] %v6358_v11  ;;  %v6360_v7 = vld [vmem:[#allocation9 + $0x30] sm:$0xff]  ;;  %v6364_v12 = vld [vmem:[#allocation9 + $0x8] sm:$0xff] }
  0xc8   :  { %840 = vmatpush1.msra.mxu0 %v6334_v15  ;;  %911 = vmatpush1.msra.mxu1 %v6336_v62  ;;  %10067 = vst [vmem:[#allocation160_spill] sm:$0xff] %v6360_v7  ;;  %10068 = vst [vmem:[#allocation161_spill] sm:$0xff] %v6364_v12  ;;  %v6366_v15 = vld [vmem:[#allocation9 + $0x18] sm:$0xff]  ;;  %v6370_v62 = vld [vmem:[#allocation9] sm:$0xff] }
  0xc9   :  { %841 = vmatprep.subr.mxu0 %v6340_v56  ;;  %912 = vmatprep.subr.mxu1 %v6342_v1  ;;  %10069 = vst [vmem:[#allocation162_spill] sm:$0xff] %v6366_v15  ;;  %10070 = vst [vmem:[#allocation163_spill] sm:$0xff] %v6370_v62  ;;  %v6372_v56 = vld [vmem:[#allocation9 + $0x10] sm:$0xff] }
  0xca   :  { %842 = vmatpush1.msra.mxu0 %v6346_v0  ;;  %913 = vmatpush1.msra.mxu1 %v6348_v60  ;;  %10071 = vst [vmem:[#allocation164_spill] sm:$0xff] %v6372_v56  ;;  %v146_v0 = vld [vmem:[#allocation7] sm:$0xf] }
  0xcb   :  { %843 = vmatprep.subr.mxu0 %v6352_v54  ;;  %914 = vmatprep.subr.mxu1 %v6354_v58  ;;  %v148_v58 = vlaneseq }
  0xcc   :  { %844 = vmatpush1.msra.mxu0 %v6358_v11  ;;  %915 = vmatpush1.msra.mxu1 %v6360_v7 }
  0xcd   :  { %845 = vmatprep.subr.mxu0 %v6364_v12  ;;  %916 = vmatprep.subr.mxu1 %v6366_v15  ;;  %v6382_v54 = vshrl.u32 %v148_v58, 7 }
  0xce   :  { %846 = vmatpush1.msra.mxu0 %v6370_v62  ;;  %917 = vmatpush1.msra.mxu1 %v6372_v56 }
  0xcf   :  { %1006 = vmatprep.subr.mxu0 %v5792_v2  ;;  %1077 = vmatprep.subr.mxu1 %v5818_v19  ;;  %v9438_v11 = vsub.s32 0, %v6382_v54  ;;  %v9440_v7 = vsub.s32 1, %v6382_v54  ;;  %v9443_v5 = vsub.s32 2, %v6382_v54 }
  0xd1   :  { %v151_v62 = vrot.slane %v146_v0, %v9438_v11  ;;  %v155_v2 = vrot.slane %v146_v0, %v9440_v7 }
 0x128   :  { %v238_v60 = vpop.f32.mrf.mxu1 }
 0x129   :  { %v6394_v58 = vadd.f32 %v238_v60, %v151_v62  ;;  %v159_v60 = vrot.slane %v146_v0, %v9443_v5 }
 0x12a   :  { %v240_v12 = vpop.f32.mrf.mxu1 }
 0x12b   :  { %10074 = vst [vmem:[#allocation167_spill] sm:$0xff] %v6394_v58  ;;  %v6396_v17 = vadd.f32 %v240_v12, %v155_v2  ;;  %v9446_v12 = vsub.s32 3, %v6382_v54 }
 0x12d   :  { %v309_v56 = vpop.f32.mrf.mxu1  ;;  %10075 = vst [vmem:[#allocation168_spill] sm:$0xff] %v6396_v17 }
 0x12f   :  { %v311_v9 = vpop.f32.mrf.mxu1 }
 0x144   :  { %v6386_v1 = vpop.f32.mrf.mxu0 }
 0x145   :  { %10072 = vst [vmem:[#allocation165_spill] sm:$0xff] %v6386_v1 }
 0x146   :  { %v6392_v19 = vpop.f32.mrf.mxu0 }
 0x147   :  { %10073 = vst [vmem:[#allocation166_spill] sm:$0xff] %v6392_v19 }
 0x14e   :  { %v6400_v50 = vpop.f32.mrf.mxu1 }
 0x14f   :  { %10076 = vst [vmem:[#allocation169_spill] sm:$0xff] %v6400_v50 }
 0x150   :  { %v6405_v62 = vpop.f32.mrf.mxu1 }
 0x151   :  { %10077 = vst [vmem:[#allocation170_spill] sm:$0xff] %v6405_v62 }
 0x166   :  { %v651_v15 = vpop.f32.mrf.mxu0 }
 0x167   :  { %v652_v52 = vadd.f32 %v651_v15, %v6394_v58  ;;  %v6408_v15 = vadd.f32 %v309_v56, %v159_v60  ;;  %v163_v58 = vrot.slane %v146_v0, %v9446_v12 }
 0x168   :  { %v653_v1 = vpop.f32.mrf.mxu0 }
 0x169   :  { %v4568_v11 = vmul.f32 -1.442695, %v652_v52  ;;  %v654_v3 = vadd.f32 %v653_v1, %v6396_v17  ;;  %10078 = vst [vmem:[#allocation171_spill] sm:$0xff] %v6408_v15  ;;  %v6413_v1 = vadd.f32 %v311_v9, %v163_v58 }
 0x16b   :  { %4683 = vpow2.f32 %v4568_v11  ;;  %v4569_v7 = vmul.f32 -1.442695, %v654_v3 }
 0x16d   :  { %4685 = vpow2.f32 %v4569_v7 }
 0x16f   :  { %v722_v2 = vpop.f32.mrf.mxu1 }
 0x170   :  { %v723_v52 = vadd.f32 %v722_v2, %v6408_v15 }
 0x171   :  { %v724_v50 = vpop.f32.mrf.mxu1 }
 0x172   :  { %v4570_v3 = vmul.f32 -1.442695, %v723_v52  ;;  %v725_v5 = vadd.f32 %v724_v50, %v6413_v1 }
 0x174   :  { %4687 = vpow2.f32 %v4570_v3 }
 0x178   :  { %v4684_v11 = vpop.eup %4683 }
 0x179   :  { %v736_v17 = vadd.f32 1.0, %v4684_v11 }
 0x17a   :  { %v4686_v62 = vpop.eup %4685 }
 0x17b   :  { %4689 = vrcp.f32 %v736_v17  ;;  %v737_v7 = vadd.f32 1.0, %v4686_v62 }
 0x17c   :  { %4691 = vtanh.f32 %v725_v5 }
 0x17d   :  { %4693 = vrcp.f32 %v737_v7 }
 0x181   :  { %v4688_v56 = vpop.eup %4687 }
 0x182   :  { %v738_v12 = vadd.f32 1.0, %v4688_v56 }
 0x184   :  { %4695 = vrcp.f32 %v738_v12 }
 0x188   :  { %v4690_v60 = vpop.eup %4689 }
 0x189   :  { %v4692_v19 = vpop.eup %4691 }
 0x18a   :  { %v4694_v0 = vpop.eup %4693  ;;  %v747_v15 = vmul.f32 %v4692_v19, %v4690_v60 }
 0x18b   :  { %v746_v2 = vmul.f32 0.0, %v4694_v0 }
 0x18d   :  { %v6416_v9 = vadd.f32 %v747_v15, %v746_v2 }
 0x18f   :  { %4697 = vtanh.f32 %v6416_v9 }
 0x191   :  { %v4696_v50 = vpop.eup %4695 }
 0x19c   :  { %v4698_v58 = vpop.eup %4697 }
 0x19d   :  { %v6419_v52 = vmul.f32 %v4698_v58, %v4696_v50 }
 0x19f   :  { %880 = vmatmul.mubr.f32.vlgmr.msra.gmra.mxu0 %v6419_v52  ;;  %951 = vmatmul.mubr.f32.vlgmr.msra.gmra.mxu1 %v6419_v52 }
 0x1a0   :  { %1007 = vmatpush1.msra.mxu0 %v5795_v4  ;;  %1078 = vmatpush1.msra.mxu1 %v5824_v21  ;;  %v10079_v4 = vld [vmem:[#allocation28_spill] sm:$0xff] }
 0x1a1   :  { %1008 = vmatprep.subr.mxu0 %v5797_v6  ;;  %1079 = vmatprep.subr.mxu1 %v5830_v23  ;;  %v10080_v6 = vld [vmem:[#allocation20_spill] sm:$0xff]  ;;  %v10090_v23 = vld [vmem:[#allocation25_spill] sm:$0xff] }
 0x1a2   :  { %1009 = vmatpush1.msra.mxu0 %v5800_v8  ;;  %1080 = vmatpush1.msra.mxu1 %v5836_v25  ;;  %v10081_v8 = vld [vmem:[#allocation29_spill] sm:$0xff]  ;;  %v10088_v21 = vld [vmem:[#allocation24_spill] sm:$0xff]  ;;  %v10092_v25 = vld [vmem:[#allocation26_spill] sm:$0xff] }
 0x1a3   :  { %1010 = vmatprep.subr.mxu0 %v5803_v10  ;;  %1081 = vmatprep.subr.mxu1 %v5842_v27  ;;  %v10082_v10 = vld [vmem:[#allocation21_spill] sm:$0xff]  ;;  %v10094_v27 = vld [vmem:[#allocation27_spill] sm:$0xff] }
 0x1a4   :  { %1011 = vmatpush1.msra.mxu0 %v5806_v13  ;;  %1082 = vmatpush1.msra.mxu1 %v5848_v29  ;;  %v10083_v13 = vld [vmem:[#allocation31_spill] sm:$0xff]  ;;  %v10096_v29 = vmov 0.0  }
 0x1a5   :  { %1012 = vmatprep.subr.mxu0 %v5808_v14  ;;  %1083 = vmatprep.subr.mxu1 %v5854_v31  ;;  %v10084_v14 = vld [vmem:[#allocation22_spill] sm:$0xff] }
 0x1a6   :  { %1013 = vmatpush1.msra.mxu0 %v5811_v16  ;;  %1084 = vmatpush1.msra.mxu1 %v5860_v33  ;;  %v10085_v16 = vld [vmem:[#allocation33_spill] sm:$0xff]  ;;  %v10098_v31 = vld [vmem:[#allocation46_spill] sm:$0xff]  ;;  %v10099_v33 = vsub.s32 0, %v6382_v54 }
 0x1a7   :  { %1014 = vmatprep.subr.mxu0 %v5816_v18  ;;  %1085 = vmatprep.subr.mxu1 %v5866_v35  ;;  %v10086_v18 = vld [vmem:[#allocation23_spill] sm:$0xff] }
 0x1a8   :  { %1015 = vmatpush1.msra.mxu0 %v5821_v20  ;;  %1086 = vmatpush1.msra.mxu1 %v5872_v37  ;;  %v10087_v20 = vld [vmem:[#allocation35_spill] sm:$0xff] }
 0x1a9   :  { %1016 = vmatprep.subr.mxu0 %v5826_v22  ;;  %1087 = vmatprep.subr.mxu1 %v5878_v39  ;;  %v10089_v22 = vld [vmem:[#allocation37_spill] sm:$0xff] }
 0x1aa   :  { %1017 = vmatpush1.msra.mxu0 %v5832_v24  ;;  %1088 = vmatpush1.msra.mxu1 %v5884_v41  ;;  %v10091_v24 = vld [vmem:[#allocation39_spill] sm:$0xff] }
 0x1ab   :  { %1018 = vmatprep.subr.mxu0 %v5838_v26  ;;  %1089 = vmatprep.subr.mxu1 %v5890_v43  ;;  %v10093_v26 = vld [vmem:[#allocation41_spill] sm:$0xff] }
 0x1ac   :  { %1019 = vmatpush1.msra.mxu0 %v5844_v28  ;;  %1090 = vmatpush1.msra.mxu1 %v5896_v45  ;;  %v10095_v28 = vld [vmem:[#allocation43_spill] sm:$0xff] }
 0x1ad   :  { %1020 = vmatprep.subr.mxu0 %v5850_v30  ;;  %1091 = vmatprep.subr.mxu1 %v5902_v47  ;;  %v10097_v30 = vld [vmem:[#allocation30_spill] sm:$0xff] }
 0x1ae   :  { %1021 = vmatpush1.msra.mxu0 %v5856_v32  ;;  %1092 = vmatpush1.msra.mxu1 %v5908_v49  ;;  %v314_v32 = vld [vmem:[#allocation12] sm:$0xf] }
 0x1af   :  { %1022 = vmatprep.subr.mxu0 %v5862_v34  ;;  %1093 = vmatprep.subr.mxu1 %v5914_v51  ;;  %v6491_v34 = vrot.slane %v314_v32, %v10099_v33  ;;  %v10105_v51 = vld [vmem:[#allocation169_spill] sm:$0xff] }
 0x1b0   :  { %1023 = vmatpush1.msra.mxu0 %v5868_v36  ;;  %1094 = vmatpush1.msra.mxu1 %v5920_v53  ;;  %v10101_v36 = vsub.s32 1, %v6382_v54  ;;  %v10127_v33 = vld [vmem:[#allocation49_spill] sm:$0xff] }
 0x1b1   :  { %1024 = vmatprep.subr.mxu0 %v5874_v38  ;;  %1095 = vmatprep.subr.mxu1 %v5926_v55  ;;  %10100 = vst [vmem:[#allocation28_spill] sm:$0xff] %v6491_v34  ;;  %v10102_v38 = vld [vmem:[#allocation165_spill] sm:$0xff] }
 0x1b2   :  { %1025 = vmatpush1.msra.mxu0 %v5880_v40  ;;  %1096 = vmatpush1.msra.mxu1 %v5932_v57  ;;  %v6495_v37 = vrot.slane %v314_v32, %v10101_v36  ;;  %v10129_v36 = vld [vmem:[#allocation51_spill] sm:$0xff] }
 0x1b3   :  { %1026 = vmatprep.subr.mxu0 %v5886_v42  ;;  %1097 = vmatprep.subr.mxu1 %v5938_v59  ;;  %v10103_v42 = vld [vmem:[#allocation166_spill] sm:$0xff]  ;;  %v10106_v59 = vsub.s32 3, %v6382_v54 }
 0x1b4   :  { %1027 = vmatpush1.msra.mxu0 %v5892_v44  ;;  %1098 = vmatpush1.msra.mxu1 %v5944_v61 }
 0x1b5   :  { %1028 = vmatprep.subr.mxu0 %v5898_v46  ;;  %1099 = vmatprep.subr.mxu1 %v5950_v63  ;;  %v6509_v61 = vrot.slane %v314_v32, %v10106_v59  ;;  %v10107_v63 = vld [vmem:[#allocation170_spill] sm:$0xff]  ;;  %v10145_v59 = vld [vmem:[#allocation67_spill] sm:$0xff] }
 0x1b6   :  { %1029 = vmatpush1.msra.mxu0 %v5904_v48  ;;  %1100 = vmatpush1.msra.mxu1 %v10079_v4  ;;  %v10104_v48 = vsub.s32 2, %v6382_v54 }
 0x1b7   :  { %1030 = vmatprep.subr.mxu0 %v10080_v6  ;;  %1101 = vmatprep.subr.mxu1 %v10081_v8  ;;  %v10109_v8 = vld [vmem:[#allocation32_spill] sm:$0xff] }
 0x1b8   :  { %1031 = vmatpush1.msra.mxu0 %v10082_v10  ;;  %1102 = vmatpush1.msra.mxu1 %v10083_v13  ;;  %v6503_v49 = vrot.slane %v314_v32, %v10104_v48  ;;  %v10110_v10 = vld [vmem:[#allocation48_spill] sm:$0xff]  ;;  %v10111_v13 = vld [vmem:[#allocation34_spill] sm:$0xff] }
 0x1b9   :  { %1032 = vmatprep.subr.mxu0 %v10084_v14  ;;  %1103 = vmatprep.subr.mxu1 %v10085_v16  ;;  %v10112_v14 = vld [vmem:[#allocation50_spill] sm:$0xff]  ;;  %v10113_v16 = vld [vmem:[#allocation36_spill] sm:$0xff] }
 0x1ba   :  { %1033 = vmatpush1.msra.mxu0 %v10086_v18  ;;  %1104 = vmatpush1.msra.mxu1 %v10087_v20  ;;  %v10114_v18 = vld [vmem:[#allocation52_spill] sm:$0xff]  ;;  %v10115_v20 = vld [vmem:[#allocation38_spill] sm:$0xff] }
 0x1bb   :  { %1034 = vmatprep.subr.mxu0 %v10088_v21  ;;  %1105 = vmatprep.subr.mxu1 %v10089_v22  ;;  %v10116_v21 = vld [vmem:[#allocation54_spill] sm:$0xff]  ;;  %v10117_v22 = vld [vmem:[#allocation40_spill] sm:$0xff] }
 0x1bc   :  { %1035 = vmatpush1.msra.mxu0 %v10090_v23  ;;  %1106 = vmatpush1.msra.mxu1 %v10091_v24  ;;  %v10118_v23 = vld [vmem:[#allocation56_spill] sm:$0xff]  ;;  %v10119_v24 = vld [vmem:[#allocation42_spill] sm:$0xff] }
 0x1bd   :  { %1036 = vmatprep.subr.mxu0 %v10092_v25  ;;  %1107 = vmatprep.subr.mxu1 %v10093_v26  ;;  %v10120_v25 = vld [vmem:[#allocation58_spill] sm:$0xff]  ;;  %v10121_v26 = vld [vmem:[#allocation44_spill] sm:$0xff] }
 0x1be   :  { %1037 = vmatpush1.msra.mxu0 %v10094_v27  ;;  %1108 = vmatpush1.msra.mxu1 %v10095_v28  ;;  %v10122_v27 = vld [vmem:[#allocation60_spill] sm:$0xff]  ;;  %v10123_v28 = vld [vmem:[#allocation45_spill] sm:$0xff]  ;;  %v10140_v48 = vld [vmem:[#allocation78_spill] sm:$0xff] }
 0x1bf   :  { %1070 = vmatprep.mubr.f32.mxu0 %v10096_v29  ;;  %1141 = vmatprep.mubr.f32.mxu1 %v10096_v29  ;;  %v10126_v32 = vld [vmem:[#allocation64_spill] sm:$0xff] }
 0x1c0   :  { %1160 = vmatprep.subr.mxu0 %v10097_v30  ;;  %1231 = vmatprep.subr.mxu1 %v10098_v31  ;;  %v10124_v30 = vld [vmem:[#allocation62_spill] sm:$0xff]  ;;  %v10125_v31 = vld [vmem:[#allocation47_spill] sm:$0xff] }
 0x25f   :  { %v881_v35 = vpop.f32.mrf.mxu0  ;;  %v952_v46 = vpop.f32.mrf.mxu1 }
 0x260   :  { %v882_v39 = vadd.f32 %v881_v35, %v10102_v38  ;;  %v953_v53 = vadd.f32 %v952_v46, %v10105_v51  ;;  %v10128_v35 = vld [vmem:[#allocation66_spill] sm:$0xff]  ;;  %v10130_v38 = vld [vmem:[#allocation68_spill] sm:$0xff]  ;;  %v10141_v51 = vld [vmem:[#allocation63_spill] sm:$0xff] }
 0x261   :  { %v883_v40 = vpop.f32.mrf.mxu0  ;;  %v954_v55 = vpop.f32.mrf.mxu1  ;;  %v10138_v46 = vld [vmem:[#allocation76_spill] sm:$0xff] }
 0x262   :  { %v978_v41 = vadd.f32 %v6491_v34, %v882_v39  ;;  %v884_v43 = vadd.f32 %v883_v40, %v10103_v42  ;;  %v980_v57 = vadd.f32 %v6503_v49, %v953_v53  ;;  %v955_v5 = vadd.f32 %v954_v55, %v10107_v63  ;;  %v10131_v39 = vld [vmem:[#allocation53_spill] sm:$0xff]  ;;  %v10132_v40 = vld [vmem:[#allocation70_spill] sm:$0xff]  ;;  %v10134_v42 = vld [vmem:[#allocation72_spill] sm:$0xff] }
 0x263   :  { %v10142_v53 = vld [vmem:[#allocation80_spill] sm:$0xff]  ;;  %v10143_v55 = vld [vmem:[#allocation65_spill] sm:$0xff] }
 0x264   :  { %v4571_v44 = vmul.f32 -1.442695, %v978_v41  ;;  %v979_v45 = vadd.f32 %v6495_v37, %v884_v43  ;;  %v4573_v17 = vmul.f32 -1.442695, %v980_v57  ;;  %v981_v62 = vadd.f32 %v6509_v61, %v955_v5  ;;  %v10133_v41 = vld [vmem:[#allocation55_spill] sm:$0xff]  ;;  %v10135_v43 = vld [vmem:[#allocation57_spill] sm:$0xff] }
 0x265   :  { %v10144_v57 = vld [vmem:[#allocation82_spill] sm:$0xff]  ;;  %v10146_v63 = vld [vmem:[#allocation84_spill] sm:$0xff]  ;;  %v10147_v5 = vld [vmem:[#allocation69_spill] sm:$0xff] }
 0x266   :  { %4699 = vpow2.f32 %v4571_v44  ;;  %v4572_v47 = vmul.f32 -1.442695, %v979_v45  ;;  %v10136_v44 = vld [vmem:[#allocation74_spill] sm:$0xff]  ;;  %v10137_v45 = vld [vmem:[#allocation59_spill] sm:$0xff] }
 0x268   :  { %4701 = vpow2.f32 %v4572_v47  ;;  %v10139_v47 = vld [vmem:[#allocation61_spill] sm:$0xff] }
 0x269   :  { %4703 = vpow2.f32 %v4573_v17  ;;  %v10148_v17 = vld [vmem:[#allocation86_spill] sm:$0xff] }
 0x273   :  { %v4700_v19 = vpop.eup %4699 }
 0x274   :  { %v991_v12 = vadd.f32 1.0, %v4700_v19  ;;  %v10149_v19 = vld [vmem:[#allocation71_spill] sm:$0xff] }
 0x275   :  { %v4702_v15 = vpop.eup %4701 }
 0x276   :  { %4705 = vrcp.f32 %v991_v12  ;;  %v992_v3 = vadd.f32 1.0, %v4702_v15  ;;  %v4704_v11 = vpop.eup %4703  ;;  %v10151_v12 = vld [vmem:[#allocation73_spill] sm:$0xff]  ;;  %v10152_v15 = vld [vmem:[#allocation90_spill] sm:$0xff] }
 0x277   :  { %4707 = vtanh.f32 %v981_v62  ;;  %v993_v54 = vadd.f32 1.0, %v4704_v11  ;;  %v10150_v62 = vld [vmem:[#allocation88_spill] sm:$0xff] }
 0x278   :  { %4709 = vrcp.f32 %v992_v3  ;;  %v10153_v3 = vld [vmem:[#allocation75_spill] sm:$0xff]  ;;  %v10154_v11 = vld [vmem:[#allocation92_spill] sm:$0xff] }
 0x279   :  { %4711 = vrcp.f32 %v993_v54  ;;  %v10158_v54 = vld [vmem:[#allocation94_spill] sm:$0xff] }
 0x283   :  { %v4706_v7 = vpop.eup %4705 }
 0x284   :  { %v4708_v56 = vpop.eup %4707 }
 0x285   :  { %v4710_v60 = vpop.eup %4709  ;;  %v1002_v2 = vmul.f32 %v4708_v56, %v4706_v7  ;;  %v10155_v7 = vld [vmem:[#allocation77_spill] sm:$0xff] }
 0x286   :  { %v1001_v0 = vmul.f32 0.0, %v4710_v60  ;;  %v4712_v58 = vpop.eup %4711  ;;  %v10156_v56 = vld [vmem:[#allocation93_spill] sm:$0xff]  ;;  %v10157_v60 = vld [vmem:[#allocation79_spill] sm:$0xff] }
 0x288   :  { %v6513_v50 = vadd.f32 %v1002_v2, %v1001_v0  ;;  %v10159_v0 = vld [vmem:[#allocation81_spill] sm:$0xff]  ;;  %v10160_v2 = vld [vmem:[#allocation95_spill] sm:$0xff] }
 0x28a   :  { %4713 = vtanh.f32 %v6513_v50 }
 0x297   :  { %v4714_v4 = vpop.eup %4713 }
 0x298   :  { %v6516_v6 = vmul.f32 %v4714_v4, %v4712_v58  ;;  %v10161_v58 = vld [vmem:[#allocation83_spill] sm:$0xff]  ;;  %v10162_v4 = vld [vmem:[#allocation96_spill] sm:$0xff] }
 0x29a   :  { %10108 = vst [vmem:[#allocation20_spill] sm:$0xff] %v6516_v6  ;;  %1071 = vmatmul.mubr.f32.vlgmr.msra.gmra.mxu0 %v6516_v6  ;;  %1142 = vmatmul.mubr.f32.vlgmr.msra.gmra.mxu1 %v6516_v6  ;;  %v6813_v6 = vld [vmem:[#allocation10 + $0x90] sm:$0xff] }
 0x29b   :  { %1161 = vmatpush1.msra.mxu0 %v10109_v8  ;;  %1232 = vmatpush1.msra.mxu1 %v10110_v10  ;;  %v10163_v8 = vld [vmem:[#allocation85_spill] sm:$0xff]  ;;  %10250 = vst [vmem:[#allocation41_spill] sm:$0xff] %v6813_v6 }
 0x29c   :  { %1162 = vmatprep.subr.mxu0 %v10111_v13  ;;  %1233 = vmatprep.subr.mxu1 %v10112_v14  ;;  %v10164_v10 = vld [vmem:[#allocation97_spill] sm:$0xff]  ;;  %v10165_v13 = vld [vmem:[#allocation87_spill] sm:$0xff]  ;;  %v10166_v14 = vld [vmem:[#allocation98_spill] sm:$0xff] }
 0x29d   :  { %1163 = vmatpush1.msra.mxu0 %v10113_v16  ;;  %1234 = vmatpush1.msra.mxu1 %v10114_v18  ;;  %v10167_v16 = vld [vmem:[#allocation89_spill] sm:$0xff]  ;;  %v10168_v18 = vld [vmem:[#allocation99_spill] sm:$0xff] }
 0x29e   :  { %1164 = vmatprep.subr.mxu0 %v10115_v20  ;;  %1235 = vmatprep.subr.mxu1 %v10116_v21  ;;  %v10169_v20 = vld [vmem:[#allocation91_spill] sm:$0xff]  ;;  %v10170_v21 = vld [vmem:[#allocation100_spill] sm:$0xff] }
 0x29f   :  { %1165 = vmatpush1.msra.mxu0 %v10117_v22  ;;  %1236 = vmatpush1.msra.mxu1 %v10118_v23  ;;  %v10171_v22 = vld [vmem:[#allocation101_spill] sm:$0xff]  ;;  %v10172_v23 = vld [vmem:[#allocation102_spill] sm:$0xff] }
 0x2a0   :  { %1166 = vmatprep.subr.mxu0 %v10119_v24  ;;  %1237 = vmatprep.subr.mxu1 %v10120_v25  ;;  %v10173_v24 = vld [vmem:[#allocation103_spill] sm:$0xff]  ;;  %v10174_v25 = vld [vmem:[#allocation104_spill] sm:$0xff] }
 0x2a1   :  { %1167 = vmatpush1.msra.mxu0 %v10121_v26  ;;  %1238 = vmatpush1.msra.mxu1 %v10122_v27  ;;  %v10175_v26 = vld [vmem:[#allocation105_spill] sm:$0xff]  ;;  %v10176_v27 = vld [vmem:[#allocation106_spill] sm:$0xff] }
 0x2a2   :  { %1168 = vmatprep.subr.mxu0 %v10123_v28  ;;  %1239 = vmatprep.subr.mxu1 %v10124_v30  ;;  %v10177_v28 = vld [vmem:[#allocation107_spill] sm:$0xff]  ;;  %v10178_v30 = vld [vmem:[#allocation108_spill] sm:$0xff] }
 0x2a3   :  { %1169 = vmatpush1.msra.mxu0 %v10125_v31  ;;  %1240 = vmatpush1.msra.mxu1 %v10126_v32  ;;  %v10179_v31 = vld [vmem:[#allocation109_spill] sm:$0xff]  ;;  %v10180_v32 = vld [vmem:[#allocation110_spill] sm:$0xff] }
 0x2a4   :  { %1170 = vmatprep.subr.mxu0 %v10127_v33  ;;  %1241 = vmatprep.subr.mxu1 %v10128_v35  ;;  %v10182_v33 = vld [vmem:[#allocation112_spill] sm:$0xff]  ;;  %v10183_v35 = vld [vmem:[#allocation113_spill] sm:$0xff] }
 0x2a5   :  { %1171 = vmatpush1.msra.mxu0 %v10129_v36  ;;  %1242 = vmatpush1.msra.mxu1 %v10130_v38  ;;  %v10184_v36 = vld [vmem:[#allocation114_spill] sm:$0xff]  ;;  %v10185_v38 = vld [vmem:[#allocation115_spill] sm:$0xff] }
 0x2a6   :  { %1172 = vmatprep.subr.mxu0 %v10131_v39  ;;  %1243 = vmatprep.subr.mxu1 %v10132_v40  ;;  %v10186_v39 = vld [vmem:[#allocation116_spill] sm:$0xff]  ;;  %v10187_v40 = vld [vmem:[#allocation117_spill] sm:$0xff] }
 0x2a7   :  { %1173 = vmatpush1.msra.mxu0 %v10133_v41  ;;  %1244 = vmatpush1.msra.mxu1 %v10134_v42  ;;  %v10188_v41 = vld [vmem:[#allocation118_spill] sm:$0xff]  ;;  %v10189_v42 = vld [vmem:[#allocation119_spill] sm:$0xff] }
 0x2a8   :  { %1174 = vmatprep.subr.mxu0 %v10135_v43  ;;  %1245 = vmatprep.subr.mxu1 %v10136_v44  ;;  %v10190_v43 = vld [vmem:[#allocation120_spill] sm:$0xff]  ;;  %v10191_v44 = vld [vmem:[#allocation121_spill] sm:$0xff] }
 0x2a9   :  { %1175 = vmatpush1.msra.mxu0 %v10137_v45  ;;  %1246 = vmatpush1.msra.mxu1 %v10138_v46  ;;  %v10192_v45 = vld [vmem:[#allocation122_spill] sm:$0xff]  ;;  %v10193_v46 = vld [vmem:[#allocation123_spill] sm:$0xff] }
 0x2aa   :  { %1176 = vmatprep.subr.mxu0 %v10139_v47  ;;  %1247 = vmatprep.subr.mxu1 %v10140_v48  ;;  %v10194_v47 = vld [vmem:[#allocation124_spill] sm:$0xff]  ;;  %v10195_v48 = vld [vmem:[#allocation125_spill] sm:$0xff] }
 0x2ab   :  { %1177 = vmatpush1.msra.mxu0 %v10141_v51  ;;  %1248 = vmatpush1.msra.mxu1 %v10142_v53  ;;  %v10196_v51 = vld [vmem:[#allocation126_spill] sm:$0xff]  ;;  %v10197_v53 = vld [vmem:[#allocation127_spill] sm:$0xff] }
 0x2ac   :  { %1178 = vmatprep.subr.mxu0 %v10143_v55  ;;  %1249 = vmatprep.subr.mxu1 %v10144_v57  ;;  %v10198_v55 = vld [vmem:[#allocation128_spill] sm:$0xff]  ;;  %v10199_v57 = vld [vmem:[#allocation129_spill] sm:$0xff] }
 0x2ad   :  { %1179 = vmatpush1.msra.mxu0 %v10145_v59  ;;  %1250 = vmatpush1.msra.mxu1 %v10146_v63  ;;  %v10200_v59 = vld [vmem:[#allocation130_spill] sm:$0xff]  ;;  %v10201_v63 = vld [vmem:[#allocation131_spill] sm:$0xff] }
 0x2ae   :  { %1180 = vmatprep.subr.mxu0 %v10147_v5  ;;  %1251 = vmatprep.subr.mxu1 %v10148_v17  ;;  %v10202_v5 = vld [vmem:[#allocation132_spill] sm:$0xff]  ;;  %v10203_v17 = vld [vmem:[#allocation133_spill] sm:$0xff] }
 0x2af   :  { %1181 = vmatpush1.msra.mxu0 %v10149_v19  ;;  %1252 = vmatpush1.msra.mxu1 %v10150_v62  ;;  %v10204_v19 = vld [vmem:[#allocation134_spill] sm:$0xff]  ;;  %v10205_v62 = vld [vmem:[#allocation135_spill] sm:$0xff] }
 0x2b0   :  { %1182 = vmatprep.subr.mxu0 %v10151_v12  ;;  %1253 = vmatprep.subr.mxu1 %v10152_v15  ;;  %v10206_v12 = vld [vmem:[#allocation136_spill] sm:$0xff]  ;;  %v10207_v15 = vld [vmem:[#allocation137_spill] sm:$0xff] }
 0x2b1   :  { %1183 = vmatpush1.msra.mxu0 %v10153_v3  ;;  %1254 = vmatpush1.msra.mxu1 %v10154_v11  ;;  %v10208_v3 = vld [vmem:[#allocation138_spill] sm:$0xff]  ;;  %v10209_v11 = vld [vmem:[#allocation139_spill] sm:$0xff] }
 0x2b2   :  { %1184 = vmatprep.subr.mxu0 %v10155_v7  ;;  %1255 = vmatprep.subr.mxu1 %v10156_v56  ;;  %v10210_v7 = vld [vmem:[#allocation140_spill] sm:$0xff]  ;;  %v10211_v56 = vld [vmem:[#allocation141_spill] sm:$0xff] }
 0x2b3   :  { %1185 = vmatpush1.msra.mxu0 %v10157_v60  ;;  %1256 = vmatpush1.msra.mxu1 %v10158_v54  ;;  %v10212_v60 = vld [vmem:[#allocation142_spill] sm:$0xff]  ;;  %v10213_v54 = vld [vmem:[#allocation143_spill] sm:$0xff] }
 0x2b4   :  { %1186 = vmatprep.subr.mxu0 %v10159_v0  ;;  %1257 = vmatprep.subr.mxu1 %v10160_v2  ;;  %v10214_v0 = vld [vmem:[#allocation144_spill] sm:$0xff]  ;;  %v10215_v2 = vld [vmem:[#allocation145_spill] sm:$0xff] }
 0x2b5   :  { %1187 = vmatpush1.msra.mxu0 %v10161_v58  ;;  %1258 = vmatpush1.msra.mxu1 %v10162_v4  ;;  %v10216_v58 = vld [vmem:[#allocation146_spill] sm:$0xff]  ;;  %v10217_v4 = vld [vmem:[#allocation147_spill] sm:$0xff] }
 0x2b6   :  { %1188 = vmatprep.subr.mxu0 %v10163_v8  ;;  %1259 = vmatprep.subr.mxu1 %v10164_v10  ;;  %v10218_v8 = vld [vmem:[#allocation148_spill] sm:$0xff]  ;;  %v10219_v10 = vld [vmem:[#allocation149_spill] sm:$0xff] }
 0x2b7   :  { %1189 = vmatpush1.msra.mxu0 %v10165_v13  ;;  %1260 = vmatpush1.msra.mxu1 %v10166_v14  ;;  %v10220_v13 = vld [vmem:[#allocation150_spill] sm:$0xff]  ;;  %v10221_v14 = vld [vmem:[#allocation151_spill] sm:$0xff] }
 0x2b8   :  { %1190 = vmatprep.subr.mxu0 %v10167_v16  ;;  %1261 = vmatprep.subr.mxu1 %v10168_v18  ;;  %v10222_v16 = vld [vmem:[#allocation152_spill] sm:$0xff]  ;;  %v10223_v18 = vld [vmem:[#allocation153_spill] sm:$0xff] }
 0x2b9   :  { %1191 = vmatpush1.msra.mxu0 %v10169_v20  ;;  %1224 = vmatprep.mubr.f32.mxu0 %v10096_v29  ;;  %v10224_v20 = vld [vmem:[#allocation154_spill] sm:$0xff] }
 0x2ba   :  { %1262 = vmatpush1.msra.mxu1 %v10170_v21  ;;  %1295 = vmatprep.mubr.f32.mxu1 %v10096_v29  ;;  %v10225_v21 = vld [vmem:[#allocation155_spill] sm:$0xff] }
 0x2bb   :  { %1225 = vmatmul.mubr.f32.vlgmr.msra.gmra.mxu0 %v6419_v52  ;;  %1296 = vmatmul.mubr.f32.vlgmr.msra.gmra.mxu1 %v6419_v52  ;;  %v10181_v52 = vld [vmem:[#allocation111_spill] sm:$0xff] }
 0x2bc   :  { %1326 = vmatprep.subr.mxu0 %v10171_v22  ;;  %1397 = vmatprep.subr.mxu1 %v10172_v23  ;;  %v10226_v22 = vld [vmem:[#allocation156_spill] sm:$0xff]  ;;  %v10227_v23 = vld [vmem:[#allocation157_spill] sm:$0xff] }
 0x2bd   :  { %1327 = vmatpush1.msra.mxu0 %v10173_v24  ;;  %1398 = vmatpush1.msra.mxu1 %v10174_v25  ;;  %v10228_v24 = vld [vmem:[#allocation158_spill] sm:$0xff]  ;;  %v10229_v25 = vld [vmem:[#allocation159_spill] sm:$0xff] }
 0x2be   :  { %1328 = vmatprep.subr.mxu0 %v10175_v26  ;;  %1399 = vmatprep.subr.mxu1 %v10176_v27  ;;  %v10230_v26 = vld [vmem:[#allocation160_spill] sm:$0xff]  ;;  %v10231_v27 = vld [vmem:[#allocation161_spill] sm:$0xff] }
 0x2bf   :  { %1329 = vmatpush1.msra.mxu0 %v10177_v28  ;;  %1400 = vmatpush1.msra.mxu1 %v10178_v30  ;;  %v10232_v28 = vld [vmem:[#allocation162_spill] sm:$0xff]  ;;  %v10233_v30 = vld [vmem:[#allocation163_spill] sm:$0xff] }
 0x2c0   :  { %1330 = vmatprep.subr.mxu0 %v10179_v31  ;;  %1401 = vmatprep.subr.mxu1 %v10180_v32  ;;  %v10234_v31 = vld [vmem:[#allocation164_spill] sm:$0xff] }
 0x2c1   :  { %1331 = vmatpush1.msra.mxu0 %v10181_v52  ;;  %1402 = vmatpush1.msra.mxu1 %v10182_v33  ;;  %v6652_v32 = vld [vmem:[#allocation10 + $0x1e8] sm:$0xff]  ;;  %v6655_v52 = vld [vmem:[#allocation10 + $0x1f8] sm:$0xff] }
 0x2c2   :  { %1332 = vmatprep.subr.mxu0 %v10183_v35  ;;  %1403 = vmatprep.subr.mxu1 %v10184_v36  ;;  %v10235_v36 = vld [vmem:[#allocation167_spill] sm:$0xff] }
 0x2c3   :  { %1333 = vmatpush1.msra.mxu0 %v10185_v38  ;;  %1404 = vmatpush1.msra.mxu1 %v10186_v39  ;;  %v1152_v38 = vrot.slane %v10235_v36, 1 }
 0x2c4   :  { %1334 = vmatprep.subr.mxu0 %v10187_v40  ;;  %1405 = vmatprep.subr.mxu1 %v10188_v41  ;;  %v10236_v41 = vld [vmem:[#allocation168_spill] sm:$0xff] }
 0x2c5   :  { %1335 = vmatpush1.msra.mxu0 %v10189_v42  ;;  %1406 = vmatpush1.msra.mxu1 %v10190_v43  ;;  %v1153_v42 = vrot.slane %v10236_v41, 1 }
 0x2c6   :  { %1336 = vmatprep.subr.mxu0 %v10191_v44  ;;  %1407 = vmatprep.subr.mxu1 %v10192_v45 }
 0x2c7   :  { %1337 = vmatpush1.msra.mxu0 %v10193_v46  ;;  %1408 = vmatpush1.msra.mxu1 %v10194_v47 }
 0x2c8   :  { %1338 = vmatprep.subr.mxu0 %v10195_v48  ;;  %1409 = vmatprep.subr.mxu1 %v10196_v51 }
 0x2c9   :  { %1339 = vmatpush1.msra.mxu0 %v10197_v53  ;;  %1410 = vmatpush1.msra.mxu1 %v10198_v55  ;;  %v10237_v53 = vld [vmem:[#allocation171_spill] sm:$0xff] }
 0x2ca   :  { %1340 = vmatprep.subr.mxu0 %v10199_v57  ;;  %1411 = vmatprep.subr.mxu1 %v10200_v59  ;;  %v1154_v55 = vrot.slane %v10237_v53, 1 }
 0x2cb   :  { %1341 = vmatpush1.msra.mxu0 %v10201_v63  ;;  %1412 = vmatpush1.msra.mxu1 %v10202_v5  ;;  %v1155_v63 = vrot.slane %v6413_v1, 1 }
 0x2cc   :  { %1342 = vmatprep.subr.mxu0 %v10203_v17  ;;  %1413 = vmatprep.subr.mxu1 %v10204_v19 }
 0x2cd   :  { %1343 = vmatpush1.msra.mxu0 %v10205_v62  ;;  %1414 = vmatpush1.msra.mxu1 %v10206_v12 }
 0x2ce   :  { %1344 = vmatprep.subr.mxu0 %v10207_v15  ;;  %1415 = vmatprep.subr.mxu1 %v10208_v3 }
 0x2cf   :  { %1345 = vmatpush1.msra.mxu0 %v10209_v11  ;;  %1416 = vmatpush1.msra.mxu1 %v10210_v7 }
 0x2d0   :  { %1346 = vmatprep.subr.mxu0 %v10211_v56  ;;  %1417 = vmatprep.subr.mxu1 %v10212_v60 }
 0x2d1   :  { %1347 = vmatpush1.msra.mxu0 %v10213_v54  ;;  %1418 = vmatpush1.msra.mxu1 %v10214_v0 }
 0x2d2   :  { %1348 = vmatprep.subr.mxu0 %v10215_v2  ;;  %1419 = vmatprep.subr.mxu1 %v10216_v58 }
 0x2d3   :  { %1349 = vmatpush1.msra.mxu0 %v10217_v4  ;;  %1420 = vmatpush1.msra.mxu1 %v10218_v8 }
 0x2d4   :  { %1350 = vmatprep.subr.mxu0 %v10219_v10  ;;  %1421 = vmatprep.subr.mxu1 %v10220_v13  ;;  %v6678_v10 = vld [vmem:[#allocation10 + $0x1e0] sm:$0xff]  ;;  %v6681_v13 = vld [vmem:[#allocation10 + $0x1f0] sm:$0xff] }
 0x2d5   :  { %1351 = vmatpush1.msra.mxu0 %v10221_v14  ;;  %1422 = vmatpush1.msra.mxu1 %v10222_v16  ;;  %v6687_v14 = vld [vmem:[#allocation10 + $0x1d8] sm:$0xff]  ;;  %v6690_v16 = vld [vmem:[#allocation10 + $0x1c0] sm:$0xff] }
 0x2d6   :  { %1352 = vmatprep.subr.mxu0 %v10223_v18  ;;  %1423 = vmatprep.subr.mxu1 %v10224_v20  ;;  %v6693_v18 = vld [vmem:[#allocation10 + $0x1d0] sm:$0xff]  ;;  %v6696_v20 = vld [vmem:[#allocation10 + $0x1a8] sm:$0xff] }
 0x2d7   :  { %1353 = vmatpush1.msra.mxu0 %v10225_v21  ;;  %1424 = vmatpush1.msra.mxu1 %v10226_v22  ;;  %v6699_v21 = vld [vmem:[#allocation10 + $0x1b8] sm:$0xff]  ;;  %v6702_v22 = vld [vmem:[#allocation10 + $0x1a0] sm:$0xff] }
 0x2d8   :  { %1354 = vmatprep.subr.mxu0 %v10227_v23  ;;  %1425 = vmatprep.subr.mxu1 %v10228_v24  ;;  %v6705_v23 = vld [vmem:[#allocation10 + $0x1b0] sm:$0xff]  ;;  %v6708_v24 = vld [vmem:[#allocation10 + $0x188] sm:$0xff] }
 0x2d9   :  { %1355 = vmatpush1.msra.mxu0 %v10229_v25  ;;  %1426 = vmatpush1.msra.mxu1 %v10230_v26  ;;  %v6711_v25 = vld [vmem:[#allocation10 + $0x198] sm:$0xff]  ;;  %v6714_v26 = vld [vmem:[#allocation10 + $0x180] sm:$0xff] }
 0x2da   :  { %1356 = vmatprep.subr.mxu0 %v10231_v27  ;;  %1427 = vmatprep.subr.mxu1 %v10232_v28  ;;  %v6717_v27 = vld [vmem:[#allocation10 + $0x190] sm:$0xff]  ;;  %v6720_v28 = vld [vmem:[#allocation10 + $0x168] sm:$0xff] }
 0x2db   :  { %1357 = vmatpush1.msra.mxu0 %v10233_v30  ;;  %1390 = vmatprep.mubr.f32.mxu0 %v10096_v29  ;;  %v6723_v30 = vld [vmem:[#allocation10 + $0x178] sm:$0xff] }
 0x2dc   :  { %1428 = vmatpush1.msra.mxu1 %v10234_v31  ;;  %1461 = vmatprep.mubr.f32.mxu1 %v10096_v29  ;;  %v6726_v31 = vld [vmem:[#allocation10 + $0x160] sm:$0xff] }
 0x2dd   :  { %1496 = vmatprep.subr.mxu0 %v6652_v32  ;;  %1567 = vmatprep.subr.mxu1 %v6655_v52 }
 0x35a   :  { %v6658_v33 = vpop.f32.mrf.mxu0  ;;  %v6664_v43 = vpop.f32.mrf.mxu1 }
 0x35c   :  { %v6660_v35 = vpop.f32.mrf.mxu0  ;;  %v6666_v48 = vpop.f32.mrf.mxu1 }
 0x37b   :  { %v1226_v39 = vpop.f32.mrf.mxu0  ;;  %v1297_v51 = vpop.f32.mrf.mxu1 }
 0x37c   :  { %v1227_v40 = vadd.f32 %v1226_v39, %v1152_v38  ;;  %v1298_v57 = vadd.f32 %v1297_v51, %v1154_v55  ;;  %v6729_v38 = vld [vmem:[#allocation10 + $0x170] sm:$0xff]  ;;  %v6732_v39 = vld [vmem:[#allocation10 + $0x148] sm:$0xff] }
 0x37d   :  { %v1228_v44 = vpop.f32.mrf.mxu0  ;;  %v1299_v59 = vpop.f32.mrf.mxu1  ;;  %v6753_v51 = vld [vmem:[#allocation10 + $0x130] sm:$0xff]  ;;  %v6756_v55 = vld [vmem:[#allocation10 + $0x108] sm:$0xff] }
 0x37e   :  { %v4574_v45 = vmul.f32 -1.442695, %v1227_v40  ;;  %v1229_v46 = vadd.f32 %v1228_v44, %v1153_v42  ;;  %v4576_v5 = vmul.f32 -1.442695, %v1298_v57  ;;  %v1300_v17 = vadd.f32 %v1299_v59, %v1155_v63  ;;  %v6735_v40 = vld [vmem:[#allocation10 + $0x158] sm:$0xff]  ;;  %v6738_v42 = vld [vmem:[#allocation10 + $0x140] sm:$0xff] }
 0x37f   :  { %v6741_v44 = vld [vmem:[#allocation10 + $0x150] sm:$0xff]  ;;  %v6759_v57 = vld [vmem:[#allocation10 + $0x118] sm:$0xff]  ;;  %v6762_v59 = vld [vmem:[#allocation10 + $0x100] sm:$0xff] }
 0x380   :  { %4715 = vpow2.f32 %v4574_v45  ;;  %v4575_v47 = vmul.f32 -1.442695, %v1229_v46  ;;  %v6744_v45 = vld [vmem:[#allocation10 + $0x128] sm:$0xff]  ;;  %v6747_v46 = vld [vmem:[#allocation10 + $0x138] sm:$0xff]  ;;  %v6765_v63 = vld [vmem:[#allocation10 + $0x110] sm:$0xff] }
 0x382   :  { %4717 = vpow2.f32 %v4575_v47  ;;  %v6750_v47 = vld [vmem:[#allocation10 + $0x120] sm:$0xff] }
 0x383   :  { %4719 = vpow2.f32 %v4576_v5  ;;  %v6768_v5 = vld [vmem:[#allocation10 + $0xe8] sm:$0xff] }
 0x384   :  { %4721 = vtanh.f32 %v1300_v17  ;;  %v6771_v17 = vld [vmem:[#allocation10 + $0xf8] sm:$0xff] }
 0x38d   :  { %v4716_v19 = vpop.eup %4715 }
 0x38e   :  { %v1311_v62 = vadd.f32 1.0, %v4716_v19  ;;  %v6774_v19 = vld [vmem:[#allocation10 + $0xe0] sm:$0xff] }
 0x38f   :  { %v4718_v12 = vpop.eup %4717 }
 0x390   :  { %4723 = vrcp.f32 %v1311_v62  ;;  %v1312_v15 = vadd.f32 1.0, %v4718_v12  ;;  %v4720_v3 = vpop.eup %4719  ;;  %v6777_v62 = vld [vmem:[#allocation10 + $0xf0] sm:$0xff]  ;;  %v6780_v12 = vld [vmem:[#allocation10 + $0xc8] sm:$0xff] }
 0x391   :  { %v4722_v11 = vpop.eup %4721  ;;  %v1313_v54 = vadd.f32 1.0, %v4720_v3  ;;  %10238 = vst [vmem:[#allocation29_spill] sm:$0xff] %v6777_v62  ;;  %10239 = vst [vmem:[#allocation21_spill] sm:$0xff] %v6780_v12  ;;  %v6786_v3 = vld [vmem:[#allocation10 + $0xc0] sm:$0xff] }
 0x392   :  { %4725 = vrcp.f32 %v1312_v15  ;;  %v6783_v15 = vld [vmem:[#allocation10 + $0xd8] sm:$0xff]  ;;  %10241 = vst [vmem:[#allocation22_spill] sm:$0xff] %v6786_v3 }
 0x393   :  { %4727 = vrcp.f32 %v1313_v54  ;;  %10240 = vst [vmem:[#allocation31_spill] sm:$0xff] %v6783_v15  ;;  %v6801_v54 = vld [vmem:[#allocation10 + $0xb0] sm:$0xff] }
 0x394   :  { %10246 = vst [vmem:[#allocation37_spill] sm:$0xff] %v6801_v54 }
 0x39d   :  { %v4724_v7 = vpop.eup %4723 }
 0x39e   :  { %v1322_v56 = vmul.f32 %v4724_v7, %v4722_v11  ;;  %v6789_v11 = vld [vmem:[#allocation10 + $0xd0] sm:$0xff]  ;;  %v6792_v7 = vld [vmem:[#allocation10 + $0xa8] sm:$0xff] }
 0x39f   :  { %v4726_v60 = vpop.eup %4725  ;;  %10242 = vst [vmem:[#allocation33_spill] sm:$0xff] %v6789_v11  ;;  %10243 = vst [vmem:[#allocation23_spill] sm:$0xff] %v6792_v7 }
 0x3a0   :  { %v1321_v0 = vmul.f32 %v4726_v60, %v6416_v9  ;;  %v4728_v58 = vpop.eup %4727  ;;  %v6684_v9 = vld [vmem:[#allocation10 + $0x1c8] sm:$0xff]  ;;  %v6798_v60 = vld [vmem:[#allocation10 + $0xa0] sm:$0xff] }
 0x3a1   :  { %10245 = vst [vmem:[#allocation24_spill] sm:$0xff] %v6798_v60 }
 0x3a2   :  { %v6671_v2 = vadd.f32 %v1322_v56, %v1321_v0  ;;  %v6795_v56 = vld [vmem:[#allocation10 + $0xb8] sm:$0xff]  ;;  %v6804_v0 = vld [vmem:[#allocation10 + $0x88] sm:$0xff] }
 0x3a3   :  { %10244 = vst [vmem:[#allocation35_spill] sm:$0xff] %v6795_v56  ;;  %10247 = vst [vmem:[#allocation25_spill] sm:$0xff] %v6804_v0 }
 0x3a4   :  { %4729 = vtanh.f32 %v6671_v2 }
 0x3b1   :  { %v4730_v4 = vpop.eup %4729 }
 0x3b2   :  { %v6674_v8 = vmul.f32 %v4730_v4, %v4728_v58  ;;  %v6807_v58 = vld [vmem:[#allocation10 + $0x98] sm:$0xff]  ;;  %v6810_v4 = vld [vmem:[#allocation10 + $0x80] sm:$0xff] }
 0x3b3   :  { %10248 = vst [vmem:[#allocation39_spill] sm:$0xff] %v6807_v58  ;;  %10249 = vst [vmem:[#allocation26_spill] sm:$0xff] %v6810_v4 }
 0x3b4   :  { %1391 = vmatmul.mubr.f32.vlgmr.msra.gmra.mxu0 %v6674_v8  ;;  %1462 = vmatmul.mubr.f32.vlgmr.msra.gmra.mxu1 %v6674_v8 }
 0x3b5   :  { %1497 = vmatpush1.msra.mxu0 %v6678_v10  ;;  %1568 = vmatpush1.msra.mxu1 %v6681_v13 }
 0x3b6   :  { %1498 = vmatprep.subr.mxu0 %v6684_v9  ;;  %1569 = vmatprep.subr.mxu1 %v6687_v14 }
 0x3b7   :  { %1499 = vmatpush1.msra.mxu0 %v6690_v16  ;;  %1570 = vmatpush1.msra.mxu1 %v6693_v18 }
 0x3b8   :  { %1500 = vmatprep.subr.mxu0 %v6696_v20  ;;  %1571 = vmatprep.subr.mxu1 %v6699_v21 }
 0x3b9   :  { %1501 = vmatpush1.msra.mxu0 %v6702_v22  ;;  %1572 = vmatpush1.msra.mxu1 %v6705_v23 }
 0x3ba   :  { %1502 = vmatprep.subr.mxu0 %v6708_v24  ;;  %1573 = vmatprep.subr.mxu1 %v6711_v25 }
 0x3bb   :  { %1503 = vmatpush1.msra.mxu0 %v6714_v26  ;;  %1574 = vmatpush1.msra.mxu1 %v6717_v27 }
 0x3bc   :  { %1504 = vmatprep.subr.mxu0 %v6720_v28  ;;  %1575 = vmatprep.subr.mxu1 %v6723_v30 }
 0x3bd   :  { %1505 = vmatpush1.msra.mxu0 %v6726_v31  ;;  %1576 = vmatpush1.msra.mxu1 %v6729_v38 }
 0x3be   :  { %1506 = vmatprep.subr.mxu0 %v6732_v39  ;;  %1577 = vmatprep.subr.mxu1 %v6735_v40 }
 0x3bf   :  { %1507 = vmatpush1.msra.mxu0 %v6738_v42  ;;  %1578 = vmatpush1.msra.mxu1 %v6741_v44 }
 0x3c0   :  { %1508 = vmatprep.subr.mxu0 %v6744_v45  ;;  %1579 = vmatprep.subr.mxu1 %v6747_v46 }
 0x3c1   :  { %1509 = vmatpush1.msra.mxu0 %v6750_v47  ;;  %1580 = vmatpush1.msra.mxu1 %v6753_v51 }
 0x3c2   :  { %1510 = vmatprep.subr.mxu0 %v6756_v55  ;;  %1581 = vmatprep.subr.mxu1 %v6759_v57 }
 0x3c3   :  { %1511 = vmatpush1.msra.mxu0 %v6762_v59  ;;  %1582 = vmatpush1.msra.mxu1 %v6765_v63 }
 0x3c4   :  { %1512 = vmatprep.subr.mxu0 %v6768_v5  ;;  %1583 = vmatprep.subr.mxu1 %v6771_v17 }
 0x3c5   :  { %1513 = vmatpush1.msra.mxu0 %v6774_v19  ;;  %1584 = vmatpush1.msra.mxu1 %v6777_v62 }
 0x3c6   :  { %1514 = vmatprep.subr.mxu0 %v6780_v12  ;;  %1585 = vmatprep.subr.mxu1 %v6783_v15 }
 0x3c7   :  { %1515 = vmatpush1.msra.mxu0 %v6786_v3  ;;  %1586 = vmatpush1.msra.mxu1 %v6789_v11 }
 0x3c8   :  { %1516 = vmatprep.subr.mxu0 %v6792_v7  ;;  %1587 = vmatprep.subr.mxu1 %v6795_v56 }
 0x3c9   :  { %1517 = vmatpush1.msra.mxu0 %v6798_v60  ;;  %1588 = vmatpush1.msra.mxu1 %v6801_v54  ;;  %v6816_v60 = vld [vmem:[#allocation10 + $0x68] sm:$0xff]  ;;  %v6819_v54 = vld [vmem:[#allocation10 + $0x78] sm:$0xff] }
 0x3ca   :  { %1518 = vmatprep.subr.mxu0 %v6804_v0  ;;  %1589 = vmatprep.subr.mxu1 %v6807_v58  ;;  %10251 = vst [vmem:[#allocation27_spill] sm:$0xff] %v6816_v60  ;;  %10252 = vst [vmem:[#allocation43_spill] sm:$0xff] %v6819_v54  ;;  %v6822_v0 = vld [vmem:[#allocation10 + $0x60] sm:$0xff]  ;;  %v6825_v58 = vld [vmem:[#allocation10 + $0x70] sm:$0xff] }
 0x3cb   :  { %1519 = vmatpush1.msra.mxu0 %v6810_v4  ;;  %1590 = vmatpush1.msra.mxu1 %v6813_v6  ;;  %10253 = vst [vmem:[#allocation30_spill] sm:$0xff] %v6822_v0  ;;  %10254 = vst [vmem:[#allocation46_spill] sm:$0xff] %v6825_v58  ;;  %v6828_v4 = vld [vmem:[#allocation10 + $0x48] sm:$0xff]  ;;  %v6831_v6 = vld [vmem:[#allocation10 + $0x58] sm:$0xff] }
 0x3cc   :  { %1520 = vmatprep.subr.mxu0 %v6816_v60  ;;  %1591 = vmatprep.subr.mxu1 %v6819_v54  ;;  %10255 = vst [vmem:[#allocation165_spill] sm:$0xff] %v6828_v4  ;;  %10256 = vst [vmem:[#allocation166_spill] sm:$0xff] %v6831_v6  ;;  %v6834_v60 = vld [vmem:[#allocation10 + $0x40] sm:$0xff]  ;;  %v6837_v54 = vld [vmem:[#allocation10 + $0x50] sm:$0xff] }
 0x3cd   :  { %1521 = vmatpush1.msra.mxu0 %v6822_v0  ;;  %1592 = vmatpush1.msra.mxu1 %v6825_v58  ;;  %10257 = vst [vmem:[#allocation169_spill] sm:$0xff] %v6834_v60  ;;  %10258 = vst [vmem:[#allocation170_spill] sm:$0xff] %v6837_v54  ;;  %v6840_v0 = vld [vmem:[#allocation10 + $0x28] sm:$0xff]  ;;  %v6843_v58 = vld [vmem:[#allocation10 + $0x38] sm:$0xff] }
 0x3ce   :  { %1522 = vmatprep.subr.mxu0 %v6828_v4  ;;  %1593 = vmatprep.subr.mxu1 %v6831_v6  ;;  %10259 = vst [vmem:[#allocation32_spill] sm:$0xff] %v6840_v0  ;;  %10260 = vst [vmem:[#allocation48_spill] sm:$0xff] %v6843_v58  ;;  %v6846_v4 = vld [vmem:[#allocation10 + $0x20] sm:$0xff]  ;;  %v6849_v6 = vld [vmem:[#allocation10 + $0x30] sm:$0xff] }
 0x3cf   :  { %1523 = vmatpush1.msra.mxu0 %v6834_v60  ;;  %1594 = vmatpush1.msra.mxu1 %v6837_v54  ;;  %10261 = vst [vmem:[#allocation34_spill] sm:$0xff] %v6846_v4  ;;  %10262 = vst [vmem:[#allocation50_spill] sm:$0xff] %v6849_v6  ;;  %v6852_v60 = vld [vmem:[#allocation10 + $0x8] sm:$0xff]  ;;  %v6855_v54 = vld [vmem:[#allocation10 + $0x18] sm:$0xff] }
 0x3d0   :  { %1524 = vmatprep.subr.mxu0 %v6840_v0  ;;  %1595 = vmatprep.subr.mxu1 %v6843_v58  ;;  %10263 = vst [vmem:[#allocation36_spill] sm:$0xff] %v6852_v60  ;;  %10264 = vst [vmem:[#allocation52_spill] sm:$0xff] %v6855_v54  ;;  %v6858_v0 = vld [vmem:[#allocation10] sm:$0xff]  ;;  %v6861_v58 = vld [vmem:[#allocation10 + $0x10] sm:$0xff] }
 0x3d1   :  { %1525 = vmatpush1.msra.mxu0 %v6846_v4  ;;  %1596 = vmatpush1.msra.mxu1 %v6849_v6  ;;  %10265 = vst [vmem:[#allocation38_spill] sm:$0xff] %v6858_v0  ;;  %10266 = vst [vmem:[#allocation54_spill] sm:$0xff] %v6861_v58  ;;  %v6866_v6 = vld [vmem:[#allocation6 + $0x1e8] sm:$0xff] }
 0x3d2   :  { %1526 = vmatprep.subr.mxu0 %v6852_v60  ;;  %1597 = vmatprep.subr.mxu1 %v6855_v54  ;;  %10267 = vst [vmem:[#allocation40_spill] sm:$0xff] %v6866_v6  ;;  %v6869_v60 = vld [vmem:[#allocation6 + $0x1f8] sm:$0xff] }
 0x3d3   :  { %1527 = vmatpush1.msra.mxu0 %v6858_v0  ;;  %1598 = vmatpush1.msra.mxu1 %v6861_v58  ;;  %10268 = vst [vmem:[#allocation56_spill] sm:$0xff] %v6869_v60 }
 0x3d4   :  { %1560 = vmatprep.mubr.f32.mxu0 %v10096_v29  ;;  %1631 = vmatprep.mubr.f32.mxu1 %v10096_v29 }
 0x3d5   :  { %1646 = vmatprep.subr.mxu0 %v6866_v6  ;;  %1717 = vmatprep.subr.mxu1 %v6869_v60 }
 0x474   :  { %v1392_v54 = vpop.f32.mrf.mxu0  ;;  %v1463_v3 = vpop.f32.mrf.mxu1 }
 0x475   :  { %v1393_v4 = vadd.f32 %v1392_v54, %v6658_v33  ;;  %v1464_v6 = vadd.f32 %v1463_v3, %v6664_v43 }
 0x476   :  { %v1394_v0 = vpop.f32.mrf.mxu0  ;;  %v1465_v12 = vpop.f32.mrf.mxu1 }
 0x477   :  { %v1468_v56 = vadd.f32 %v1393_v4, %v6491_v34  ;;  %v1395_v58 = vadd.f32 %v1394_v0, %v6660_v35  ;;  %v1470_v60 = vadd.f32 %v1464_v6, %v6503_v49  ;;  %v1466_v62 = vadd.f32 %v1465_v12, %v6666_v48 }
 0x479   :  { %v4577_v7 = vmul.f32 -1.442695, %v1468_v56  ;;  %v1469_v11 = vadd.f32 %v1395_v58, %v6495_v37  ;;  %v4579_v33 = vmul.f32 -1.442695, %v1470_v60  ;;  %v1471_v4 = vadd.f32 %v1466_v62, %v6509_v61  ;;  %v6891_v58 = vld [vmem:[#allocation6 + $0x1f0] sm:$0xff] }
 0x47b   :  { %4731 = vpow2.f32 %v4577_v7  ;;  %v4578_v15 = vmul.f32 -1.442695, %v1469_v11 }
 0x47d   :  { %4733 = vpow2.f32 %v4578_v15 }
 0x47e   :  { %4735 = vpow2.f32 %v4579_v33  ;;  %v6897_v33 = vld [vmem:[#allocation6 + $0x1d8] sm:$0xff] }
 0x47f   :  { %10270 = vst [vmem:[#allocation58_spill] sm:$0xff] %v6897_v33 }
 0x488   :  { %v4732_v54 = vpop.eup %4731 }
 0x489   :  { %v1481_v34 = vadd.f32 1.0, %v4732_v54  ;;  %v6900_v54 = vld [vmem:[#allocation6 + $0x1c0] sm:$0xff] }
 0x48a   :  { %v4734_v35 = vpop.eup %4733  ;;  %10271 = vst [vmem:[#allocation44_spill] sm:$0xff] %v6900_v54 }
 0x48b   :  { %4737 = vrcp.f32 %v1481_v34  ;;  %v1482_v56 = vadd.f32 1.0, %v4734_v35  ;;  %v4736_v11 = vpop.eup %4735  ;;  %v6888_v34 = vld [vmem:[#allocation6 + $0x1e0] sm:$0xff]  ;;  %v6906_v35 = vld [vmem:[#allocation6 + $0x1a8] sm:$0xff] }
 0x48c   :  { %4739 = vtanh.f32 %v1471_v4  ;;  %v1483_v3 = vadd.f32 1.0, %v4736_v11  ;;  %v6903_v4 = vld [vmem:[#allocation6 + $0x1d0] sm:$0xff]  ;;  %10273 = vst [vmem:[#allocation45_spill] sm:$0xff] %v6906_v35  ;;  %v6912_v11 = vld [vmem:[#allocation6 + $0x1a0] sm:$0xff] }
 0x48d   :  { %4741 = vrcp.f32 %v1482_v56  ;;  %10272 = vst [vmem:[#allocation60_spill] sm:$0xff] %v6903_v4  ;;  %v6909_v56 = vld [vmem:[#allocation6 + $0x1b8] sm:$0xff]  ;;  %10275 = vst [vmem:[#allocation47_spill] sm:$0xff] %v6912_v11 }
 0x48e   :  { %4743 = vrcp.f32 %v1483_v3  ;;  %10274 = vst [vmem:[#allocation62_spill] sm:$0xff] %v6909_v56  ;;  %v6924_v3 = vld [vmem:[#allocation6 + $0x180] sm:$0xff] }
 0x48f   :  { %10279 = vst [vmem:[#allocation51_spill] sm:$0xff] %v6924_v3 }
 0x498   :  { %v4738_v15 = vpop.eup %4737 }
 0x499   :  { %v4740_v7 = vpop.eup %4739 }
 0x49a   :  { %v4742_v43 = vpop.eup %4741  ;;  %v1492_v0 = vmul.f32 %v4740_v7, %v4738_v15  ;;  %v6915_v15 = vld [vmem:[#allocation6 + $0x1b0] sm:$0xff]  ;;  %v6918_v7 = vld [vmem:[#allocation6 + $0x188] sm:$0xff] }
 0x49b   :  { %v1491_v6 = vmul.f32 %v4742_v43, %v6513_v50  ;;  %v4744_v62 = vpop.eup %4743  ;;  %v6894_v50 = vld [vmem:[#allocation6 + $0x1c8] sm:$0xff]  ;;  %10276 = vst [vmem:[#allocation64_spill] sm:$0xff] %v6915_v15  ;;  %10277 = vst [vmem:[#allocation49_spill] sm:$0xff] %v6918_v7  ;;  %v6921_v43 = vld [vmem:[#allocation6 + $0x198] sm:$0xff] }
 0x49c   :  { %10269 = vst [vmem:[#allocation42_spill] sm:$0xff] %v6894_v50  ;;  %10278 = vst [vmem:[#allocation66_spill] sm:$0xff] %v6921_v43 }
 0x49d   :  { %v6881_v48 = vadd.f32 %v1492_v0, %v1491_v6  ;;  %v6927_v6 = vld [vmem:[#allocation6 + $0x190] sm:$0xff]  ;;  %v6930_v0 = vld [vmem:[#allocation6 + $0x168] sm:$0xff] }
 0x49e   :  { %10280 = vst [vmem:[#allocation68_spill] sm:$0xff] %v6927_v6  ;;  %10281 = vst [vmem:[#allocation53_spill] sm:$0xff] %v6930_v0 }
 0x49f   :  { %4745 = vtanh.f32 %v6881_v48 }
 0x4ac   :  { %v4746_v12 = vpop.eup %4745 }
 0x4ad   :  { %v6884_v60 = vmul.f32 %v4746_v12, %v4744_v62  ;;  %v6933_v62 = vld [vmem:[#allocation6 + $0x178] sm:$0xff]  ;;  %v6936_v12 = vld [vmem:[#allocation6 + $0x160] sm:$0xff] }
 0x4ae   :  { %10282 = vst [vmem:[#allocation70_spill] sm:$0xff] %v6933_v62  ;;  %10283 = vst [vmem:[#allocation55_spill] sm:$0xff] %v6936_v12 }
 0x4af   :  { %1561 = vmatmul.mubr.f32.vlgmr.msra.gmra.mxu0 %v6884_v60  ;;  %1632 = vmatmul.mubr.f32.vlgmr.msra.gmra.mxu1 %v6884_v60 }
 0x4b0   :  { %1647 = vmatpush1.msra.mxu0 %v6888_v34  ;;  %1718 = vmatpush1.msra.mxu1 %v6891_v58 }
 0x4b1   :  { %1648 = vmatprep.subr.mxu0 %v6894_v50  ;;  %1719 = vmatprep.subr.mxu1 %v6897_v33 }
 0x4b2   :  { %1649 = vmatpush1.msra.mxu0 %v6900_v54  ;;  %1720 = vmatpush1.msra.mxu1 %v6903_v4 }
 0x4b3   :  { %1650 = vmatprep.subr.mxu0 %v6906_v35  ;;  %1721 = vmatprep.subr.mxu1 %v6909_v56  ;;  %v1640_v35 = vrot.slane %v10237_v53, 2 }
 0x4b4   :  { %1651 = vmatpush1.msra.mxu0 %v6912_v11  ;;  %1722 = vmatpush1.msra.mxu1 %v6915_v15 }
 0x4b5   :  { %1652 = vmatprep.subr.mxu0 %v6918_v7  ;;  %1723 = vmatprep.subr.mxu1 %v6921_v43  ;;  %v6939_v43 = vld [vmem:[#allocation6 + $0x170] sm:$0xff] }
 0x4b6   :  { %1653 = vmatpush1.msra.mxu0 %v6924_v3  ;;  %1724 = vmatpush1.msra.mxu1 %v6927_v6  ;;  %10284 = vst [vmem:[#allocation72_spill] sm:$0xff] %v6939_v43  ;;  %v6942_v3 = vld [vmem:[#allocation6 + $0x148] sm:$0xff]  ;;  %v6945_v6 = vld [vmem:[#allocation6 + $0x158] sm:$0xff] }
 0x4b7   :  { %1654 = vmatprep.subr.mxu0 %v6930_v0  ;;  %1725 = vmatprep.subr.mxu1 %v6933_v62  ;;  %10285 = vst [vmem:[#allocation57_spill] sm:$0xff] %v6942_v3  ;;  %10286 = vst [vmem:[#allocation74_spill] sm:$0xff] %v6945_v6  ;;  %v6948_v0 = vld [vmem:[#allocation6 + $0x140] sm:$0xff]  ;;  %v6951_v62 = vld [vmem:[#allocation6 + $0x150] sm:$0xff] }
 0x4b8   :  { %1655 = vmatpush1.msra.mxu0 %v6936_v12  ;;  %1726 = vmatpush1.msra.mxu1 %v6939_v43  ;;  %10287 = vst [vmem:[#allocation59_spill] sm:$0xff] %v6948_v0  ;;  %10288 = vst [vmem:[#allocation76_spill] sm:$0xff] %v6951_v62  ;;  %v6954_v12 = vld [vmem:[#allocation6 + $0x128] sm:$0xff]  ;;  %v6957_v43 = vld [vmem:[#allocation6 + $0x138] sm:$0xff] }
 0x4b9   :  { %1656 = vmatprep.subr.mxu0 %v6942_v3  ;;  %1727 = vmatprep.subr.mxu1 %v6945_v6  ;;  %10289 = vst [vmem:[#allocation61_spill] sm:$0xff] %v6954_v12  ;;  %10290 = vst [vmem:[#allocation78_spill] sm:$0xff] %v6957_v43  ;;  %v6960_v3 = vld [vmem:[#allocation6 + $0x120] sm:$0xff]  ;;  %v6963_v6 = vld [vmem:[#allocation6 + $0x130] sm:$0xff] }
 0x4ba   :  { %1657 = vmatpush1.msra.mxu0 %v6948_v0  ;;  %1728 = vmatpush1.msra.mxu1 %v6951_v62  ;;  %10291 = vst [vmem:[#allocation63_spill] sm:$0xff] %v6960_v3  ;;  %10292 = vst [vmem:[#allocation80_spill] sm:$0xff] %v6963_v6  ;;  %v6966_v0 = vld [vmem:[#allocation6 + $0x108] sm:$0xff]  ;;  %v6969_v62 = vld [vmem:[#allocation6 + $0x118] sm:$0xff] }
 0x4bb   :  { %1658 = vmatprep.subr.mxu0 %v6954_v12  ;;  %1729 = vmatprep.subr.mxu1 %v6957_v43  ;;  %10293 = vst [vmem:[#allocation65_spill] sm:$0xff] %v6966_v0  ;;  %10294 = vst [vmem:[#allocation82_spill] sm:$0xff] %v6969_v62  ;;  %v6972_v12 = vld [vmem:[#allocation6 + $0x100] sm:$0xff]  ;;  %v6975_v43 = vld [vmem:[#allocation6 + $0x110] sm:$0xff] }
 0x4bc   :  { %1659 = vmatpush1.msra.mxu0 %v6960_v3  ;;  %1730 = vmatpush1.msra.mxu1 %v6963_v6  ;;  %10295 = vst [vmem:[#allocation67_spill] sm:$0xff] %v6972_v12  ;;  %10296 = vst [vmem:[#allocation84_spill] sm:$0xff] %v6975_v43  ;;  %v6978_v3 = vld [vmem:[#allocation6 + $0xe8] sm:$0xff]  ;;  %v6981_v6 = vld [vmem:[#allocation6 + $0xf8] sm:$0xff] }
 0x4bd   :  { %1660 = vmatprep.subr.mxu0 %v6966_v0  ;;  %1731 = vmatprep.subr.mxu1 %v6969_v62  ;;  %10297 = vst [vmem:[#allocation69_spill] sm:$0xff] %v6978_v3  ;;  %10298 = vst [vmem:[#allocation86_spill] sm:$0xff] %v6981_v6  ;;  %v6984_v0 = vld [vmem:[#allocation6 + $0xe0] sm:$0xff]  ;;  %v6987_v62 = vld [vmem:[#allocation6 + $0xf0] sm:$0xff] }
 0x4be   :  { %1661 = vmatpush1.msra.mxu0 %v6972_v12  ;;  %1732 = vmatpush1.msra.mxu1 %v6975_v43  ;;  %10299 = vst [vmem:[#allocation71_spill] sm:$0xff] %v6984_v0  ;;  %10300 = vst [vmem:[#allocation88_spill] sm:$0xff] %v6987_v62  ;;  %v6990_v12 = vld [vmem:[#allocation6 + $0xc8] sm:$0xff]  ;;  %v6993_v43 = vld [vmem:[#allocation6 + $0xd8] sm:$0xff] }
 0x4bf   :  { %1662 = vmatprep.subr.mxu0 %v6978_v3  ;;  %1733 = vmatprep.subr.mxu1 %v6981_v6  ;;  %10301 = vst [vmem:[#allocation73_spill] sm:$0xff] %v6990_v12  ;;  %10302 = vst [vmem:[#allocation90_spill] sm:$0xff] %v6993_v43  ;;  %v6996_v3 = vld [vmem:[#allocation6 + $0xc0] sm:$0xff]  ;;  %v6999_v6 = vld [vmem:[#allocation6 + $0xd0] sm:$0xff] }
 0x4c0   :  { %1663 = vmatpush1.msra.mxu0 %v6984_v0  ;;  %1734 = vmatpush1.msra.mxu1 %v6987_v62  ;;  %10303 = vst [vmem:[#allocation75_spill] sm:$0xff] %v6996_v3  ;;  %10304 = vst [vmem:[#allocation92_spill] sm:$0xff] %v6999_v6  ;;  %v7002_v0 = vld [vmem:[#allocation6 + $0xa8] sm:$0xff]  ;;  %v7005_v62 = vld [vmem:[#allocation6 + $0xb8] sm:$0xff] }
 0x4c1   :  { %1664 = vmatprep.subr.mxu0 %v6990_v12  ;;  %1735 = vmatprep.subr.mxu1 %v6993_v43  ;;  %10305 = vst [vmem:[#allocation77_spill] sm:$0xff] %v7002_v0  ;;  %10306 = vst [vmem:[#allocation93_spill] sm:$0xff] %v7005_v62  ;;  %v7008_v12 = vld [vmem:[#allocation6 + $0xa0] sm:$0xff]  ;;  %v7011_v43 = vld [vmem:[#allocation6 + $0xb0] sm:$0xff] }
 0x4c2   :  { %1665 = vmatpush1.msra.mxu0 %v6996_v3  ;;  %1736 = vmatpush1.msra.mxu1 %v6999_v6  ;;  %10307 = vst [vmem:[#allocation79_spill] sm:$0xff] %v7008_v12  ;;  %10308 = vst [vmem:[#allocation94_spill] sm:$0xff] %v7011_v43  ;;  %v7014_v3 = vld [vmem:[#allocation6 + $0x88] sm:$0xff]  ;;  %v7017_v6 = vld [vmem:[#allocation6 + $0x98] sm:$0xff] }
 0x4c3   :  { %1666 = vmatprep.subr.mxu0 %v7002_v0  ;;  %1737 = vmatprep.subr.mxu1 %v7005_v62  ;;  %10309 = vst [vmem:[#allocation81_spill] sm:$0xff] %v7014_v3  ;;  %10310 = vst [vmem:[#allocation95_spill] sm:$0xff] %v7017_v6  ;;  %v7020_v0 = vld [vmem:[#allocation6 + $0x80] sm:$0xff]  ;;  %v7023_v62 = vld [vmem:[#allocation6 + $0x90] sm:$0xff] }
 0x4c4   :  { %1667 = vmatpush1.msra.mxu0 %v7008_v12  ;;  %1738 = vmatpush1.msra.mxu1 %v7011_v43  ;;  %10311 = vst [vmem:[#allocation83_spill] sm:$0xff] %v7020_v0  ;;  %10312 = vst [vmem:[#allocation96_spill] sm:$0xff] %v7023_v62  ;;  %v7026_v12 = vld [vmem:[#allocation6 + $0x68] sm:$0xff]  ;;  %v7029_v43 = vld [vmem:[#allocation6 + $0x78] sm:$0xff] }
 0x4c5   :  { %1668 = vmatprep.subr.mxu0 %v7014_v3  ;;  %1739 = vmatprep.subr.mxu1 %v7017_v6  ;;  %10313 = vst [vmem:[#allocation85_spill] sm:$0xff] %v7026_v12  ;;  %10314 = vst [vmem:[#allocation97_spill] sm:$0xff] %v7029_v43  ;;  %v7032_v3 = vld [vmem:[#allocation6 + $0x60] sm:$0xff]  ;;  %v7035_v6 = vld [vmem:[#allocation6 + $0x70] sm:$0xff] }
 0x4c6   :  { %1669 = vmatpush1.msra.mxu0 %v7020_v0  ;;  %1740 = vmatpush1.msra.mxu1 %v7023_v62  ;;  %10315 = vst [vmem:[#allocation87_spill] sm:$0xff] %v7032_v3  ;;  %10316 = vst [vmem:[#allocation98_spill] sm:$0xff] %v7035_v6  ;;  %v7038_v0 = vld [vmem:[#allocation6 + $0x48] sm:$0xff]  ;;  %v7041_v62 = vld [vmem:[#allocation6 + $0x58] sm:$0xff] }
 0x4c7   :  { %1670 = vmatprep.subr.mxu0 %v7026_v12  ;;  %1741 = vmatprep.subr.mxu1 %v7029_v43  ;;  %10317 = vst [vmem:[#allocation89_spill] sm:$0xff] %v7038_v0  ;;  %10318 = vst [vmem:[#allocation99_spill] sm:$0xff] %v7041_v62  ;;  %v7044_v12 = vld [vmem:[#allocation6 + $0x40] sm:$0xff]  ;;  %v7047_v43 = vld [vmem:[#allocation6 + $0x50] sm:$0xff] }
 0x4c8   :  { %1671 = vmatpush1.msra.mxu0 %v7032_v3  ;;  %1742 = vmatpush1.msra.mxu1 %v7035_v6  ;;  %10319 = vst [vmem:[#allocation91_spill] sm:$0xff] %v7044_v12  ;;  %10320 = vst [vmem:[#allocation100_spill] sm:$0xff] %v7047_v43  ;;  %v7050_v3 = vld [vmem:[#allocation6 + $0x28] sm:$0xff]  ;;  %v7053_v6 = vld [vmem:[#allocation6 + $0x38] sm:$0xff] }
 0x4c9   :  { %1672 = vmatprep.subr.mxu0 %v7038_v0  ;;  %1743 = vmatprep.subr.mxu1 %v7041_v62  ;;  %10321 = vst [vmem:[#allocation101_spill] sm:$0xff] %v7050_v3  ;;  %10322 = vst [vmem:[#allocation102_spill] sm:$0xff] %v7053_v6  ;;  %v7056_v0 = vld [vmem:[#allocation6 + $0x20] sm:$0xff]  ;;  %v7059_v62 = vld [vmem:[#allocation6 + $0x30] sm:$0xff] }
 0x4ca   :  { %1673 = vmatpush1.msra.mxu0 %v7044_v12  ;;  %1744 = vmatpush1.msra.mxu1 %v7047_v43  ;;  %10323 = vst [vmem:[#allocation103_spill] sm:$0xff] %v7056_v0  ;;  %10324 = vst [vmem:[#allocation104_spill] sm:$0xff] %v7059_v62  ;;  %v7062_v12 = vld [vmem:[#allocation6 + $0x8] sm:$0xff]  ;;  %v7065_v43 = vld [vmem:[#allocation6 + $0x18] sm:$0xff] }
 0x4cb   :  { %1674 = vmatprep.subr.mxu0 %v7050_v3  ;;  %1745 = vmatprep.subr.mxu1 %v7053_v6  ;;  %10325 = vst [vmem:[#allocation105_spill] sm:$0xff] %v7062_v12  ;;  %10326 = vst [vmem:[#allocation106_spill] sm:$0xff] %v7065_v43  ;;  %v7068_v3 = vld [vmem:[#allocation6] sm:$0xff]  ;;  %v7072_v6 = vld [vmem:[#allocation6 + $0x10] sm:$0xff] }
 0x4cc   :  { %1675 = vmatpush1.msra.mxu0 %v7056_v0  ;;  %1746 = vmatpush1.msra.mxu1 %v7059_v62  ;;  %10327 = vst [vmem:[#allocation107_spill] sm:$0xff] %v7068_v3  ;;  %10328 = vst [vmem:[#allocation108_spill] sm:$0xff] %v7072_v6  ;;  %v7087_v62 = vld [vmem:[#allocation9 + $0x1f0] sm:$0xff]  ;;  %v1639_v0 = vrot.slane %v10236_v41, 2 }
 0x4cd   :  { %1676 = vmatprep.subr.mxu0 %v7062_v12  ;;  %1747 = vmatprep.subr.mxu1 %v7065_v43  ;;  %v7078_v12 = vld [vmem:[#allocation9 + $0x1e8] sm:$0xff]  ;;  %v7081_v43 = vld [vmem:[#allocation9 + $0x1f8] sm:$0xff]  ;;  %10332 = vst [vmem:[#allocation112_spill] sm:$0xff] %v7087_v62 }
 0x4ce   :  { %1677 = vmatpush1.msra.mxu0 %v7068_v3  ;;  %1710 = vmatprep.mubr.f32.mxu0 %v10096_v29  ;;  %10329 = vst [vmem:[#allocation109_spill] sm:$0xff] %v7078_v12  ;;  %10330 = vst [vmem:[#allocation110_spill] sm:$0xff] %v7081_v43  ;;  %v7084_v3 = vld [vmem:[#allocation9 + $0x1e0] sm:$0xff] }
 0x4cf   :  { %1748 = vmatpush1.msra.mxu1 %v7072_v6  ;;  %1781 = vmatprep.mubr.f32.mxu1 %v10096_v29  ;;  %10331 = vst [vmem:[#allocation111_spill] sm:$0xff] %v7084_v3  ;;  %v7090_v6 = vld [vmem:[#allocation9 + $0x1c8] sm:$0xff] }
 0x4d0   :  { %1711 = vmatmul.mubr.f32.vlgmr.msra.gmra.mxu0 %v6674_v8  ;;  %1782 = vmatmul.mubr.f32.vlgmr.msra.gmra.mxu1 %v6674_v8  ;;  %10333 = vst [vmem:[#allocation113_spill] sm:$0xff] %v7090_v6  ;;  %v7093_v8 = vld [vmem:[#allocation9 + $0x1d8] sm:$0xff] }
 0x4d1   :  { %1812 = vmatprep.subr.mxu0 %v7078_v12  ;;  %1883 = vmatprep.subr.mxu1 %v7081_v43  ;;  %10334 = vst [vmem:[#allocation114_spill] sm:$0xff] %v7093_v8  ;;  %v7096_v12 = vld [vmem:[#allocation9 + $0x1c0] sm:$0xff]  ;;  %v7099_v43 = vld [vmem:[#allocation9 + $0x1d0] sm:$0xff] }
 0x4d2   :  { %1813 = vmatpush1.msra.mxu0 %v7084_v3  ;;  %1884 = vmatpush1.msra.mxu1 %v7087_v62  ;;  %10335 = vst [vmem:[#allocation115_spill] sm:$0xff] %v7096_v12  ;;  %10336 = vst [vmem:[#allocation116_spill] sm:$0xff] %v7099_v43  ;;  %v7102_v3 = vld [vmem:[#allocation9 + $0x1a8] sm:$0xff]  ;;  %v7105_v62 = vld [vmem:[#allocation9 + $0x1b8] sm:$0xff] }
 0x4d3   :  { %1814 = vmatprep.subr.mxu0 %v7090_v6  ;;  %1885 = vmatprep.subr.mxu1 %v7093_v8  ;;  %10337 = vst [vmem:[#allocation117_spill] sm:$0xff] %v7102_v3  ;;  %10338 = vst [vmem:[#allocation118_spill] sm:$0xff] %v7105_v62  ;;  %v7108_v6 = vld [vmem:[#allocation9 + $0x1a0] sm:$0xff]  ;;  %v7111_v8 = vld [vmem:[#allocation9 + $0x1b0] sm:$0xff] }
 0x4d4   :  { %1815 = vmatpush1.msra.mxu0 %v7096_v12  ;;  %1886 = vmatpush1.msra.mxu1 %v7099_v43  ;;  %10339 = vst [vmem:[#allocation119_spill] sm:$0xff] %v7108_v6  ;;  %10340 = vst [vmem:[#allocation120_spill] sm:$0xff] %v7111_v8  ;;  %v7114_v12 = vld [vmem:[#allocation9 + $0x188] sm:$0xff]  ;;  %v7117_v43 = vld [vmem:[#allocation9 + $0x198] sm:$0xff] }
 0x4d5   :  { %1816 = vmatprep.subr.mxu0 %v7102_v3  ;;  %1887 = vmatprep.subr.mxu1 %v7105_v62  ;;  %10341 = vst [vmem:[#allocation121_spill] sm:$0xff] %v7114_v12  ;;  %10342 = vst [vmem:[#allocation122_spill] sm:$0xff] %v7117_v43  ;;  %v7120_v3 = vld [vmem:[#allocation9 + $0x180] sm:$0xff]  ;;  %v7123_v62 = vld [vmem:[#allocation9 + $0x190] sm:$0xff] }
 0x4d6   :  { %1817 = vmatpush1.msra.mxu0 %v7108_v6  ;;  %1888 = vmatpush1.msra.mxu1 %v7111_v8  ;;  %10343 = vst [vmem:[#allocation123_spill] sm:$0xff] %v7120_v3  ;;  %10344 = vst [vmem:[#allocation124_spill] sm:$0xff] %v7123_v62  ;;  %v7126_v6 = vld [vmem:[#allocation9 + $0x168] sm:$0xff]  ;;  %v7129_v8 = vld [vmem:[#allocation9 + $0x178] sm:$0xff] }
 0x4d7   :  { %1818 = vmatprep.subr.mxu0 %v7114_v12  ;;  %1889 = vmatprep.subr.mxu1 %v7117_v43  ;;  %10345 = vst [vmem:[#allocation125_spill] sm:$0xff] %v7126_v6  ;;  %10346 = vst [vmem:[#allocation126_spill] sm:$0xff] %v7129_v8  ;;  %v7132_v12 = vld [vmem:[#allocation9 + $0x160] sm:$0xff]  ;;  %v7135_v43 = vld [vmem:[#allocation9 + $0x170] sm:$0xff] }
 0x4d8   :  { %1819 = vmatpush1.msra.mxu0 %v7120_v3  ;;  %1890 = vmatpush1.msra.mxu1 %v7123_v62  ;;  %10347 = vst [vmem:[#allocation127_spill] sm:$0xff] %v7132_v12  ;;  %10348 = vst [vmem:[#allocation128_spill] sm:$0xff] %v7135_v43  ;;  %v7138_v3 = vld [vmem:[#allocation9 + $0x148] sm:$0xff]  ;;  %v7141_v62 = vld [vmem:[#allocation9 + $0x158] sm:$0xff] }
 0x4d9   :  { %1820 = vmatprep.subr.mxu0 %v7126_v6  ;;  %1891 = vmatprep.subr.mxu1 %v7129_v8  ;;  %10349 = vst [vmem:[#allocation129_spill] sm:$0xff] %v7138_v3  ;;  %10350 = vst [vmem:[#allocation130_spill] sm:$0xff] %v7141_v62  ;;  %v7144_v6 = vld [vmem:[#allocation9 + $0x140] sm:$0xff]  ;;  %v7147_v8 = vld [vmem:[#allocation9 + $0x150] sm:$0xff] }
 0x4da   :  { %1821 = vmatpush1.msra.mxu0 %v7132_v12  ;;  %1892 = vmatpush1.msra.mxu1 %v7135_v43  ;;  %10351 = vst [vmem:[#allocation131_spill] sm:$0xff] %v7144_v6  ;;  %10352 = vst [vmem:[#allocation132_spill] sm:$0xff] %v7147_v8  ;;  %v7150_v12 = vld [vmem:[#allocation9 + $0x128] sm:$0xff]  ;;  %v7153_v43 = vld [vmem:[#allocation9 + $0x138] sm:$0xff] }
 0x4db   :  { %1822 = vmatprep.subr.mxu0 %v7138_v3  ;;  %1893 = vmatprep.subr.mxu1 %v7141_v62  ;;  %10353 = vst [vmem:[#allocation133_spill] sm:$0xff] %v7150_v12  ;;  %10354 = vst [vmem:[#allocation134_spill] sm:$0xff] %v7153_v43  ;;  %v7156_v3 = vld [vmem:[#allocation9 + $0x120] sm:$0xff]  ;;  %v7159_v62 = vld [vmem:[#allocation9 + $0x130] sm:$0xff] }
 0x4dc   :  { %1823 = vmatpush1.msra.mxu0 %v7144_v6  ;;  %1894 = vmatpush1.msra.mxu1 %v7147_v8  ;;  %10355 = vst [vmem:[#allocation135_spill] sm:$0xff] %v7156_v3  ;;  %10356 = vst [vmem:[#allocation136_spill] sm:$0xff] %v7159_v62  ;;  %v7162_v6 = vld [vmem:[#allocation9 + $0x108] sm:$0xff]  ;;  %v7165_v8 = vld [vmem:[#allocation9 + $0x118] sm:$0xff] }
 0x4dd   :  { %1824 = vmatprep.subr.mxu0 %v7150_v12  ;;  %1895 = vmatprep.subr.mxu1 %v7153_v43  ;;  %10357 = vst [vmem:[#allocation137_spill] sm:$0xff] %v7162_v6  ;;  %10358 = vst [vmem:[#allocation138_spill] sm:$0xff] %v7165_v8  ;;  %v7168_v12 = vld [vmem:[#allocation9 + $0x100] sm:$0xff]  ;;  %v7171_v43 = vld [vmem:[#allocation9 + $0x110] sm:$0xff] }
 0x4de   :  { %1825 = vmatpush1.msra.mxu0 %v7156_v3  ;;  %1896 = vmatpush1.msra.mxu1 %v7159_v62  ;;  %10359 = vst [vmem:[#allocation139_spill] sm:$0xff] %v7168_v12  ;;  %10360 = vst [vmem:[#allocation140_spill] sm:$0xff] %v7171_v43  ;;  %v7174_v3 = vld [vmem:[#allocation9 + $0xe8] sm:$0xff]  ;;  %v7177_v62 = vld [vmem:[#allocation9 + $0xf8] sm:$0xff] }
 0x4df   :  { %1826 = vmatprep.subr.mxu0 %v7162_v6  ;;  %1897 = vmatprep.subr.mxu1 %v7165_v8  ;;  %10361 = vst [vmem:[#allocation141_spill] sm:$0xff] %v7174_v3  ;;  %10362 = vst [vmem:[#allocation142_spill] sm:$0xff] %v7177_v62  ;;  %v7180_v6 = vld [vmem:[#allocation9 + $0xe0] sm:$0xff]  ;;  %v7183_v8 = vld [vmem:[#allocation9 + $0xf0] sm:$0xff] }
 0x4e0   :  { %1827 = vmatpush1.msra.mxu0 %v7168_v12  ;;  %1898 = vmatpush1.msra.mxu1 %v7171_v43  ;;  %10363 = vst [vmem:[#allocation143_spill] sm:$0xff] %v7180_v6  ;;  %10364 = vst [vmem:[#allocation144_spill] sm:$0xff] %v7183_v8  ;;  %v7186_v12 = vld [vmem:[#allocation9 + $0xc8] sm:$0xff]  ;;  %v7189_v43 = vld [vmem:[#allocation9 + $0xd8] sm:$0xff] }
 0x4e1   :  { %1828 = vmatprep.subr.mxu0 %v7174_v3  ;;  %1899 = vmatprep.subr.mxu1 %v7177_v62  ;;  %10365 = vst [vmem:[#allocation145_spill] sm:$0xff] %v7186_v12  ;;  %10366 = vst [vmem:[#allocation146_spill] sm:$0xff] %v7189_v43  ;;  %v7192_v3 = vld [vmem:[#allocation9 + $0xc0] sm:$0xff]  ;;  %v7195_v62 = vld [vmem:[#allocation9 + $0xd0] sm:$0xff] }
 0x4e2   :  { %1829 = vmatpush1.msra.mxu0 %v7180_v6  ;;  %1900 = vmatpush1.msra.mxu1 %v7183_v8  ;;  %10367 = vst [vmem:[#allocation147_spill] sm:$0xff] %v7192_v3  ;;  %10368 = vst [vmem:[#allocation148_spill] sm:$0xff] %v7195_v62  ;;  %v7198_v6 = vld [vmem:[#allocation9 + $0xa8] sm:$0xff]  ;;  %v7201_v8 = vld [vmem:[#allocation9 + $0xb8] sm:$0xff] }
 0x4e3   :  { %1830 = vmatprep.subr.mxu0 %v7186_v12  ;;  %1901 = vmatprep.subr.mxu1 %v7189_v43  ;;  %10369 = vst [vmem:[#allocation149_spill] sm:$0xff] %v7198_v6  ;;  %10370 = vst [vmem:[#allocation150_spill] sm:$0xff] %v7201_v8  ;;  %v7204_v12 = vld [vmem:[#allocation9 + $0xa0] sm:$0xff]  ;;  %v7207_v43 = vld [vmem:[#allocation9 + $0xb0] sm:$0xff] }
 0x4e4   :  { %1831 = vmatpush1.msra.mxu0 %v7192_v3  ;;  %1902 = vmatpush1.msra.mxu1 %v7195_v62  ;;  %10371 = vst [vmem:[#allocation151_spill] sm:$0xff] %v7204_v12  ;;  %10372 = vst [vmem:[#allocation152_spill] sm:$0xff] %v7207_v43  ;;  %v7210_v3 = vld [vmem:[#allocation9 + $0x88] sm:$0xff]  ;;  %v7213_v62 = vld [vmem:[#allocation9 + $0x98] sm:$0xff] }
 0x4e5   :  { %1832 = vmatprep.subr.mxu0 %v7198_v6  ;;  %1903 = vmatprep.subr.mxu1 %v7201_v8  ;;  %10373 = vst [vmem:[#allocation153_spill] sm:$0xff] %v7210_v3  ;;  %10374 = vst [vmem:[#allocation154_spill] sm:$0xff] %v7213_v62  ;;  %v7216_v6 = vld [vmem:[#allocation9 + $0x80] sm:$0xff]  ;;  %v7219_v8 = vld [vmem:[#allocation9 + $0x90] sm:$0xff] }
 0x4e6   :  { %1833 = vmatpush1.msra.mxu0 %v7204_v12  ;;  %1904 = vmatpush1.msra.mxu1 %v7207_v43  ;;  %10375 = vst [vmem:[#allocation155_spill] sm:$0xff] %v7216_v6  ;;  %10376 = vst [vmem:[#allocation156_spill] sm:$0xff] %v7219_v8  ;;  %v7222_v12 = vld [vmem:[#allocation9 + $0x68] sm:$0xff]  ;;  %v7225_v43 = vld [vmem:[#allocation9 + $0x78] sm:$0xff] }
 0x4e7   :  { %1834 = vmatprep.subr.mxu0 %v7210_v3  ;;  %1905 = vmatprep.subr.mxu1 %v7213_v62  ;;  %10377 = vst [vmem:[#allocation157_spill] sm:$0xff] %v7222_v12  ;;  %10378 = vst [vmem:[#allocation158_spill] sm:$0xff] %v7225_v43  ;;  %v7228_v3 = vld [vmem:[#allocation9 + $0x60] sm:$0xff]  ;;  %v7231_v62 = vld [vmem:[#allocation9 + $0x70] sm:$0xff] }
 0x4e8   :  { %1835 = vmatpush1.msra.mxu0 %v7216_v6  ;;  %1906 = vmatpush1.msra.mxu1 %v7219_v8  ;;  %10379 = vst [vmem:[#allocation159_spill] sm:$0xff] %v7228_v3  ;;  %10380 = vst [vmem:[#allocation160_spill] sm:$0xff] %v7231_v62  ;;  %v7234_v6 = vld [vmem:[#allocation9 + $0x48] sm:$0xff]  ;;  %v7237_v8 = vld [vmem:[#allocation9 + $0x58] sm:$0xff] }
 0x4e9   :  { %1836 = vmatprep.subr.mxu0 %v7222_v12  ;;  %1907 = vmatprep.subr.mxu1 %v7225_v43  ;;  %10381 = vst [vmem:[#allocation161_spill] sm:$0xff] %v7234_v6  ;;  %10382 = vst [vmem:[#allocation162_spill] sm:$0xff] %v7237_v8  ;;  %v7240_v12 = vld [vmem:[#allocation9 + $0x40] sm:$0xff]  ;;  %v7243_v43 = vld [vmem:[#allocation9 + $0x50] sm:$0xff] }
 0x4ea   :  { %1837 = vmatpush1.msra.mxu0 %v7228_v3  ;;  %1908 = vmatpush1.msra.mxu1 %v7231_v62  ;;  %10383 = vst [vmem:[#allocation163_spill] sm:$0xff] %v7240_v12  ;;  %10384 = vst [vmem:[#allocation164_spill] sm:$0xff] %v7243_v43  ;;  %v7246_v3 = vld [vmem:[#allocation9 + $0x28] sm:$0xff]  ;;  %v7249_v62 = vld [vmem:[#allocation9 + $0x38] sm:$0xff] }
 0x4eb   :  { %1838 = vmatprep.subr.mxu0 %v7234_v6  ;;  %1909 = vmatprep.subr.mxu1 %v7237_v8  ;;  %10385 = vst [vmem:[#allocation172_spill] sm:$0xff] %v7246_v3  ;;  %10386 = vst [vmem:[#allocation173_spill] sm:$0xff] %v7249_v62  ;;  %v7252_v6 = vld [vmem:[#allocation9 + $0x20] sm:$0xff]  ;;  %v7255_v8 = vld [vmem:[#allocation9 + $0x30] sm:$0xff] }
 0x4ec   :  { %1839 = vmatpush1.msra.mxu0 %v7240_v12  ;;  %1910 = vmatpush1.msra.mxu1 %v7243_v43  ;;  %10387 = vst [vmem:[#allocation174_spill] sm:$0xff] %v7252_v6  ;;  %10388 = vst [vmem:[#allocation175_spill] sm:$0xff] %v7255_v8  ;;  %v7258_v12 = vld [vmem:[#allocation9 + $0x8] sm:$0xff]  ;;  %v7261_v43 = vld [vmem:[#allocation9 + $0x18] sm:$0xff] }
 0x4ed   :  { %1840 = vmatprep.subr.mxu0 %v7246_v3  ;;  %1911 = vmatprep.subr.mxu1 %v7249_v62  ;;  %10389 = vst [vmem:[#allocation176_spill] sm:$0xff] %v7258_v12  ;;  %10390 = vst [vmem:[#allocation177_spill] sm:$0xff] %v7261_v43  ;;  %v7264_v3 = vld [vmem:[#allocation9] sm:$0xff]  ;;  %v7268_v62 = vld [vmem:[#allocation9 + $0x10] sm:$0xff] }
 0x4ee   :  { %1841 = vmatpush1.msra.mxu0 %v7252_v6  ;;  %1912 = vmatpush1.msra.mxu1 %v7255_v8  ;;  %10391 = vst [vmem:[#allocation178_spill] sm:$0xff] %v7264_v3  ;;  %10392 = vst [vmem:[#allocation179_spill] sm:$0xff] %v7268_v62 }
 0x4ef   :  { %1842 = vmatprep.subr.mxu0 %v7258_v12  ;;  %1913 = vmatprep.subr.mxu1 %v7261_v43  ;;  %v1638_v43 = vrot.slane %v10235_v36, 2  ;;  %v1641_v36 = vrot.slane %v6413_v1, 2 }
 0x4f0   :  { %1843 = vmatpush1.msra.mxu0 %v7264_v3  ;;  %1876 = vmatprep.mubr.f32.mxu0 %v10096_v29 }
 0x4f1   :  { %1914 = vmatpush1.msra.mxu1 %v7268_v62  ;;  %1947 = vmatprep.mubr.f32.mxu1 %v10096_v29 }
 0x4f2   :  { %1982 = vmatprep.subr.mxu0 %v6652_v32  ;;  %2053 = vmatprep.subr.mxu1 %v6655_v52 }
 0x56f   :  { %v7274_v12 = vpop.f32.mrf.mxu0  ;;  %v7280_v7 = vpop.f32.mrf.mxu1 }
 0x571   :  { %v7276_v8 = vpop.f32.mrf.mxu0  ;;  %v7282_v32 = vpop.f32.mrf.mxu1 }
 0x590   :  { %v1712_v6 = vpop.f32.mrf.mxu0  ;;  %v1783_v52 = vpop.f32.mrf.mxu1 }
 0x591   :  { %v1713_v3 = vadd.f32 %v1712_v6, %v1638_v43  ;;  %v1784_v4 = vadd.f32 %v1783_v52, %v1640_v35 }
 0x592   :  { %v1714_v15 = vpop.f32.mrf.mxu0  ;;  %v1785_v54 = vpop.f32.mrf.mxu1 }
 0x593   :  { %v4580_v62 = vmul.f32 -1.442695, %v1713_v3  ;;  %v1715_v11 = vadd.f32 %v1714_v15, %v1639_v0  ;;  %v4582_v43 = vmul.f32 -1.442695, %v1784_v4  ;;  %v1786_v6 = vadd.f32 %v1785_v54, %v1641_v36 }
 0x595   :  { %4747 = vpow2.f32 %v4580_v62  ;;  %v4581_v56 = vmul.f32 -1.442695, %v1715_v11 }
 0x597   :  { %4749 = vpow2.f32 %v4581_v56 }
 0x598   :  { %4751 = vpow2.f32 %v4582_v43 }
 0x599   :  { %4753 = vtanh.f32 %v1786_v6 }
 0x5a2   :  { %v4748_v41 = vpop.eup %4747 }
 0x5a3   :  { %v1797_v33 = vadd.f32 1.0, %v4748_v41 }
 0x5a4   :  { %v4750_v50 = vpop.eup %4749 }
 0x5a5   :  { %4755 = vrcp.f32 %v1797_v33  ;;  %v1798_v15 = vadd.f32 1.0, %v4750_v50  ;;  %v4752_v11 = vpop.eup %4751 }
 0x5a6   :  { %v4754_v3 = vpop.eup %4753  ;;  %v1799_v53 = vadd.f32 1.0, %v4752_v11 }
 0x5a7   :  { %4757 = vrcp.f32 %v1798_v15 }
 0x5a8   :  { %4759 = vrcp.f32 %v1799_v53  ;;  %v10393_v53 = vld [vmem:[#allocation29_spill] sm:$0xff] }
 0x5b2   :  { %v4756_v56 = vpop.eup %4755 }
 0x5b3   :  { %v1808_v0 = vmul.f32 %v4756_v56, %v4754_v3 }
 0x5b4   :  { %v4758_v62 = vpop.eup %4757 }
 0x5b5   :  { %v1807_v35 = vmul.f32 %v4758_v62, %v6671_v2  ;;  %v4760_v36 = vpop.eup %4759  ;;  %v10394_v2 = vld [vmem:[#allocation21_spill] sm:$0xff] }
 0x5b7   :  { %v7287_v52 = vadd.f32 %v1808_v0, %v1807_v35 }
 0x5b9   :  { %4761 = vtanh.f32 %v7287_v52 }
 0x5c6   :  { %v4762_v41 = vpop.eup %4761 }
 0x5c7   :  { %v7290_v54 = vmul.f32 %v4762_v41, %v4760_v36 }
 0x5c9   :  { %1877 = vmatmul.mubr.f32.vlgmr.msra.gmra.mxu0 %v7290_v54  ;;  %1948 = vmatmul.mubr.f32.vlgmr.msra.gmra.mxu1 %v7290_v54 }
 0x5ca   :  { %1983 = vmatpush1.msra.mxu0 %v6678_v10  ;;  %2054 = vmatpush1.msra.mxu1 %v6681_v13  ;;  %v10395_v10 = vld [vmem:[#allocation31_spill] sm:$0xff]  ;;  %v10396_v13 = vld [vmem:[#allocation22_spill] sm:$0xff] }
 0x5cb   :  { %1984 = vmatprep.subr.mxu0 %v6684_v9  ;;  %2055 = vmatprep.subr.mxu1 %v6687_v14  ;;  %v10397_v9 = vld [vmem:[#allocation33_spill] sm:$0xff]  ;;  %v10398_v14 = vld [vmem:[#allocation23_spill] sm:$0xff] }
 0x5cc   :  { %1985 = vmatpush1.msra.mxu0 %v6690_v16  ;;  %2056 = vmatpush1.msra.mxu1 %v6693_v18  ;;  %v10399_v16 = vld [vmem:[#allocation35_spill] sm:$0xff]  ;;  %v10400_v18 = vld [vmem:[#allocation24_spill] sm:$0xff] }
 0x5cd   :  { %1986 = vmatprep.subr.mxu0 %v6696_v20  ;;  %2057 = vmatprep.subr.mxu1 %v6699_v21  ;;  %v10401_v20 = vld [vmem:[#allocation37_spill] sm:$0xff] }
 0x5ce   :  { %1987 = vmatpush1.msra.mxu0 %v6702_v22  ;;  %2058 = vmatpush1.msra.mxu1 %v6705_v23  ;;  %v10402_v21 = vld [vmem:[#allocation25_spill] sm:$0xff]  ;;  %v10403_v22 = vld [vmem:[#allocation39_spill] sm:$0xff]  ;;  %v10404_v23 = vld [vmem:[#allocation26_spill] sm:$0xff] }
 0x5cf   :  { %1988 = vmatprep.subr.mxu0 %v6708_v24  ;;  %2059 = vmatprep.subr.mxu1 %v6711_v25  ;;  %v10405_v24 = vld [vmem:[#allocation41_spill] sm:$0xff]  ;;  %v10406_v25 = vld [vmem:[#allocation27_spill] sm:$0xff] }
 0x5d0   :  { %1989 = vmatpush1.msra.mxu0 %v6714_v26  ;;  %2060 = vmatpush1.msra.mxu1 %v6717_v27  ;;  %v10407_v26 = vld [vmem:[#allocation43_spill] sm:$0xff]  ;;  %v10408_v27 = vld [vmem:[#allocation30_spill] sm:$0xff] }
 0x5d1   :  { %1990 = vmatprep.subr.mxu0 %v6720_v28  ;;  %2061 = vmatprep.subr.mxu1 %v6723_v30  ;;  %v10409_v28 = vld [vmem:[#allocation46_spill] sm:$0xff]  ;;  %v10410_v30 = vld [vmem:[#allocation165_spill] sm:$0xff] }
 0x5d2   :  { %1991 = vmatpush1.msra.mxu0 %v6726_v31  ;;  %2062 = vmatpush1.msra.mxu1 %v6729_v38  ;;  %v10411_v31 = vld [vmem:[#allocation166_spill] sm:$0xff]  ;;  %v10412_v38 = vld [vmem:[#allocation169_spill] sm:$0xff] }
 0x5d3   :  { %1992 = vmatprep.subr.mxu0 %v6732_v39  ;;  %2063 = vmatprep.subr.mxu1 %v6735_v40  ;;  %v10413_v39 = vld [vmem:[#allocation170_spill] sm:$0xff]  ;;  %v10414_v40 = vld [vmem:[#allocation32_spill] sm:$0xff] }
 0x5d4   :  { %1993 = vmatpush1.msra.mxu0 %v6738_v42  ;;  %2064 = vmatpush1.msra.mxu1 %v6741_v44  ;;  %v10415_v42 = vld [vmem:[#allocation48_spill] sm:$0xff]  ;;  %v10416_v44 = vld [vmem:[#allocation34_spill] sm:$0xff] }
 0x5d5   :  { %1994 = vmatprep.subr.mxu0 %v6744_v45  ;;  %2065 = vmatprep.subr.mxu1 %v6747_v46  ;;  %v10417_v45 = vld [vmem:[#allocation50_spill] sm:$0xff]  ;;  %v10418_v46 = vld [vmem:[#allocation36_spill] sm:$0xff] }
 0x5d6   :  { %1995 = vmatpush1.msra.mxu0 %v6750_v47  ;;  %2066 = vmatpush1.msra.mxu1 %v6753_v51  ;;  %v10419_v47 = vld [vmem:[#allocation52_spill] sm:$0xff]  ;;  %v10420_v51 = vld [vmem:[#allocation38_spill] sm:$0xff] }
 0x5d7   :  { %1996 = vmatprep.subr.mxu0 %v6756_v55  ;;  %2067 = vmatprep.subr.mxu1 %v6759_v57  ;;  %v10421_v55 = vld [vmem:[#allocation54_spill] sm:$0xff]  ;;  %v10422_v57 = vld [vmem:[#allocation40_spill] sm:$0xff] }
 0x5d8   :  { %1997 = vmatpush1.msra.mxu0 %v6762_v59  ;;  %2068 = vmatpush1.msra.mxu1 %v6765_v63  ;;  %v10423_v59 = vld [vmem:[#allocation56_spill] sm:$0xff] }
 0x5d9   :  { %1998 = vmatprep.subr.mxu0 %v6768_v5  ;;  %2069 = vmatprep.subr.mxu1 %v6771_v17 }
 0x5da   :  { %1999 = vmatpush1.msra.mxu0 %v6774_v19  ;;  %2070 = vmatpush1.msra.mxu1 %v10393_v53  ;;  %v10424_v19 = vld [vmem:[#allocation28_spill] sm:$0xff] }
 0x5db   :  { %2000 = vmatprep.subr.mxu0 %v10394_v2  ;;  %2071 = vmatprep.subr.mxu1 %v10395_v10 }
 0x5dc   :  { %2001 = vmatpush1.msra.mxu0 %v10396_v13  ;;  %2072 = vmatpush1.msra.mxu1 %v10397_v9 }
 0x5dd   :  { %2002 = vmatprep.subr.mxu0 %v10398_v14  ;;  %2073 = vmatprep.subr.mxu1 %v10399_v16 }
 0x5de   :  { %2003 = vmatpush1.msra.mxu0 %v10400_v18  ;;  %2074 = vmatpush1.msra.mxu1 %v10401_v20  ;;  %v4413_v20 = vrot.slane %v6884_v60, 7  ;;  %v10428_v60 = vld [vmem:[#allocation44_spill] sm:$0xff] }
 0x5df   :  { %2004 = vmatprep.subr.mxu0 %v10402_v21  ;;  %2075 = vmatprep.subr.mxu1 %v10403_v22 }
 0x5e0   :  { %2005 = vmatpush1.msra.mxu0 %v10404_v23  ;;  %2076 = vmatpush1.msra.mxu1 %v10405_v24  ;;  %v10425_v23 = vld [vmem:[#allocation20_spill] sm:$0xff] }
 0x5e1   :  { %2006 = vmatprep.subr.mxu0 %v10406_v25  ;;  %2077 = vmatprep.subr.mxu1 %v10407_v26  ;;  %v4434_v24 = vsel %vm4433_vm1, %v10425_v23, %v4413_v20  ;;  %v10427_v25 = vld [vmem:[#allocation58_spill] sm:$0xff]  ;;  %v10475_v20 = vld [vmem:[#allocation99_spill] sm:$0xff]  ;;  %v10478_v23 = vld [vmem:[#allocation101_spill] sm:$0xff] }
 0x5e2   :  { %2007 = vmatpush1.msra.mxu0 %v10408_v27  ;;  %2078 = vmatpush1.msra.mxu1 %v10409_v28  ;;  %v10429_v27 = vld [vmem:[#allocation60_spill] sm:$0xff]  ;;  %v10430_v28 = vld [vmem:[#allocation45_spill] sm:$0xff] }
 0x5e3   :  { %2008 = vmatprep.subr.mxu0 %v10410_v30  ;;  %2079 = vmatprep.subr.mxu1 %v10411_v31  ;;  %v10431_v30 = vld [vmem:[#allocation62_spill] sm:$0xff]  ;;  %v10432_v31 = vld [vmem:[#allocation47_spill] sm:$0xff] }
 0x5e4   :  { %2009 = vmatpush1.msra.mxu0 %v10412_v38  ;;  %2080 = vmatpush1.msra.mxu1 %v10413_v39  ;;  %v10435_v38 = vld [vmem:[#allocation66_spill] sm:$0xff]  ;;  %v10436_v39 = vld [vmem:[#allocation51_spill] sm:$0xff] }
 0x5e5   :  { %2010 = vmatprep.subr.mxu0 %v10414_v40  ;;  %2081 = vmatprep.subr.mxu1 %v10415_v42  ;;  %v10437_v40 = vld [vmem:[#allocation68_spill] sm:$0xff]  ;;  %v10438_v42 = vld [vmem:[#allocation53_spill] sm:$0xff] }
 0x5e6   :  { %2011 = vmatpush1.msra.mxu0 %v10416_v44  ;;  %2082 = vmatpush1.msra.mxu1 %v10417_v45  ;;  %v10439_v44 = vld [vmem:[#allocation70_spill] sm:$0xff]  ;;  %v10440_v45 = vld [vmem:[#allocation55_spill] sm:$0xff] }
 0x5e7   :  { %2012 = vmatprep.subr.mxu0 %v10418_v46  ;;  %2083 = vmatprep.subr.mxu1 %v10419_v47  ;;  %v10441_v46 = vld [vmem:[#allocation72_spill] sm:$0xff]  ;;  %v10442_v47 = vld [vmem:[#allocation57_spill] sm:$0xff] }
 0x5e8   :  { %2013 = vmatpush1.msra.mxu0 %v10420_v51  ;;  %2084 = vmatpush1.msra.mxu1 %v10421_v55  ;;  %v10443_v51 = vld [vmem:[#allocation74_spill] sm:$0xff]  ;;  %v10444_v55 = vld [vmem:[#allocation59_spill] sm:$0xff] }
 0x5e9   :  { %2046 = vmatprep.mubr.f32.mxu0 %v10096_v29  ;;  %2117 = vmatprep.mubr.f32.mxu1 %v10096_v29 }
 0x5ea   :  { %2132 = vmatprep.subr.mxu0 %v10422_v57  ;;  %2203 = vmatprep.subr.mxu1 %v10423_v59  ;;  %v10445_v57 = vld [vmem:[#allocation76_spill] sm:$0xff]  ;;  %v10446_v59 = vld [vmem:[#allocation61_spill] sm:$0xff] }
 0x689   :  { %v1878_v63 = vpop.f32.mrf.mxu0  ;;  %v1949_v6 = vpop.f32.mrf.mxu1 }
 0x68a   :  { %v1879_v5 = vadd.f32 %v1878_v63, %v7274_v12  ;;  %v1950_v11 = vadd.f32 %v1949_v6, %v7280_v7  ;;  %v10447_v63 = vld [vmem:[#allocation78_spill] sm:$0xff]  ;;  %v10454_v6 = vld [vmem:[#allocation69_spill] sm:$0xff] }
 0x68b   :  { %v1880_v17 = vpop.f32.mrf.mxu0  ;;  %v1951_v3 = vpop.f32.mrf.mxu1 }
 0x68c   :  { %v1954_v50 = vadd.f32 %v1879_v5, %v10424_v19  ;;  %v1881_v33 = vadd.f32 %v1880_v17, %v7276_v8  ;;  %v1956_v56 = vadd.f32 %v1950_v11, %v6503_v49  ;;  %v1952_v0 = vadd.f32 %v1951_v3, %v7282_v32  ;;  %v10448_v5 = vld [vmem:[#allocation63_spill] sm:$0xff]  ;;  %v10449_v17 = vld [vmem:[#allocation80_spill] sm:$0xff] }
 0x68d   :  { %v10456_v11 = vld [vmem:[#allocation71_spill] sm:$0xff]  ;;  %v10457_v3 = vld [vmem:[#allocation88_spill] sm:$0xff] }
 0x68e   :  { %v4583_v4 = vmul.f32 -1.442695, %v1954_v50  ;;  %v1955_v43 = vadd.f32 %v1881_v33, %v6495_v37  ;;  %v4585_v12 = vmul.f32 -1.442695, %v1956_v56  ;;  %v1957_v35 = vadd.f32 %v1952_v0, %v6509_v61  ;;  %v10450_v50 = vld [vmem:[#allocation65_spill] sm:$0xff]  ;;  %v10451_v33 = vld [vmem:[#allocation82_spill] sm:$0xff] }
 0x68f   :  { %v10458_v56 = vld [vmem:[#allocation73_spill] sm:$0xff]  ;;  %v10459_v0 = vld [vmem:[#allocation90_spill] sm:$0xff] }
 0x690   :  { %4763 = vpow2.f32 %v4583_v4  ;;  %v4584_v15 = vmul.f32 -1.442695, %v1955_v43  ;;  %v10452_v4 = vld [vmem:[#allocation67_spill] sm:$0xff]  ;;  %v10453_v43 = vld [vmem:[#allocation84_spill] sm:$0xff] }
 0x692   :  { %4765 = vpow2.f32 %v4584_v15  ;;  %v10455_v15 = vld [vmem:[#allocation86_spill] sm:$0xff] }
 0x693   :  { %4767 = vpow2.f32 %v4585_v12  ;;  %v10460_v12 = vld [vmem:[#allocation75_spill] sm:$0xff] }
 0x69d   :  { %v4764_v62 = vpop.eup %4763 }
 0x69e   :  { %v1967_v36 = vadd.f32 1.0, %v4764_v62  ;;  %v10461_v62 = vld [vmem:[#allocation92_spill] sm:$0xff] }
 0x69f   :  { %v4766_v8 = vpop.eup %4765 }
 0x6a0   :  { %4769 = vrcp.f32 %v1967_v36  ;;  %v1968_v41 = vadd.f32 1.0, %v4766_v8  ;;  %v4768_v53 = vpop.eup %4767  ;;  %v10463_v36 = vld [vmem:[#allocation93_spill] sm:$0xff]  ;;  %v10464_v8 = vld [vmem:[#allocation79_spill] sm:$0xff] }
 0x6a1   :  { %4771 = vtanh.f32 %v1957_v35  ;;  %v1969_v13 = vadd.f32 1.0, %v4768_v53  ;;  %v10462_v35 = vld [vmem:[#allocation77_spill] sm:$0xff] }
 0x6a2   :  { %4773 = vrcp.f32 %v1968_v41  ;;  %v10465_v41 = vld [vmem:[#allocation94_spill] sm:$0xff]  ;;  %v10466_v53 = vld [vmem:[#allocation81_spill] sm:$0xff] }
 0x6a3   :  { %4775 = vrcp.f32 %v1969_v13  ;;  %v10470_v13 = vld [vmem:[#allocation85_spill] sm:$0xff] }
 0x6ad   :  { %v4770_v2 = vpop.eup %4769 }
 0x6ae   :  { %v4772_v10 = vpop.eup %4771 }
 0x6af   :  { %v4774_v7 = vpop.eup %4773  ;;  %v1978_v14 = vmul.f32 %v4772_v10, %v4770_v2  ;;  %v10467_v2 = vld [vmem:[#allocation95_spill] sm:$0xff] }
 0x6b0   :  { %v1977_v9 = vmul.f32 %v4774_v7, %v6881_v48  ;;  %v4776_v16 = vpop.eup %4775  ;;  %v10426_v48 = vld [vmem:[#allocation42_spill] sm:$0xff]  ;;  %v10468_v10 = vld [vmem:[#allocation83_spill] sm:$0xff]  ;;  %v10469_v7 = vld [vmem:[#allocation96_spill] sm:$0xff] }
 0x6b2   :  { %v7369_v32 = vadd.f32 %v1978_v14, %v1977_v9  ;;  %v10471_v9 = vld [vmem:[#allocation97_spill] sm:$0xff]  ;;  %v10472_v14 = vld [vmem:[#allocation87_spill] sm:$0xff] }
 0x6b4   :  { %4777 = vtanh.f32 %v7369_v32 }
 0x6c1   :  { %v4778_v18 = vpop.eup %4777 }
 0x6c2   :  { %v1981_v21 = vmul.f32 %v4778_v18, %v4776_v16  ;;  %v10473_v16 = vld [vmem:[#allocation98_spill] sm:$0xff]  ;;  %v10474_v18 = vld [vmem:[#allocation89_spill] sm:$0xff] }
 0x6c4   :  { %2047 = vmatmul.mubr.f32.vlgmr.msra.gmra.mxu0 %v1981_v21  ;;  %v4416_v22 = vrot.slane %v1981_v21, 6  ;;  %2118 = vmatmul.mubr.f32.vlgmr.msra.gmra.mxu1 %v1981_v21  ;;  %v10476_v21 = vld [vmem:[#allocation91_spill] sm:$0xff] }
 0x6c5   :  { %2133 = vmatpush1.msra.mxu0 %v6888_v34  ;;  %2204 = vmatpush1.msra.mxu1 %v6891_v58  ;;  %v10433_v34 = vld [vmem:[#allocation64_spill] sm:$0xff]  ;;  %v10434_v58 = vld [vmem:[#allocation49_spill] sm:$0xff] }
 0x6c6   :  { %2134 = vmatprep.subr.mxu0 %v10426_v48  ;;  %2205 = vmatprep.subr.mxu1 %v10427_v25  ;;  %v7380_v26 = vsel %vm4435_vm2, %v4434_v24, %v4416_v22  ;;  %v10477_v22 = vld [vmem:[#allocation100_spill] sm:$0xff]  ;;  %v10479_v24 = vld [vmem:[#allocation102_spill] sm:$0xff]  ;;  %v10480_v48 = vld [vmem:[#allocation103_spill] sm:$0xff] }
 0x6c7   :  { %2135 = vmatpush1.msra.mxu0 %v10428_v60  ;;  %2206 = vmatpush1.msra.mxu1 %v10429_v27  ;;  %v10481_v25 = vld [vmem:[#allocation104_spill] sm:$0xff]  ;;  %v10482_v60 = vld [vmem:[#allocation105_spill] sm:$0xff]  ;;  %v10483_v27 = vld [vmem:[#allocation106_spill] sm:$0xff] }
 0x6c8   :  { %2136 = vmatprep.subr.mxu0 %v10430_v28  ;;  %2207 = vmatprep.subr.mxu1 %v10431_v30  ;;  %v10484_v28 = vld [vmem:[#allocation107_spill] sm:$0xff]  ;;  %v10485_v30 = vld [vmem:[#allocation108_spill] sm:$0xff] }
 0x6c9   :  { %2137 = vmatpush1.msra.mxu0 %v10432_v31  ;;  %2208 = vmatpush1.msra.mxu1 %v10433_v34  ;;  %v10486_v31 = vld [vmem:[#allocation109_spill] sm:$0xff]  ;;  %v10487_v34 = vld [vmem:[#allocation110_spill] sm:$0xff] }
 0x6ca   :  { %2138 = vmatprep.subr.mxu0 %v10434_v58  ;;  %2209 = vmatprep.subr.mxu1 %v10435_v38  ;;  %v10488_v58 = vld [vmem:[#allocation111_spill] sm:$0xff]  ;;  %v10489_v38 = vld [vmem:[#allocation112_spill] sm:$0xff] }
 0x6cb   :  { %2139 = vmatpush1.msra.mxu0 %v10436_v39  ;;  %2210 = vmatpush1.msra.mxu1 %v10437_v40  ;;  %v10490_v39 = vld [vmem:[#allocation113_spill] sm:$0xff]  ;;  %v10491_v40 = vld [vmem:[#allocation114_spill] sm:$0xff] }
 0x6cc   :  { %2140 = vmatprep.subr.mxu0 %v10438_v42  ;;  %2211 = vmatprep.subr.mxu1 %v10439_v44  ;;  %v10492_v42 = vld [vmem:[#allocation115_spill] sm:$0xff]  ;;  %v10493_v44 = vld [vmem:[#allocation116_spill] sm:$0xff] }
 0x6cd   :  { %2141 = vmatpush1.msra.mxu0 %v10440_v45  ;;  %2212 = vmatpush1.msra.mxu1 %v10441_v46  ;;  %v10494_v45 = vld [vmem:[#allocation117_spill] sm:$0xff]  ;;  %v10495_v46 = vld [vmem:[#allocation118_spill] sm:$0xff] }
 0x6ce   :  { %2142 = vmatprep.subr.mxu0 %v10442_v47  ;;  %2213 = vmatprep.subr.mxu1 %v10443_v51  ;;  %v10497_v47 = vld [vmem:[#allocation120_spill] sm:$0xff]  ;;  %v10498_v51 = vld [vmem:[#allocation121_spill] sm:$0xff] }
 0x6cf   :  { %2143 = vmatpush1.msra.mxu0 %v10444_v55  ;;  %2214 = vmatpush1.msra.mxu1 %v10445_v57  ;;  %v10499_v55 = vld [vmem:[#allocation122_spill] sm:$0xff]  ;;  %v10500_v57 = vld [vmem:[#allocation123_spill] sm:$0xff] }
 0x6d0   :  { %2144 = vmatprep.subr.mxu0 %v10446_v59  ;;  %2215 = vmatprep.subr.mxu1 %v10447_v63  ;;  %v10501_v59 = vld [vmem:[#allocation124_spill] sm:$0xff]  ;;  %v10502_v63 = vld [vmem:[#allocation125_spill] sm:$0xff] }
 0x6d1   :  { %2145 = vmatpush1.msra.mxu0 %v10448_v5  ;;  %2216 = vmatpush1.msra.mxu1 %v10449_v17  ;;  %v10503_v5 = vld [vmem:[#allocation126_spill] sm:$0xff]  ;;  %v10504_v17 = vld [vmem:[#allocation127_spill] sm:$0xff] }
 0x6d2   :  { %2146 = vmatprep.subr.mxu0 %v10450_v50  ;;  %2217 = vmatprep.subr.mxu1 %v10451_v33  ;;  %v10505_v50 = vld [vmem:[#allocation128_spill] sm:$0xff]  ;;  %v10506_v33 = vld [vmem:[#allocation129_spill] sm:$0xff] }
 0x6d3   :  { %2147 = vmatpush1.msra.mxu0 %v10452_v4  ;;  %2218 = vmatpush1.msra.mxu1 %v10453_v43  ;;  %v10507_v4 = vld [vmem:[#allocation130_spill] sm:$0xff]  ;;  %v10508_v43 = vld [vmem:[#allocation131_spill] sm:$0xff] }
 0x6d4   :  { %2148 = vmatprep.subr.mxu0 %v10454_v6  ;;  %2219 = vmatprep.subr.mxu1 %v10455_v15  ;;  %v10509_v6 = vld [vmem:[#allocation132_spill] sm:$0xff]  ;;  %v10510_v15 = vld [vmem:[#allocation133_spill] sm:$0xff] }
 0x6d5   :  { %2149 = vmatpush1.msra.mxu0 %v10456_v11  ;;  %2220 = vmatpush1.msra.mxu1 %v10457_v3  ;;  %v10511_v11 = vld [vmem:[#allocation134_spill] sm:$0xff]  ;;  %v10512_v3 = vld [vmem:[#allocation135_spill] sm:$0xff] }
 0x6d6   :  { %2150 = vmatprep.subr.mxu0 %v10458_v56  ;;  %2221 = vmatprep.subr.mxu1 %v10459_v0  ;;  %v10513_v56 = vld [vmem:[#allocation136_spill] sm:$0xff]  ;;  %v10514_v0 = vld [vmem:[#allocation137_spill] sm:$0xff] }
 0x6d7   :  { %2151 = vmatpush1.msra.mxu0 %v10460_v12  ;;  %2222 = vmatpush1.msra.mxu1 %v10461_v62  ;;  %v10515_v12 = vld [vmem:[#allocation138_spill] sm:$0xff]  ;;  %v10516_v62 = vld [vmem:[#allocation139_spill] sm:$0xff] }
 0x6d8   :  { %2152 = vmatprep.subr.mxu0 %v10462_v35  ;;  %2223 = vmatprep.subr.mxu1 %v10463_v36  ;;  %v10517_v35 = vld [vmem:[#allocation140_spill] sm:$0xff]  ;;  %v10518_v36 = vld [vmem:[#allocation141_spill] sm:$0xff] }
 0x6d9   :  { %2153 = vmatpush1.msra.mxu0 %v10464_v8  ;;  %2224 = vmatpush1.msra.mxu1 %v10465_v41  ;;  %v10519_v8 = vld [vmem:[#allocation142_spill] sm:$0xff]  ;;  %v10520_v41 = vld [vmem:[#allocation143_spill] sm:$0xff] }
 0x6da   :  { %2154 = vmatprep.subr.mxu0 %v10466_v53  ;;  %2225 = vmatprep.subr.mxu1 %v10467_v2  ;;  %v10521_v53 = vld [vmem:[#allocation144_spill] sm:$0xff]  ;;  %v10522_v2 = vld [vmem:[#allocation145_spill] sm:$0xff] }
 0x6db   :  { %2155 = vmatpush1.msra.mxu0 %v10468_v10  ;;  %2226 = vmatpush1.msra.mxu1 %v10469_v7  ;;  %v10523_v10 = vld [vmem:[#allocation146_spill] sm:$0xff]  ;;  %v10524_v7 = vld [vmem:[#allocation147_spill] sm:$0xff] }
 0x6dc   :  { %2156 = vmatprep.subr.mxu0 %v10470_v13  ;;  %2227 = vmatprep.subr.mxu1 %v10471_v9  ;;  %v10525_v13 = vld [vmem:[#allocation148_spill] sm:$0xff]  ;;  %v10526_v9 = vld [vmem:[#allocation149_spill] sm:$0xff] }
 0x6dd   :  { %2157 = vmatpush1.msra.mxu0 %v10472_v14  ;;  %2228 = vmatpush1.msra.mxu1 %v10473_v16  ;;  %v10527_v14 = vld [vmem:[#allocation150_spill] sm:$0xff]  ;;  %v10528_v16 = vld [vmem:[#allocation151_spill] sm:$0xff] }
 0x6de   :  { %2158 = vmatprep.subr.mxu0 %v10474_v18  ;;  %2229 = vmatprep.subr.mxu1 %v10475_v20  ;;  %v10529_v18 = vld [vmem:[#allocation152_spill] sm:$0xff]  ;;  %v10530_v20 = vld [vmem:[#allocation153_spill] sm:$0xff] }
 0x6df   :  { %2159 = vmatpush1.msra.mxu0 %v10476_v21  ;;  %2230 = vmatpush1.msra.mxu1 %v10477_v22  ;;  %v10531_v21 = vld [vmem:[#allocation154_spill] sm:$0xff]  ;;  %v10532_v22 = vld [vmem:[#allocation155_spill] sm:$0xff] }
 0x6e0   :  { %2160 = vmatprep.subr.mxu0 %v10478_v23  ;;  %2231 = vmatprep.subr.mxu1 %v10479_v24  ;;  %v10533_v23 = vld [vmem:[#allocation156_spill] sm:$0xff]  ;;  %v10534_v24 = vld [vmem:[#allocation157_spill] sm:$0xff] }
 0x6e1   :  { %2161 = vmatpush1.msra.mxu0 %v10480_v48  ;;  %2232 = vmatpush1.msra.mxu1 %v10481_v25  ;;  %v10535_v48 = vld [vmem:[#allocation158_spill] sm:$0xff]  ;;  %v10536_v25 = vld [vmem:[#allocation159_spill] sm:$0xff] }
 0x6e2   :  { %2162 = vmatprep.subr.mxu0 %v10482_v60  ;;  %2233 = vmatprep.subr.mxu1 %v10483_v27  ;;  %v10537_v60 = vld [vmem:[#allocation160_spill] sm:$0xff]  ;;  %v10538_v27 = vld [vmem:[#allocation161_spill] sm:$0xff] }
 0x6e3   :  { %2163 = vmatpush1.msra.mxu0 %v10484_v28  ;;  %2196 = vmatprep.mubr.f32.mxu0 %v10096_v29  ;;  %v10539_v28 = vld [vmem:[#allocation162_spill] sm:$0xff] }
 0x6e4   :  { %2234 = vmatpush1.msra.mxu1 %v10485_v30  ;;  %2267 = vmatprep.mubr.f32.mxu1 %v10096_v29  ;;  %v10540_v30 = vld [vmem:[#allocation163_spill] sm:$0xff] }
 0x6e5   :  { %2197 = vmatmul.mubr.f32.vlgmr.msra.gmra.mxu0 %v7290_v54  ;;  %2268 = vmatmul.mubr.f32.vlgmr.msra.gmra.mxu1 %v7290_v54  ;;  %v10496_v54 = vld [vmem:[#allocation119_spill] sm:$0xff] }
 0x6e6   :  { %2298 = vmatprep.subr.mxu0 %v10486_v31  ;;  %2369 = vmatprep.subr.mxu1 %v10487_v34  ;;  %v10541_v31 = vld [vmem:[#allocation164_spill] sm:$0xff] }
 0x6e7   :  { %2299 = vmatpush1.msra.mxu0 %v10488_v58  ;;  %2370 = vmatpush1.msra.mxu1 %v10489_v38  ;;  %v10542_v34 = vld [vmem:[#allocation172_spill] sm:$0xff]  ;;  %v10543_v58 = vld [vmem:[#allocation173_spill] sm:$0xff]  ;;  %v10544_v38 = vld [vmem:[#allocation174_spill] sm:$0xff] }
 0x6e8   :  { %2300 = vmatprep.subr.mxu0 %v10490_v39  ;;  %2371 = vmatprep.subr.mxu1 %v10491_v40  ;;  %v10545_v39 = vld [vmem:[#allocation175_spill] sm:$0xff]  ;;  %v10546_v40 = vld [vmem:[#allocation176_spill] sm:$0xff] }
 0x6e9   :  { %2301 = vmatpush1.msra.mxu0 %v10492_v42  ;;  %2372 = vmatpush1.msra.mxu1 %v10493_v44  ;;  %v10547_v42 = vld [vmem:[#allocation177_spill] sm:$0xff]  ;;  %v10548_v44 = vld [vmem:[#allocation178_spill] sm:$0xff] }
 0x6ea   :  { %2302 = vmatprep.subr.mxu0 %v10494_v45  ;;  %2373 = vmatprep.subr.mxu1 %v10495_v46  ;;  %v10549_v45 = vld [vmem:[#allocation179_spill] sm:$0xff]  ;;  %v7510_v46 = vld [vmem:[#allocation10 + $0x1e8] sm:$0xff] }
 0x6eb   :  { %2303 = vmatpush1.msra.mxu0 %v10496_v54  ;;  %2374 = vmatpush1.msra.mxu1 %v10497_v47  ;;  %v7513_v54 = vld [vmem:[#allocation10 + $0x1f8] sm:$0xff] }
 0x6ec   :  { %2304 = vmatprep.subr.mxu0 %v10498_v51  ;;  %2375 = vmatprep.subr.mxu1 %v10499_v55  ;;  %v10550_v55 = vld [vmem:[#allocation167_spill] sm:$0xff] }
 0x6ed   :  { %2305 = vmatpush1.msra.mxu0 %v10500_v57  ;;  %2376 = vmatpush1.msra.mxu1 %v10501_v59  ;;  %v2124_v57 = vrot.slane %v10550_v55, 3 }
 0x6ee   :  { %2306 = vmatprep.subr.mxu0 %v10502_v63  ;;  %2377 = vmatprep.subr.mxu1 %v10503_v5  ;;  %v10551_v5 = vld [vmem:[#allocation168_spill] sm:$0xff] }
 0x6ef   :  { %2307 = vmatpush1.msra.mxu0 %v10504_v17  ;;  %2378 = vmatpush1.msra.mxu1 %v10505_v50  ;;  %v2125_v17 = vrot.slane %v10551_v5, 3 }
 0x6f0   :  { %2308 = vmatprep.subr.mxu0 %v10506_v33  ;;  %2379 = vmatprep.subr.mxu1 %v10507_v4 }
 0x6f1   :  { %2309 = vmatpush1.msra.mxu0 %v10508_v43  ;;  %2380 = vmatpush1.msra.mxu1 %v10509_v6 }
 0x6f2   :  { %2310 = vmatprep.subr.mxu0 %v10510_v15  ;;  %2381 = vmatprep.subr.mxu1 %v10511_v11 }
 0x6f3   :  { %2311 = vmatpush1.msra.mxu0 %v10512_v3  ;;  %2382 = vmatpush1.msra.mxu1 %v10513_v56  ;;  %v10552_v3 = vld [vmem:[#allocation171_spill] sm:$0xff] }
 0x6f4   :  { %2312 = vmatprep.subr.mxu0 %v10514_v0  ;;  %2383 = vmatprep.subr.mxu1 %v10515_v12  ;;  %v2126_v56 = vrot.slane %v10552_v3, 3 }
 0x6f5   :  { %2313 = vmatpush1.msra.mxu0 %v10516_v62  ;;  %2384 = vmatpush1.msra.mxu1 %v10517_v35  ;;  %v2127_v62 = vrot.slane %v6413_v1, 3 }
 0x6f6   :  { %2314 = vmatprep.subr.mxu0 %v10518_v36  ;;  %2385 = vmatprep.subr.mxu1 %v10519_v8 }
 0x6f7   :  { %2315 = vmatpush1.msra.mxu0 %v10520_v41  ;;  %2386 = vmatpush1.msra.mxu1 %v10521_v53 }
 0x6f8   :  { %2316 = vmatprep.subr.mxu0 %v10522_v2  ;;  %2387 = vmatprep.subr.mxu1 %v10523_v10 }
 0x6f9   :  { %2317 = vmatpush1.msra.mxu0 %v10524_v7  ;;  %2388 = vmatpush1.msra.mxu1 %v10525_v13 }
 0x6fa   :  { %2318 = vmatprep.subr.mxu0 %v10526_v9  ;;  %2389 = vmatprep.subr.mxu1 %v10527_v14 }
 0x6fb   :  { %2319 = vmatpush1.msra.mxu0 %v10528_v16  ;;  %2390 = vmatpush1.msra.mxu1 %v10529_v18 }
 0x6fc   :  { %2320 = vmatprep.subr.mxu0 %v10530_v20  ;;  %2391 = vmatprep.subr.mxu1 %v10531_v21 }
 0x6fd   :  { %2321 = vmatpush1.msra.mxu0 %v10532_v22  ;;  %2392 = vmatpush1.msra.mxu1 %v10533_v23 }
 0x6fe   :  { %2322 = vmatprep.subr.mxu0 %v10534_v24  ;;  %2393 = vmatprep.subr.mxu1 %v10535_v48  ;;  %v7536_v24 = vld [vmem:[#allocation10 + $0x1e0] sm:$0xff]  ;;  %v7539_v48 = vld [vmem:[#allocation10 + $0x1f0] sm:$0xff] }
 0x6ff   :  { %2323 = vmatpush1.msra.mxu0 %v10536_v25  ;;  %2394 = vmatpush1.msra.mxu1 %v10537_v60  ;;  %v7545_v25 = vld [vmem:[#allocation10 + $0x1d8] sm:$0xff]  ;;  %v7548_v60 = vld [vmem:[#allocation10 + $0x1c0] sm:$0xff] }
 0x700   :  { %2324 = vmatprep.subr.mxu0 %v10538_v27  ;;  %2395 = vmatprep.subr.mxu1 %v10539_v28  ;;  %v7551_v27 = vld [vmem:[#allocation10 + $0x1d0] sm:$0xff]  ;;  %v7554_v28 = vld [vmem:[#allocation10 + $0x1a8] sm:$0xff] }
 0x701   :  { %2325 = vmatpush1.msra.mxu0 %v10540_v30  ;;  %2396 = vmatpush1.msra.mxu1 %v10541_v31  ;;  %v7557_v30 = vld [vmem:[#allocation10 + $0x1b8] sm:$0xff]  ;;  %v7560_v31 = vld [vmem:[#allocation10 + $0x1a0] sm:$0xff] }
 0x702   :  { %2326 = vmatprep.subr.mxu0 %v10542_v34  ;;  %2397 = vmatprep.subr.mxu1 %v10543_v58  ;;  %v7563_v34 = vld [vmem:[#allocation10 + $0x1b0] sm:$0xff]  ;;  %v7566_v58 = vld [vmem:[#allocation10 + $0x188] sm:$0xff] }
 0x703   :  { %2327 = vmatpush1.msra.mxu0 %v10544_v38  ;;  %2398 = vmatpush1.msra.mxu1 %v10545_v39  ;;  %v7569_v38 = vld [vmem:[#allocation10 + $0x198] sm:$0xff]  ;;  %v7572_v39 = vld [vmem:[#allocation10 + $0x180] sm:$0xff] }
 0x704   :  { %2328 = vmatprep.subr.mxu0 %v10546_v40  ;;  %2399 = vmatprep.subr.mxu1 %v10547_v42  ;;  %v7575_v40 = vld [vmem:[#allocation10 + $0x190] sm:$0xff]  ;;  %v7578_v42 = vld [vmem:[#allocation10 + $0x168] sm:$0xff] }
 0x705   :  { %2329 = vmatpush1.msra.mxu0 %v10548_v44  ;;  %2362 = vmatprep.mubr.f32.mxu0 %v10096_v29  ;;  %v7581_v44 = vld [vmem:[#allocation10 + $0x178] sm:$0xff] }
 0x706   :  { %2400 = vmatpush1.msra.mxu1 %v10549_v45  ;;  %2433 = vmatprep.mubr.f32.mxu1 %v10096_v29  ;;  %v7584_v45 = vld [vmem:[#allocation10 + $0x160] sm:$0xff] }
 0x707   :  { %2468 = vmatprep.subr.mxu0 %v7510_v46  ;;  %2539 = vmatprep.subr.mxu1 %v7513_v54 }
 0x784   :  { %v7516_v47 = vpop.f32.mrf.mxu0  ;;  %v7522_v50 = vpop.f32.mrf.mxu1 }
 0x786   :  { %v7518_v51 = vpop.f32.mrf.mxu0  ;;  %v7524_v15 = vpop.f32.mrf.mxu1 }
 0x7a5   :  { %v2198_v59 = vpop.f32.mrf.mxu0  ;;  %v2269_v11 = vpop.f32.mrf.mxu1 }
 0x7a6   :  { %v2199_v63 = vadd.f32 %v2198_v59, %v2124_v57  ;;  %v2270_v0 = vadd.f32 %v2269_v11, %v2126_v56  ;;  %v7587_v57 = vld [vmem:[#allocation10 + $0x170] sm:$0xff]  ;;  %v7590_v59 = vld [vmem:[#allocation10 + $0x148] sm:$0xff] }
 0x7a7   :  { %v2200_v33 = vpop.f32.mrf.mxu0  ;;  %v2271_v12 = vpop.f32.mrf.mxu1  ;;  %v7611_v11 = vld [vmem:[#allocation10 + $0x130] sm:$0xff]  ;;  %v7614_v56 = vld [vmem:[#allocation10 + $0x108] sm:$0xff] }
 0x7a8   :  { %v4586_v4 = vmul.f32 -1.442695, %v2199_v63  ;;  %v2201_v43 = vadd.f32 %v2200_v33, %v2125_v17  ;;  %v4588_v35 = vmul.f32 -1.442695, %v2270_v0  ;;  %v2272_v36 = vadd.f32 %v2271_v12, %v2127_v62  ;;  %v7593_v63 = vld [vmem:[#allocation10 + $0x158] sm:$0xff]  ;;  %v7596_v17 = vld [vmem:[#allocation10 + $0x140] sm:$0xff] }
 0x7a9   :  { %v7599_v33 = vld [vmem:[#allocation10 + $0x150] sm:$0xff]  ;;  %v7617_v0 = vld [vmem:[#allocation10 + $0x118] sm:$0xff]  ;;  %v7620_v12 = vld [vmem:[#allocation10 + $0x100] sm:$0xff] }
 0x7aa   :  { %4779 = vpow2.f32 %v4586_v4  ;;  %v4587_v6 = vmul.f32 -1.442695, %v2201_v43  ;;  %v7602_v4 = vld [vmem:[#allocation10 + $0x128] sm:$0xff]  ;;  %v7605_v43 = vld [vmem:[#allocation10 + $0x138] sm:$0xff]  ;;  %v7623_v62 = vld [vmem:[#allocation10 + $0x110] sm:$0xff] }
 0x7ac   :  { %4781 = vpow2.f32 %v4587_v6  ;;  %v7608_v6 = vld [vmem:[#allocation10 + $0x120] sm:$0xff] }
 0x7ad   :  { %4783 = vpow2.f32 %v4588_v35  ;;  %v7626_v35 = vld [vmem:[#allocation10 + $0xe8] sm:$0xff] }
 0x7ae   :  { %4785 = vtanh.f32 %v2272_v36  ;;  %v7629_v36 = vld [vmem:[#allocation10 + $0xf8] sm:$0xff] }
 0x7b7   :  { %v4780_v8 = vpop.eup %4779 }
 0x7b8   :  { %v2283_v41 = vadd.f32 1.0, %v4780_v8  ;;  %v7632_v8 = vld [vmem:[#allocation10 + $0xe0] sm:$0xff] }
 0x7b9   :  { %v4782_v53 = vpop.eup %4781  ;;  %10553 = vst [vmem:[#allocation29_spill] sm:$0xff] %v7632_v8 }
 0x7ba   :  { %4787 = vrcp.f32 %v2283_v41  ;;  %v2284_v2 = vadd.f32 1.0, %v4782_v53  ;;  %v4784_v10 = vpop.eup %4783  ;;  %v7635_v41 = vld [vmem:[#allocation10 + $0xf0] sm:$0xff]  ;;  %v7638_v53 = vld [vmem:[#allocation10 + $0xc8] sm:$0xff] }
 0x7bb   :  { %v4786_v7 = vpop.eup %4785  ;;  %v2285_v16 = vadd.f32 1.0, %v4784_v10  ;;  %10554 = vst [vmem:[#allocation21_spill] sm:$0xff] %v7635_v41  ;;  %10555 = vst [vmem:[#allocation31_spill] sm:$0xff] %v7638_v53  ;;  %v7644_v10 = vld [vmem:[#allocation10 + $0xc0] sm:$0xff] }
 0x7bc   :  { %4789 = vrcp.f32 %v2284_v2  ;;  %v7641_v2 = vld [vmem:[#allocation10 + $0xd8] sm:$0xff]  ;;  %10557 = vst [vmem:[#allocation33_spill] sm:$0xff] %v7644_v10 }
 0x7bd   :  { %4791 = vrcp.f32 %v2285_v16  ;;  %10556 = vst [vmem:[#allocation22_spill] sm:$0xff] %v7641_v2  ;;  %v7659_v16 = vld [vmem:[#allocation10 + $0xb0] sm:$0xff] }
 0x7be   :  { %10562 = vst [vmem:[#allocation25_spill] sm:$0xff] %v7659_v16 }
 0x7c7   :  { %v4788_v13 = vpop.eup %4787 }
 0x7c8   :  { %v2294_v9 = vmul.f32 %v4788_v13, %v4786_v7  ;;  %v7647_v7 = vld [vmem:[#allocation10 + $0xd0] sm:$0xff]  ;;  %v7650_v13 = vld [vmem:[#allocation10 + $0xa8] sm:$0xff] }
 0x7c9   :  { %v4790_v14 = vpop.eup %4789  ;;  %10558 = vst [vmem:[#allocation23_spill] sm:$0xff] %v7647_v7  ;;  %10559 = vst [vmem:[#allocation35_spill] sm:$0xff] %v7650_v13 }
 0x7ca   :  { %v2293_v18 = vmul.f32 %v4790_v14, %v7287_v52  ;;  %v4792_v21 = vpop.eup %4791  ;;  %v7542_v52 = vld [vmem:[#allocation10 + $0x1c8] sm:$0xff]  ;;  %v7656_v14 = vld [vmem:[#allocation10 + $0xa0] sm:$0xff] }
 0x7cb   :  { %10561 = vst [vmem:[#allocation37_spill] sm:$0xff] %v7656_v14 }
 0x7cc   :  { %v7529_v20 = vadd.f32 %v2294_v9, %v2293_v18  ;;  %v7653_v9 = vld [vmem:[#allocation10 + $0xb8] sm:$0xff]  ;;  %v7662_v18 = vld [vmem:[#allocation10 + $0x88] sm:$0xff] }
 0x7cd   :  { %10560 = vst [vmem:[#allocation24_spill] sm:$0xff] %v7653_v9  ;;  %10563 = vst [vmem:[#allocation39_spill] sm:$0xff] %v7662_v18 }
 0x7ce   :  { %4793 = vtanh.f32 %v7529_v20 }
 0x7db   :  { %v4794_v22 = vpop.eup %4793 }
 0x7dc   :  { %v7532_v23 = vmul.f32 %v4794_v22, %v4792_v21  ;;  %v7665_v21 = vld [vmem:[#allocation10 + $0x98] sm:$0xff]  ;;  %v7668_v22 = vld [vmem:[#allocation10 + $0x80] sm:$0xff] }
 0x7dd   :  { %10564 = vst [vmem:[#allocation26_spill] sm:$0xff] %v7665_v21  ;;  %10565 = vst [vmem:[#allocation41_spill] sm:$0xff] %v7668_v22 }
 0x7de   :  { %2363 = vmatmul.mubr.f32.vlgmr.msra.gmra.mxu0 %v7532_v23  ;;  %2434 = vmatmul.mubr.f32.vlgmr.msra.gmra.mxu1 %v7532_v23 }
 0x7df   :  { %2469 = vmatpush1.msra.mxu0 %v7536_v24  ;;  %2540 = vmatpush1.msra.mxu1 %v7539_v48 }
 0x7e0   :  { %2470 = vmatprep.subr.mxu0 %v7542_v52  ;;  %2541 = vmatprep.subr.mxu1 %v7545_v25 }
 0x7e1   :  { %2471 = vmatpush1.msra.mxu0 %v7548_v60  ;;  %2542 = vmatpush1.msra.mxu1 %v7551_v27 }
 0x7e2   :  { %2472 = vmatprep.subr.mxu0 %v7554_v28  ;;  %2543 = vmatprep.subr.mxu1 %v7557_v30 }
 0x7e3   :  { %2473 = vmatpush1.msra.mxu0 %v7560_v31  ;;  %2544 = vmatpush1.msra.mxu1 %v7563_v34 }
 0x7e4   :  { %2474 = vmatprep.subr.mxu0 %v7566_v58  ;;  %2545 = vmatprep.subr.mxu1 %v7569_v38 }
 0x7e5   :  { %2475 = vmatpush1.msra.mxu0 %v7572_v39  ;;  %2546 = vmatpush1.msra.mxu1 %v7575_v40 }
 0x7e6   :  { %2476 = vmatprep.subr.mxu0 %v7578_v42  ;;  %2547 = vmatprep.subr.mxu1 %v7581_v44 }
 0x7e7   :  { %2477 = vmatpush1.msra.mxu0 %v7584_v45  ;;  %2548 = vmatpush1.msra.mxu1 %v7587_v57 }
 0x7e8   :  { %2478 = vmatprep.subr.mxu0 %v7590_v59  ;;  %2549 = vmatprep.subr.mxu1 %v7593_v63 }
 0x7e9   :  { %2479 = vmatpush1.msra.mxu0 %v7596_v17  ;;  %2550 = vmatpush1.msra.mxu1 %v7599_v33 }
 0x7ea   :  { %2480 = vmatprep.subr.mxu0 %v7602_v4  ;;  %2551 = vmatprep.subr.mxu1 %v7605_v43 }
 0x7eb   :  { %2481 = vmatpush1.msra.mxu0 %v7608_v6  ;;  %2552 = vmatpush1.msra.mxu1 %v7611_v11 }
 0x7ec   :  { %2482 = vmatprep.subr.mxu0 %v7614_v56  ;;  %2553 = vmatprep.subr.mxu1 %v7617_v0 }
 0x7ed   :  { %2483 = vmatpush1.msra.mxu0 %v7620_v12  ;;  %2554 = vmatpush1.msra.mxu1 %v7623_v62 }
 0x7ee   :  { %2484 = vmatprep.subr.mxu0 %v7626_v35  ;;  %2555 = vmatprep.subr.mxu1 %v7629_v36 }
 0x7ef   :  { %2485 = vmatpush1.msra.mxu0 %v7632_v8  ;;  %2556 = vmatpush1.msra.mxu1 %v7635_v41 }
 0x7f0   :  { %2486 = vmatprep.subr.mxu0 %v7638_v53  ;;  %2557 = vmatprep.subr.mxu1 %v7641_v2 }
 0x7f1   :  { %2487 = vmatpush1.msra.mxu0 %v7644_v10  ;;  %2558 = vmatpush1.msra.mxu1 %v7647_v7 }
 0x7f2   :  { %2488 = vmatprep.subr.mxu0 %v7650_v13  ;;  %2559 = vmatprep.subr.mxu1 %v7653_v9  ;;  %v7671_v9 = vld [vmem:[#allocation10 + $0x90] sm:$0xff] }
 0x7f3   :  { %2489 = vmatpush1.msra.mxu0 %v7656_v14  ;;  %2560 = vmatpush1.msra.mxu1 %v7659_v16  ;;  %10566 = vst [vmem:[#allocation27_spill] sm:$0xff] %v7671_v9  ;;  %v7674_v14 = vld [vmem:[#allocation10 + $0x68] sm:$0xff]  ;;  %v7677_v16 = vld [vmem:[#allocation10 + $0x78] sm:$0xff] }
 0x7f4   :  { %2490 = vmatprep.subr.mxu0 %v7662_v18  ;;  %2561 = vmatprep.subr.mxu1 %v7665_v21  ;;  %10567 = vst [vmem:[#allocation43_spill] sm:$0xff] %v7674_v14  ;;  %10568 = vst [vmem:[#allocation30_spill] sm:$0xff] %v7677_v16  ;;  %v7680_v18 = vld [vmem:[#allocation10 + $0x60] sm:$0xff]  ;;  %v7683_v21 = vld [vmem:[#allocation10 + $0x70] sm:$0xff] }
 0x7f5   :  { %2491 = vmatpush1.msra.mxu0 %v7668_v22  ;;  %2562 = vmatpush1.msra.mxu1 %v7671_v9  ;;  %10569 = vst [vmem:[#allocation46_spill] sm:$0xff] %v7680_v18  ;;  %10570 = vst [vmem:[#allocation165_spill] sm:$0xff] %v7683_v21  ;;  %v7686_v22 = vld [vmem:[#allocation10 + $0x48] sm:$0xff]  ;;  %v7689_v9 = vld [vmem:[#allocation10 + $0x58] sm:$0xff] }
 0x7f6   :  { %2492 = vmatprep.subr.mxu0 %v7674_v14  ;;  %2563 = vmatprep.subr.mxu1 %v7677_v16  ;;  %10571 = vst [vmem:[#allocation166_spill] sm:$0xff] %v7686_v22  ;;  %10572 = vst [vmem:[#allocation169_spill] sm:$0xff] %v7689_v9  ;;  %v7692_v14 = vld [vmem:[#allocation10 + $0x40] sm:$0xff]  ;;  %v7695_v16 = vld [vmem:[#allocation10 + $0x50] sm:$0xff] }
 0x7f7   :  { %2493 = vmatpush1.msra.mxu0 %v7680_v18  ;;  %2564 = vmatpush1.msra.mxu1 %v7683_v21  ;;  %10573 = vst [vmem:[#allocation170_spill] sm:$0xff] %v7692_v14  ;;  %10574 = vst [vmem:[#allocation32_spill] sm:$0xff] %v7695_v16  ;;  %v7698_v18 = vld [vmem:[#allocation10 + $0x28] sm:$0xff]  ;;  %v7701_v21 = vld [vmem:[#allocation10 + $0x38] sm:$0xff] }
 0x7f8   :  { %2494 = vmatprep.subr.mxu0 %v7686_v22  ;;  %2565 = vmatprep.subr.mxu1 %v7689_v9  ;;  %10575 = vst [vmem:[#allocation48_spill] sm:$0xff] %v7698_v18  ;;  %10576 = vst [vmem:[#allocation34_spill] sm:$0xff] %v7701_v21  ;;  %v7704_v22 = vld [vmem:[#allocation10 + $0x20] sm:$0xff]  ;;  %v7707_v9 = vld [vmem:[#allocation10 + $0x30] sm:$0xff] }
 0x7f9   :  { %2495 = vmatpush1.msra.mxu0 %v7692_v14  ;;  %2566 = vmatpush1.msra.mxu1 %v7695_v16  ;;  %10577 = vst [vmem:[#allocation50_spill] sm:$0xff] %v7704_v22  ;;  %10578 = vst [vmem:[#allocation36_spill] sm:$0xff] %v7707_v9  ;;  %v7710_v14 = vld [vmem:[#allocation10 + $0x8] sm:$0xff]  ;;  %v7713_v16 = vld [vmem:[#allocation10 + $0x18] sm:$0xff] }
 0x7fa   :  { %2496 = vmatprep.subr.mxu0 %v7698_v18  ;;  %2567 = vmatprep.subr.mxu1 %v7701_v21  ;;  %10579 = vst [vmem:[#allocation52_spill] sm:$0xff] %v7710_v14  ;;  %10580 = vst [vmem:[#allocation38_spill] sm:$0xff] %v7713_v16  ;;  %v7716_v18 = vld [vmem:[#allocation10] sm:$0xff]  ;;  %v7719_v21 = vld [vmem:[#allocation10 + $0x10] sm:$0xff] }
 0x7fb   :  { %2497 = vmatpush1.msra.mxu0 %v7704_v22  ;;  %2568 = vmatpush1.msra.mxu1 %v7707_v9  ;;  %10581 = vst [vmem:[#allocation54_spill] sm:$0xff] %v7716_v18  ;;  %10582 = vst [vmem:[#allocation40_spill] sm:$0xff] %v7719_v21  ;;  %v7724_v9 = vld [vmem:[#allocation6 + $0x1e8] sm:$0xff] }
 0x7fc   :  { %2498 = vmatprep.subr.mxu0 %v7710_v14  ;;  %2569 = vmatprep.subr.mxu1 %v7713_v16  ;;  %10583 = vst [vmem:[#allocation56_spill] sm:$0xff] %v7724_v9  ;;  %v7727_v14 = vld [vmem:[#allocation6 + $0x1f8] sm:$0xff] }
 0x7fd   :  { %2499 = vmatpush1.msra.mxu0 %v7716_v18  ;;  %2570 = vmatpush1.msra.mxu1 %v7719_v21  ;;  %10584 = vst [vmem:[#allocation20_spill] sm:$0xff] %v7727_v14 }
 0x7fe   :  { %2532 = vmatprep.mubr.f32.mxu0 %v10096_v29  ;;  %2603 = vmatprep.mubr.f32.mxu1 %v10096_v29 }
 0x7ff   :  { %2618 = vmatprep.subr.mxu0 %v7724_v9  ;;  %2689 = vmatprep.subr.mxu1 %v7727_v14 }
 0x89e   :  { %v2364_v16 = vpop.f32.mrf.mxu0  ;;  %v2435_v2 = vpop.f32.mrf.mxu1 }
 0x89f   :  { %v2365_v22 = vadd.f32 %v2364_v16, %v7516_v47  ;;  %v2436_v9 = vadd.f32 %v2435_v2, %v7522_v50 }
 0x8a0   :  { %v2366_v18 = vpop.f32.mrf.mxu0  ;;  %v2437_v41 = vpop.f32.mrf.mxu1 }
 0x8a1   :  { %v2440_v13 = vadd.f32 %v2365_v22, %v10424_v19  ;;  %v2367_v21 = vadd.f32 %v2366_v18, %v7518_v51  ;;  %v2442_v14 = vadd.f32 %v2436_v9, %v6503_v49  ;;  %v2438_v8 = vadd.f32 %v2437_v41, %v7524_v15 }
 0x8a3   :  { %v4589_v7 = vmul.f32 -1.442695, %v2440_v13  ;;  %v2441_v10 = vadd.f32 %v2367_v21, %v6495_v37  ;;  %v4591_v47 = vmul.f32 -1.442695, %v2442_v14  ;;  %v2443_v22 = vadd.f32 %v2438_v8, %v6509_v61  ;;  %v7742_v21 = vld [vmem:[#allocation6 + $0x1e0] sm:$0xff] }
 0x8a5   :  { %4795 = vpow2.f32 %v4589_v7  ;;  %v4590_v53 = vmul.f32 -1.442695, %v2441_v10 }
 0x8a7   :  { %4797 = vpow2.f32 %v4590_v53 }
 0x8a8   :  { %4799 = vpow2.f32 %v4591_v47  ;;  %v7745_v47 = vld [vmem:[#allocation6 + $0x1f0] sm:$0xff] }
 0x8b2   :  { %v4796_v16 = vpop.eup %4795 }
 0x8b3   :  { %v2453_v19 = vadd.f32 1.0, %v4796_v16  ;;  %v7751_v16 = vld [vmem:[#allocation6 + $0x1d8] sm:$0xff] }
 0x8b4   :  { %v4798_v51 = vpop.eup %4797 }
 0x8b5   :  { %4801 = vrcp.f32 %v2453_v19  ;;  %v2454_v13 = vadd.f32 1.0, %v4798_v51  ;;  %v4800_v10 = vpop.eup %4799  ;;  %v7758_v51 = vld [vmem:[#allocation6 + $0x1c0] sm:$0xff] }
 0x8b6   :  { %4803 = vtanh.f32 %v2443_v22  ;;  %v2455_v2 = vadd.f32 1.0, %v4800_v10  ;;  %10586 = vst [vmem:[#allocation58_spill] sm:$0xff] %v7758_v51  ;;  %v7764_v10 = vld [vmem:[#allocation6 + $0x1a8] sm:$0xff] }
 0x8b7   :  { %4805 = vrcp.f32 %v2454_v13  ;;  %v7761_v13 = vld [vmem:[#allocation6 + $0x1d0] sm:$0xff]  ;;  %10588 = vst [vmem:[#allocation60_spill] sm:$0xff] %v7764_v10 }
 0x8b8   :  { %4807 = vrcp.f32 %v2455_v2  ;;  %10587 = vst [vmem:[#allocation44_spill] sm:$0xff] %v7761_v13  ;;  %v7779_v2 = vld [vmem:[#allocation6 + $0x198] sm:$0xff] }
 0x8b9   :  { %10593 = vst [vmem:[#allocation49_spill] sm:$0xff] %v7779_v2 }
 0x8c2   :  { %v4802_v53 = vpop.eup %4801 }
 0x8c3   :  { %v4804_v7 = vpop.eup %4803 }
 0x8c4   :  { %v4806_v50 = vpop.eup %4805  ;;  %v2464_v18 = vmul.f32 %v4804_v7, %v4802_v53  ;;  %v7767_v53 = vld [vmem:[#allocation6 + $0x1b8] sm:$0xff]  ;;  %v7770_v7 = vld [vmem:[#allocation6 + $0x1a0] sm:$0xff] }
 0x8c5   :  { %v2463_v9 = vmul.f32 %v4806_v50, %v7369_v32  ;;  %v4808_v8 = vpop.eup %4807  ;;  %v7748_v32 = vld [vmem:[#allocation6 + $0x1c8] sm:$0xff]  ;;  %10589 = vst [vmem:[#allocation45_spill] sm:$0xff] %v7767_v53  ;;  %10590 = vst [vmem:[#allocation62_spill] sm:$0xff] %v7770_v7 }
 0x8c6   :  { %v7776_v50 = vld [vmem:[#allocation6 + $0x188] sm:$0xff] }
 0x8c7   :  { %v7739_v15 = vadd.f32 %v2464_v18, %v2463_v9  ;;  %10592 = vst [vmem:[#allocation64_spill] sm:$0xff] %v7776_v50  ;;  %v7782_v9 = vld [vmem:[#allocation6 + $0x180] sm:$0xff]  ;;  %v7785_v18 = vld [vmem:[#allocation6 + $0x190] sm:$0xff] }
 0x8c8   :  { %10594 = vst [vmem:[#allocation66_spill] sm:$0xff] %v7782_v9  ;;  %10595 = vst [vmem:[#allocation51_spill] sm:$0xff] %v7785_v18 }
 0x8c9   :  { %4809 = vtanh.f32 %v7739_v15 }
 0x8d6   :  { %v4810_v41 = vpop.eup %4809 }
 0x8d7   :  { %v2467_v14 = vmul.f32 %v4810_v41, %v4808_v8  ;;  %v7788_v8 = vld [vmem:[#allocation6 + $0x168] sm:$0xff]  ;;  %v7791_v41 = vld [vmem:[#allocation6 + $0x178] sm:$0xff] }
 0x8d8   :  { %10596 = vst [vmem:[#allocation68_spill] sm:$0xff] %v7788_v8  ;;  %10597 = vst [vmem:[#allocation53_spill] sm:$0xff] %v7791_v41 }
 0x8d9   :  { %2533 = vmatmul.mubr.f32.vlgmr.msra.gmra.mxu0 %v2467_v14  ;;  %v4419_v19 = vrot.slane %v2467_v14, 5  ;;  %2604 = vmatmul.mubr.f32.vlgmr.msra.gmra.mxu1 %v2467_v14  ;;  %v7794_v14 = vld [vmem:[#allocation6 + $0x160] sm:$0xff] }
 0x8da   :  { %2619 = vmatpush1.msra.mxu0 %v7742_v21  ;;  %2690 = vmatpush1.msra.mxu1 %v7745_v47  ;;  %10598 = vst [vmem:[#allocation70_spill] sm:$0xff] %v7794_v14 }
 0x8db   :  { %2620 = vmatprep.subr.mxu0 %v7748_v32  ;;  %2691 = vmatprep.subr.mxu1 %v7751_v16  ;;  %v7756_v22 = vsel %vm4437_vm3, %v7380_v26, %v4419_v19  ;;  %v7773_v26 = vld [vmem:[#allocation6 + $0x1b0] sm:$0xff] }
 0x8dc   :  { %10585 = vst [vmem:[#allocation42_spill] sm:$0xff] %v7756_v22  ;;  %2621 = vmatpush1.msra.mxu0 %v7758_v51  ;;  %2692 = vmatpush1.msra.mxu1 %v7761_v13  ;;  %10591 = vst [vmem:[#allocation47_spill] sm:$0xff] %v7773_v26  ;;  %v7797_v19 = vld [vmem:[#allocation6 + $0x170] sm:$0xff] }
 0x8dd   :  { %2622 = vmatprep.subr.mxu0 %v7764_v10  ;;  %2693 = vmatprep.subr.mxu1 %v7767_v53  ;;  %10599 = vst [vmem:[#allocation55_spill] sm:$0xff] %v7797_v19  ;;  %v2612_v53 = vrot.slane %v10552_v3, 4 }
 0x8de   :  { %2623 = vmatpush1.msra.mxu0 %v7770_v7  ;;  %2694 = vmatpush1.msra.mxu1 %v7773_v26 }
 0x8df   :  { %2624 = vmatprep.subr.mxu0 %v7776_v50  ;;  %2695 = vmatprep.subr.mxu1 %v7779_v2 }
 0x8e0   :  { %2625 = vmatpush1.msra.mxu0 %v7782_v9  ;;  %2696 = vmatpush1.msra.mxu1 %v7785_v18  ;;  %v7800_v9 = vld [vmem:[#allocation6 + $0x148] sm:$0xff]  ;;  %v7803_v18 = vld [vmem:[#allocation6 + $0x158] sm:$0xff] }
 0x8e1   :  { %2626 = vmatprep.subr.mxu0 %v7788_v8  ;;  %2697 = vmatprep.subr.mxu1 %v7791_v41  ;;  %10600 = vst [vmem:[#allocation72_spill] sm:$0xff] %v7800_v9  ;;  %10601 = vst [vmem:[#allocation57_spill] sm:$0xff] %v7803_v18  ;;  %v7806_v8 = vld [vmem:[#allocation6 + $0x140] sm:$0xff]  ;;  %v7809_v41 = vld [vmem:[#allocation6 + $0x150] sm:$0xff] }
 0x8e2   :  { %2627 = vmatpush1.msra.mxu0 %v7794_v14  ;;  %2698 = vmatpush1.msra.mxu1 %v7797_v19  ;;  %10602 = vst [vmem:[#allocation74_spill] sm:$0xff] %v7806_v8  ;;  %10603 = vst [vmem:[#allocation59_spill] sm:$0xff] %v7809_v41  ;;  %v7812_v14 = vld [vmem:[#allocation6 + $0x128] sm:$0xff]  ;;  %v7815_v19 = vld [vmem:[#allocation6 + $0x138] sm:$0xff] }
 0x8e3   :  { %2628 = vmatprep.subr.mxu0 %v7800_v9  ;;  %2699 = vmatprep.subr.mxu1 %v7803_v18  ;;  %10604 = vst [vmem:[#allocation76_spill] sm:$0xff] %v7812_v14  ;;  %10605 = vst [vmem:[#allocation61_spill] sm:$0xff] %v7815_v19  ;;  %v7818_v9 = vld [vmem:[#allocation6 + $0x120] sm:$0xff]  ;;  %v7821_v18 = vld [vmem:[#allocation6 + $0x130] sm:$0xff] }
 0x8e4   :  { %2629 = vmatpush1.msra.mxu0 %v7806_v8  ;;  %2700 = vmatpush1.msra.mxu1 %v7809_v41  ;;  %10606 = vst [vmem:[#allocation78_spill] sm:$0xff] %v7818_v9  ;;  %10607 = vst [vmem:[#allocation63_spill] sm:$0xff] %v7821_v18  ;;  %v7824_v8 = vld [vmem:[#allocation6 + $0x108] sm:$0xff]  ;;  %v7827_v41 = vld [vmem:[#allocation6 + $0x118] sm:$0xff] }
 0x8e5   :  { %2630 = vmatprep.subr.mxu0 %v7812_v14  ;;  %2701 = vmatprep.subr.mxu1 %v7815_v19  ;;  %10608 = vst [vmem:[#allocation80_spill] sm:$0xff] %v7824_v8  ;;  %10609 = vst [vmem:[#allocation65_spill] sm:$0xff] %v7827_v41  ;;  %v7830_v14 = vld [vmem:[#allocation6 + $0x100] sm:$0xff]  ;;  %v7833_v19 = vld [vmem:[#allocation6 + $0x110] sm:$0xff] }
 0x8e6   :  { %2631 = vmatpush1.msra.mxu0 %v7818_v9  ;;  %2702 = vmatpush1.msra.mxu1 %v7821_v18  ;;  %10610 = vst [vmem:[#allocation82_spill] sm:$0xff] %v7830_v14  ;;  %10611 = vst [vmem:[#allocation67_spill] sm:$0xff] %v7833_v19  ;;  %v7836_v9 = vld [vmem:[#allocation6 + $0xe8] sm:$0xff]  ;;  %v7839_v18 = vld [vmem:[#allocation6 + $0xf8] sm:$0xff] }
 0x8e7   :  { %2632 = vmatprep.subr.mxu0 %v7824_v8  ;;  %2703 = vmatprep.subr.mxu1 %v7827_v41  ;;  %10612 = vst [vmem:[#allocation84_spill] sm:$0xff] %v7836_v9  ;;  %10613 = vst [vmem:[#allocation69_spill] sm:$0xff] %v7839_v18  ;;  %v7842_v8 = vld [vmem:[#allocation6 + $0xe0] sm:$0xff]  ;;  %v7845_v41 = vld [vmem:[#allocation6 + $0xf0] sm:$0xff] }
 0x8e8   :  { %2633 = vmatpush1.msra.mxu0 %v7830_v14  ;;  %2704 = vmatpush1.msra.mxu1 %v7833_v19  ;;  %10614 = vst [vmem:[#allocation86_spill] sm:$0xff] %v7842_v8  ;;  %10615 = vst [vmem:[#allocation71_spill] sm:$0xff] %v7845_v41  ;;  %v7848_v14 = vld [vmem:[#allocation6 + $0xc8] sm:$0xff]  ;;  %v7851_v19 = vld [vmem:[#allocation6 + $0xd8] sm:$0xff] }
 0x8e9   :  { %2634 = vmatprep.subr.mxu0 %v7836_v9  ;;  %2705 = vmatprep.subr.mxu1 %v7839_v18  ;;  %10616 = vst [vmem:[#allocation88_spill] sm:$0xff] %v7848_v14  ;;  %10617 = vst [vmem:[#allocation73_spill] sm:$0xff] %v7851_v19  ;;  %v7854_v9 = vld [vmem:[#allocation6 + $0xc0] sm:$0xff]  ;;  %v7857_v18 = vld [vmem:[#allocation6 + $0xd0] sm:$0xff] }
 0x8ea   :  { %2635 = vmatpush1.msra.mxu0 %v7842_v8  ;;  %2706 = vmatpush1.msra.mxu1 %v7845_v41  ;;  %10618 = vst [vmem:[#allocation90_spill] sm:$0xff] %v7854_v9  ;;  %10619 = vst [vmem:[#allocation75_spill] sm:$0xff] %v7857_v18  ;;  %v7860_v8 = vld [vmem:[#allocation6 + $0xa8] sm:$0xff]  ;;  %v7863_v41 = vld [vmem:[#allocation6 + $0xb8] sm:$0xff] }
 0x8eb   :  { %2636 = vmatprep.subr.mxu0 %v7848_v14  ;;  %2707 = vmatprep.subr.mxu1 %v7851_v19  ;;  %10620 = vst [vmem:[#allocation92_spill] sm:$0xff] %v7860_v8  ;;  %10621 = vst [vmem:[#allocation77_spill] sm:$0xff] %v7863_v41  ;;  %v7866_v14 = vld [vmem:[#allocation6 + $0xa0] sm:$0xff]  ;;  %v7869_v19 = vld [vmem:[#allocation6 + $0xb0] sm:$0xff] }
 0x8ec   :  { %2637 = vmatpush1.msra.mxu0 %v7854_v9  ;;  %2708 = vmatpush1.msra.mxu1 %v7857_v18  ;;  %10622 = vst [vmem:[#allocation93_spill] sm:$0xff] %v7866_v14  ;;  %10623 = vst [vmem:[#allocation79_spill] sm:$0xff] %v7869_v19  ;;  %v7872_v9 = vld [vmem:[#allocation6 + $0x88] sm:$0xff]  ;;  %v7875_v18 = vld [vmem:[#allocation6 + $0x98] sm:$0xff] }
 0x8ed   :  { %2638 = vmatprep.subr.mxu0 %v7860_v8  ;;  %2709 = vmatprep.subr.mxu1 %v7863_v41  ;;  %10624 = vst [vmem:[#allocation94_spill] sm:$0xff] %v7872_v9  ;;  %10625 = vst [vmem:[#allocation81_spill] sm:$0xff] %v7875_v18  ;;  %v7878_v8 = vld [vmem:[#allocation6 + $0x80] sm:$0xff]  ;;  %v7881_v41 = vld [vmem:[#allocation6 + $0x90] sm:$0xff] }
 0x8ee   :  { %2639 = vmatpush1.msra.mxu0 %v7866_v14  ;;  %2710 = vmatpush1.msra.mxu1 %v7869_v19  ;;  %10626 = vst [vmem:[#allocation95_spill] sm:$0xff] %v7878_v8  ;;  %10627 = vst [vmem:[#allocation83_spill] sm:$0xff] %v7881_v41  ;;  %v7884_v14 = vld [vmem:[#allocation6 + $0x68] sm:$0xff]  ;;  %v7887_v19 = vld [vmem:[#allocation6 + $0x78] sm:$0xff] }
 0x8ef   :  { %2640 = vmatprep.subr.mxu0 %v7872_v9  ;;  %2711 = vmatprep.subr.mxu1 %v7875_v18  ;;  %10628 = vst [vmem:[#allocation96_spill] sm:$0xff] %v7884_v14  ;;  %10629 = vst [vmem:[#allocation85_spill] sm:$0xff] %v7887_v19  ;;  %v7890_v9 = vld [vmem:[#allocation6 + $0x60] sm:$0xff]  ;;  %v7893_v18 = vld [vmem:[#allocation6 + $0x70] sm:$0xff] }
 0x8f0   :  { %2641 = vmatpush1.msra.mxu0 %v7878_v8  ;;  %2712 = vmatpush1.msra.mxu1 %v7881_v41  ;;  %10630 = vst [vmem:[#allocation97_spill] sm:$0xff] %v7890_v9  ;;  %10631 = vst [vmem:[#allocation87_spill] sm:$0xff] %v7893_v18  ;;  %v7896_v8 = vld [vmem:[#allocation6 + $0x48] sm:$0xff]  ;;  %v7899_v41 = vld [vmem:[#allocation6 + $0x58] sm:$0xff] }
 0x8f1   :  { %2642 = vmatprep.subr.mxu0 %v7884_v14  ;;  %2713 = vmatprep.subr.mxu1 %v7887_v19  ;;  %10632 = vst [vmem:[#allocation98_spill] sm:$0xff] %v7896_v8  ;;  %10633 = vst [vmem:[#allocation89_spill] sm:$0xff] %v7899_v41  ;;  %v7902_v14 = vld [vmem:[#allocation6 + $0x40] sm:$0xff]  ;;  %v7905_v19 = vld [vmem:[#allocation6 + $0x50] sm:$0xff] }
 0x8f2   :  { %2643 = vmatpush1.msra.mxu0 %v7890_v9  ;;  %2714 = vmatpush1.msra.mxu1 %v7893_v18  ;;  %10634 = vst [vmem:[#allocation99_spill] sm:$0xff] %v7902_v14  ;;  %10635 = vst [vmem:[#allocation91_spill] sm:$0xff] %v7905_v19  ;;  %v7908_v9 = vld [vmem:[#allocation6 + $0x28] sm:$0xff]  ;;  %v7911_v18 = vld [vmem:[#allocation6 + $0x38] sm:$0xff] }
 0x8f3   :  { %2644 = vmatprep.subr.mxu0 %v7896_v8  ;;  %2715 = vmatprep.subr.mxu1 %v7899_v41  ;;  %10636 = vst [vmem:[#allocation100_spill] sm:$0xff] %v7908_v9  ;;  %10637 = vst [vmem:[#allocation101_spill] sm:$0xff] %v7911_v18  ;;  %v7914_v8 = vld [vmem:[#allocation6 + $0x20] sm:$0xff]  ;;  %v7917_v41 = vld [vmem:[#allocation6 + $0x30] sm:$0xff] }
 0x8f4   :  { %2645 = vmatpush1.msra.mxu0 %v7902_v14  ;;  %2716 = vmatpush1.msra.mxu1 %v7905_v19  ;;  %10638 = vst [vmem:[#allocation102_spill] sm:$0xff] %v7914_v8  ;;  %10639 = vst [vmem:[#allocation103_spill] sm:$0xff] %v7917_v41  ;;  %v7920_v14 = vld [vmem:[#allocation6 + $0x8] sm:$0xff]  ;;  %v7923_v19 = vld [vmem:[#allocation6 + $0x18] sm:$0xff] }
 0x8f5   :  { %2646 = vmatprep.subr.mxu0 %v7908_v9  ;;  %2717 = vmatprep.subr.mxu1 %v7911_v18  ;;  %10640 = vst [vmem:[#allocation104_spill] sm:$0xff] %v7920_v14  ;;  %10641 = vst [vmem:[#allocation105_spill] sm:$0xff] %v7923_v19  ;;  %v7926_v9 = vld [vmem:[#allocation6] sm:$0xff]  ;;  %v7930_v18 = vld [vmem:[#allocation6 + $0x10] sm:$0xff] }
 0x8f6   :  { %2647 = vmatpush1.msra.mxu0 %v7914_v8  ;;  %2718 = vmatpush1.msra.mxu1 %v7917_v41  ;;  %10642 = vst [vmem:[#allocation106_spill] sm:$0xff] %v7926_v9  ;;  %10643 = vst [vmem:[#allocation107_spill] sm:$0xff] %v7930_v18  ;;  %v7945_v41 = vld [vmem:[#allocation9 + $0x1f0] sm:$0xff]  ;;  %v2611_v8 = vrot.slane %v10551_v5, 4 }
 0x8f7   :  { %2648 = vmatprep.subr.mxu0 %v7920_v14  ;;  %2719 = vmatprep.subr.mxu1 %v7923_v19  ;;  %v7936_v14 = vld [vmem:[#allocation9 + $0x1e8] sm:$0xff]  ;;  %v7939_v19 = vld [vmem:[#allocation9 + $0x1f8] sm:$0xff]  ;;  %10647 = vst [vmem:[#allocation111_spill] sm:$0xff] %v7945_v41 }
 0x8f8   :  { %2649 = vmatpush1.msra.mxu0 %v7926_v9  ;;  %2682 = vmatprep.mubr.f32.mxu0 %v10096_v29  ;;  %10644 = vst [vmem:[#allocation108_spill] sm:$0xff] %v7936_v14  ;;  %10645 = vst [vmem:[#allocation109_spill] sm:$0xff] %v7939_v19  ;;  %v7942_v9 = vld [vmem:[#allocation9 + $0x1e0] sm:$0xff] }
 0x8f9   :  { %2720 = vmatpush1.msra.mxu1 %v7930_v18  ;;  %2753 = vmatprep.mubr.f32.mxu1 %v10096_v29  ;;  %10646 = vst [vmem:[#allocation110_spill] sm:$0xff] %v7942_v9  ;;  %v7948_v18 = vld [vmem:[#allocation9 + $0x1c8] sm:$0xff] }
 0x8fa   :  { %2683 = vmatmul.mubr.f32.vlgmr.msra.gmra.mxu0 %v7532_v23  ;;  %2754 = vmatmul.mubr.f32.vlgmr.msra.gmra.mxu1 %v7532_v23  ;;  %10648 = vst [vmem:[#allocation112_spill] sm:$0xff] %v7948_v18  ;;  %v7951_v23 = vld [vmem:[#allocation9 + $0x1d8] sm:$0xff] }
 0x8fb   :  { %2784 = vmatprep.subr.mxu0 %v7936_v14  ;;  %2855 = vmatprep.subr.mxu1 %v7939_v19  ;;  %10649 = vst [vmem:[#allocation113_spill] sm:$0xff] %v7951_v23  ;;  %v7954_v14 = vld [vmem:[#allocation9 + $0x1c0] sm:$0xff]  ;;  %v7957_v19 = vld [vmem:[#allocation9 + $0x1d0] sm:$0xff] }
 0x8fc   :  { %2785 = vmatpush1.msra.mxu0 %v7942_v9  ;;  %2856 = vmatpush1.msra.mxu1 %v7945_v41  ;;  %10650 = vst [vmem:[#allocation114_spill] sm:$0xff] %v7954_v14  ;;  %10651 = vst [vmem:[#allocation115_spill] sm:$0xff] %v7957_v19  ;;  %v7960_v9 = vld [vmem:[#allocation9 + $0x1a8] sm:$0xff]  ;;  %v7963_v41 = vld [vmem:[#allocation9 + $0x1b8] sm:$0xff] }
 0x8fd   :  { %2786 = vmatprep.subr.mxu0 %v7948_v18  ;;  %2857 = vmatprep.subr.mxu1 %v7951_v23  ;;  %10652 = vst [vmem:[#allocation116_spill] sm:$0xff] %v7960_v9  ;;  %10653 = vst [vmem:[#allocation117_spill] sm:$0xff] %v7963_v41  ;;  %v7966_v18 = vld [vmem:[#allocation9 + $0x1a0] sm:$0xff]  ;;  %v7969_v23 = vld [vmem:[#allocation9 + $0x1b0] sm:$0xff] }
 0x8fe   :  { %2787 = vmatpush1.msra.mxu0 %v7954_v14  ;;  %2858 = vmatpush1.msra.mxu1 %v7957_v19  ;;  %10654 = vst [vmem:[#allocation118_spill] sm:$0xff] %v7966_v18  ;;  %10655 = vst [vmem:[#allocation119_spill] sm:$0xff] %v7969_v23  ;;  %v7972_v14 = vld [vmem:[#allocation9 + $0x188] sm:$0xff]  ;;  %v7975_v19 = vld [vmem:[#allocation9 + $0x198] sm:$0xff] }
 0x8ff   :  { %2788 = vmatprep.subr.mxu0 %v7960_v9  ;;  %2859 = vmatprep.subr.mxu1 %v7963_v41  ;;  %10656 = vst [vmem:[#allocation120_spill] sm:$0xff] %v7972_v14  ;;  %10657 = vst [vmem:[#allocation121_spill] sm:$0xff] %v7975_v19  ;;  %v7978_v9 = vld [vmem:[#allocation9 + $0x180] sm:$0xff]  ;;  %v7981_v41 = vld [vmem:[#allocation9 + $0x190] sm:$0xff] }
 0x900   :  { %2789 = vmatpush1.msra.mxu0 %v7966_v18  ;;  %2860 = vmatpush1.msra.mxu1 %v7969_v23  ;;  %10658 = vst [vmem:[#allocation122_spill] sm:$0xff] %v7978_v9  ;;  %10659 = vst [vmem:[#allocation123_spill] sm:$0xff] %v7981_v41  ;;  %v7984_v18 = vld [vmem:[#allocation9 + $0x168] sm:$0xff]  ;;  %v7987_v23 = vld [vmem:[#allocation9 + $0x178] sm:$0xff] }
 0x901   :  { %2790 = vmatprep.subr.mxu0 %v7972_v14  ;;  %2861 = vmatprep.subr.mxu1 %v7975_v19  ;;  %10660 = vst [vmem:[#allocation124_spill] sm:$0xff] %v7984_v18  ;;  %10661 = vst [vmem:[#allocation125_spill] sm:$0xff] %v7987_v23  ;;  %v7990_v14 = vld [vmem:[#allocation9 + $0x160] sm:$0xff]  ;;  %v7993_v19 = vld [vmem:[#allocation9 + $0x170] sm:$0xff] }
 0x902   :  { %2791 = vmatpush1.msra.mxu0 %v7978_v9  ;;  %2862 = vmatpush1.msra.mxu1 %v7981_v41  ;;  %10662 = vst [vmem:[#allocation126_spill] sm:$0xff] %v7990_v14  ;;  %10663 = vst [vmem:[#allocation127_spill] sm:$0xff] %v7993_v19  ;;  %v7996_v9 = vld [vmem:[#allocation9 + $0x148] sm:$0xff]  ;;  %v7999_v41 = vld [vmem:[#allocation9 + $0x158] sm:$0xff] }
 0x903   :  { %2792 = vmatprep.subr.mxu0 %v7984_v18  ;;  %2863 = vmatprep.subr.mxu1 %v7987_v23  ;;  %10664 = vst [vmem:[#allocation128_spill] sm:$0xff] %v7996_v9  ;;  %10665 = vst [vmem:[#allocation129_spill] sm:$0xff] %v7999_v41  ;;  %v8002_v18 = vld [vmem:[#allocation9 + $0x140] sm:$0xff]  ;;  %v8005_v23 = vld [vmem:[#allocation9 + $0x150] sm:$0xff] }
 0x904   :  { %2793 = vmatpush1.msra.mxu0 %v7990_v14  ;;  %2864 = vmatpush1.msra.mxu1 %v7993_v19  ;;  %10666 = vst [vmem:[#allocation130_spill] sm:$0xff] %v8002_v18  ;;  %10667 = vst [vmem:[#allocation131_spill] sm:$0xff] %v8005_v23  ;;  %v8008_v14 = vld [vmem:[#allocation9 + $0x128] sm:$0xff]  ;;  %v8011_v19 = vld [vmem:[#allocation9 + $0x138] sm:$0xff] }
 0x905   :  { %2794 = vmatprep.subr.mxu0 %v7996_v9  ;;  %2865 = vmatprep.subr.mxu1 %v7999_v41  ;;  %10668 = vst [vmem:[#allocation132_spill] sm:$0xff] %v8008_v14  ;;  %10669 = vst [vmem:[#allocation133_spill] sm:$0xff] %v8011_v19  ;;  %v8014_v9 = vld [vmem:[#allocation9 + $0x120] sm:$0xff]  ;;  %v8017_v41 = vld [vmem:[#allocation9 + $0x130] sm:$0xff] }
 0x906   :  { %2795 = vmatpush1.msra.mxu0 %v8002_v18  ;;  %2866 = vmatpush1.msra.mxu1 %v8005_v23  ;;  %10670 = vst [vmem:[#allocation134_spill] sm:$0xff] %v8014_v9  ;;  %10671 = vst [vmem:[#allocation135_spill] sm:$0xff] %v8017_v41  ;;  %v8020_v18 = vld [vmem:[#allocation9 + $0x108] sm:$0xff]  ;;  %v8023_v23 = vld [vmem:[#allocation9 + $0x118] sm:$0xff] }
 0x907   :  { %2796 = vmatprep.subr.mxu0 %v8008_v14  ;;  %2867 = vmatprep.subr.mxu1 %v8011_v19  ;;  %10672 = vst [vmem:[#allocation136_spill] sm:$0xff] %v8020_v18  ;;  %10673 = vst [vmem:[#allocation137_spill] sm:$0xff] %v8023_v23  ;;  %v8026_v14 = vld [vmem:[#allocation9 + $0x100] sm:$0xff]  ;;  %v8029_v19 = vld [vmem:[#allocation9 + $0x110] sm:$0xff] }
 0x908   :  { %2797 = vmatpush1.msra.mxu0 %v8014_v9  ;;  %2868 = vmatpush1.msra.mxu1 %v8017_v41  ;;  %10674 = vst [vmem:[#allocation138_spill] sm:$0xff] %v8026_v14  ;;  %10675 = vst [vmem:[#allocation139_spill] sm:$0xff] %v8029_v19  ;;  %v8032_v9 = vld [vmem:[#allocation9 + $0xe8] sm:$0xff]  ;;  %v8035_v41 = vld [vmem:[#allocation9 + $0xf8] sm:$0xff] }
 0x909   :  { %2798 = vmatprep.subr.mxu0 %v8020_v18  ;;  %2869 = vmatprep.subr.mxu1 %v8023_v23  ;;  %10676 = vst [vmem:[#allocation140_spill] sm:$0xff] %v8032_v9  ;;  %10677 = vst [vmem:[#allocation141_spill] sm:$0xff] %v8035_v41  ;;  %v8038_v18 = vld [vmem:[#allocation9 + $0xe0] sm:$0xff]  ;;  %v8041_v23 = vld [vmem:[#allocation9 + $0xf0] sm:$0xff] }
 0x90a   :  { %2799 = vmatpush1.msra.mxu0 %v8026_v14  ;;  %2870 = vmatpush1.msra.mxu1 %v8029_v19  ;;  %10678 = vst [vmem:[#allocation142_spill] sm:$0xff] %v8038_v18  ;;  %10679 = vst [vmem:[#allocation143_spill] sm:$0xff] %v8041_v23  ;;  %v8044_v14 = vld [vmem:[#allocation9 + $0xc8] sm:$0xff]  ;;  %v8047_v19 = vld [vmem:[#allocation9 + $0xd8] sm:$0xff] }
 0x90b   :  { %2800 = vmatprep.subr.mxu0 %v8032_v9  ;;  %2871 = vmatprep.subr.mxu1 %v8035_v41  ;;  %10680 = vst [vmem:[#allocation144_spill] sm:$0xff] %v8044_v14  ;;  %10681 = vst [vmem:[#allocation145_spill] sm:$0xff] %v8047_v19  ;;  %v8050_v9 = vld [vmem:[#allocation9 + $0xc0] sm:$0xff]  ;;  %v8053_v41 = vld [vmem:[#allocation9 + $0xd0] sm:$0xff] }
 0x90c   :  { %2801 = vmatpush1.msra.mxu0 %v8038_v18  ;;  %2872 = vmatpush1.msra.mxu1 %v8041_v23  ;;  %10682 = vst [vmem:[#allocation146_spill] sm:$0xff] %v8050_v9  ;;  %10683 = vst [vmem:[#allocation147_spill] sm:$0xff] %v8053_v41  ;;  %v8056_v18 = vld [vmem:[#allocation9 + $0xa8] sm:$0xff]  ;;  %v8059_v23 = vld [vmem:[#allocation9 + $0xb8] sm:$0xff] }
 0x90d   :  { %2802 = vmatprep.subr.mxu0 %v8044_v14  ;;  %2873 = vmatprep.subr.mxu1 %v8047_v19  ;;  %10684 = vst [vmem:[#allocation148_spill] sm:$0xff] %v8056_v18  ;;  %10685 = vst [vmem:[#allocation149_spill] sm:$0xff] %v8059_v23  ;;  %v8062_v14 = vld [vmem:[#allocation9 + $0xa0] sm:$0xff]  ;;  %v8065_v19 = vld [vmem:[#allocation9 + $0xb0] sm:$0xff] }
 0x90e   :  { %2803 = vmatpush1.msra.mxu0 %v8050_v9  ;;  %2874 = vmatpush1.msra.mxu1 %v8053_v41  ;;  %10686 = vst [vmem:[#allocation150_spill] sm:$0xff] %v8062_v14  ;;  %10687 = vst [vmem:[#allocation151_spill] sm:$0xff] %v8065_v19  ;;  %v8068_v9 = vld [vmem:[#allocation9 + $0x88] sm:$0xff]  ;;  %v8071_v41 = vld [vmem:[#allocation9 + $0x98] sm:$0xff] }
 0x90f   :  { %2804 = vmatprep.subr.mxu0 %v8056_v18  ;;  %2875 = vmatprep.subr.mxu1 %v8059_v23  ;;  %10688 = vst [vmem:[#allocation152_spill] sm:$0xff] %v8068_v9  ;;  %10689 = vst [vmem:[#allocation153_spill] sm:$0xff] %v8071_v41  ;;  %v8074_v18 = vld [vmem:[#allocation9 + $0x80] sm:$0xff]  ;;  %v8077_v23 = vld [vmem:[#allocation9 + $0x90] sm:$0xff] }
 0x910   :  { %2805 = vmatpush1.msra.mxu0 %v8062_v14  ;;  %2876 = vmatpush1.msra.mxu1 %v8065_v19  ;;  %10690 = vst [vmem:[#allocation154_spill] sm:$0xff] %v8074_v18  ;;  %10691 = vst [vmem:[#allocation155_spill] sm:$0xff] %v8077_v23  ;;  %v8080_v14 = vld [vmem:[#allocation9 + $0x68] sm:$0xff]  ;;  %v8083_v19 = vld [vmem:[#allocation9 + $0x78] sm:$0xff] }
 0x911   :  { %2806 = vmatprep.subr.mxu0 %v8068_v9  ;;  %2877 = vmatprep.subr.mxu1 %v8071_v41  ;;  %10692 = vst [vmem:[#allocation156_spill] sm:$0xff] %v8080_v14  ;;  %10693 = vst [vmem:[#allocation157_spill] sm:$0xff] %v8083_v19  ;;  %v8086_v9 = vld [vmem:[#allocation9 + $0x60] sm:$0xff]  ;;  %v8089_v41 = vld [vmem:[#allocation9 + $0x70] sm:$0xff] }
 0x912   :  { %2807 = vmatpush1.msra.mxu0 %v8074_v18  ;;  %2878 = vmatpush1.msra.mxu1 %v8077_v23  ;;  %10694 = vst [vmem:[#allocation158_spill] sm:$0xff] %v8086_v9  ;;  %10695 = vst [vmem:[#allocation159_spill] sm:$0xff] %v8089_v41  ;;  %v8092_v18 = vld [vmem:[#allocation9 + $0x48] sm:$0xff]  ;;  %v8095_v23 = vld [vmem:[#allocation9 + $0x58] sm:$0xff] }
 0x913   :  { %2808 = vmatprep.subr.mxu0 %v8080_v14  ;;  %2879 = vmatprep.subr.mxu1 %v8083_v19  ;;  %10696 = vst [vmem:[#allocation160_spill] sm:$0xff] %v8092_v18  ;;  %10697 = vst [vmem:[#allocation161_spill] sm:$0xff] %v8095_v23  ;;  %v8098_v14 = vld [vmem:[#allocation9 + $0x40] sm:$0xff]  ;;  %v8101_v19 = vld [vmem:[#allocation9 + $0x50] sm:$0xff] }
 0x914   :  { %2809 = vmatpush1.msra.mxu0 %v8086_v9  ;;  %2880 = vmatpush1.msra.mxu1 %v8089_v41  ;;  %10698 = vst [vmem:[#allocation162_spill] sm:$0xff] %v8098_v14  ;;  %10699 = vst [vmem:[#allocation163_spill] sm:$0xff] %v8101_v19  ;;  %v8104_v9 = vld [vmem:[#allocation9 + $0x28] sm:$0xff]  ;;  %v8107_v41 = vld [vmem:[#allocation9 + $0x38] sm:$0xff] }
 0x915   :  { %2810 = vmatprep.subr.mxu0 %v8092_v18  ;;  %2881 = vmatprep.subr.mxu1 %v8095_v23  ;;  %10700 = vst [vmem:[#allocation164_spill] sm:$0xff] %v8104_v9  ;;  %10701 = vst [vmem:[#allocation172_spill] sm:$0xff] %v8107_v41  ;;  %v8110_v18 = vld [vmem:[#allocation9 + $0x20] sm:$0xff]  ;;  %v8113_v23 = vld [vmem:[#allocation9 + $0x30] sm:$0xff] }
 0x916   :  { %2811 = vmatpush1.msra.mxu0 %v8098_v14  ;;  %2882 = vmatpush1.msra.mxu1 %v8101_v19  ;;  %10702 = vst [vmem:[#allocation173_spill] sm:$0xff] %v8110_v18  ;;  %10703 = vst [vmem:[#allocation174_spill] sm:$0xff] %v8113_v23  ;;  %v8116_v14 = vld [vmem:[#allocation9 + $0x8] sm:$0xff]  ;;  %v8119_v19 = vld [vmem:[#allocation9 + $0x18] sm:$0xff] }
 0x917   :  { %2812 = vmatprep.subr.mxu0 %v8104_v9  ;;  %2883 = vmatprep.subr.mxu1 %v8107_v41  ;;  %10704 = vst [vmem:[#allocation175_spill] sm:$0xff] %v8116_v14  ;;  %10705 = vst [vmem:[#allocation176_spill] sm:$0xff] %v8119_v19  ;;  %v8122_v9 = vld [vmem:[#allocation9] sm:$0xff]  ;;  %v8126_v41 = vld [vmem:[#allocation9 + $0x10] sm:$0xff] }
 0x918   :  { %2813 = vmatpush1.msra.mxu0 %v8110_v18  ;;  %2884 = vmatpush1.msra.mxu1 %v8113_v23  ;;  %10706 = vst [vmem:[#allocation177_spill] sm:$0xff] %v8122_v9  ;;  %10707 = vst [vmem:[#allocation178_spill] sm:$0xff] %v8126_v41 }
 0x919   :  { %2814 = vmatprep.subr.mxu0 %v8116_v14  ;;  %2885 = vmatprep.subr.mxu1 %v8119_v19  ;;  %v2610_v19 = vrot.slane %v10550_v55, 4  ;;  %v2613_v55 = vrot.slane %v6413_v1, 4 }
 0x91a   :  { %2815 = vmatpush1.msra.mxu0 %v8122_v9  ;;  %2848 = vmatprep.mubr.f32.mxu0 %v10096_v29 }
 0x91b   :  { %2886 = vmatpush1.msra.mxu1 %v8126_v41  ;;  %2919 = vmatprep.mubr.f32.mxu1 %v10096_v29 }
 0x91c   :  { %2954 = vmatprep.subr.mxu0 %v7510_v46  ;;  %3025 = vmatprep.subr.mxu1 %v7513_v54 }
 0x999   :  { %v8132_v14 = vpop.f32.mrf.mxu0  ;;  %v8138_v2 = vpop.f32.mrf.mxu1 }
 0x99b   :  { %v8134_v23 = vpop.f32.mrf.mxu0  ;;  %v8140_v46 = vpop.f32.mrf.mxu1 }
 0x9ba   :  { %v2684_v18 = vpop.f32.mrf.mxu0  ;;  %v2755_v54 = vpop.f32.mrf.mxu1 }
 0x9bb   :  { %v2685_v9 = vadd.f32 %v2684_v18, %v2610_v19  ;;  %v2756_v10 = vadd.f32 %v2755_v54, %v2612_v53 }
 0x9bc   :  { %v2686_v50 = vpop.f32.mrf.mxu0  ;;  %v2757_v13 = vpop.f32.mrf.mxu1 }
 0x9bd   :  { %v4592_v41 = vmul.f32 -1.442695, %v2685_v9  ;;  %v2687_v26 = vadd.f32 %v2686_v50, %v2611_v8  ;;  %v4594_v18 = vmul.f32 -1.442695, %v2756_v10  ;;  %v2758_v19 = vadd.f32 %v2757_v13, %v2613_v55 }
 0x9bf   :  { %4811 = vpow2.f32 %v4592_v41  ;;  %v4593_v7 = vmul.f32 -1.442695, %v2687_v26 }
 0x9c1   :  { %4813 = vpow2.f32 %v4593_v7 }
 0x9c2   :  { %4815 = vpow2.f32 %v4594_v18 }
 0x9c3   :  { %4817 = vtanh.f32 %v2758_v19 }
 0x9cc   :  { %v4812_v5 = vpop.eup %4811 }
 0x9cd   :  { %v2769_v51 = vadd.f32 1.0, %v4812_v5 }
 0x9ce   :  { %v4814_v22 = vpop.eup %4813 }
 0x9cf   :  { %4819 = vrcp.f32 %v2769_v51  ;;  %v2770_v50 = vadd.f32 1.0, %v4814_v22  ;;  %v4816_v26 = vpop.eup %4815  ;;  %v10740_v51 = vld [vmem:[#allocation28_spill] sm:$0xff] }
 0x9d0   :  { %v4818_v9 = vpop.eup %4817  ;;  %v2771_v3 = vadd.f32 1.0, %v4816_v26 }
 0x9d1   :  { %4821 = vrcp.f32 %v2770_v50 }
 0x9d2   :  { %4823 = vrcp.f32 %v2771_v3  ;;  %v10708_v3 = vld [vmem:[#allocation29_spill] sm:$0xff] }
 0x9dc   :  { %v4820_v7 = vpop.eup %4819 }
 0x9dd   :  { %v2780_v8 = vmul.f32 %v4820_v7, %v4818_v9 }
 0x9de   :  { %v4822_v41 = vpop.eup %4821 }
 0x9df   :  { %v2779_v53 = vmul.f32 %v4822_v41, %v7529_v20  ;;  %v4824_v55 = vpop.eup %4823  ;;  %v10709_v20 = vld [vmem:[#allocation21_spill] sm:$0xff] }
 0x9e1   :  { %v8145_v54 = vadd.f32 %v2780_v8, %v2779_v53 }
 0x9e3   :  { %4825 = vtanh.f32 %v8145_v54 }
 0x9f0   :  { %v4826_v5 = vpop.eup %4825 }
 0x9f1   :  { %v8148_v13 = vmul.f32 %v4826_v5, %v4824_v55 }
 0x9f3   :  { %2849 = vmatmul.mubr.f32.vlgmr.msra.gmra.mxu0 %v8148_v13  ;;  %2920 = vmatmul.mubr.f32.vlgmr.msra.gmra.mxu1 %v8148_v13 }
 0x9f4   :  { %2955 = vmatpush1.msra.mxu0 %v7536_v24  ;;  %3026 = vmatpush1.msra.mxu1 %v7539_v48  ;;  %v10710_v24 = vld [vmem:[#allocation31_spill] sm:$0xff]  ;;  %v10711_v48 = vld [vmem:[#allocation22_spill] sm:$0xff] }
 0x9f5   :  { %2956 = vmatprep.subr.mxu0 %v7542_v52  ;;  %3027 = vmatprep.subr.mxu1 %v7545_v25  ;;  %v10712_v52 = vld [vmem:[#allocation33_spill] sm:$0xff]  ;;  %v10713_v25 = vld [vmem:[#allocation23_spill] sm:$0xff] }
 0x9f6   :  { %2957 = vmatpush1.msra.mxu0 %v7548_v60  ;;  %3028 = vmatpush1.msra.mxu1 %v7551_v27  ;;  %v10714_v60 = vld [vmem:[#allocation35_spill] sm:$0xff]  ;;  %v10715_v27 = vld [vmem:[#allocation24_spill] sm:$0xff] }
 0x9f7   :  { %2958 = vmatprep.subr.mxu0 %v7554_v28  ;;  %3029 = vmatprep.subr.mxu1 %v7557_v30  ;;  %v10716_v28 = vld [vmem:[#allocation37_spill] sm:$0xff] }
 0x9f8   :  { %2959 = vmatpush1.msra.mxu0 %v7560_v31  ;;  %3030 = vmatpush1.msra.mxu1 %v7563_v34  ;;  %v10717_v30 = vld [vmem:[#allocation25_spill] sm:$0xff]  ;;  %v10718_v31 = vld [vmem:[#allocation39_spill] sm:$0xff]  ;;  %v10719_v34 = vld [vmem:[#allocation26_spill] sm:$0xff] }
 0x9f9   :  { %2960 = vmatprep.subr.mxu0 %v7566_v58  ;;  %3031 = vmatprep.subr.mxu1 %v7569_v38  ;;  %v10720_v58 = vld [vmem:[#allocation41_spill] sm:$0xff]  ;;  %v10721_v38 = vld [vmem:[#allocation27_spill] sm:$0xff] }
 0x9fa   :  { %2961 = vmatpush1.msra.mxu0 %v7572_v39  ;;  %3032 = vmatpush1.msra.mxu1 %v7575_v40  ;;  %v10722_v39 = vld [vmem:[#allocation43_spill] sm:$0xff]  ;;  %v10723_v40 = vld [vmem:[#allocation30_spill] sm:$0xff] }
 0x9fb   :  { %2962 = vmatprep.subr.mxu0 %v7578_v42  ;;  %3033 = vmatprep.subr.mxu1 %v7581_v44  ;;  %v10724_v42 = vld [vmem:[#allocation46_spill] sm:$0xff]  ;;  %v10725_v44 = vld [vmem:[#allocation165_spill] sm:$0xff] }
 0x9fc   :  { %2963 = vmatpush1.msra.mxu0 %v7584_v45  ;;  %3034 = vmatpush1.msra.mxu1 %v7587_v57  ;;  %v10726_v45 = vld [vmem:[#allocation166_spill] sm:$0xff]  ;;  %v10727_v57 = vld [vmem:[#allocation169_spill] sm:$0xff] }
 0x9fd   :  { %2964 = vmatprep.subr.mxu0 %v7590_v59  ;;  %3035 = vmatprep.subr.mxu1 %v7593_v63  ;;  %v10728_v59 = vld [vmem:[#allocation170_spill] sm:$0xff]  ;;  %v10729_v63 = vld [vmem:[#allocation32_spill] sm:$0xff] }
 0x9fe   :  { %2965 = vmatpush1.msra.mxu0 %v7596_v17  ;;  %3036 = vmatpush1.msra.mxu1 %v7599_v33  ;;  %v10730_v17 = vld [vmem:[#allocation48_spill] sm:$0xff]  ;;  %v10731_v33 = vld [vmem:[#allocation34_spill] sm:$0xff] }
 0x9ff   :  { %2966 = vmatprep.subr.mxu0 %v7602_v4  ;;  %3037 = vmatprep.subr.mxu1 %v7605_v43  ;;  %v10732_v4 = vld [vmem:[#allocation50_spill] sm:$0xff]  ;;  %v10733_v43 = vld [vmem:[#allocation36_spill] sm:$0xff] }
 0xa00   :  { %2967 = vmatpush1.msra.mxu0 %v7608_v6  ;;  %3038 = vmatpush1.msra.mxu1 %v7611_v11  ;;  %v10734_v6 = vld [vmem:[#allocation52_spill] sm:$0xff]  ;;  %v10735_v11 = vld [vmem:[#allocation38_spill] sm:$0xff] }
 0xa01   :  { %2968 = vmatprep.subr.mxu0 %v7614_v56  ;;  %3039 = vmatprep.subr.mxu1 %v7617_v0  ;;  %v10736_v56 = vld [vmem:[#allocation54_spill] sm:$0xff]  ;;  %v10737_v0 = vld [vmem:[#allocation40_spill] sm:$0xff] }
 0xa02   :  { %2969 = vmatpush1.msra.mxu0 %v7620_v12  ;;  %3040 = vmatpush1.msra.mxu1 %v7623_v62  ;;  %v10738_v12 = vld [vmem:[#allocation56_spill] sm:$0xff] }
 0xa03   :  { %2970 = vmatprep.subr.mxu0 %v7626_v35  ;;  %3041 = vmatprep.subr.mxu1 %v7629_v36  ;;  %v10739_v62 = vld [vmem:[#allocation20_spill] sm:$0xff] }
 0xa04   :  { %2971 = vmatpush1.msra.mxu0 %v10708_v3  ;;  %3042 = vmatpush1.msra.mxu1 %v10709_v20 }
 0xa05   :  { %2972 = vmatprep.subr.mxu0 %v10710_v24  ;;  %3043 = vmatprep.subr.mxu1 %v10711_v48 }
 0xa06   :  { %2973 = vmatpush1.msra.mxu0 %v10712_v52  ;;  %3044 = vmatpush1.msra.mxu1 %v10713_v25 }
 0xa07   :  { %2974 = vmatprep.subr.mxu0 %v10714_v60  ;;  %3045 = vmatprep.subr.mxu1 %v10715_v27 }
 0xa08   :  { %2975 = vmatpush1.msra.mxu0 %v10716_v28  ;;  %3046 = vmatpush1.msra.mxu1 %v10717_v30 }
 0xa09   :  { %2976 = vmatprep.subr.mxu0 %v10718_v31  ;;  %3047 = vmatprep.subr.mxu1 %v10719_v34 }
 0xa0a   :  { %2977 = vmatpush1.msra.mxu0 %v10720_v58  ;;  %3048 = vmatpush1.msra.mxu1 %v10721_v38  ;;  %v10742_v38 = vld [vmem:[#allocation58_spill] sm:$0xff] }
 0xa0b   :  { %2978 = vmatprep.subr.mxu0 %v10722_v39  ;;  %3049 = vmatprep.subr.mxu1 %v10723_v40  ;;  %v10743_v39 = vld [vmem:[#allocation44_spill] sm:$0xff] }
 0xa0c   :  { %2979 = vmatpush1.msra.mxu0 %v10724_v42  ;;  %3050 = vmatpush1.msra.mxu1 %v10725_v44  ;;  %v10744_v40 = vld [vmem:[#allocation60_spill] sm:$0xff]  ;;  %v10745_v42 = vld [vmem:[#allocation45_spill] sm:$0xff]  ;;  %v10746_v44 = vld [vmem:[#allocation62_spill] sm:$0xff] }
 0xa0d   :  { %2980 = vmatprep.subr.mxu0 %v10726_v45  ;;  %3051 = vmatprep.subr.mxu1 %v10727_v57  ;;  %v10751_v45 = vld [vmem:[#allocation51_spill] sm:$0xff]  ;;  %v10752_v57 = vld [vmem:[#allocation68_spill] sm:$0xff] }
 0xa0e   :  { %2981 = vmatpush1.msra.mxu0 %v10728_v59  ;;  %3052 = vmatpush1.msra.mxu1 %v10729_v63  ;;  %v10753_v59 = vld [vmem:[#allocation53_spill] sm:$0xff]  ;;  %v10754_v63 = vld [vmem:[#allocation70_spill] sm:$0xff] }
 0xa0f   :  { %2982 = vmatprep.subr.mxu0 %v10730_v17  ;;  %3053 = vmatprep.subr.mxu1 %v10731_v33  ;;  %v10755_v17 = vld [vmem:[#allocation55_spill] sm:$0xff]  ;;  %v10756_v33 = vld [vmem:[#allocation72_spill] sm:$0xff] }
 0xa10   :  { %2983 = vmatpush1.msra.mxu0 %v10732_v4  ;;  %3054 = vmatpush1.msra.mxu1 %v10733_v43  ;;  %v10757_v4 = vld [vmem:[#allocation57_spill] sm:$0xff]  ;;  %v10758_v43 = vld [vmem:[#allocation74_spill] sm:$0xff] }
 0xa11   :  { %2984 = vmatprep.subr.mxu0 %v10734_v6  ;;  %3055 = vmatprep.subr.mxu1 %v10735_v11  ;;  %v10759_v6 = vld [vmem:[#allocation59_spill] sm:$0xff]  ;;  %v10760_v11 = vld [vmem:[#allocation76_spill] sm:$0xff] }
 0xa12   :  { %2985 = vmatpush1.msra.mxu0 %v10736_v56  ;;  %3056 = vmatpush1.msra.mxu1 %v10737_v0  ;;  %v10761_v56 = vld [vmem:[#allocation61_spill] sm:$0xff]  ;;  %v10762_v0 = vld [vmem:[#allocation78_spill] sm:$0xff] }
 0xa13   :  { %3018 = vmatprep.mubr.f32.mxu0 %v10096_v29  ;;  %3089 = vmatprep.mubr.f32.mxu1 %v10096_v29 }
 0xa14   :  { %3104 = vmatprep.subr.mxu0 %v10738_v12  ;;  %3175 = vmatprep.subr.mxu1 %v10739_v62  ;;  %v10763_v12 = vld [vmem:[#allocation63_spill] sm:$0xff]  ;;  %v10764_v62 = vld [vmem:[#allocation80_spill] sm:$0xff] }
 0xab3   :  { %v2850_v35 = vpop.f32.mrf.mxu0  ;;  %v2921_v26 = vpop.f32.mrf.mxu1 }
 0xab4   :  { %v2851_v36 = vadd.f32 %v2850_v35, %v8132_v14  ;;  %v2922_v7 = vadd.f32 %v2921_v26, %v8138_v2  ;;  %v10765_v35 = vld [vmem:[#allocation65_spill] sm:$0xff]  ;;  %v10772_v26 = vld [vmem:[#allocation88_spill] sm:$0xff] }
 0xab5   :  { %v2852_v22 = vpop.f32.mrf.mxu0  ;;  %v2923_v8 = vpop.f32.mrf.mxu1 }
 0xab6   :  { %v2926_v10 = vadd.f32 %v2851_v36, %v10740_v51  ;;  %v2853_v18 = vadd.f32 %v2852_v22, %v8134_v23  ;;  %v2928_v41 = vadd.f32 %v2922_v7, %v6503_v49  ;;  %v2924_v53 = vadd.f32 %v2923_v8, %v8140_v46  ;;  %v10766_v36 = vld [vmem:[#allocation82_spill] sm:$0xff]  ;;  %v10767_v22 = vld [vmem:[#allocation67_spill] sm:$0xff] }
 0xab7   :  { %v10774_v7 = vld [vmem:[#allocation90_spill] sm:$0xff]  ;;  %v10775_v8 = vld [vmem:[#allocation75_spill] sm:$0xff] }
 0xab8   :  { %v4595_v19 = vmul.f32 -1.442695, %v2926_v10  ;;  %v2927_v50 = vadd.f32 %v2853_v18, %v6495_v37  ;;  %v4597_v14 = vmul.f32 -1.442695, %v2928_v41  ;;  %v2929_v5 = vadd.f32 %v2924_v53, %v6509_v61  ;;  %v10768_v10 = vld [vmem:[#allocation84_spill] sm:$0xff]  ;;  %v10769_v18 = vld [vmem:[#allocation69_spill] sm:$0xff] }
 0xab9   :  { %v10776_v41 = vld [vmem:[#allocation92_spill] sm:$0xff]  ;;  %v10777_v53 = vld [vmem:[#allocation77_spill] sm:$0xff] }
 0xaba   :  { %4827 = vpow2.f32 %v4595_v19  ;;  %v4596_v9 = vmul.f32 -1.442695, %v2927_v50  ;;  %v10770_v19 = vld [vmem:[#allocation86_spill] sm:$0xff]  ;;  %v10771_v50 = vld [vmem:[#allocation71_spill] sm:$0xff] }
 0xabc   :  { %4829 = vpow2.f32 %v4596_v9  ;;  %v10773_v9 = vld [vmem:[#allocation73_spill] sm:$0xff] }
 0xabd   :  { %4831 = vpow2.f32 %v4597_v14  ;;  %v10778_v14 = vld [vmem:[#allocation93_spill] sm:$0xff] }
 0xac7   :  { %v4828_v55 = vpop.eup %4827 }
 0xac8   :  { %v2939_v3 = vadd.f32 1.0, %v4828_v55  ;;  %v10779_v55 = vld [vmem:[#allocation79_spill] sm:$0xff] }
 0xac9   :  { %v4830_v23 = vpop.eup %4829 }
 0xaca   :  { %4833 = vrcp.f32 %v2939_v3  ;;  %v2940_v20 = vadd.f32 1.0, %v4830_v23  ;;  %v4832_v24 = vpop.eup %4831  ;;  %v10781_v3 = vld [vmem:[#allocation81_spill] sm:$0xff]  ;;  %v10782_v23 = vld [vmem:[#allocation95_spill] sm:$0xff] }
 0xacb   :  { %4835 = vtanh.f32 %v2929_v5  ;;  %v2941_v25 = vadd.f32 1.0, %v4832_v24  ;;  %v10780_v5 = vld [vmem:[#allocation94_spill] sm:$0xff]  ;;  %v10784_v24 = vld [vmem:[#allocation96_spill] sm:$0xff] }
 0xacc   :  { %4837 = vrcp.f32 %v2940_v20  ;;  %v10783_v20 = vld [vmem:[#allocation83_spill] sm:$0xff] }
 0xacd   :  { %4839 = vrcp.f32 %v2941_v25  ;;  %v10788_v25 = vld [vmem:[#allocation98_spill] sm:$0xff] }
 0xad7   :  { %v4834_v48 = vpop.eup %4833 }
 0xad8   :  { %v4836_v52 = vpop.eup %4835 }
 0xad9   :  { %v4838_v2 = vpop.eup %4837  ;;  %v2950_v27 = vmul.f32 %v4836_v52, %v4834_v48  ;;  %v10785_v48 = vld [vmem:[#allocation85_spill] sm:$0xff] }
 0xada   :  { %v2949_v60 = vmul.f32 %v4838_v2, %v7739_v15  ;;  %v4840_v28 = vpop.eup %4839  ;;  %v10741_v15 = vld [vmem:[#allocation42_spill] sm:$0xff]  ;;  %v10786_v52 = vld [vmem:[#allocation97_spill] sm:$0xff]  ;;  %v10787_v2 = vld [vmem:[#allocation87_spill] sm:$0xff] }
 0xadc   :  { %v8227_v46 = vadd.f32 %v2950_v27, %v2949_v60  ;;  %v10789_v60 = vld [vmem:[#allocation89_spill] sm:$0xff]  ;;  %v10790_v27 = vld [vmem:[#allocation99_spill] sm:$0xff] }
 0xade   :  { %4841 = vtanh.f32 %v8227_v46 }
 0xaeb   :  { %v4842_v30 = vpop.eup %4841 }
 0xaec   :  { %v2953_v31 = vmul.f32 %v4842_v30, %v4840_v28  ;;  %v10791_v28 = vld [vmem:[#allocation91_spill] sm:$0xff]  ;;  %v10792_v30 = vld [vmem:[#allocation100_spill] sm:$0xff] }
 0xaee   :  { %3019 = vmatmul.mubr.f32.vlgmr.msra.gmra.mxu0 %v2953_v31  ;;  %v4422_v34 = vrot.slane %v2953_v31, 4  ;;  %3090 = vmatmul.mubr.f32.vlgmr.msra.gmra.mxu1 %v2953_v31  ;;  %v10793_v31 = vld [vmem:[#allocation101_spill] sm:$0xff] }
 0xaef   :  { %3105 = vmatpush1.msra.mxu0 %v7742_v21  ;;  %3176 = vmatpush1.msra.mxu1 %v7745_v47  ;;  %v10747_v21 = vld [vmem:[#allocation47_spill] sm:$0xff]  ;;  %v10748_v47 = vld [vmem:[#allocation64_spill] sm:$0xff] }
 0xaf0   :  { %3106 = vmatprep.subr.mxu0 %v7748_v32  ;;  %3177 = vmatprep.subr.mxu1 %v7751_v16  ;;  %v8235_v58 = vsel %vm4439_vm4, %v10741_v15, %v4422_v34  ;;  %v10749_v32 = vld [vmem:[#allocation49_spill] sm:$0xff]  ;;  %v10750_v16 = vld [vmem:[#allocation66_spill] sm:$0xff]  ;;  %v10795_v15 = vld [vmem:[#allocation103_spill] sm:$0xff] }
 0xaf1   :  { %3107 = vmatpush1.msra.mxu0 %v10742_v38  ;;  %3178 = vmatpush1.msra.mxu1 %v10743_v39  ;;  %v10794_v34 = vld [vmem:[#allocation102_spill] sm:$0xff]  ;;  %v10796_v38 = vld [vmem:[#allocation104_spill] sm:$0xff]  ;;  %v10797_v39 = vld [vmem:[#allocation105_spill] sm:$0xff] }
 0xaf2   :  { %3108 = vmatprep.subr.mxu0 %v10744_v40  ;;  %3179 = vmatprep.subr.mxu1 %v10745_v42  ;;  %v10798_v40 = vld [vmem:[#allocation106_spill] sm:$0xff]  ;;  %v10799_v42 = vld [vmem:[#allocation107_spill] sm:$0xff] }
 0xaf3   :  { %3109 = vmatpush1.msra.mxu0 %v10746_v44  ;;  %3180 = vmatpush1.msra.mxu1 %v10747_v21  ;;  %v10800_v44 = vld [vmem:[#allocation108_spill] sm:$0xff]  ;;  %v10801_v21 = vld [vmem:[#allocation109_spill] sm:$0xff] }
 0xaf4   :  { %3110 = vmatprep.subr.mxu0 %v10748_v47  ;;  %3181 = vmatprep.subr.mxu1 %v10749_v32  ;;  %v10802_v47 = vld [vmem:[#allocation110_spill] sm:$0xff]  ;;  %v10803_v32 = vld [vmem:[#allocation111_spill] sm:$0xff] }
 0xaf5   :  { %3111 = vmatpush1.msra.mxu0 %v10750_v16  ;;  %3182 = vmatpush1.msra.mxu1 %v10751_v45  ;;  %v10804_v16 = vld [vmem:[#allocation112_spill] sm:$0xff]  ;;  %v10805_v45 = vld [vmem:[#allocation113_spill] sm:$0xff] }
 0xaf6   :  { %3112 = vmatprep.subr.mxu0 %v10752_v57  ;;  %3183 = vmatprep.subr.mxu1 %v10753_v59  ;;  %v10806_v57 = vld [vmem:[#allocation114_spill] sm:$0xff]  ;;  %v10807_v59 = vld [vmem:[#allocation115_spill] sm:$0xff] }
 0xaf7   :  { %3113 = vmatpush1.msra.mxu0 %v10754_v63  ;;  %3184 = vmatpush1.msra.mxu1 %v10755_v17  ;;  %v10808_v63 = vld [vmem:[#allocation116_spill] sm:$0xff]  ;;  %v10809_v17 = vld [vmem:[#allocation117_spill] sm:$0xff] }
 0xaf8   :  { %3114 = vmatprep.subr.mxu0 %v10756_v33  ;;  %3185 = vmatprep.subr.mxu1 %v10757_v4  ;;  %v10811_v33 = vld [vmem:[#allocation119_spill] sm:$0xff]  ;;  %v10812_v4 = vld [vmem:[#allocation120_spill] sm:$0xff] }
 0xaf9   :  { %3115 = vmatpush1.msra.mxu0 %v10758_v43  ;;  %3186 = vmatpush1.msra.mxu1 %v10759_v6  ;;  %v10813_v43 = vld [vmem:[#allocation121_spill] sm:$0xff]  ;;  %v10814_v6 = vld [vmem:[#allocation122_spill] sm:$0xff] }
 0xafa   :  { %3116 = vmatprep.subr.mxu0 %v10760_v11  ;;  %3187 = vmatprep.subr.mxu1 %v10761_v56  ;;  %v10815_v11 = vld [vmem:[#allocation123_spill] sm:$0xff]  ;;  %v10816_v56 = vld [vmem:[#allocation124_spill] sm:$0xff] }
 0xafb   :  { %3117 = vmatpush1.msra.mxu0 %v10762_v0  ;;  %3188 = vmatpush1.msra.mxu1 %v10763_v12  ;;  %v10817_v0 = vld [vmem:[#allocation125_spill] sm:$0xff]  ;;  %v10818_v12 = vld [vmem:[#allocation126_spill] sm:$0xff] }
 0xafc   :  { %3118 = vmatprep.subr.mxu0 %v10764_v62  ;;  %3189 = vmatprep.subr.mxu1 %v10765_v35  ;;  %v10819_v62 = vld [vmem:[#allocation127_spill] sm:$0xff]  ;;  %v10820_v35 = vld [vmem:[#allocation128_spill] sm:$0xff] }
 0xafd   :  { %3119 = vmatpush1.msra.mxu0 %v10766_v36  ;;  %3190 = vmatpush1.msra.mxu1 %v10767_v22  ;;  %v10821_v36 = vld [vmem:[#allocation129_spill] sm:$0xff]  ;;  %v10822_v22 = vld [vmem:[#allocation130_spill] sm:$0xff] }
 0xafe   :  { %3120 = vmatprep.subr.mxu0 %v10768_v10  ;;  %3191 = vmatprep.subr.mxu1 %v10769_v18  ;;  %v10823_v10 = vld [vmem:[#allocation131_spill] sm:$0xff]  ;;  %v10824_v18 = vld [vmem:[#allocation132_spill] sm:$0xff] }
 0xaff   :  { %3121 = vmatpush1.msra.mxu0 %v10770_v19  ;;  %3192 = vmatpush1.msra.mxu1 %v10771_v50  ;;  %v10825_v19 = vld [vmem:[#allocation133_spill] sm:$0xff]  ;;  %v10826_v50 = vld [vmem:[#allocation134_spill] sm:$0xff] }
 0xb00   :  { %3122 = vmatprep.subr.mxu0 %v10772_v26  ;;  %3193 = vmatprep.subr.mxu1 %v10773_v9  ;;  %v10827_v26 = vld [vmem:[#allocation135_spill] sm:$0xff]  ;;  %v10828_v9 = vld [vmem:[#allocation136_spill] sm:$0xff] }
 0xb01   :  { %3123 = vmatpush1.msra.mxu0 %v10774_v7  ;;  %3194 = vmatpush1.msra.mxu1 %v10775_v8  ;;  %v10829_v7 = vld [vmem:[#allocation137_spill] sm:$0xff]  ;;  %v10830_v8 = vld [vmem:[#allocation138_spill] sm:$0xff] }
 0xb02   :  { %3124 = vmatprep.subr.mxu0 %v10776_v41  ;;  %3195 = vmatprep.subr.mxu1 %v10777_v53  ;;  %v10831_v41 = vld [vmem:[#allocation139_spill] sm:$0xff]  ;;  %v10832_v53 = vld [vmem:[#allocation140_spill] sm:$0xff] }
 0xb03   :  { %3125 = vmatpush1.msra.mxu0 %v10778_v14  ;;  %3196 = vmatpush1.msra.mxu1 %v10779_v55  ;;  %v10833_v14 = vld [vmem:[#allocation141_spill] sm:$0xff]  ;;  %v10834_v55 = vld [vmem:[#allocation142_spill] sm:$0xff] }
 0xb04   :  { %3126 = vmatprep.subr.mxu0 %v10780_v5  ;;  %3197 = vmatprep.subr.mxu1 %v10781_v3  ;;  %v10835_v5 = vld [vmem:[#allocation143_spill] sm:$0xff]  ;;  %v10836_v3 = vld [vmem:[#allocation144_spill] sm:$0xff] }
 0xb05   :  { %3127 = vmatpush1.msra.mxu0 %v10782_v23  ;;  %3198 = vmatpush1.msra.mxu1 %v10783_v20  ;;  %v10837_v23 = vld [vmem:[#allocation145_spill] sm:$0xff]  ;;  %v10838_v20 = vld [vmem:[#allocation146_spill] sm:$0xff] }
 0xb06   :  { %3128 = vmatprep.subr.mxu0 %v10784_v24  ;;  %3199 = vmatprep.subr.mxu1 %v10785_v48  ;;  %v10839_v24 = vld [vmem:[#allocation147_spill] sm:$0xff]  ;;  %v10840_v48 = vld [vmem:[#allocation148_spill] sm:$0xff] }
 0xb07   :  { %3129 = vmatpush1.msra.mxu0 %v10786_v52  ;;  %3200 = vmatpush1.msra.mxu1 %v10787_v2  ;;  %v10841_v52 = vld [vmem:[#allocation149_spill] sm:$0xff]  ;;  %v10842_v2 = vld [vmem:[#allocation150_spill] sm:$0xff] }
 0xb08   :  { %3130 = vmatprep.subr.mxu0 %v10788_v25  ;;  %3201 = vmatprep.subr.mxu1 %v10789_v60  ;;  %v10843_v25 = vld [vmem:[#allocation151_spill] sm:$0xff]  ;;  %v10844_v60 = vld [vmem:[#allocation152_spill] sm:$0xff] }
 0xb09   :  { %3131 = vmatpush1.msra.mxu0 %v10790_v27  ;;  %3202 = vmatpush1.msra.mxu1 %v10791_v28  ;;  %v10845_v27 = vld [vmem:[#allocation153_spill] sm:$0xff]  ;;  %v10846_v28 = vld [vmem:[#allocation154_spill] sm:$0xff] }
 0xb0a   :  { %3132 = vmatprep.subr.mxu0 %v10792_v30  ;;  %3203 = vmatprep.subr.mxu1 %v10793_v31  ;;  %v10847_v30 = vld [vmem:[#allocation155_spill] sm:$0xff]  ;;  %v10848_v31 = vld [vmem:[#allocation156_spill] sm:$0xff] }
 0xb0b   :  { %3133 = vmatpush1.msra.mxu0 %v10794_v34  ;;  %3204 = vmatpush1.msra.mxu1 %v10795_v15  ;;  %v10849_v34 = vld [vmem:[#allocation157_spill] sm:$0xff]  ;;  %v10850_v15 = vld [vmem:[#allocation158_spill] sm:$0xff] }
 0xb0c   :  { %3134 = vmatprep.subr.mxu0 %v10796_v38  ;;  %3205 = vmatprep.subr.mxu1 %v10797_v39  ;;  %v10851_v38 = vld [vmem:[#allocation159_spill] sm:$0xff]  ;;  %v10852_v39 = vld [vmem:[#allocation160_spill] sm:$0xff] }
 0xb0d   :  { %3135 = vmatpush1.msra.mxu0 %v10798_v40  ;;  %3168 = vmatprep.mubr.f32.mxu0 %v10096_v29  ;;  %v10853_v40 = vld [vmem:[#allocation161_spill] sm:$0xff] }
 0xb0e   :  { %3206 = vmatpush1.msra.mxu1 %v10799_v42  ;;  %3239 = vmatprep.mubr.f32.mxu1 %v10096_v29  ;;  %v10854_v42 = vld [vmem:[#allocation162_spill] sm:$0xff] }
 0xb0f   :  { %3169 = vmatmul.mubr.f32.vlgmr.msra.gmra.mxu0 %v8148_v13  ;;  %3240 = vmatmul.mubr.f32.vlgmr.msra.gmra.mxu1 %v8148_v13  ;;  %v10810_v13 = vld [vmem:[#allocation118_spill] sm:$0xff] }
 0xb10   :  { %3270 = vmatprep.subr.mxu0 %v10800_v44  ;;  %3341 = vmatprep.subr.mxu1 %v10801_v21  ;;  %v10855_v44 = vld [vmem:[#allocation163_spill] sm:$0xff]  ;;  %v10856_v21 = vld [vmem:[#allocation164_spill] sm:$0xff] }
 0xb11   :  { %3271 = vmatpush1.msra.mxu0 %v10802_v47  ;;  %3342 = vmatpush1.msra.mxu1 %v10803_v32  ;;  %v10857_v47 = vld [vmem:[#allocation172_spill] sm:$0xff]  ;;  %v10858_v32 = vld [vmem:[#allocation173_spill] sm:$0xff] }
 0xb12   :  { %3272 = vmatprep.subr.mxu0 %v10804_v16  ;;  %3343 = vmatprep.subr.mxu1 %v10805_v45  ;;  %v10859_v16 = vld [vmem:[#allocation174_spill] sm:$0xff]  ;;  %v10860_v45 = vld [vmem:[#allocation175_spill] sm:$0xff] }
 0xb13   :  { %3273 = vmatpush1.msra.mxu0 %v10806_v57  ;;  %3344 = vmatpush1.msra.mxu1 %v10807_v59  ;;  %v10861_v57 = vld [vmem:[#allocation176_spill] sm:$0xff]  ;;  %v10862_v59 = vld [vmem:[#allocation177_spill] sm:$0xff] }
 0xb14   :  { %3274 = vmatprep.subr.mxu0 %v10808_v63  ;;  %3345 = vmatprep.subr.mxu1 %v10809_v17  ;;  %v10863_v63 = vld [vmem:[#allocation178_spill] sm:$0xff]  ;;  %v8365_v17 = vld [vmem:[#allocation10 + $0x1e8] sm:$0xff] }
 0xb15   :  { %3275 = vmatpush1.msra.mxu0 %v10810_v13  ;;  %3346 = vmatpush1.msra.mxu1 %v10811_v33  ;;  %v8368_v13 = vld [vmem:[#allocation10 + $0x1f8] sm:$0xff] }
 0xb16   :  { %3276 = vmatprep.subr.mxu0 %v10812_v4  ;;  %3347 = vmatprep.subr.mxu1 %v10813_v43  ;;  %v10864_v43 = vld [vmem:[#allocation167_spill] sm:$0xff] }
 0xb17   :  { %3277 = vmatpush1.msra.mxu0 %v10814_v6  ;;  %3348 = vmatpush1.msra.mxu1 %v10815_v11  ;;  %v3096_v6 = vrot.slane %v10864_v43, 5 }
 0xb18   :  { %3278 = vmatprep.subr.mxu0 %v10816_v56  ;;  %3349 = vmatprep.subr.mxu1 %v10817_v0  ;;  %v10865_v0 = vld [vmem:[#allocation168_spill] sm:$0xff] }
 0xb19   :  { %3279 = vmatpush1.msra.mxu0 %v10818_v12  ;;  %3350 = vmatpush1.msra.mxu1 %v10819_v62  ;;  %v3097_v12 = vrot.slane %v10865_v0, 5 }
 0xb1a   :  { %3280 = vmatprep.subr.mxu0 %v10820_v35  ;;  %3351 = vmatprep.subr.mxu1 %v10821_v36 }
 0xb1b   :  { %3281 = vmatpush1.msra.mxu0 %v10822_v22  ;;  %3352 = vmatpush1.msra.mxu1 %v10823_v10 }
 0xb1c   :  { %3282 = vmatprep.subr.mxu0 %v10824_v18  ;;  %3353 = vmatprep.subr.mxu1 %v10825_v19 }
 0xb1d   :  { %3283 = vmatpush1.msra.mxu0 %v10826_v50  ;;  %3354 = vmatpush1.msra.mxu1 %v10827_v26  ;;  %v10866_v50 = vld [vmem:[#allocation171_spill] sm:$0xff] }
 0xb1e   :  { %3284 = vmatprep.subr.mxu0 %v10828_v9  ;;  %3355 = vmatprep.subr.mxu1 %v10829_v7  ;;  %v3098_v26 = vrot.slane %v10866_v50, 5 }
 0xb1f   :  { %3285 = vmatpush1.msra.mxu0 %v10830_v8  ;;  %3356 = vmatpush1.msra.mxu1 %v10831_v41  ;;  %v3099_v8 = vrot.slane %v6413_v1, 5 }
 0xb20   :  { %3286 = vmatprep.subr.mxu0 %v10832_v53  ;;  %3357 = vmatprep.subr.mxu1 %v10833_v14 }
 0xb21   :  { %3287 = vmatpush1.msra.mxu0 %v10834_v55  ;;  %3358 = vmatpush1.msra.mxu1 %v10835_v5 }
 0xb22   :  { %3288 = vmatprep.subr.mxu0 %v10836_v3  ;;  %3359 = vmatprep.subr.mxu1 %v10837_v23 }
 0xb23   :  { %3289 = vmatpush1.msra.mxu0 %v10838_v20  ;;  %3360 = vmatpush1.msra.mxu1 %v10839_v24 }
 0xb24   :  { %3290 = vmatprep.subr.mxu0 %v10840_v48  ;;  %3361 = vmatprep.subr.mxu1 %v10841_v52 }
 0xb25   :  { %3291 = vmatpush1.msra.mxu0 %v10842_v2  ;;  %3362 = vmatpush1.msra.mxu1 %v10843_v25 }
 0xb26   :  { %3292 = vmatprep.subr.mxu0 %v10844_v60  ;;  %3363 = vmatprep.subr.mxu1 %v10845_v27 }
 0xb27   :  { %3293 = vmatpush1.msra.mxu0 %v10846_v28  ;;  %3364 = vmatpush1.msra.mxu1 %v10847_v30 }
 0xb28   :  { %3294 = vmatprep.subr.mxu0 %v10848_v31  ;;  %3365 = vmatprep.subr.mxu1 %v10849_v34  ;;  %v8391_v31 = vld [vmem:[#allocation10 + $0x1e0] sm:$0xff]  ;;  %v8394_v34 = vld [vmem:[#allocation10 + $0x1f0] sm:$0xff] }
 0xb29   :  { %3295 = vmatpush1.msra.mxu0 %v10850_v15  ;;  %3366 = vmatpush1.msra.mxu1 %v10851_v38  ;;  %v8400_v15 = vld [vmem:[#allocation10 + $0x1d8] sm:$0xff]  ;;  %v8403_v38 = vld [vmem:[#allocation10 + $0x1c0] sm:$0xff] }
 0xb2a   :  { %3296 = vmatprep.subr.mxu0 %v10852_v39  ;;  %3367 = vmatprep.subr.mxu1 %v10853_v40  ;;  %v8406_v39 = vld [vmem:[#allocation10 + $0x1d0] sm:$0xff]  ;;  %v8409_v40 = vld [vmem:[#allocation10 + $0x1a8] sm:$0xff] }
 0xb2b   :  { %3297 = vmatpush1.msra.mxu0 %v10854_v42  ;;  %3368 = vmatpush1.msra.mxu1 %v10855_v44  ;;  %v8412_v42 = vld [vmem:[#allocation10 + $0x1b8] sm:$0xff]  ;;  %v8415_v44 = vld [vmem:[#allocation10 + $0x1a0] sm:$0xff] }
 0xb2c   :  { %3298 = vmatprep.subr.mxu0 %v10856_v21  ;;  %3369 = vmatprep.subr.mxu1 %v10857_v47  ;;  %v8418_v21 = vld [vmem:[#allocation10 + $0x1b0] sm:$0xff]  ;;  %v8421_v47 = vld [vmem:[#allocation10 + $0x188] sm:$0xff] }
 0xb2d   :  { %3299 = vmatpush1.msra.mxu0 %v10858_v32  ;;  %3370 = vmatpush1.msra.mxu1 %v10859_v16  ;;  %v8424_v32 = vld [vmem:[#allocation10 + $0x198] sm:$0xff]  ;;  %v8427_v16 = vld [vmem:[#allocation10 + $0x180] sm:$0xff] }
 0xb2e   :  { %3300 = vmatprep.subr.mxu0 %v10860_v45  ;;  %3371 = vmatprep.subr.mxu1 %v10861_v57  ;;  %v8430_v45 = vld [vmem:[#allocation10 + $0x190] sm:$0xff]  ;;  %v8433_v57 = vld [vmem:[#allocation10 + $0x168] sm:$0xff] }
 0xb2f   :  { %3301 = vmatpush1.msra.mxu0 %v10862_v59  ;;  %3334 = vmatprep.mubr.f32.mxu0 %v10096_v29  ;;  %v8436_v59 = vld [vmem:[#allocation10 + $0x178] sm:$0xff] }
 0xb30   :  { %3372 = vmatpush1.msra.mxu1 %v10863_v63  ;;  %3405 = vmatprep.mubr.f32.mxu1 %v10096_v29  ;;  %v8439_v63 = vld [vmem:[#allocation10 + $0x160] sm:$0xff] }
 0xb31   :  { %3440 = vmatprep.subr.mxu0 %v8365_v17  ;;  %3511 = vmatprep.subr.mxu1 %v8368_v13 }
 0xbae   :  { %v8371_v33 = vpop.f32.mrf.mxu0  ;;  %v8377_v62 = vpop.f32.mrf.mxu1 }
 0xbb0   :  { %v8373_v4 = vpop.f32.mrf.mxu0  ;;  %v8379_v18 = vpop.f32.mrf.mxu1 }
 0xbcf   :  { %v3170_v11 = vpop.f32.mrf.mxu0  ;;  %v3241_v19 = vpop.f32.mrf.mxu1 }
 0xbd0   :  { %v3171_v56 = vadd.f32 %v3170_v11, %v3096_v6  ;;  %v3242_v9 = vadd.f32 %v3241_v19, %v3098_v26  ;;  %v8442_v6 = vld [vmem:[#allocation10 + $0x170] sm:$0xff]  ;;  %v8445_v11 = vld [vmem:[#allocation10 + $0x148] sm:$0xff] }
 0xbd1   :  { %v3172_v35 = vpop.f32.mrf.mxu0  ;;  %v3243_v7 = vpop.f32.mrf.mxu1  ;;  %v8466_v19 = vld [vmem:[#allocation10 + $0x130] sm:$0xff]  ;;  %v8469_v26 = vld [vmem:[#allocation10 + $0x108] sm:$0xff] }
 0xbd2   :  { %v4598_v36 = vmul.f32 -1.442695, %v3171_v56  ;;  %v3173_v22 = vadd.f32 %v3172_v35, %v3097_v12  ;;  %v4600_v41 = vmul.f32 -1.442695, %v3242_v9  ;;  %v3244_v53 = vadd.f32 %v3243_v7, %v3099_v8  ;;  %v8448_v56 = vld [vmem:[#allocation10 + $0x158] sm:$0xff]  ;;  %v8451_v12 = vld [vmem:[#allocation10 + $0x140] sm:$0xff] }
 0xbd3   :  { %v8454_v35 = vld [vmem:[#allocation10 + $0x150] sm:$0xff]  ;;  %v8472_v9 = vld [vmem:[#allocation10 + $0x118] sm:$0xff]  ;;  %v8475_v7 = vld [vmem:[#allocation10 + $0x100] sm:$0xff] }
 0xbd4   :  { %4843 = vpow2.f32 %v4598_v36  ;;  %v4599_v10 = vmul.f32 -1.442695, %v3173_v22  ;;  %v8457_v36 = vld [vmem:[#allocation10 + $0x128] sm:$0xff]  ;;  %v8460_v22 = vld [vmem:[#allocation10 + $0x138] sm:$0xff]  ;;  %v8478_v8 = vld [vmem:[#allocation10 + $0x110] sm:$0xff] }
 0xbd6   :  { %4845 = vpow2.f32 %v4599_v10  ;;  %v8463_v10 = vld [vmem:[#allocation10 + $0x120] sm:$0xff] }
 0xbd7   :  { %4847 = vpow2.f32 %v4600_v41  ;;  %v8481_v41 = vld [vmem:[#allocation10 + $0xe8] sm:$0xff] }
 0xbd8   :  { %4849 = vtanh.f32 %v3244_v53  ;;  %v8484_v53 = vld [vmem:[#allocation10 + $0xf8] sm:$0xff] }
 0xbe1   :  { %v4844_v14 = vpop.eup %4843 }
 0xbe2   :  { %v3255_v55 = vadd.f32 1.0, %v4844_v14  ;;  %v8487_v14 = vld [vmem:[#allocation10 + $0xe0] sm:$0xff] }
 0xbe3   :  { %v4846_v5 = vpop.eup %4845  ;;  %10867 = vst [vmem:[#allocation179_spill] sm:$0xff] %v8487_v14 }
 0xbe4   :  { %4851 = vrcp.f32 %v3255_v55  ;;  %v3256_v3 = vadd.f32 1.0, %v4846_v5  ;;  %v4848_v23 = vpop.eup %4847  ;;  %v8490_v55 = vld [vmem:[#allocation10 + $0xf0] sm:$0xff]  ;;  %v8493_v5 = vld [vmem:[#allocation10 + $0xc8] sm:$0xff] }
 0xbe5   :  { %v4850_v20 = vpop.eup %4849  ;;  %v3257_v2 = vadd.f32 1.0, %v4848_v23  ;;  %10868 = vst [vmem:[#allocation29_spill] sm:$0xff] %v8490_v55  ;;  %10869 = vst [vmem:[#allocation21_spill] sm:$0xff] %v8493_v5  ;;  %v8499_v23 = vld [vmem:[#allocation10 + $0xc0] sm:$0xff] }
 0xbe6   :  { %4853 = vrcp.f32 %v3256_v3  ;;  %v8496_v3 = vld [vmem:[#allocation10 + $0xd8] sm:$0xff]  ;;  %10871 = vst [vmem:[#allocation22_spill] sm:$0xff] %v8499_v23 }
 0xbe7   :  { %4855 = vrcp.f32 %v3257_v2  ;;  %10870 = vst [vmem:[#allocation31_spill] sm:$0xff] %v8496_v3  ;;  %v8514_v2 = vld [vmem:[#allocation10 + $0xb0] sm:$0xff] }
 0xbe8   :  { %10876 = vst [vmem:[#allocation37_spill] sm:$0xff] %v8514_v2 }
 0xbf1   :  { %v4852_v24 = vpop.eup %4851 }
 0xbf2   :  { %v3266_v48 = vmul.f32 %v4852_v24, %v4850_v20  ;;  %v8502_v20 = vld [vmem:[#allocation10 + $0xd0] sm:$0xff]  ;;  %v8505_v24 = vld [vmem:[#allocation10 + $0xa8] sm:$0xff] }
 0xbf3   :  { %v4854_v52 = vpop.eup %4853  ;;  %10872 = vst [vmem:[#allocation33_spill] sm:$0xff] %v8502_v20  ;;  %10873 = vst [vmem:[#allocation23_spill] sm:$0xff] %v8505_v24 }
 0xbf4   :  { %v3265_v25 = vmul.f32 %v4854_v52, %v8145_v54  ;;  %v4856_v27 = vpop.eup %4855  ;;  %v8397_v54 = vld [vmem:[#allocation10 + $0x1c8] sm:$0xff]  ;;  %v8511_v52 = vld [vmem:[#allocation10 + $0xa0] sm:$0xff] }
 0xbf5   :  { %10875 = vst [vmem:[#allocation24_spill] sm:$0xff] %v8511_v52 }
 0xbf6   :  { %v8384_v60 = vadd.f32 %v3266_v48, %v3265_v25  ;;  %v8508_v48 = vld [vmem:[#allocation10 + $0xb8] sm:$0xff]  ;;  %v8517_v25 = vld [vmem:[#allocation10 + $0x88] sm:$0xff] }
 0xbf7   :  { %10874 = vst [vmem:[#allocation35_spill] sm:$0xff] %v8508_v48  ;;  %10877 = vst [vmem:[#allocation25_spill] sm:$0xff] %v8517_v25 }
 0xbf8   :  { %4857 = vtanh.f32 %v8384_v60 }
 0xc05   :  { %v4858_v28 = vpop.eup %4857 }
 0xc06   :  { %v8387_v30 = vmul.f32 %v4858_v28, %v4856_v27  ;;  %v8520_v27 = vld [vmem:[#allocation10 + $0x98] sm:$0xff]  ;;  %v8523_v28 = vld [vmem:[#allocation10 + $0x80] sm:$0xff] }
 0xc07   :  { %10878 = vst [vmem:[#allocation39_spill] sm:$0xff] %v8520_v27  ;;  %10879 = vst [vmem:[#allocation26_spill] sm:$0xff] %v8523_v28 }
 0xc08   :  { %3335 = vmatmul.mubr.f32.vlgmr.msra.gmra.mxu0 %v8387_v30  ;;  %3406 = vmatmul.mubr.f32.vlgmr.msra.gmra.mxu1 %v8387_v30 }
 0xc09   :  { %3441 = vmatpush1.msra.mxu0 %v8391_v31  ;;  %3512 = vmatpush1.msra.mxu1 %v8394_v34 }
 0xc0a   :  { %3442 = vmatprep.subr.mxu0 %v8397_v54  ;;  %3513 = vmatprep.subr.mxu1 %v8400_v15 }
 0xc0b   :  { %3443 = vmatpush1.msra.mxu0 %v8403_v38  ;;  %3514 = vmatpush1.msra.mxu1 %v8406_v39 }
 0xc0c   :  { %3444 = vmatprep.subr.mxu0 %v8409_v40  ;;  %3515 = vmatprep.subr.mxu1 %v8412_v42 }
 0xc0d   :  { %3445 = vmatpush1.msra.mxu0 %v8415_v44  ;;  %3516 = vmatpush1.msra.mxu1 %v8418_v21 }
 0xc0e   :  { %3446 = vmatprep.subr.mxu0 %v8421_v47  ;;  %3517 = vmatprep.subr.mxu1 %v8424_v32 }
 0xc0f   :  { %3447 = vmatpush1.msra.mxu0 %v8427_v16  ;;  %3518 = vmatpush1.msra.mxu1 %v8430_v45 }
 0xc10   :  { %3448 = vmatprep.subr.mxu0 %v8433_v57  ;;  %3519 = vmatprep.subr.mxu1 %v8436_v59 }
 0xc11   :  { %3449 = vmatpush1.msra.mxu0 %v8439_v63  ;;  %3520 = vmatpush1.msra.mxu1 %v8442_v6 }
 0xc12   :  { %3450 = vmatprep.subr.mxu0 %v8445_v11  ;;  %3521 = vmatprep.subr.mxu1 %v8448_v56 }
 0xc13   :  { %3451 = vmatpush1.msra.mxu0 %v8451_v12  ;;  %3522 = vmatpush1.msra.mxu1 %v8454_v35 }
 0xc14   :  { %3452 = vmatprep.subr.mxu0 %v8457_v36  ;;  %3523 = vmatprep.subr.mxu1 %v8460_v22 }
 0xc15   :  { %3453 = vmatpush1.msra.mxu0 %v8463_v10  ;;  %3524 = vmatpush1.msra.mxu1 %v8466_v19 }
 0xc16   :  { %3454 = vmatprep.subr.mxu0 %v8469_v26  ;;  %3525 = vmatprep.subr.mxu1 %v8472_v9 }
 0xc17   :  { %3455 = vmatpush1.msra.mxu0 %v8475_v7  ;;  %3526 = vmatpush1.msra.mxu1 %v8478_v8 }
 0xc18   :  { %3456 = vmatprep.subr.mxu0 %v8481_v41  ;;  %3527 = vmatprep.subr.mxu1 %v8484_v53 }
 0xc19   :  { %3457 = vmatpush1.msra.mxu0 %v8487_v14  ;;  %3528 = vmatpush1.msra.mxu1 %v8490_v55 }
 0xc1a   :  { %3458 = vmatprep.subr.mxu0 %v8493_v5  ;;  %3529 = vmatprep.subr.mxu1 %v8496_v3 }
 0xc1b   :  { %3459 = vmatpush1.msra.mxu0 %v8499_v23  ;;  %3530 = vmatpush1.msra.mxu1 %v8502_v20 }
 0xc1c   :  { %3460 = vmatprep.subr.mxu0 %v8505_v24  ;;  %3531 = vmatprep.subr.mxu1 %v8508_v48  ;;  %v8526_v48 = vld [vmem:[#allocation10 + $0x90] sm:$0xff] }
 0xc1d   :  { %3461 = vmatpush1.msra.mxu0 %v8511_v52  ;;  %3532 = vmatpush1.msra.mxu1 %v8514_v2  ;;  %10880 = vst [vmem:[#allocation41_spill] sm:$0xff] %v8526_v48  ;;  %v8529_v52 = vld [vmem:[#allocation10 + $0x68] sm:$0xff]  ;;  %v8532_v2 = vld [vmem:[#allocation10 + $0x78] sm:$0xff] }
 0xc1e   :  { %3462 = vmatprep.subr.mxu0 %v8517_v25  ;;  %3533 = vmatprep.subr.mxu1 %v8520_v27  ;;  %10881 = vst [vmem:[#allocation27_spill] sm:$0xff] %v8529_v52  ;;  %10882 = vst [vmem:[#allocation43_spill] sm:$0xff] %v8532_v2  ;;  %v8535_v25 = vld [vmem:[#allocation10 + $0x60] sm:$0xff]  ;;  %v8538_v27 = vld [vmem:[#allocation10 + $0x70] sm:$0xff] }
 0xc1f   :  { %3463 = vmatpush1.msra.mxu0 %v8523_v28  ;;  %3534 = vmatpush1.msra.mxu1 %v8526_v48  ;;  %10883 = vst [vmem:[#allocation30_spill] sm:$0xff] %v8535_v25  ;;  %10884 = vst [vmem:[#allocation46_spill] sm:$0xff] %v8538_v27  ;;  %v8541_v28 = vld [vmem:[#allocation10 + $0x48] sm:$0xff]  ;;  %v8544_v48 = vld [vmem:[#allocation10 + $0x58] sm:$0xff] }
 0xc20   :  { %3464 = vmatprep.subr.mxu0 %v8529_v52  ;;  %3535 = vmatprep.subr.mxu1 %v8532_v2  ;;  %10885 = vst [vmem:[#allocation165_spill] sm:$0xff] %v8541_v28  ;;  %10886 = vst [vmem:[#allocation166_spill] sm:$0xff] %v8544_v48  ;;  %v8547_v52 = vld [vmem:[#allocation10 + $0x40] sm:$0xff]  ;;  %v8550_v2 = vld [vmem:[#allocation10 + $0x50] sm:$0xff] }
 0xc21   :  { %3465 = vmatpush1.msra.mxu0 %v8535_v25  ;;  %3536 = vmatpush1.msra.mxu1 %v8538_v27  ;;  %10887 = vst [vmem:[#allocation169_spill] sm:$0xff] %v8547_v52  ;;  %10888 = vst [vmem:[#allocation170_spill] sm:$0xff] %v8550_v2  ;;  %v8553_v25 = vld [vmem:[#allocation10 + $0x28] sm:$0xff]  ;;  %v8556_v27 = vld [vmem:[#allocation10 + $0x38] sm:$0xff] }
 0xc22   :  { %3466 = vmatprep.subr.mxu0 %v8541_v28  ;;  %3537 = vmatprep.subr.mxu1 %v8544_v48  ;;  %10889 = vst [vmem:[#allocation32_spill] sm:$0xff] %v8553_v25  ;;  %10890 = vst [vmem:[#allocation48_spill] sm:$0xff] %v8556_v27  ;;  %v8559_v28 = vld [vmem:[#allocation10 + $0x20] sm:$0xff]  ;;  %v8562_v48 = vld [vmem:[#allocation10 + $0x30] sm:$0xff] }
 0xc23   :  { %3467 = vmatpush1.msra.mxu0 %v8547_v52  ;;  %3538 = vmatpush1.msra.mxu1 %v8550_v2  ;;  %10891 = vst [vmem:[#allocation34_spill] sm:$0xff] %v8559_v28  ;;  %10892 = vst [vmem:[#allocation50_spill] sm:$0xff] %v8562_v48  ;;  %v8565_v52 = vld [vmem:[#allocation10 + $0x8] sm:$0xff]  ;;  %v8568_v2 = vld [vmem:[#allocation10 + $0x18] sm:$0xff] }
 0xc24   :  { %3468 = vmatprep.subr.mxu0 %v8553_v25  ;;  %3539 = vmatprep.subr.mxu1 %v8556_v27  ;;  %10893 = vst [vmem:[#allocation36_spill] sm:$0xff] %v8565_v52  ;;  %10894 = vst [vmem:[#allocation52_spill] sm:$0xff] %v8568_v2  ;;  %v8571_v25 = vld [vmem:[#allocation10] sm:$0xff]  ;;  %v8574_v27 = vld [vmem:[#allocation10 + $0x10] sm:$0xff] }
 0xc25   :  { %3469 = vmatpush1.msra.mxu0 %v8559_v28  ;;  %3540 = vmatpush1.msra.mxu1 %v8562_v48  ;;  %10895 = vst [vmem:[#allocation38_spill] sm:$0xff] %v8571_v25  ;;  %10896 = vst [vmem:[#allocation54_spill] sm:$0xff] %v8574_v27  ;;  %v8579_v48 = vld [vmem:[#allocation6 + $0x1e8] sm:$0xff] }
 0xc26   :  { %3470 = vmatprep.subr.mxu0 %v8565_v52  ;;  %3541 = vmatprep.subr.mxu1 %v8568_v2  ;;  %10897 = vst [vmem:[#allocation40_spill] sm:$0xff] %v8579_v48  ;;  %v8582_v52 = vld [vmem:[#allocation6 + $0x1f8] sm:$0xff] }
 0xc27   :  { %3471 = vmatpush1.msra.mxu0 %v8571_v25  ;;  %3542 = vmatpush1.msra.mxu1 %v8574_v27  ;;  %10898 = vst [vmem:[#allocation56_spill] sm:$0xff] %v8582_v52 }
 0xc28   :  { %3504 = vmatprep.mubr.f32.mxu0 %v10096_v29  ;;  %3575 = vmatprep.mubr.f32.mxu1 %v10096_v29 }
 0xc29   :  { %3590 = vmatprep.subr.mxu0 %v8579_v48  ;;  %3661 = vmatprep.subr.mxu1 %v8582_v52 }
 0xcc8   :  { %v3336_v2 = vpop.f32.mrf.mxu0  ;;  %v3407_v3 = vpop.f32.mrf.mxu1 }
 0xcc9   :  { %v3337_v28 = vadd.f32 %v3336_v2, %v8371_v33  ;;  %v3408_v48 = vadd.f32 %v3407_v3, %v8377_v62 }
 0xcca   :  { %v3338_v25 = vpop.f32.mrf.mxu0  ;;  %v3409_v55 = vpop.f32.mrf.mxu1 }
 0xccb   :  { %v3412_v24 = vadd.f32 %v3337_v28, %v10740_v51  ;;  %v3339_v27 = vadd.f32 %v3338_v25, %v8373_v4  ;;  %v3414_v52 = vadd.f32 %v3408_v48, %v6503_v49  ;;  %v3410_v14 = vadd.f32 %v3409_v55, %v8379_v18 }
 0xccd   :  { %v4601_v20 = vmul.f32 -1.442695, %v3412_v24  ;;  %v3413_v23 = vadd.f32 %v3339_v27, %v6495_v37  ;;  %v4603_v33 = vmul.f32 -1.442695, %v3414_v52  ;;  %v3415_v28 = vadd.f32 %v3410_v14, %v6509_v61  ;;  %v8597_v27 = vld [vmem:[#allocation6 + $0x1e0] sm:$0xff] }
 0xccf   :  { %4859 = vpow2.f32 %v4601_v20  ;;  %v4602_v5 = vmul.f32 -1.442695, %v3413_v23 }
 0xcd1   :  { %4861 = vpow2.f32 %v4602_v5 }
 0xcd2   :  { %4863 = vpow2.f32 %v4603_v33  ;;  %v8600_v33 = vld [vmem:[#allocation6 + $0x1f0] sm:$0xff] }
 0xcdc   :  { %v4860_v2 = vpop.eup %4859 }
 0xcdd   :  { %v3425_v51 = vadd.f32 1.0, %v4860_v2  ;;  %v8606_v2 = vld [vmem:[#allocation6 + $0x1d8] sm:$0xff] }
 0xcde   :  { %v4862_v4 = vpop.eup %4861 }
 0xcdf   :  { %4865 = vrcp.f32 %v3425_v51  ;;  %v3426_v24 = vadd.f32 1.0, %v4862_v4  ;;  %v4864_v23 = vpop.eup %4863  ;;  %v8612_v4 = vld [vmem:[#allocation6 + $0x1c0] sm:$0xff] }
 0xce0   :  { %4867 = vtanh.f32 %v3415_v28  ;;  %v3427_v3 = vadd.f32 1.0, %v4864_v23  ;;  %10900 = vst [vmem:[#allocation42_spill] sm:$0xff] %v8612_v4  ;;  %v8618_v23 = vld [vmem:[#allocation6 + $0x1a8] sm:$0xff] }
 0xce1   :  { %4869 = vrcp.f32 %v3426_v24  ;;  %v8615_v24 = vld [vmem:[#allocation6 + $0x1d0] sm:$0xff]  ;;  %10902 = vst [vmem:[#allocation44_spill] sm:$0xff] %v8618_v23 }
 0xce2   :  { %4871 = vrcp.f32 %v3427_v3  ;;  %10901 = vst [vmem:[#allocation58_spill] sm:$0xff] %v8615_v24  ;;  %v8633_v3 = vld [vmem:[#allocation6 + $0x198] sm:$0xff] }
 0xce3   :  { %10907 = vst [vmem:[#allocation64_spill] sm:$0xff] %v8633_v3 }
 0xcec   :  { %v4866_v5 = vpop.eup %4865 }
 0xced   :  { %v4868_v20 = vpop.eup %4867 }
 0xcee   :  { %v4870_v62 = vpop.eup %4869  ;;  %v3436_v25 = vmul.f32 %v4868_v20, %v4866_v5  ;;  %v8621_v5 = vld [vmem:[#allocation6 + $0x1b8] sm:$0xff]  ;;  %v8624_v20 = vld [vmem:[#allocation6 + $0x1a0] sm:$0xff] }
 0xcef   :  { %v3435_v48 = vmul.f32 %v4870_v62, %v8227_v46  ;;  %v4872_v14 = vpop.eup %4871  ;;  %v8603_v46 = vld [vmem:[#allocation6 + $0x1c8] sm:$0xff]  ;;  %10903 = vst [vmem:[#allocation60_spill] sm:$0xff] %v8621_v5  ;;  %10904 = vst [vmem:[#allocation45_spill] sm:$0xff] %v8624_v20 }
 0xcf0   :  { %v8630_v62 = vld [vmem:[#allocation6 + $0x188] sm:$0xff] }
 0xcf1   :  { %v8594_v18 = vadd.f32 %v3436_v25, %v3435_v48  ;;  %10906 = vst [vmem:[#allocation47_spill] sm:$0xff] %v8630_v62  ;;  %v8636_v48 = vld [vmem:[#allocation6 + $0x180] sm:$0xff]  ;;  %v8639_v25 = vld [vmem:[#allocation6 + $0x190] sm:$0xff] }
 0xcf2   :  { %10908 = vst [vmem:[#allocation49_spill] sm:$0xff] %v8636_v48  ;;  %10909 = vst [vmem:[#allocation66_spill] sm:$0xff] %v8639_v25 }
 0xcf3   :  { %4873 = vtanh.f32 %v8594_v18 }
 0xd00   :  { %v4874_v55 = vpop.eup %4873 }
 0xd01   :  { %v3439_v52 = vmul.f32 %v4874_v55, %v4872_v14  ;;  %v8642_v14 = vld [vmem:[#allocation6 + $0x168] sm:$0xff]  ;;  %v8645_v55 = vld [vmem:[#allocation6 + $0x178] sm:$0xff] }
 0xd02   :  { %10910 = vst [vmem:[#allocation51_spill] sm:$0xff] %v8642_v14  ;;  %10911 = vst [vmem:[#allocation68_spill] sm:$0xff] %v8645_v55 }
 0xd03   :  { %3505 = vmatmul.mubr.f32.vlgmr.msra.gmra.mxu0 %v3439_v52  ;;  %v4425_v51 = vrot.slane %v3439_v52, 3  ;;  %3576 = vmatmul.mubr.f32.vlgmr.msra.gmra.mxu1 %v3439_v52  ;;  %v8648_v52 = vld [vmem:[#allocation6 + $0x160] sm:$0xff] }
 0xd04   :  { %3591 = vmatpush1.msra.mxu0 %v8597_v27  ;;  %3662 = vmatpush1.msra.mxu1 %v8600_v33  ;;  %10912 = vst [vmem:[#allocation53_spill] sm:$0xff] %v8648_v52 }
 0xd05   :  { %3592 = vmatprep.subr.mxu0 %v8603_v46  ;;  %3663 = vmatprep.subr.mxu1 %v8606_v2  ;;  %v8610_v28 = vsel %vm4441_vm5, %v8235_v58, %v4425_v51  ;;  %v8627_v58 = vld [vmem:[#allocation6 + $0x1b0] sm:$0xff] }
 0xd06   :  { %10899 = vst [vmem:[#allocation20_spill] sm:$0xff] %v8610_v28  ;;  %3593 = vmatpush1.msra.mxu0 %v8612_v4  ;;  %3664 = vmatpush1.msra.mxu1 %v8615_v24  ;;  %10905 = vst [vmem:[#allocation62_spill] sm:$0xff] %v8627_v58  ;;  %v8651_v51 = vld [vmem:[#allocation6 + $0x170] sm:$0xff] }
 0xd07   :  { %3594 = vmatprep.subr.mxu0 %v8618_v23  ;;  %3665 = vmatprep.subr.mxu1 %v8621_v5  ;;  %10913 = vst [vmem:[#allocation70_spill] sm:$0xff] %v8651_v51  ;;  %v3584_v5 = vrot.slane %v10866_v50, 6 }
 0xd08   :  { %3595 = vmatpush1.msra.mxu0 %v8624_v20  ;;  %3666 = vmatpush1.msra.mxu1 %v8627_v58 }
 0xd09   :  { %3596 = vmatprep.subr.mxu0 %v8630_v62  ;;  %3667 = vmatprep.subr.mxu1 %v8633_v3 }
 0xd0a   :  { %3597 = vmatpush1.msra.mxu0 %v8636_v48  ;;  %3668 = vmatpush1.msra.mxu1 %v8639_v25  ;;  %v8654_v48 = vld [vmem:[#allocation6 + $0x148] sm:$0xff]  ;;  %v8657_v25 = vld [vmem:[#allocation6 + $0x158] sm:$0xff] }
 0xd0b   :  { %3598 = vmatprep.subr.mxu0 %v8642_v14  ;;  %3669 = vmatprep.subr.mxu1 %v8645_v55  ;;  %10914 = vst [vmem:[#allocation55_spill] sm:$0xff] %v8654_v48  ;;  %10915 = vst [vmem:[#allocation72_spill] sm:$0xff] %v8657_v25  ;;  %v8660_v14 = vld [vmem:[#allocation6 + $0x140] sm:$0xff]  ;;  %v8663_v55 = vld [vmem:[#allocation6 + $0x150] sm:$0xff] }
 0xd0c   :  { %3599 = vmatpush1.msra.mxu0 %v8648_v52  ;;  %3670 = vmatpush1.msra.mxu1 %v8651_v51  ;;  %10916 = vst [vmem:[#allocation57_spill] sm:$0xff] %v8660_v14  ;;  %10917 = vst [vmem:[#allocation74_spill] sm:$0xff] %v8663_v55  ;;  %v8666_v52 = vld [vmem:[#allocation6 + $0x128] sm:$0xff]  ;;  %v8669_v51 = vld [vmem:[#allocation6 + $0x138] sm:$0xff] }
 0xd0d   :  { %3600 = vmatprep.subr.mxu0 %v8654_v48  ;;  %3671 = vmatprep.subr.mxu1 %v8657_v25  ;;  %10918 = vst [vmem:[#allocation59_spill] sm:$0xff] %v8666_v52  ;;  %10919 = vst [vmem:[#allocation76_spill] sm:$0xff] %v8669_v51  ;;  %v8672_v48 = vld [vmem:[#allocation6 + $0x120] sm:$0xff]  ;;  %v8675_v25 = vld [vmem:[#allocation6 + $0x130] sm:$0xff] }
 0xd0e   :  { %3601 = vmatpush1.msra.mxu0 %v8660_v14  ;;  %3672 = vmatpush1.msra.mxu1 %v8663_v55  ;;  %10920 = vst [vmem:[#allocation61_spill] sm:$0xff] %v8672_v48  ;;  %10921 = vst [vmem:[#allocation78_spill] sm:$0xff] %v8675_v25  ;;  %v8678_v14 = vld [vmem:[#allocation6 + $0x108] sm:$0xff]  ;;  %v8681_v55 = vld [vmem:[#allocation6 + $0x118] sm:$0xff] }
 0xd0f   :  { %3602 = vmatprep.subr.mxu0 %v8666_v52  ;;  %3673 = vmatprep.subr.mxu1 %v8669_v51  ;;  %10922 = vst [vmem:[#allocation63_spill] sm:$0xff] %v8678_v14  ;;  %10923 = vst [vmem:[#allocation80_spill] sm:$0xff] %v8681_v55  ;;  %v8684_v52 = vld [vmem:[#allocation6 + $0x100] sm:$0xff]  ;;  %v8687_v51 = vld [vmem:[#allocation6 + $0x110] sm:$0xff] }
 0xd10   :  { %3603 = vmatpush1.msra.mxu0 %v8672_v48  ;;  %3674 = vmatpush1.msra.mxu1 %v8675_v25  ;;  %10924 = vst [vmem:[#allocation65_spill] sm:$0xff] %v8684_v52  ;;  %10925 = vst [vmem:[#allocation82_spill] sm:$0xff] %v8687_v51  ;;  %v8690_v48 = vld [vmem:[#allocation6 + $0xe8] sm:$0xff]  ;;  %v8693_v25 = vld [vmem:[#allocation6 + $0xf8] sm:$0xff] }
 0xd11   :  { %3604 = vmatprep.subr.mxu0 %v8678_v14  ;;  %3675 = vmatprep.subr.mxu1 %v8681_v55  ;;  %10926 = vst [vmem:[#allocation67_spill] sm:$0xff] %v8690_v48  ;;  %10927 = vst [vmem:[#allocation84_spill] sm:$0xff] %v8693_v25  ;;  %v8696_v14 = vld [vmem:[#allocation6 + $0xe0] sm:$0xff]  ;;  %v8699_v55 = vld [vmem:[#allocation6 + $0xf0] sm:$0xff] }
 0xd12   :  { %3605 = vmatpush1.msra.mxu0 %v8684_v52  ;;  %3676 = vmatpush1.msra.mxu1 %v8687_v51  ;;  %10928 = vst [vmem:[#allocation69_spill] sm:$0xff] %v8696_v14  ;;  %10929 = vst [vmem:[#allocation86_spill] sm:$0xff] %v8699_v55  ;;  %v8702_v52 = vld [vmem:[#allocation6 + $0xc8] sm:$0xff]  ;;  %v8705_v51 = vld [vmem:[#allocation6 + $0xd8] sm:$0xff] }
 0xd13   :  { %3606 = vmatprep.subr.mxu0 %v8690_v48  ;;  %3677 = vmatprep.subr.mxu1 %v8693_v25  ;;  %10930 = vst [vmem:[#allocation71_spill] sm:$0xff] %v8702_v52  ;;  %10931 = vst [vmem:[#allocation88_spill] sm:$0xff] %v8705_v51  ;;  %v8708_v48 = vld [vmem:[#allocation6 + $0xc0] sm:$0xff]  ;;  %v8711_v25 = vld [vmem:[#allocation6 + $0xd0] sm:$0xff] }
 0xd14   :  { %3607 = vmatpush1.msra.mxu0 %v8696_v14  ;;  %3678 = vmatpush1.msra.mxu1 %v8699_v55  ;;  %10932 = vst [vmem:[#allocation73_spill] sm:$0xff] %v8708_v48  ;;  %10933 = vst [vmem:[#allocation90_spill] sm:$0xff] %v8711_v25  ;;  %v8714_v14 = vld [vmem:[#allocation6 + $0xa8] sm:$0xff]  ;;  %v8717_v55 = vld [vmem:[#allocation6 + $0xb8] sm:$0xff] }
 0xd15   :  { %3608 = vmatprep.subr.mxu0 %v8702_v52  ;;  %3679 = vmatprep.subr.mxu1 %v8705_v51  ;;  %10934 = vst [vmem:[#allocation75_spill] sm:$0xff] %v8714_v14  ;;  %10935 = vst [vmem:[#allocation92_spill] sm:$0xff] %v8717_v55  ;;  %v8720_v52 = vld [vmem:[#allocation6 + $0xa0] sm:$0xff]  ;;  %v8723_v51 = vld [vmem:[#allocation6 + $0xb0] sm:$0xff] }
 0xd16   :  { %3609 = vmatpush1.msra.mxu0 %v8708_v48  ;;  %3680 = vmatpush1.msra.mxu1 %v8711_v25  ;;  %10936 = vst [vmem:[#allocation77_spill] sm:$0xff] %v8720_v52  ;;  %10937 = vst [vmem:[#allocation93_spill] sm:$0xff] %v8723_v51  ;;  %v8726_v48 = vld [vmem:[#allocation6 + $0x88] sm:$0xff]  ;;  %v8729_v25 = vld [vmem:[#allocation6 + $0x98] sm:$0xff] }
 0xd17   :  { %3610 = vmatprep.subr.mxu0 %v8714_v14  ;;  %3681 = vmatprep.subr.mxu1 %v8717_v55  ;;  %10938 = vst [vmem:[#allocation79_spill] sm:$0xff] %v8726_v48  ;;  %10939 = vst [vmem:[#allocation94_spill] sm:$0xff] %v8729_v25  ;;  %v8732_v14 = vld [vmem:[#allocation6 + $0x80] sm:$0xff]  ;;  %v8735_v55 = vld [vmem:[#allocation6 + $0x90] sm:$0xff] }
 0xd18   :  { %3611 = vmatpush1.msra.mxu0 %v8720_v52  ;;  %3682 = vmatpush1.msra.mxu1 %v8723_v51  ;;  %10940 = vst [vmem:[#allocation81_spill] sm:$0xff] %v8732_v14  ;;  %10941 = vst [vmem:[#allocation95_spill] sm:$0xff] %v8735_v55  ;;  %v8738_v52 = vld [vmem:[#allocation6 + $0x68] sm:$0xff]  ;;  %v8741_v51 = vld [vmem:[#allocation6 + $0x78] sm:$0xff] }
 0xd19   :  { %3612 = vmatprep.subr.mxu0 %v8726_v48  ;;  %3683 = vmatprep.subr.mxu1 %v8729_v25  ;;  %10942 = vst [vmem:[#allocation83_spill] sm:$0xff] %v8738_v52  ;;  %10943 = vst [vmem:[#allocation96_spill] sm:$0xff] %v8741_v51  ;;  %v8744_v48 = vld [vmem:[#allocation6 + $0x60] sm:$0xff]  ;;  %v8747_v25 = vld [vmem:[#allocation6 + $0x70] sm:$0xff] }
 0xd1a   :  { %3613 = vmatpush1.msra.mxu0 %v8732_v14  ;;  %3684 = vmatpush1.msra.mxu1 %v8735_v55  ;;  %10944 = vst [vmem:[#allocation85_spill] sm:$0xff] %v8744_v48  ;;  %10945 = vst [vmem:[#allocation97_spill] sm:$0xff] %v8747_v25  ;;  %v8750_v14 = vld [vmem:[#allocation6 + $0x48] sm:$0xff]  ;;  %v8753_v55 = vld [vmem:[#allocation6 + $0x58] sm:$0xff] }
 0xd1b   :  { %3614 = vmatprep.subr.mxu0 %v8738_v52  ;;  %3685 = vmatprep.subr.mxu1 %v8741_v51  ;;  %10946 = vst [vmem:[#allocation87_spill] sm:$0xff] %v8750_v14  ;;  %10947 = vst [vmem:[#allocation98_spill] sm:$0xff] %v8753_v55  ;;  %v8756_v52 = vld [vmem:[#allocation6 + $0x40] sm:$0xff]  ;;  %v8759_v51 = vld [vmem:[#allocation6 + $0x50] sm:$0xff] }
 0xd1c   :  { %3615 = vmatpush1.msra.mxu0 %v8744_v48  ;;  %3686 = vmatpush1.msra.mxu1 %v8747_v25  ;;  %10948 = vst [vmem:[#allocation89_spill] sm:$0xff] %v8756_v52  ;;  %10949 = vst [vmem:[#allocation99_spill] sm:$0xff] %v8759_v51  ;;  %v8762_v48 = vld [vmem:[#allocation6 + $0x28] sm:$0xff]  ;;  %v8765_v25 = vld [vmem:[#allocation6 + $0x38] sm:$0xff] }
 0xd1d   :  { %3616 = vmatprep.subr.mxu0 %v8750_v14  ;;  %3687 = vmatprep.subr.mxu1 %v8753_v55  ;;  %10950 = vst [vmem:[#allocation91_spill] sm:$0xff] %v8762_v48  ;;  %10951 = vst [vmem:[#allocation100_spill] sm:$0xff] %v8765_v25  ;;  %v8768_v14 = vld [vmem:[#allocation6 + $0x20] sm:$0xff]  ;;  %v8771_v55 = vld [vmem:[#allocation6 + $0x30] sm:$0xff] }
 0xd1e   :  { %3617 = vmatpush1.msra.mxu0 %v8756_v52  ;;  %3688 = vmatpush1.msra.mxu1 %v8759_v51  ;;  %10952 = vst [vmem:[#allocation101_spill] sm:$0xff] %v8768_v14  ;;  %10953 = vst [vmem:[#allocation102_spill] sm:$0xff] %v8771_v55  ;;  %v8774_v52 = vld [vmem:[#allocation6 + $0x8] sm:$0xff]  ;;  %v8777_v51 = vld [vmem:[#allocation6 + $0x18] sm:$0xff] }
 0xd1f   :  { %3618 = vmatprep.subr.mxu0 %v8762_v48  ;;  %3689 = vmatprep.subr.mxu1 %v8765_v25  ;;  %10954 = vst [vmem:[#allocation103_spill] sm:$0xff] %v8774_v52  ;;  %10955 = vst [vmem:[#allocation104_spill] sm:$0xff] %v8777_v51  ;;  %v8780_v48 = vld [vmem:[#allocation6] sm:$0xff]  ;;  %v8784_v25 = vld [vmem:[#allocation6 + $0x10] sm:$0xff] }
 0xd20   :  { %3619 = vmatpush1.msra.mxu0 %v8768_v14  ;;  %3690 = vmatpush1.msra.mxu1 %v8771_v55  ;;  %10956 = vst [vmem:[#allocation105_spill] sm:$0xff] %v8780_v48  ;;  %10957 = vst [vmem:[#allocation106_spill] sm:$0xff] %v8784_v25  ;;  %v8799_v55 = vld [vmem:[#allocation9 + $0x1f0] sm:$0xff]  ;;  %v3583_v14 = vrot.slane %v10865_v0, 6 }
 0xd21   :  { %3620 = vmatprep.subr.mxu0 %v8774_v52  ;;  %3691 = vmatprep.subr.mxu1 %v8777_v51  ;;  %v8790_v52 = vld [vmem:[#allocation9 + $0x1e8] sm:$0xff]  ;;  %v8793_v51 = vld [vmem:[#allocation9 + $0x1f8] sm:$0xff]  ;;  %10961 = vst [vmem:[#allocation110_spill] sm:$0xff] %v8799_v55 }
 0xd22   :  { %3621 = vmatpush1.msra.mxu0 %v8780_v48  ;;  %3654 = vmatprep.mubr.f32.mxu0 %v10096_v29  ;;  %10958 = vst [vmem:[#allocation107_spill] sm:$0xff] %v8790_v52  ;;  %10959 = vst [vmem:[#allocation108_spill] sm:$0xff] %v8793_v51  ;;  %v8796_v48 = vld [vmem:[#allocation9 + $0x1e0] sm:$0xff] }
 0xd23   :  { %3692 = vmatpush1.msra.mxu1 %v8784_v25  ;;  %3725 = vmatprep.mubr.f32.mxu1 %v10096_v29  ;;  %10960 = vst [vmem:[#allocation109_spill] sm:$0xff] %v8796_v48  ;;  %v8802_v25 = vld [vmem:[#allocation9 + $0x1c8] sm:$0xff] }
 0xd24   :  { %3655 = vmatmul.mubr.f32.vlgmr.msra.gmra.mxu0 %v8387_v30  ;;  %3726 = vmatmul.mubr.f32.vlgmr.msra.gmra.mxu1 %v8387_v30  ;;  %10962 = vst [vmem:[#allocation111_spill] sm:$0xff] %v8802_v25  ;;  %v8805_v30 = vld [vmem:[#allocation9 + $0x1d8] sm:$0xff] }
 0xd25   :  { %3756 = vmatprep.subr.mxu0 %v8790_v52  ;;  %3827 = vmatprep.subr.mxu1 %v8793_v51  ;;  %10963 = vst [vmem:[#allocation112_spill] sm:$0xff] %v8805_v30  ;;  %v8808_v52 = vld [vmem:[#allocation9 + $0x1c0] sm:$0xff]  ;;  %v8811_v51 = vld [vmem:[#allocation9 + $0x1d0] sm:$0xff] }
 0xd26   :  { %3757 = vmatpush1.msra.mxu0 %v8796_v48  ;;  %3828 = vmatpush1.msra.mxu1 %v8799_v55  ;;  %10964 = vst [vmem:[#allocation113_spill] sm:$0xff] %v8808_v52  ;;  %10965 = vst [vmem:[#allocation114_spill] sm:$0xff] %v8811_v51  ;;  %v8814_v48 = vld [vmem:[#allocation9 + $0x1a8] sm:$0xff]  ;;  %v8817_v55 = vld [vmem:[#allocation9 + $0x1b8] sm:$0xff] }
 0xd27   :  { %3758 = vmatprep.subr.mxu0 %v8802_v25  ;;  %3829 = vmatprep.subr.mxu1 %v8805_v30  ;;  %10966 = vst [vmem:[#allocation115_spill] sm:$0xff] %v8814_v48  ;;  %10967 = vst [vmem:[#allocation116_spill] sm:$0xff] %v8817_v55  ;;  %v8820_v25 = vld [vmem:[#allocation9 + $0x1a0] sm:$0xff]  ;;  %v8823_v30 = vld [vmem:[#allocation9 + $0x1b0] sm:$0xff] }
 0xd28   :  { %3759 = vmatpush1.msra.mxu0 %v8808_v52  ;;  %3830 = vmatpush1.msra.mxu1 %v8811_v51  ;;  %10968 = vst [vmem:[#allocation117_spill] sm:$0xff] %v8820_v25  ;;  %10969 = vst [vmem:[#allocation118_spill] sm:$0xff] %v8823_v30  ;;  %v8826_v52 = vld [vmem:[#allocation9 + $0x188] sm:$0xff]  ;;  %v8829_v51 = vld [vmem:[#allocation9 + $0x198] sm:$0xff] }
 0xd29   :  { %3760 = vmatprep.subr.mxu0 %v8814_v48  ;;  %3831 = vmatprep.subr.mxu1 %v8817_v55  ;;  %10970 = vst [vmem:[#allocation119_spill] sm:$0xff] %v8826_v52  ;;  %10971 = vst [vmem:[#allocation120_spill] sm:$0xff] %v8829_v51  ;;  %v8832_v48 = vld [vmem:[#allocation9 + $0x180] sm:$0xff]  ;;  %v8835_v55 = vld [vmem:[#allocation9 + $0x190] sm:$0xff] }
 0xd2a   :  { %3761 = vmatpush1.msra.mxu0 %v8820_v25  ;;  %3832 = vmatpush1.msra.mxu1 %v8823_v30  ;;  %10972 = vst [vmem:[#allocation121_spill] sm:$0xff] %v8832_v48  ;;  %10973 = vst [vmem:[#allocation122_spill] sm:$0xff] %v8835_v55  ;;  %v8838_v25 = vld [vmem:[#allocation9 + $0x168] sm:$0xff]  ;;  %v8841_v30 = vld [vmem:[#allocation9 + $0x178] sm:$0xff] }
 0xd2b   :  { %3762 = vmatprep.subr.mxu0 %v8826_v52  ;;  %3833 = vmatprep.subr.mxu1 %v8829_v51  ;;  %10974 = vst [vmem:[#allocation123_spill] sm:$0xff] %v8838_v25  ;;  %10975 = vst [vmem:[#allocation124_spill] sm:$0xff] %v8841_v30  ;;  %v8844_v52 = vld [vmem:[#allocation9 + $0x160] sm:$0xff]  ;;  %v8847_v51 = vld [vmem:[#allocation9 + $0x170] sm:$0xff] }
 0xd2c   :  { %3763 = vmatpush1.msra.mxu0 %v8832_v48  ;;  %3834 = vmatpush1.msra.mxu1 %v8835_v55  ;;  %10976 = vst [vmem:[#allocation125_spill] sm:$0xff] %v8844_v52  ;;  %10977 = vst [vmem:[#allocation126_spill] sm:$0xff] %v8847_v51  ;;  %v8850_v48 = vld [vmem:[#allocation9 + $0x148] sm:$0xff]  ;;  %v8853_v55 = vld [vmem:[#allocation9 + $0x158] sm:$0xff] }
 0xd2d   :  { %3764 = vmatprep.subr.mxu0 %v8838_v25  ;;  %3835 = vmatprep.subr.mxu1 %v8841_v30  ;;  %10978 = vst [vmem:[#allocation127_spill] sm:$0xff] %v8850_v48  ;;  %10979 = vst [vmem:[#allocation128_spill] sm:$0xff] %v8853_v55  ;;  %v8856_v25 = vld [vmem:[#allocation9 + $0x140] sm:$0xff]  ;;  %v8859_v30 = vld [vmem:[#allocation9 + $0x150] sm:$0xff] }
 0xd2e   :  { %3765 = vmatpush1.msra.mxu0 %v8844_v52  ;;  %3836 = vmatpush1.msra.mxu1 %v8847_v51  ;;  %10980 = vst [vmem:[#allocation129_spill] sm:$0xff] %v8856_v25  ;;  %10981 = vst [vmem:[#allocation130_spill] sm:$0xff] %v8859_v30  ;;  %v8862_v52 = vld [vmem:[#allocation9 + $0x128] sm:$0xff]  ;;  %v8865_v51 = vld [vmem:[#allocation9 + $0x138] sm:$0xff] }
 0xd2f   :  { %3766 = vmatprep.subr.mxu0 %v8850_v48  ;;  %3837 = vmatprep.subr.mxu1 %v8853_v55  ;;  %10982 = vst [vmem:[#allocation131_spill] sm:$0xff] %v8862_v52  ;;  %10983 = vst [vmem:[#allocation132_spill] sm:$0xff] %v8865_v51  ;;  %v8868_v48 = vld [vmem:[#allocation9 + $0x120] sm:$0xff]  ;;  %v8871_v55 = vld [vmem:[#allocation9 + $0x130] sm:$0xff] }
 0xd30   :  { %3767 = vmatpush1.msra.mxu0 %v8856_v25  ;;  %3838 = vmatpush1.msra.mxu1 %v8859_v30  ;;  %10984 = vst [vmem:[#allocation133_spill] sm:$0xff] %v8868_v48  ;;  %10985 = vst [vmem:[#allocation134_spill] sm:$0xff] %v8871_v55  ;;  %v8874_v25 = vld [vmem:[#allocation9 + $0x108] sm:$0xff]  ;;  %v8877_v30 = vld [vmem:[#allocation9 + $0x118] sm:$0xff] }
 0xd31   :  { %3768 = vmatprep.subr.mxu0 %v8862_v52  ;;  %3839 = vmatprep.subr.mxu1 %v8865_v51  ;;  %10986 = vst [vmem:[#allocation135_spill] sm:$0xff] %v8874_v25  ;;  %10987 = vst [vmem:[#allocation136_spill] sm:$0xff] %v8877_v30  ;;  %v8880_v52 = vld [vmem:[#allocation9 + $0x100] sm:$0xff]  ;;  %v8883_v51 = vld [vmem:[#allocation9 + $0x110] sm:$0xff] }
 0xd32   :  { %3769 = vmatpush1.msra.mxu0 %v8868_v48  ;;  %3840 = vmatpush1.msra.mxu1 %v8871_v55  ;;  %10988 = vst [vmem:[#allocation137_spill] sm:$0xff] %v8880_v52  ;;  %10989 = vst [vmem:[#allocation138_spill] sm:$0xff] %v8883_v51  ;;  %v8886_v48 = vld [vmem:[#allocation9 + $0xe8] sm:$0xff]  ;;  %v8889_v55 = vld [vmem:[#allocation9 + $0xf8] sm:$0xff] }
 0xd33   :  { %3770 = vmatprep.subr.mxu0 %v8874_v25  ;;  %3841 = vmatprep.subr.mxu1 %v8877_v30  ;;  %10990 = vst [vmem:[#allocation139_spill] sm:$0xff] %v8886_v48  ;;  %10991 = vst [vmem:[#allocation140_spill] sm:$0xff] %v8889_v55  ;;  %v8892_v25 = vld [vmem:[#allocation9 + $0xe0] sm:$0xff]  ;;  %v8895_v30 = vld [vmem:[#allocation9 + $0xf0] sm:$0xff] }
 0xd34   :  { %3771 = vmatpush1.msra.mxu0 %v8880_v52  ;;  %3842 = vmatpush1.msra.mxu1 %v8883_v51  ;;  %10992 = vst [vmem:[#allocation141_spill] sm:$0xff] %v8892_v25  ;;  %10993 = vst [vmem:[#allocation142_spill] sm:$0xff] %v8895_v30  ;;  %v8898_v52 = vld [vmem:[#allocation9 + $0xc8] sm:$0xff]  ;;  %v8901_v51 = vld [vmem:[#allocation9 + $0xd8] sm:$0xff] }
 0xd35   :  { %3772 = vmatprep.subr.mxu0 %v8886_v48  ;;  %3843 = vmatprep.subr.mxu1 %v8889_v55  ;;  %10994 = vst [vmem:[#allocation143_spill] sm:$0xff] %v8898_v52  ;;  %10995 = vst [vmem:[#allocation144_spill] sm:$0xff] %v8901_v51  ;;  %v8904_v48 = vld [vmem:[#allocation9 + $0xc0] sm:$0xff]  ;;  %v8907_v55 = vld [vmem:[#allocation9 + $0xd0] sm:$0xff] }
 0xd36   :  { %3773 = vmatpush1.msra.mxu0 %v8892_v25  ;;  %3844 = vmatpush1.msra.mxu1 %v8895_v30  ;;  %10996 = vst [vmem:[#allocation145_spill] sm:$0xff] %v8904_v48  ;;  %10997 = vst [vmem:[#allocation146_spill] sm:$0xff] %v8907_v55  ;;  %v8910_v25 = vld [vmem:[#allocation9 + $0xa8] sm:$0xff]  ;;  %v8913_v30 = vld [vmem:[#allocation9 + $0xb8] sm:$0xff] }
 0xd37   :  { %3774 = vmatprep.subr.mxu0 %v8898_v52  ;;  %3845 = vmatprep.subr.mxu1 %v8901_v51  ;;  %10998 = vst [vmem:[#allocation147_spill] sm:$0xff] %v8910_v25  ;;  %10999 = vst [vmem:[#allocation148_spill] sm:$0xff] %v8913_v30  ;;  %v8916_v52 = vld [vmem:[#allocation9 + $0xa0] sm:$0xff]  ;;  %v8919_v51 = vld [vmem:[#allocation9 + $0xb0] sm:$0xff] }
 0xd38   :  { %3775 = vmatpush1.msra.mxu0 %v8904_v48  ;;  %3846 = vmatpush1.msra.mxu1 %v8907_v55  ;;  %11000 = vst [vmem:[#allocation149_spill] sm:$0xff] %v8916_v52  ;;  %11001 = vst [vmem:[#allocation150_spill] sm:$0xff] %v8919_v51  ;;  %v8922_v48 = vld [vmem:[#allocation9 + $0x88] sm:$0xff]  ;;  %v8925_v55 = vld [vmem:[#allocation9 + $0x98] sm:$0xff] }
 0xd39   :  { %3776 = vmatprep.subr.mxu0 %v8910_v25  ;;  %3847 = vmatprep.subr.mxu1 %v8913_v30  ;;  %11002 = vst [vmem:[#allocation151_spill] sm:$0xff] %v8922_v48  ;;  %11003 = vst [vmem:[#allocation152_spill] sm:$0xff] %v8925_v55  ;;  %v8928_v25 = vld [vmem:[#allocation9 + $0x80] sm:$0xff]  ;;  %v8931_v30 = vld [vmem:[#allocation9 + $0x90] sm:$0xff] }
 0xd3a   :  { %3777 = vmatpush1.msra.mxu0 %v8916_v52  ;;  %3848 = vmatpush1.msra.mxu1 %v8919_v51  ;;  %11004 = vst [vmem:[#allocation153_spill] sm:$0xff] %v8928_v25  ;;  %11005 = vst [vmem:[#allocation154_spill] sm:$0xff] %v8931_v30  ;;  %v8934_v52 = vld [vmem:[#allocation9 + $0x68] sm:$0xff]  ;;  %v8937_v51 = vld [vmem:[#allocation9 + $0x78] sm:$0xff] }
 0xd3b   :  { %3778 = vmatprep.subr.mxu0 %v8922_v48  ;;  %3849 = vmatprep.subr.mxu1 %v8925_v55  ;;  %11006 = vst [vmem:[#allocation155_spill] sm:$0xff] %v8934_v52  ;;  %11007 = vst [vmem:[#allocation156_spill] sm:$0xff] %v8937_v51  ;;  %v8940_v48 = vld [vmem:[#allocation9 + $0x60] sm:$0xff]  ;;  %v8943_v55 = vld [vmem:[#allocation9 + $0x70] sm:$0xff] }
 0xd3c   :  { %3779 = vmatpush1.msra.mxu0 %v8928_v25  ;;  %3850 = vmatpush1.msra.mxu1 %v8931_v30  ;;  %11008 = vst [vmem:[#allocation157_spill] sm:$0xff] %v8940_v48  ;;  %11009 = vst [vmem:[#allocation158_spill] sm:$0xff] %v8943_v55  ;;  %v8946_v25 = vld [vmem:[#allocation9 + $0x48] sm:$0xff]  ;;  %v8949_v30 = vld [vmem:[#allocation9 + $0x58] sm:$0xff] }
 0xd3d   :  { %3780 = vmatprep.subr.mxu0 %v8934_v52  ;;  %3851 = vmatprep.subr.mxu1 %v8937_v51  ;;  %11010 = vst [vmem:[#allocation159_spill] sm:$0xff] %v8946_v25  ;;  %11011 = vst [vmem:[#allocation160_spill] sm:$0xff] %v8949_v30  ;;  %v8952_v52 = vld [vmem:[#allocation9 + $0x40] sm:$0xff]  ;;  %v8955_v51 = vld [vmem:[#allocation9 + $0x50] sm:$0xff] }
 0xd3e   :  { %3781 = vmatpush1.msra.mxu0 %v8940_v48  ;;  %3852 = vmatpush1.msra.mxu1 %v8943_v55  ;;  %11012 = vst [vmem:[#allocation161_spill] sm:$0xff] %v8952_v52  ;;  %11013 = vst [vmem:[#allocation162_spill] sm:$0xff] %v8955_v51  ;;  %v8958_v48 = vld [vmem:[#allocation9 + $0x28] sm:$0xff]  ;;  %v8961_v55 = vld [vmem:[#allocation9 + $0x38] sm:$0xff] }
 0xd3f   :  { %3782 = vmatprep.subr.mxu0 %v8946_v25  ;;  %3853 = vmatprep.subr.mxu1 %v8949_v30  ;;  %11014 = vst [vmem:[#allocation163_spill] sm:$0xff] %v8958_v48  ;;  %11015 = vst [vmem:[#allocation164_spill] sm:$0xff] %v8961_v55  ;;  %v8964_v25 = vld [vmem:[#allocation9 + $0x20] sm:$0xff]  ;;  %v8967_v30 = vld [vmem:[#allocation9 + $0x30] sm:$0xff] }
 0xd40   :  { %3783 = vmatpush1.msra.mxu0 %v8952_v52  ;;  %3854 = vmatpush1.msra.mxu1 %v8955_v51  ;;  %11016 = vst [vmem:[#allocation172_spill] sm:$0xff] %v8964_v25  ;;  %11017 = vst [vmem:[#allocation173_spill] sm:$0xff] %v8967_v30  ;;  %v8970_v52 = vld [vmem:[#allocation9 + $0x8] sm:$0xff]  ;;  %v8973_v51 = vld [vmem:[#allocation9 + $0x18] sm:$0xff] }
 0xd41   :  { %3784 = vmatprep.subr.mxu0 %v8958_v48  ;;  %3855 = vmatprep.subr.mxu1 %v8961_v55  ;;  %11018 = vst [vmem:[#allocation174_spill] sm:$0xff] %v8970_v52  ;;  %11019 = vst [vmem:[#allocation175_spill] sm:$0xff] %v8973_v51  ;;  %v8976_v48 = vld [vmem:[#allocation9] sm:$0xff]  ;;  %v8980_v55 = vld [vmem:[#allocation9 + $0x10] sm:$0xff] }
 0xd42   :  { %3785 = vmatpush1.msra.mxu0 %v8964_v25  ;;  %3856 = vmatpush1.msra.mxu1 %v8967_v30  ;;  %11020 = vst [vmem:[#allocation176_spill] sm:$0xff] %v8976_v48  ;;  %11021 = vst [vmem:[#allocation177_spill] sm:$0xff] %v8980_v55 }
 0xd43   :  { %3786 = vmatprep.subr.mxu0 %v8970_v52  ;;  %3857 = vmatprep.subr.mxu1 %v8973_v51  ;;  %v3582_v51 = vrot.slane %v10864_v43, 6  ;;  %v3585_v43 = vrot.slane %v6413_v1, 6 }
 0xd44   :  { %3787 = vmatpush1.msra.mxu0 %v8976_v48  ;;  %3820 = vmatprep.mubr.f32.mxu0 %v10096_v29 }
 0xd45   :  { %3858 = vmatpush1.msra.mxu1 %v8980_v55  ;;  %3891 = vmatprep.mubr.f32.mxu1 %v10096_v29 }
 0xd46   :  { %3926 = vmatprep.subr.mxu0 %v8365_v17  ;;  %3997 = vmatprep.subr.mxu1 %v8368_v13 }
 0xdc3   :  { %v8986_v52 = vpop.f32.mrf.mxu0  ;;  %v8992_v3 = vpop.f32.mrf.mxu1 }
 0xdc5   :  { %v8988_v30 = vpop.f32.mrf.mxu0  ;;  %v8994_v17 = vpop.f32.mrf.mxu1 }
 0xde4   :  { %v3656_v25 = vpop.f32.mrf.mxu0  ;;  %v3727_v13 = vpop.f32.mrf.mxu1 }
 0xde5   :  { %v3657_v48 = vadd.f32 %v3656_v25, %v3582_v51  ;;  %v3728_v23 = vadd.f32 %v3727_v13, %v3584_v5 }
 0xde6   :  { %v3658_v62 = vpop.f32.mrf.mxu0  ;;  %v3729_v24 = vpop.f32.mrf.mxu1 }
 0xde7   :  { %v4604_v55 = vmul.f32 -1.442695, %v3657_v48  ;;  %v3659_v58 = vadd.f32 %v3658_v62, %v3583_v14  ;;  %v4606_v25 = vmul.f32 -1.442695, %v3728_v23  ;;  %v3730_v51 = vadd.f32 %v3729_v24, %v3585_v43 }
 0xde9   :  { %4875 = vpow2.f32 %v4604_v55  ;;  %v4605_v20 = vmul.f32 -1.442695, %v3659_v58 }
 0xdeb   :  { %4877 = vpow2.f32 %v4605_v20 }
 0xdec   :  { %4879 = vpow2.f32 %v4606_v25 }
 0xded   :  { %4881 = vtanh.f32 %v3730_v51 }
 0xdf6   :  { %v4876_v0 = vpop.eup %4875 }
 0xdf7   :  { %v3741_v4 = vadd.f32 1.0, %v4876_v0 }
 0xdf8   :  { %v4878_v28 = vpop.eup %4877 }
 0xdf9   :  { %4883 = vrcp.f32 %v3741_v4  ;;  %v3742_v62 = vadd.f32 1.0, %v4878_v28  ;;  %v4880_v58 = vpop.eup %4879  ;;  %v11054_v4 = vld [vmem:[#allocation28_spill] sm:$0xff] }
 0xdfa   :  { %v4882_v48 = vpop.eup %4881  ;;  %v3743_v50 = vadd.f32 1.0, %v4880_v58 }
 0xdfb   :  { %4885 = vrcp.f32 %v3742_v62 }
 0xdfc   :  { %4887 = vrcp.f32 %v3743_v50  ;;  %v11022_v50 = vld [vmem:[#allocation179_spill] sm:$0xff] }
 0xe06   :  { %v4884_v20 = vpop.eup %4883 }
 0xe07   :  { %v3752_v14 = vmul.f32 %v4884_v20, %v4882_v48 }
 0xe08   :  { %v4886_v55 = vpop.eup %4885 }
 0xe09   :  { %v3751_v5 = vmul.f32 %v4886_v55, %v8384_v60  ;;  %v4888_v43 = vpop.eup %4887  ;;  %v11023_v60 = vld [vmem:[#allocation29_spill] sm:$0xff] }
 0xe0b   :  { %v8999_v13 = vadd.f32 %v3752_v14, %v3751_v5 }
 0xe0d   :  { %4889 = vtanh.f32 %v8999_v13 }
 0xe1a   :  { %v4890_v0 = vpop.eup %4889 }
 0xe1b   :  { %v9002_v24 = vmul.f32 %v4890_v0, %v4888_v43 }
 0xe1d   :  { %3821 = vmatmul.mubr.f32.vlgmr.msra.gmra.mxu0 %v9002_v24  ;;  %3892 = vmatmul.mubr.f32.vlgmr.msra.gmra.mxu1 %v9002_v24 }
 0xe1e   :  { %3927 = vmatpush1.msra.mxu0 %v8391_v31  ;;  %3998 = vmatpush1.msra.mxu1 %v8394_v34  ;;  %v11024_v31 = vld [vmem:[#allocation21_spill] sm:$0xff]  ;;  %v11025_v34 = vld [vmem:[#allocation31_spill] sm:$0xff] }
 0xe1f   :  { %3928 = vmatprep.subr.mxu0 %v8397_v54  ;;  %3999 = vmatprep.subr.mxu1 %v8400_v15  ;;  %v11026_v54 = vld [vmem:[#allocation22_spill] sm:$0xff]  ;;  %v11027_v15 = vld [vmem:[#allocation33_spill] sm:$0xff] }
 0xe20   :  { %3929 = vmatpush1.msra.mxu0 %v8403_v38  ;;  %4000 = vmatpush1.msra.mxu1 %v8406_v39  ;;  %v11028_v38 = vld [vmem:[#allocation23_spill] sm:$0xff] }
 0xe21   :  { %3930 = vmatprep.subr.mxu0 %v8409_v40  ;;  %4001 = vmatprep.subr.mxu1 %v8412_v42  ;;  %v11029_v39 = vld [vmem:[#allocation35_spill] sm:$0xff]  ;;  %v11030_v40 = vld [vmem:[#allocation24_spill] sm:$0xff]  ;;  %v11031_v42 = vld [vmem:[#allocation37_spill] sm:$0xff] }
 0xe22   :  { %3931 = vmatpush1.msra.mxu0 %v8415_v44  ;;  %4002 = vmatpush1.msra.mxu1 %v8418_v21  ;;  %v11032_v44 = vld [vmem:[#allocation25_spill] sm:$0xff]  ;;  %v11033_v21 = vld [vmem:[#allocation39_spill] sm:$0xff] }
 0xe23   :  { %3932 = vmatprep.subr.mxu0 %v8421_v47  ;;  %4003 = vmatprep.subr.mxu1 %v8424_v32  ;;  %v11034_v47 = vld [vmem:[#allocation26_spill] sm:$0xff]  ;;  %v11035_v32 = vld [vmem:[#allocation41_spill] sm:$0xff] }
 0xe24   :  { %3933 = vmatpush1.msra.mxu0 %v8427_v16  ;;  %4004 = vmatpush1.msra.mxu1 %v8430_v45  ;;  %v11036_v16 = vld [vmem:[#allocation27_spill] sm:$0xff] }
 0xe25   :  { %3934 = vmatprep.subr.mxu0 %v8433_v57  ;;  %4005 = vmatprep.subr.mxu1 %v8436_v59  ;;  %v11037_v45 = vld [vmem:[#allocation43_spill] sm:$0xff]  ;;  %v11038_v57 = vld [vmem:[#allocation30_spill] sm:$0xff] }
 0xe26   :  { %3935 = vmatpush1.msra.mxu0 %v8439_v63  ;;  %4006 = vmatpush1.msra.mxu1 %v8442_v6  ;;  %v11039_v59 = vld [vmem:[#allocation46_spill] sm:$0xff]  ;;  %v11040_v63 = vld [vmem:[#allocation165_spill] sm:$0xff] }
 0xe27   :  { %3936 = vmatprep.subr.mxu0 %v8445_v11  ;;  %4007 = vmatprep.subr.mxu1 %v8448_v56  ;;  %v11041_v6 = vld [vmem:[#allocation166_spill] sm:$0xff]  ;;  %v11042_v11 = vld [vmem:[#allocation169_spill] sm:$0xff] }
 0xe28   :  { %3937 = vmatpush1.msra.mxu0 %v8451_v12  ;;  %4008 = vmatpush1.msra.mxu1 %v8454_v35  ;;  %v11043_v56 = vld [vmem:[#allocation170_spill] sm:$0xff]  ;;  %v11044_v12 = vld [vmem:[#allocation32_spill] sm:$0xff] }
 0xe29   :  { %3938 = vmatprep.subr.mxu0 %v8457_v36  ;;  %4009 = vmatprep.subr.mxu1 %v8460_v22  ;;  %v11045_v35 = vld [vmem:[#allocation48_spill] sm:$0xff]  ;;  %v11046_v36 = vld [vmem:[#allocation34_spill] sm:$0xff] }
 0xe2a   :  { %3939 = vmatpush1.msra.mxu0 %v8463_v10  ;;  %4010 = vmatpush1.msra.mxu1 %v8466_v19  ;;  %v11047_v22 = vld [vmem:[#allocation50_spill] sm:$0xff]  ;;  %v11048_v10 = vld [vmem:[#allocation36_spill] sm:$0xff] }
 0xe2b   :  { %3940 = vmatprep.subr.mxu0 %v8469_v26  ;;  %4011 = vmatprep.subr.mxu1 %v8472_v9  ;;  %v11049_v19 = vld [vmem:[#allocation52_spill] sm:$0xff]  ;;  %v11050_v26 = vld [vmem:[#allocation38_spill] sm:$0xff] }
 0xe2c   :  { %3941 = vmatpush1.msra.mxu0 %v8475_v7  ;;  %4012 = vmatpush1.msra.mxu1 %v8478_v8  ;;  %v11051_v9 = vld [vmem:[#allocation54_spill] sm:$0xff]  ;;  %v11052_v7 = vld [vmem:[#allocation40_spill] sm:$0xff] }
 0xe2d   :  { %3942 = vmatprep.subr.mxu0 %v8481_v41  ;;  %4013 = vmatprep.subr.mxu1 %v8484_v53  ;;  %v11053_v8 = vld [vmem:[#allocation56_spill] sm:$0xff] }
 0xe2e   :  { %3943 = vmatpush1.msra.mxu0 %v11022_v50  ;;  %4014 = vmatpush1.msra.mxu1 %v11023_v60 }
 0xe2f   :  { %3944 = vmatprep.subr.mxu0 %v11024_v31  ;;  %4015 = vmatprep.subr.mxu1 %v11025_v34 }
 0xe30   :  { %3945 = vmatpush1.msra.mxu0 %v11026_v54  ;;  %4016 = vmatpush1.msra.mxu1 %v11027_v15 }
 0xe31   :  { %3946 = vmatprep.subr.mxu0 %v11028_v38  ;;  %4017 = vmatprep.subr.mxu1 %v11029_v39 }
 0xe32   :  { %3947 = vmatpush1.msra.mxu0 %v11030_v40  ;;  %4018 = vmatpush1.msra.mxu1 %v11031_v42 }
 0xe33   :  { %3948 = vmatprep.subr.mxu0 %v11032_v44  ;;  %4019 = vmatprep.subr.mxu1 %v11033_v21 }
 0xe34   :  { %3949 = vmatpush1.msra.mxu0 %v11034_v47  ;;  %4020 = vmatpush1.msra.mxu1 %v11035_v32  ;;  %v11056_v32 = vld [vmem:[#allocation42_spill] sm:$0xff] }
 0xe35   :  { %3950 = vmatprep.subr.mxu0 %v11036_v16  ;;  %4021 = vmatprep.subr.mxu1 %v11037_v45  ;;  %v11057_v16 = vld [vmem:[#allocation58_spill] sm:$0xff]  ;;  %v11058_v45 = vld [vmem:[#allocation44_spill] sm:$0xff] }
 0xe36   :  { %3951 = vmatpush1.msra.mxu0 %v11038_v57  ;;  %4022 = vmatpush1.msra.mxu1 %v11039_v59  ;;  %v11059_v57 = vld [vmem:[#allocation60_spill] sm:$0xff]  ;;  %v11060_v59 = vld [vmem:[#allocation45_spill] sm:$0xff] }
 0xe37   :  { %3952 = vmatprep.subr.mxu0 %v11040_v63  ;;  %4023 = vmatprep.subr.mxu1 %v11041_v6  ;;  %v11065_v63 = vld [vmem:[#allocation66_spill] sm:$0xff]  ;;  %v11066_v6 = vld [vmem:[#allocation51_spill] sm:$0xff] }
 0xe38   :  { %3953 = vmatpush1.msra.mxu0 %v11042_v11  ;;  %4024 = vmatpush1.msra.mxu1 %v11043_v56  ;;  %v11067_v11 = vld [vmem:[#allocation68_spill] sm:$0xff]  ;;  %v11068_v56 = vld [vmem:[#allocation53_spill] sm:$0xff] }
 0xe39   :  { %3954 = vmatprep.subr.mxu0 %v11044_v12  ;;  %4025 = vmatprep.subr.mxu1 %v11045_v35  ;;  %v11069_v12 = vld [vmem:[#allocation70_spill] sm:$0xff]  ;;  %v11070_v35 = vld [vmem:[#allocation55_spill] sm:$0xff] }
 0xe3a   :  { %3955 = vmatpush1.msra.mxu0 %v11046_v36  ;;  %4026 = vmatpush1.msra.mxu1 %v11047_v22  ;;  %v11071_v36 = vld [vmem:[#allocation72_spill] sm:$0xff]  ;;  %v11072_v22 = vld [vmem:[#allocation57_spill] sm:$0xff] }
 0xe3b   :  { %3956 = vmatprep.subr.mxu0 %v11048_v10  ;;  %4027 = vmatprep.subr.mxu1 %v11049_v19  ;;  %v11073_v10 = vld [vmem:[#allocation74_spill] sm:$0xff]  ;;  %v11074_v19 = vld [vmem:[#allocation59_spill] sm:$0xff] }
 0xe3c   :  { %3957 = vmatpush1.msra.mxu0 %v11050_v26  ;;  %4028 = vmatpush1.msra.mxu1 %v11051_v9  ;;  %v11075_v26 = vld [vmem:[#allocation76_spill] sm:$0xff]  ;;  %v11076_v9 = vld [vmem:[#allocation61_spill] sm:$0xff] }
 0xe3d   :  { %3990 = vmatprep.mubr.f32.mxu0 %v10096_v29  ;;  %4061 = vmatprep.mubr.f32.mxu1 %v10096_v29 }
 0xe3e   :  { %4076 = vmatprep.subr.mxu0 %v11052_v7  ;;  %4147 = vmatprep.subr.mxu1 %v11053_v8  ;;  %v11077_v7 = vld [vmem:[#allocation78_spill] sm:$0xff]  ;;  %v11078_v8 = vld [vmem:[#allocation63_spill] sm:$0xff] }
 0xedd   :  { %v3822_v41 = vpop.f32.mrf.mxu0  ;;  %v3893_v58 = vpop.f32.mrf.mxu1 }
 0xede   :  { %v3823_v53 = vadd.f32 %v3822_v41, %v8986_v52  ;;  %v3894_v20 = vadd.f32 %v3893_v58, %v8992_v3  ;;  %v11079_v41 = vld [vmem:[#allocation80_spill] sm:$0xff]  ;;  %v11086_v58 = vld [vmem:[#allocation71_spill] sm:$0xff] }
 0xedf   :  { %v3824_v28 = vpop.f32.mrf.mxu0  ;;  %v3895_v14 = vpop.f32.mrf.mxu1 }
 0xee0   :  { %v3898_v23 = vadd.f32 %v3823_v53, %v11054_v4  ;;  %v3825_v25 = vadd.f32 %v3824_v28, %v8988_v30  ;;  %v3900_v55 = vadd.f32 %v3894_v20, %v6503_v49  ;;  %v3896_v5 = vadd.f32 %v3895_v14, %v8994_v17  ;;  %v11080_v53 = vld [vmem:[#allocation65_spill] sm:$0xff]  ;;  %v11081_v28 = vld [vmem:[#allocation82_spill] sm:$0xff] }
 0xee1   :  { %v11088_v20 = vld [vmem:[#allocation73_spill] sm:$0xff]  ;;  %v11089_v14 = vld [vmem:[#allocation90_spill] sm:$0xff] }
 0xee2   :  { %v4607_v51 = vmul.f32 -1.442695, %v3898_v23  ;;  %v3899_v62 = vadd.f32 %v3825_v25, %v6495_v37  ;;  %v4609_v52 = vmul.f32 -1.442695, %v3900_v55  ;;  %v3901_v0 = vadd.f32 %v3896_v5, %v6509_v61  ;;  %v11082_v23 = vld [vmem:[#allocation67_spill] sm:$0xff]  ;;  %v11083_v25 = vld [vmem:[#allocation84_spill] sm:$0xff] }
 0xee3   :  { %v11090_v55 = vld [vmem:[#allocation75_spill] sm:$0xff]  ;;  %v11091_v5 = vld [vmem:[#allocation92_spill] sm:$0xff] }
 0xee4   :  { %4891 = vpow2.f32 %v4607_v51  ;;  %v4608_v48 = vmul.f32 -1.442695, %v3899_v62  ;;  %v11084_v51 = vld [vmem:[#allocation69_spill] sm:$0xff]  ;;  %v11085_v62 = vld [vmem:[#allocation86_spill] sm:$0xff] }
 0xee6   :  { %4893 = vpow2.f32 %v4608_v48  ;;  %v11087_v48 = vld [vmem:[#allocation88_spill] sm:$0xff] }
 0xee7   :  { %4895 = vpow2.f32 %v4609_v52  ;;  %v11092_v52 = vld [vmem:[#allocation77_spill] sm:$0xff] }
 0xef1   :  { %v4892_v43 = vpop.eup %4891 }
 0xef2   :  { %v3911_v50 = vadd.f32 1.0, %v4892_v43  ;;  %v11093_v43 = vld [vmem:[#allocation93_spill] sm:$0xff] }
 0xef3   :  { %v4894_v30 = vpop.eup %4893 }
 0xef4   :  { %4897 = vrcp.f32 %v3911_v50  ;;  %v3912_v60 = vadd.f32 1.0, %v4894_v30  ;;  %v4896_v31 = vpop.eup %4895  ;;  %v11095_v50 = vld [vmem:[#allocation94_spill] sm:$0xff]  ;;  %v11096_v30 = vld [vmem:[#allocation81_spill] sm:$0xff] }
 0xef5   :  { %4899 = vtanh.f32 %v3901_v0  ;;  %v3913_v15 = vadd.f32 1.0, %v4896_v31  ;;  %v11094_v0 = vld [vmem:[#allocation79_spill] sm:$0xff] }
 0xef6   :  { %4901 = vrcp.f32 %v3912_v60  ;;  %v11097_v60 = vld [vmem:[#allocation95_spill] sm:$0xff] }
 0xef7   :  { %4903 = vrcp.f32 %v3913_v15  ;;  %v11098_v31 = vld [vmem:[#allocation83_spill] sm:$0xff] }
 0xef8   :  { %v11102_v15 = vld [vmem:[#allocation87_spill] sm:$0xff] }
 0xf01   :  { %v4898_v34 = vpop.eup %4897 }
 0xf02   :  { %v4900_v54 = vpop.eup %4899 }
 0xf03   :  { %v4902_v3 = vpop.eup %4901  ;;  %v3922_v39 = vmul.f32 %v4900_v54, %v4898_v34  ;;  %v11099_v34 = vld [vmem:[#allocation96_spill] sm:$0xff]  ;;  %v11100_v54 = vld [vmem:[#allocation85_spill] sm:$0xff] }
 0xf04   :  { %v3921_v38 = vmul.f32 %v4902_v3, %v8594_v18  ;;  %v4904_v40 = vpop.eup %4903  ;;  %v11055_v18 = vld [vmem:[#allocation20_spill] sm:$0xff]  ;;  %v11101_v3 = vld [vmem:[#allocation97_spill] sm:$0xff] }
 0xf06   :  { %v9081_v17 = vadd.f32 %v3922_v39, %v3921_v38  ;;  %v11103_v38 = vld [vmem:[#allocation98_spill] sm:$0xff]  ;;  %v11104_v39 = vld [vmem:[#allocation89_spill] sm:$0xff] }
 0xf08   :  { %4905 = vtanh.f32 %v9081_v17 }
 0xf15   :  { %v4906_v42 = vpop.eup %4905 }
 0xf16   :  { %v3925_v44 = vmul.f32 %v4906_v42, %v4904_v40  ;;  %v11105_v40 = vld [vmem:[#allocation99_spill] sm:$0xff] }
 0xf17   :  { %v11106_v42 = vld [vmem:[#allocation91_spill] sm:$0xff] }
 0xf18   :  { %3991 = vmatmul.mubr.f32.vlgmr.msra.gmra.mxu0 %v3925_v44  ;;  %4062 = vmatmul.mubr.f32.vlgmr.msra.gmra.mxu1 %v3925_v44  ;;  %v4428_v21 = vrot.slane %v3925_v44, 2  ;;  %v11107_v44 = vld [vmem:[#allocation100_spill] sm:$0xff] }
 0xf19   :  { %4077 = vmatpush1.msra.mxu0 %v8597_v27  ;;  %4148 = vmatpush1.msra.mxu1 %v8600_v33  ;;  %v11061_v27 = vld [vmem:[#allocation62_spill] sm:$0xff]  ;;  %v11062_v33 = vld [vmem:[#allocation47_spill] sm:$0xff] }
 0xf1a   :  { %4078 = vmatprep.subr.mxu0 %v8603_v46  ;;  %4149 = vmatprep.subr.mxu1 %v8606_v2  ;;  %v9089_v47 = vsel %vm4443_vm6, %v11055_v18, %v4428_v21  ;;  %v11063_v46 = vld [vmem:[#allocation64_spill] sm:$0xff]  ;;  %v11064_v2 = vld [vmem:[#allocation49_spill] sm:$0xff]  ;;  %v11109_v18 = vld [vmem:[#allocation102_spill] sm:$0xff] }
 0xf1b   :  { %4079 = vmatpush1.msra.mxu0 %v11056_v32  ;;  %4150 = vmatpush1.msra.mxu1 %v11057_v16  ;;  %v11108_v21 = vld [vmem:[#allocation101_spill] sm:$0xff]  ;;  %v11110_v32 = vld [vmem:[#allocation103_spill] sm:$0xff]  ;;  %v11111_v16 = vld [vmem:[#allocation104_spill] sm:$0xff] }
 0xf1c   :  { %4080 = vmatprep.subr.mxu0 %v11058_v45  ;;  %4151 = vmatprep.subr.mxu1 %v11059_v57  ;;  %v11112_v45 = vld [vmem:[#allocation105_spill] sm:$0xff]  ;;  %v11113_v57 = vld [vmem:[#allocation106_spill] sm:$0xff] }
 0xf1d   :  { %4081 = vmatpush1.msra.mxu0 %v11060_v59  ;;  %4152 = vmatpush1.msra.mxu1 %v11061_v27  ;;  %v11114_v59 = vld [vmem:[#allocation107_spill] sm:$0xff]  ;;  %v11115_v27 = vld [vmem:[#allocation108_spill] sm:$0xff] }
 0xf1e   :  { %4082 = vmatprep.subr.mxu0 %v11062_v33  ;;  %4153 = vmatprep.subr.mxu1 %v11063_v46  ;;  %v11116_v33 = vld [vmem:[#allocation109_spill] sm:$0xff]  ;;  %v11117_v46 = vld [vmem:[#allocation110_spill] sm:$0xff] }
 0xf1f   :  { %4083 = vmatpush1.msra.mxu0 %v11064_v2  ;;  %4154 = vmatpush1.msra.mxu1 %v11065_v63  ;;  %v11118_v2 = vld [vmem:[#allocation111_spill] sm:$0xff]  ;;  %v11119_v63 = vld [vmem:[#allocation112_spill] sm:$0xff] }
 0xf20   :  { %4084 = vmatprep.subr.mxu0 %v11066_v6  ;;  %4155 = vmatprep.subr.mxu1 %v11067_v11  ;;  %v11120_v6 = vld [vmem:[#allocation113_spill] sm:$0xff]  ;;  %v11121_v11 = vld [vmem:[#allocation114_spill] sm:$0xff] }
 0xf21   :  { %4085 = vmatpush1.msra.mxu0 %v11068_v56  ;;  %4156 = vmatpush1.msra.mxu1 %v11069_v12  ;;  %v11122_v56 = vld [vmem:[#allocation115_spill] sm:$0xff]  ;;  %v11123_v12 = vld [vmem:[#allocation116_spill] sm:$0xff] }
 0xf22   :  { %4086 = vmatprep.subr.mxu0 %v11070_v35  ;;  %4157 = vmatprep.subr.mxu1 %v11071_v36  ;;  %v11125_v35 = vld [vmem:[#allocation118_spill] sm:$0xff]  ;;  %v11126_v36 = vld [vmem:[#allocation119_spill] sm:$0xff] }
 0xf23   :  { %4087 = vmatpush1.msra.mxu0 %v11072_v22  ;;  %4158 = vmatpush1.msra.mxu1 %v11073_v10  ;;  %v11127_v22 = vld [vmem:[#allocation120_spill] sm:$0xff]  ;;  %v11128_v10 = vld [vmem:[#allocation121_spill] sm:$0xff] }
 0xf24   :  { %4088 = vmatprep.subr.mxu0 %v11074_v19  ;;  %4159 = vmatprep.subr.mxu1 %v11075_v26  ;;  %v11129_v19 = vld [vmem:[#allocation122_spill] sm:$0xff]  ;;  %v11130_v26 = vld [vmem:[#allocation123_spill] sm:$0xff] }
 0xf25   :  { %4089 = vmatpush1.msra.mxu0 %v11076_v9  ;;  %4160 = vmatpush1.msra.mxu1 %v11077_v7  ;;  %v11131_v9 = vld [vmem:[#allocation124_spill] sm:$0xff]  ;;  %v11132_v7 = vld [vmem:[#allocation125_spill] sm:$0xff] }
 0xf26   :  { %4090 = vmatprep.subr.mxu0 %v11078_v8  ;;  %4161 = vmatprep.subr.mxu1 %v11079_v41  ;;  %v11133_v8 = vld [vmem:[#allocation126_spill] sm:$0xff]  ;;  %v11134_v41 = vld [vmem:[#allocation127_spill] sm:$0xff] }
 0xf27   :  { %4091 = vmatpush1.msra.mxu0 %v11080_v53  ;;  %4162 = vmatpush1.msra.mxu1 %v11081_v28  ;;  %v11135_v53 = vld [vmem:[#allocation128_spill] sm:$0xff]  ;;  %v11136_v28 = vld [vmem:[#allocation129_spill] sm:$0xff] }
 0xf28   :  { %4092 = vmatprep.subr.mxu0 %v11082_v23  ;;  %4163 = vmatprep.subr.mxu1 %v11083_v25  ;;  %v11137_v23 = vld [vmem:[#allocation130_spill] sm:$0xff]  ;;  %v11138_v25 = vld [vmem:[#allocation131_spill] sm:$0xff] }
 0xf29   :  { %4093 = vmatpush1.msra.mxu0 %v11084_v51  ;;  %4164 = vmatpush1.msra.mxu1 %v11085_v62  ;;  %v11139_v51 = vld [vmem:[#allocation132_spill] sm:$0xff]  ;;  %v11140_v62 = vld [vmem:[#allocation133_spill] sm:$0xff] }
 0xf2a   :  { %4094 = vmatprep.subr.mxu0 %v11086_v58  ;;  %4165 = vmatprep.subr.mxu1 %v11087_v48  ;;  %v11141_v58 = vld [vmem:[#allocation134_spill] sm:$0xff]  ;;  %v11142_v48 = vld [vmem:[#allocation135_spill] sm:$0xff] }
 0xf2b   :  { %4095 = vmatpush1.msra.mxu0 %v11088_v20  ;;  %4166 = vmatpush1.msra.mxu1 %v11089_v14  ;;  %v11143_v20 = vld [vmem:[#allocation136_spill] sm:$0xff]  ;;  %v11144_v14 = vld [vmem:[#allocation137_spill] sm:$0xff] }
 0xf2c   :  { %4096 = vmatprep.subr.mxu0 %v11090_v55  ;;  %4167 = vmatprep.subr.mxu1 %v11091_v5  ;;  %v11145_v55 = vld [vmem:[#allocation138_spill] sm:$0xff]  ;;  %v11146_v5 = vld [vmem:[#allocation139_spill] sm:$0xff] }
 0xf2d   :  { %4097 = vmatpush1.msra.mxu0 %v11092_v52  ;;  %4168 = vmatpush1.msra.mxu1 %v11093_v43  ;;  %v11147_v52 = vld [vmem:[#allocation140_spill] sm:$0xff]  ;;  %v11148_v43 = vld [vmem:[#allocation141_spill] sm:$0xff] }
 0xf2e   :  { %4098 = vmatprep.subr.mxu0 %v11094_v0  ;;  %4169 = vmatprep.subr.mxu1 %v11095_v50  ;;  %v11149_v0 = vld [vmem:[#allocation142_spill] sm:$0xff]  ;;  %v11150_v50 = vld [vmem:[#allocation143_spill] sm:$0xff] }
 0xf2f   :  { %4099 = vmatpush1.msra.mxu0 %v11096_v30  ;;  %4170 = vmatpush1.msra.mxu1 %v11097_v60  ;;  %v11151_v30 = vld [vmem:[#allocation144_spill] sm:$0xff]  ;;  %v11152_v60 = vld [vmem:[#allocation145_spill] sm:$0xff] }
 0xf30   :  { %4100 = vmatprep.subr.mxu0 %v11098_v31  ;;  %4171 = vmatprep.subr.mxu1 %v11099_v34  ;;  %v11153_v31 = vld [vmem:[#allocation146_spill] sm:$0xff]  ;;  %v11154_v34 = vld [vmem:[#allocation147_spill] sm:$0xff] }
 0xf31   :  { %4101 = vmatpush1.msra.mxu0 %v11100_v54  ;;  %4172 = vmatpush1.msra.mxu1 %v11101_v3  ;;  %v11155_v54 = vld [vmem:[#allocation148_spill] sm:$0xff]  ;;  %v11156_v3 = vld [vmem:[#allocation149_spill] sm:$0xff] }
 0xf32   :  { %4102 = vmatprep.subr.mxu0 %v11102_v15  ;;  %4173 = vmatprep.subr.mxu1 %v11103_v38  ;;  %v11157_v15 = vld [vmem:[#allocation150_spill] sm:$0xff]  ;;  %v11158_v38 = vld [vmem:[#allocation151_spill] sm:$0xff] }
 0xf33   :  { %4103 = vmatpush1.msra.mxu0 %v11104_v39  ;;  %4174 = vmatpush1.msra.mxu1 %v11105_v40  ;;  %v11159_v39 = vld [vmem:[#allocation152_spill] sm:$0xff]  ;;  %v11160_v40 = vld [vmem:[#allocation153_spill] sm:$0xff] }
 0xf34   :  { %4104 = vmatprep.subr.mxu0 %v11106_v42  ;;  %4175 = vmatprep.subr.mxu1 %v11107_v44  ;;  %v11161_v42 = vld [vmem:[#allocation154_spill] sm:$0xff]  ;;  %v11162_v44 = vld [vmem:[#allocation155_spill] sm:$0xff] }
 0xf35   :  { %4105 = vmatpush1.msra.mxu0 %v11108_v21  ;;  %4176 = vmatpush1.msra.mxu1 %v11109_v18  ;;  %v11163_v21 = vld [vmem:[#allocation156_spill] sm:$0xff]  ;;  %v11164_v18 = vld [vmem:[#allocation157_spill] sm:$0xff] }
 0xf36   :  { %4106 = vmatprep.subr.mxu0 %v11110_v32  ;;  %4177 = vmatprep.subr.mxu1 %v11111_v16  ;;  %v11165_v32 = vld [vmem:[#allocation158_spill] sm:$0xff]  ;;  %v11166_v16 = vld [vmem:[#allocation159_spill] sm:$0xff] }
 0xf37   :  { %4107 = vmatpush1.msra.mxu0 %v11112_v45  ;;  %4140 = vmatprep.mubr.f32.mxu0 %v10096_v29  ;;  %v11167_v45 = vld [vmem:[#allocation160_spill] sm:$0xff] }
 0xf38   :  { %4178 = vmatpush1.msra.mxu1 %v11113_v57  ;;  %4211 = vmatprep.mubr.f32.mxu1 %v10096_v29  ;;  %v11168_v57 = vld [vmem:[#allocation161_spill] sm:$0xff] }
 0xf39   :  { %4141 = vmatmul.mubr.f32.vlgmr.msra.gmra.mxu0 %v9002_v24  ;;  %4212 = vmatmul.mubr.f32.vlgmr.msra.gmra.mxu1 %v9002_v24  ;;  %v11124_v24 = vld [vmem:[#allocation117_spill] sm:$0xff] }
 0xf3a   :  { %4242 = vmatprep.subr.mxu0 %v11114_v59  ;;  %4313 = vmatprep.subr.mxu1 %v11115_v27  ;;  %v11169_v59 = vld [vmem:[#allocation162_spill] sm:$0xff]  ;;  %v11170_v27 = vld [vmem:[#allocation163_spill] sm:$0xff] }
 0xf3b   :  { %4243 = vmatpush1.msra.mxu0 %v11116_v33  ;;  %4314 = vmatpush1.msra.mxu1 %v11117_v46  ;;  %v11171_v33 = vld [vmem:[#allocation164_spill] sm:$0xff] }
 0xf3c   :  { %4244 = vmatprep.subr.mxu0 %v11118_v2  ;;  %4315 = vmatprep.subr.mxu1 %v11119_v63  ;;  %v11172_v46 = vld [vmem:[#allocation172_spill] sm:$0xff]  ;;  %v11173_v2 = vld [vmem:[#allocation173_spill] sm:$0xff]  ;;  %v11174_v63 = vld [vmem:[#allocation174_spill] sm:$0xff] }
 0xf3d   :  { %4245 = vmatpush1.msra.mxu0 %v11120_v6  ;;  %4316 = vmatpush1.msra.mxu1 %v11121_v11  ;;  %v11175_v6 = vld [vmem:[#allocation175_spill] sm:$0xff]  ;;  %v11176_v11 = vld [vmem:[#allocation176_spill] sm:$0xff] }
 0xf3e   :  { %4246 = vmatprep.subr.mxu0 %v11122_v56  ;;  %4317 = vmatprep.subr.mxu1 %v11123_v12  ;;  %v11177_v56 = vld [vmem:[#allocation177_spill] sm:$0xff] }
 0xf3f   :  { %4247 = vmatpush1.msra.mxu0 %v11124_v24  ;;  %4318 = vmatpush1.msra.mxu1 %v11125_v35  ;;  %v11178_v35 = vld [vmem:[#allocation167_spill] sm:$0xff] }
 0xf40   :  { %4248 = vmatprep.subr.mxu0 %v11126_v36  ;;  %4319 = vmatprep.subr.mxu1 %v11127_v22  ;;  %v4068_v36 = vrot.slane %v11178_v35, 7 }
 0xf41   :  { %4249 = vmatpush1.msra.mxu0 %v11128_v10  ;;  %4320 = vmatpush1.msra.mxu1 %v11129_v19  ;;  %v11179_v19 = vld [vmem:[#allocation168_spill] sm:$0xff] }
 0xf42   :  { %4250 = vmatprep.subr.mxu0 %v11130_v26  ;;  %4321 = vmatprep.subr.mxu1 %v11131_v9  ;;  %v4069_v26 = vrot.slane %v11179_v19, 7 }
 0xf43   :  { %4251 = vmatpush1.msra.mxu0 %v11132_v7  ;;  %4322 = vmatpush1.msra.mxu1 %v11133_v8 }
 0xf44   :  { %4252 = vmatprep.subr.mxu0 %v11134_v41  ;;  %4323 = vmatprep.subr.mxu1 %v11135_v53 }
 0xf45   :  { %4253 = vmatpush1.msra.mxu0 %v11136_v28  ;;  %4324 = vmatpush1.msra.mxu1 %v11137_v23 }
 0xf46   :  { %4254 = vmatprep.subr.mxu0 %v11138_v25  ;;  %4325 = vmatprep.subr.mxu1 %v11139_v51  ;;  %v11180_v25 = vld [vmem:[#allocation171_spill] sm:$0xff] }
 0xf47   :  { %4255 = vmatpush1.msra.mxu0 %v11140_v62  ;;  %4326 = vmatpush1.msra.mxu1 %v11141_v58  ;;  %v4070_v51 = vrot.slane %v11180_v25, 7 }
 0xf48   :  { %4256 = vmatprep.subr.mxu0 %v11142_v48  ;;  %4327 = vmatprep.subr.mxu1 %v11143_v20  ;;  %v4071_v48 = vrot.slane %v6413_v1, 7 }
 0xf49   :  { %4257 = vmatpush1.msra.mxu0 %v11144_v14  ;;  %4328 = vmatpush1.msra.mxu1 %v11145_v55 }
 0xf4a   :  { %4258 = vmatprep.subr.mxu0 %v11146_v5  ;;  %4329 = vmatprep.subr.mxu1 %v11147_v52 }
 0xf4b   :  { %4259 = vmatpush1.msra.mxu0 %v11148_v43  ;;  %4330 = vmatpush1.msra.mxu1 %v11149_v0 }
 0xf4c   :  { %4260 = vmatprep.subr.mxu0 %v11150_v50  ;;  %4331 = vmatprep.subr.mxu1 %v11151_v30 }
 0xf4d   :  { %4261 = vmatpush1.msra.mxu0 %v11152_v60  ;;  %4332 = vmatpush1.msra.mxu1 %v11153_v31 }
 0xf4e   :  { %4262 = vmatprep.subr.mxu0 %v11154_v34  ;;  %4333 = vmatprep.subr.mxu1 %v11155_v54 }
 0xf4f   :  { %4263 = vmatpush1.msra.mxu0 %v11156_v3  ;;  %4334 = vmatpush1.msra.mxu1 %v11157_v15 }
 0xf50   :  { %4264 = vmatprep.subr.mxu0 %v11158_v38  ;;  %4335 = vmatprep.subr.mxu1 %v11159_v39  ;;  %v4462_v39 = vld [vmem:[#allocation13 + $0x78] sm:$0xff] }
 0xf51   :  { %4265 = vmatpush1.msra.mxu0 %v11160_v40  ;;  %4336 = vmatpush1.msra.mxu1 %v11161_v42  ;;  %v4461_v40 = vld [vmem:[#allocation13 + $0x70] sm:$0xff]  ;;  %v4459_v42 = vld [vmem:[#allocation13 + $0x60] sm:$0xff] }
 0xf52   :  { %4266 = vmatprep.subr.mxu0 %v11162_v44  ;;  %4337 = vmatprep.subr.mxu1 %v11163_v21  ;;  %v4458_v44 = vld [vmem:[#allocation13 + $0x58] sm:$0xff]  ;;  %v4457_v21 = vld [vmem:[#allocation13 + $0x50] sm:$0xff] }
 0xf53   :  { %4267 = vmatpush1.msra.mxu0 %v11164_v18  ;;  %4338 = vmatpush1.msra.mxu1 %v11165_v32  ;;  %v4456_v18 = vld [vmem:[#allocation13 + $0x48] sm:$0xff]  ;;  %v4455_v32 = vld [vmem:[#allocation13 + $0x40] sm:$0xff] }
 0xf54   :  { %4268 = vmatprep.subr.mxu0 %v11166_v16  ;;  %4339 = vmatprep.subr.mxu1 %v11167_v45  ;;  %v4454_v16 = vld [vmem:[#allocation13 + $0x38] sm:$0xff]  ;;  %v4453_v45 = vld [vmem:[#allocation13 + $0x30] sm:$0xff] }
 0xf55   :  { %4269 = vmatpush1.msra.mxu0 %v11168_v57  ;;  %4340 = vmatpush1.msra.mxu1 %v11169_v59  ;;  %v4452_v57 = vld [vmem:[#allocation13 + $0x28] sm:$0xff]  ;;  %v4451_v59 = vld [vmem:[#allocation13 + $0x20] sm:$0xff] }
 0xf56   :  { %4270 = vmatprep.subr.mxu0 %v11170_v27  ;;  %4341 = vmatprep.subr.mxu1 %v11171_v33  ;;  %v4450_v27 = vld [vmem:[#allocation13 + $0x18] sm:$0xff]  ;;  %v4449_v33 = vld [vmem:[#allocation13 + $0x10] sm:$0xff] }
 0xf57   :  { %4271 = vmatpush1.msra.mxu0 %v11172_v46  ;;  %4342 = vmatpush1.msra.mxu1 %v11173_v2  ;;  %v4448_v46 = vld [vmem:[#allocation13 + $0x8] sm:$0xff]  ;;  %v4447_v2 = vld [vmem:[#allocation13] sm:$0xff] }
 0xf58   :  { %4272 = vmatprep.subr.mxu0 %v11174_v63  ;;  %4343 = vmatprep.subr.mxu1 %v11175_v6 }
 0xf59   :  { %4273 = vmatpush1.msra.mxu0 %v11176_v11  ;;  %4306 = vmatprep.mubr.f32.mxu0 %v10096_v29 }
 0xf5a   :  { %4344 = vmatpush1.msra.mxu1 %v11177_v56  ;;  %4377 = vmatprep.mubr.f32.mxu1 %v10096_v29 }
 0xf5b   :  { %4634 = vmatprep.subr.mxu0 %v10096_v29 }
 0xfd8   :  { %v9220_v12 = vpop.f32.mrf.mxu0  ;;  %v9226_v9 = vpop.f32.mrf.mxu1 }
 0xfda   :  { %v9222_v24 = vpop.f32.mrf.mxu0  ;;  %v9228_v28 = vpop.f32.mrf.mxu1 }
 0xff9   :  { %v4142_v22 = vpop.f32.mrf.mxu0  ;;  %v4213_v23 = vpop.f32.mrf.mxu1 }
 0xffa   :  { %v4143_v10 = vadd.f32 %v4142_v22, %v4068_v36  ;;  %v4214_v62 = vadd.f32 %v4213_v23, %v4070_v51 }
 0xffb   :  { %v4144_v7 = vpop.f32.mrf.mxu0  ;;  %v4215_v58 = vpop.f32.mrf.mxu1 }
 0xffc   :  { %v4610_v8 = vmul.f32 -1.442695, %v4143_v10  ;;  %v4145_v41 = vadd.f32 %v4144_v7, %v4069_v26  ;;  %v4612_v20 = vmul.f32 -1.442695, %v4214_v62  ;;  %v4216_v14 = vadd.f32 %v4215_v58, %v4071_v48 }
 0xffe   :  { %4907 = vpow2.f32 %v4610_v8  ;;  %v4611_v53 = vmul.f32 -1.442695, %v4145_v41 }
0x1000   :  { %4909 = vpow2.f32 %v4611_v53 }
0x1001   :  { %4911 = vpow2.f32 %v4612_v20 }
0x1002   :  { %4913 = vtanh.f32 %v4216_v14 }
0x100b   :  { %v4908_v55 = vpop.eup %4907 }
0x100c   :  { %v4227_v5 = vadd.f32 1.0, %v4908_v55 }
0x100d   :  { %v4910_v52 = vpop.eup %4909 }
0x100e   :  { %4915 = vrcp.f32 %v4227_v5  ;;  %v4228_v43 = vadd.f32 1.0, %v4910_v52  ;;  %v4912_v0 = vpop.eup %4911 }
0x100f   :  { %v4914_v50 = vpop.eup %4913  ;;  %v4229_v34 = vadd.f32 1.0, %v4912_v0 }
0x1010   :  { %4917 = vrcp.f32 %v4228_v43 }
0x1011   :  { %4919 = vrcp.f32 %v4229_v34 }
0x101b   :  { %v4916_v30 = vpop.eup %4915 }
0x101c   :  { %v4238_v60 = vmul.f32 %v4916_v30, %v4914_v50  ;;  %v4616_v30 = vld [vmem:[%s9288_s8] ss:$0 sm:$0xff] }
0x101d   :  { %v4918_v31 = vpop.eup %4917 }
0x101e   :  { %v4237_v54 = vmul.f32 %v4918_v31, %v8999_v13  ;;  %v4920_v1 = vpop.eup %4919  ;;  %v4460_v13 = vld [vmem:[#allocation13 + $0x68] sm:$0xff] }
0x1020   :  { %v9233_v3 = vadd.f32 %v4238_v60, %v4237_v54 }
0x1022   :  { %4921 = vtanh.f32 %v9233_v3  ;;  %v4544_v5 = vrot.slane %v9233_v3, 6 }
0x102f   :  { %v4922_v15 = vpop.eup %4921 }
0x1030   :  { %v9236_v38 = vmul.f32 %v4922_v15, %v4920_v1 }
0x1032   :  { %4307 = vmatmul.mubr.f32.vlgmr.msra.gmra.mxu0 %v9236_v38  ;;  %4378 = vmatmul.mubr.f32.vlgmr.msra.gmra.mxu1 %v9236_v38 }
0x1033   :  { %4635 = vmatpush3.msra.mxu0 %v4462_v39  ;;  %4666 = vmatprep.mubr.msk.f32.mxu0 %vm5698_vm7, %v10096_v29 }
0x1034   :  { %4636 = vmatprep.subr.mxu0 %v10096_v29 }
0x1035   :  { %4637 = vmatpush3.msra.mxu0 %v4461_v40 }
0x1036   :  { %4638 = vmatprep.subr.mxu0 %v10096_v29 }
0x1037   :  { %4639 = vmatpush3.msra.mxu0 %v4460_v13 }
0x1038   :  { %4640 = vmatprep.subr.mxu0 %v10096_v29 }
0x1039   :  { %4641 = vmatpush3.msra.mxu0 %v4459_v42 }
0x103a   :  { %4642 = vmatprep.subr.mxu0 %v10096_v29 }
0x103b   :  { %4643 = vmatpush3.msra.mxu0 %v4458_v44 }
0x103c   :  { %4644 = vmatprep.subr.mxu0 %v10096_v29 }
0x103d   :  { %4645 = vmatpush3.msra.mxu0 %v4457_v21 }
0x103e   :  { %4646 = vmatprep.subr.mxu0 %v10096_v29 }
0x103f   :  { %4647 = vmatpush3.msra.mxu0 %v4456_v18 }
0x1040   :  { %4648 = vmatprep.subr.mxu0 %v10096_v29 }
0x1041   :  { %4649 = vmatpush3.msra.mxu0 %v4455_v32 }
0x1042   :  { %4650 = vmatprep.subr.mxu0 %v10096_v29 }
0x1043   :  { %4651 = vmatpush3.msra.mxu0 %v4454_v16 }
0x1044   :  { %4652 = vmatprep.subr.mxu0 %v10096_v29 }
0x1045   :  { %4653 = vmatpush3.msra.mxu0 %v4453_v45 }
0x1046   :  { %4654 = vmatprep.subr.mxu0 %v10096_v29 }
0x1047   :  { %4655 = vmatpush3.msra.mxu0 %v4452_v57 }
0x1048   :  { %4656 = vmatprep.subr.mxu0 %v10096_v29 }
0x1049   :  { %4657 = vmatpush3.msra.mxu0 %v4451_v59 }
0x104a   :  { %4658 = vmatprep.subr.mxu0 %v10096_v29 }
0x104b   :  { %4659 = vmatpush3.msra.mxu0 %v4450_v27 }
0x104c   :  { %4660 = vmatprep.subr.mxu0 %v10096_v29 }
0x104d   :  { %4661 = vmatpush3.msra.mxu0 %v4449_v33 }
0x104e   :  { %4662 = vmatprep.subr.mxu0 %v10096_v29 }
0x104f   :  { %4663 = vmatpush3.msra.mxu0 %v4448_v46 }
0x1050   :  { %4664 = vmatprep.subr.mxu0 %v10096_v29 }
0x1051   :  { %4665 = vmatpush3.msra.mxu0 %v4447_v2 }
0x10f2   :  { %v4308_v63 = vpop.f32.mrf.mxu0  ;;  %v4379_v10 = vpop.f32.mrf.mxu1 }
0x10f3   :  { %v4309_v6 = vadd.f32 %v4308_v63, %v9220_v12  ;;  %v4380_v26 = vadd.f32 %v4379_v10, %v9226_v9 }
0x10f4   :  { %v4310_v11 = vpop.f32.mrf.mxu0  ;;  %v4381_v7 = vpop.f32.mrf.mxu1 }
0x10f5   :  { %v4384_v56 = vadd.f32 %v4309_v6, %v11054_v4  ;;  %v4311_v35 = vadd.f32 %v4310_v11, %v9222_v24  ;;  %v4386_v29 = vadd.f32 %v4380_v26, %v6503_v49  ;;  %v4382_v8 = vadd.f32 %v4381_v7, %v9228_v28 }
0x10f7   :  { %v4613_v36 = vmul.f32 -1.442695, %v4384_v56  ;;  %v4385_v22 = vadd.f32 %v4311_v35, %v6495_v37  ;;  %v4615_v12 = vmul.f32 -1.442695, %v4386_v29  ;;  %v4387_v4 = vadd.f32 %v4382_v8, %v6509_v61 }
0x10f9   :  { %4923 = vpow2.f32 %v4613_v36  ;;  %v4614_v19 = vmul.f32 -1.442695, %v4385_v22 }
0x10fb   :  { %4925 = vpow2.f32 %v4614_v19 }
0x10fc   :  { %4927 = vpow2.f32 %v4615_v12 }
0x1106   :  { %v4924_v41 = vpop.eup %4923 }
0x1107   :  { %v4397_v53 = vadd.f32 1.0, %v4924_v41 }
0x1108   :  { %v4926_v24 = vpop.eup %4925 }
0x1109   :  { %4929 = vrcp.f32 %v4397_v53  ;;  %v4398_v37 = vadd.f32 1.0, %v4926_v24  ;;  %v4928_v23 = vpop.eup %4927 }
0x110a   :  { %4931 = vtanh.f32 %v4387_v4  ;;  %v4399_v62 = vadd.f32 1.0, %v4928_v23 }
0x110b   :  { %4933 = vrcp.f32 %v4398_v37 }
0x110c   :  { %4935 = vrcp.f32 %v4399_v62 }
0x1116   :  { %v4930_v25 = vpop.eup %4929 }
0x1117   :  { %v4932_v51 = vpop.eup %4931 }
0x1118   :  { %v4934_v9 = vpop.eup %4933  ;;  %v4408_v58 = vmul.f32 %v4932_v51, %v4930_v25 }
0x1119   :  { %v4407_v49 = vmul.f32 %v4934_v9, %v9081_v17  ;;  %v4936_v48 = vpop.eup %4935 }
0x111b   :  { %v4409_v28 = vadd.f32 %v4408_v58, %v4407_v49 }
0x111d   :  { %4937 = vtanh.f32 %v4409_v28  ;;  %v4547_v52 = vrot.slane %v4409_v28, 5 }
0x112a   :  { %v4938_v61 = vpop.eup %4937 }
0x112b   :  { %v4411_v20 = vmul.f32 %v4938_v61, %v4936_v48 }
0x112d   :  { %v4431_v14 = vrot.slane %v4411_v20, 1  ;;  %v4541_v55 = vrot.slane %v4411_v20, 7 }
0x112f   :  { %v4446_v43 = vsel %vm4445_vm8, %v9089_v47, %v4431_v14  ;;  %v4549_v0 = vsel %vm4433_vm1, %v9236_v38, %v4541_v55 }
0x1130   :  { %4667 = vmatmul.mubr.f32.vlgmr.msra.gmra.mxu0 %v4446_v43  ;;  %v4550_v17 = vsel %vm4435_vm2, %v4549_v0, %v4544_v5 }
0x1131   :  { %v4551_v50 = vsel %vm4437_vm3, %v4550_v17, %v4547_v52 }
0x1132   :  { %4552 = vst [vmem:[%s9290_s10] sm:$0xf] %v4551_v50 }
0x11f0   :  { %v4536_v60 = vpop.f32.mrf.mxu0 }
0x11f1   :  { %v4537_v31 = vadd.f32 %v4616_v30, %v4536_v60 }
0x11f2   :  { %v4668_v34 = vpop.f32.mrf.mxu0 }
0x11f3   :  { %4540 = vst [vmem:[%s9289_s9] sm:$0xff] %v4537_v31 }
0x11f4   :  { %4561 = vsyncpa [#allocation3], 1 }
0x11f5   :  { %4562 = vsyncpa [#allocation5], 1 }
0x11f6   :  { %4563 = vsyncpa [#allocation8], 1 }
0x11f7   :  { %4564 = vsyncpa [#allocation11], 1 }
0x11f8   :  { %4565 = vsyncpa [#allocation14], 1 }

</bundles_post_ra>
